<compile_context>
chip_gen: v7x
topology: tpu7x:2x2x1
jax: 0.10.0
libtpu: 0.0.40
codegen_flags: <defaults>
</compile_context>

<pallas_src>
import math
import functools

import numpy as np
import jax
import jax.numpy as jnp
from jax.experimental import pallas as pl
from jax.experimental.pallas import tpu as pltpu

# ------------------------- small, module-consistent config -------------------
STYLE_DIM = 64        # 512 in the real DualStyleGAN
N_MLP = 8             # 8-layer mapping network
N_LATENT = 18         # w+ layers (interp_weights has 18 entries)
CH = 16               # synthesis channels (small)
IMG_RES = 16          # final resolution (1024 in the real model)
B = 2                 # StyleTransfer.forward always runs batch 2
SQRT2 = math.sqrt(2.0)
TRUNCATION = 0.7      # truncation=0.7, truncation_latent=0 in forward()

# execution-order layer table: (name, kind, latent_index)
_LAYERS = (
    ('conv1',     '3x3', 0),
    ('torgb1',    '1x1', 1),
    ('b8_conv1',  '3x3', 1),
    ('b8_conv2',  '3x3', 2),
    ('b8_torgb',  '1x1', 3),
    ('b16_conv1', '3x3', 3),
    ('b16_conv2', '3x3', 4),
    ('b16_torgb', '1x1', 5),
)
N_LAYERS = len(_LAYERS)


# ------------------------------ fused Pallas kernel ---------------------------
def _dualstyle_fused_kernel(lat_ref, mapw_ref, mapb_ref, blend_ref, modw_ref,
                            modb_ref, dmask_ref, wsq_ref, bias_ref, x0_ref,
                            w3_ref, w1_ref, u8_ref, u16_ref,
                            m4_ref, m8_ref, m16_ref, o_ref):
    f32 = jnp.float32
    bf16 = jnp.bfloat16

    # ---- style mapping network (exstyle + instyle paths, 72 cols), feature-major
    z = lat_ref[...]                                                        # (D, 72) f32
    z = z * jax.lax.rsqrt(jnp.mean(z * z, axis=0, keepdims=True) + 1e-8)    # PixelNorm
    mapb = mapb_ref[...]                                                    # (D, N_MLP)
    for l in range(N_MLP):
        z = jnp.dot(mapw_ref[l], z.astype(bf16), preferred_element_type=f32)
        z = z + mapb[:, l:l + 1]
        z = jnp.where(z >= 0.0, z, 0.2 * z) * SQRT2                         # fused_leaky_relu
    # TODO(synk): at real size (D=512) pad/tile columns to multiples of 128/256 so
    # each of the 8 serial MXU pushes fills the lane dim.

    # ---- truncation + interp_weights blend + per-layer latent select: ONE matmul
    wcols = jnp.dot(z, blend_ref[...], preferred_element_type=f32)          # (D, 16)

    # ---- all 8 layers' style affines in ONE MXU push; diagonal blocks extracted
    sall = jnp.dot(modw_ref[...], wcols.astype(bf16),
                   preferred_element_type=f32)                              # (128, 16)
    sd0 = jnp.sum(sall * dmask_ref[0], axis=1, keepdims=True)               # (128, 1)
    sd1 = jnp.sum(sall * dmask_ref[1], axis=1, keepdims=True)               # (128, 1)
    sdiag = jnp.concatenate([sd0, sd1], axis=1) + modb_ref[...]             # (128, 2)

    # ---- all 5 demod factors from ONE block-diagonal matmul (torgb rows unused)
    dem_all = jax.lax.rsqrt(
        jnp.dot(wsq_ref[...], sdiag * sdiag, preferred_element_type=f32) + 1e-8)  # (128, 2)

    bias = bias_ref[...]                                                    # (128, 1)

    def per_sample(pair, lane_m):
        # (R, 2) per-sample values -> (R, B*hw) with one blend (no bcast+concat)
        c0 = pair[:, 0:1]
        c1 = pair[:, 1:2]
        return c1 + lane_m * (c0 - c1)

    def im2col(xs, H, W, masks):
        # (CH, B*hw) -> (9*CH, B*hw); 3x3 same-pad taps via XLU lane rotation +
        # precomputed boundary masks (cross-sample wrap is always masked out).
        hw = H * W
        n = B * hw
        taps = []
        for a in range(3):
            for b_ in range(3):
                d = ((a - 1) * W + (b_ - 1)) % n
                if d == 0:
                    rolled = xs
                elif n % 128 == 0:
                    rolled = pltpu.roll(xs, shift=n - d, axis=1)            # XLU vrot
                else:
                    # 4x4 stage: 32-lane axis is sub-vreg; keep the concat form there.
                    rolled = jnp.concatenate([xs[:, d:], xs[:, :d]], axis=1)
                taps.append(rolled * masks[3 * a + b_:3 * a + b_ + 1, :])
        return jnp.concatenate(taps, axis=0)

    def conv3(x, H, W, ci, l, masks):
        # ModulatedConv2d 3x3 + demod + FusedLeakyReLU, input-scaled formulation.
        lane_m = masks[9:10, :]                                             # sample-0 lane mask
        xs = x * per_sample(sdiag[l * CH:(l + 1) * CH, :], lane_m)
        patches = im2col(xs, H, W, masks)                                   # (9*CH, B*hw)
        out = jnp.dot(w3_ref[ci], patches.astype(bf16),
                      preferred_element_type=f32)                           # (CH, B*hw)
        out = out * per_sample(dem_all[l * CH:(l + 1) * CH, :], lane_m)
        out = out + bias[l * CH:(l + 1) * CH, :]
        # TODO(synk): per-pixel noise injection omitted (noise weights init to 0).
        return jnp.where(out >= 0.0, out, 0.2 * out) * SQRT2

    def torgb(x, H, W, ri, l, masks):
        # ToRGB: 1x1 modulated conv, no demod, no activation.
        lane_m = masks[9:10, :]
        xs = x * per_sample(sdiag[l * CH:(l + 1) * CH, :], lane_m)
        out = jnp.dot(w1_ref[ri], xs.astype(bf16), preferred_element_type=f32)  # (3, B*hw)
        return out + bias[l * CH:l * CH + 3, :]

    m4 = m4_ref[...]
    m8 = m8_ref[...]
    m16 = m16_ref[...]

    # ---- synthesis: 4x4 -> 8x8 -> 16x16, everything VMEM-resident ------------
    x = x0_ref[...]                                                         # (CH, 32)
    x = conv3(x, 4, 4, 0, 0, m4)
    rgb = torgb(x, 4, 4, 0, 1, m4)

    # fused feature + RGB nearest 2x upsample: one MXU push per transition.
    # TODO(synk): StyleGAN2 blur/upfirdn2d upsampling replaced with nearest.
    up = jnp.dot(jnp.concatenate([x, rgb], axis=0), u8_ref[...],
                 preferred_element_type=f32)                                # (19, 128)
    x = up[:CH, :]
    rgb_skip = up[CH:CH + 3, :]
    x = conv3(x, 8, 8, 1, 2, m8)
    x = conv3(x, 8, 8, 2, 3, m8)
    rgb = torgb(x, 8, 8, 1, 4, m8) + rgb_skip

    up = jnp.dot(jnp.concatenate([x, rgb], axis=0), u16_ref[...],
                 preferred_element_type=f32)                                # (19, 512)
    x = up[:CH, :]
    rgb_skip = up[CH:CH + 3, :]
    x = conv3(x, 16, 16, 3, 5, m16)
    x = conv3(x, 16, 16, 4, 6, m16)
    rgb = torgb(x, 16, 16, 2, 7, m16) + rgb_skip

    o_ref[...] = jnp.clip(rgb, -1.0, 1.0).astype(o_ref.dtype)               # torch.clamp


# ------------------------- host-side constant / weight packing ----------------
def _boundary_and_lane_masks(H, W):
    # rows 0..8: 3x3 same-pad boundary masks per tap; row 9: sample-0 lane mask.
    hw = H * W
    n = B * hw
    j = np.arange(n)
    r = j % hw
    h = r // W
    w = r % W
    rows = []
    for a in range(3):
        for b_ in range(3):
            hh = h + (a - 1)
            ww = w + (b_ - 1)
            rows.append(((hh >= 0) & (hh < H) & (ww >= 0) & (ww < W)).astype(np.float32))
    rows.append((j < hw).astype(np.float32))
    return jnp.asarray(np.stack(rows))                                      # (10, B*H*W)


def _upsample_matrix(H, W):
    # (B*H*W, B*4*H*W) 0/1 selection matrix for nearest 2x upsampling.
    hw = H * W
    n_src = B * hw
    W2 = 2 * W
    hw2 = 4 * hw
    n_dst = B * hw2
    dst = np.arange(n_dst)
    b = dst // hw2
    rr = dst % hw2
    h2 = rr // W2
    w2 = rr % W2
    src_idx = b * hw + (h2 // 2) * W + (w2 // 2)
    u = np.zeros((n_src, n_dst), np.float32)
    u[src_idx, dst] = 1.0
    return jnp.asarray(u)


def _prep_kernel_inputs(params, instyle, exstyle_latent, interp_weights):
    D = STYLE_DIM
    bf16 = jnp.bfloat16

    # latent mixing — mirrors StyleTransfer.forward
    latent = jnp.tile(exstyle_latent, (2, 1, 1))
    latent = latent.at[1, 7:18].set(instyle[0, 7:18])
    ins2 = jnp.tile(instyle, (2, 1, 1))
    lat_all = jnp.concatenate([latent.reshape(-1, D), ins2.reshape(-1, D)], axis=0)
    lat_t = lat_all.T.astype(jnp.float32)                                   # (D, 72)

    # per-layer latent select + interp blend + truncation folded into (72, 16):
    # column (2*l + b) = iw[li]*mapped_ex[:, b*18+li] + 0.7*(1-iw[li])*mapped_in[:, b*18+li]
    # TODO(synk): DualStyleGAN's extrinsic residual path (StyledConv ResBlocks +
    # structure/color transforms) approximated by this per-layer latent blend;
    # truncation is a pure 0.7 scale because truncation_latent=0.
    iw = np.asarray(interp_weights, np.float32)
    blend_sel = np.zeros((2 * B * N_LATENT, 2 * N_LAYERS), np.float32)
    for l, (_, _, li) in enumerate(_LAYERS):
        for b in range(B):
            blend_sel[b * N_LATENT + li, 2 * l + b] = iw[li]
            blend_sel[B * N_LATENT + b * N_LATENT + li, 2 * l + b] = TRUNCATION * (1.0 - iw[li])
    blend_sel = jnp.asarray(blend_sel)

    # diagonal-block extraction masks for the batched style matmul
    dmask = np.zeros((B, N_LAYERS * CH, 2 * N_LAYERS), np.float32)
    for l in range(N_LAYERS):
        for b in range(B):
            dmask[b, l * CH:(l + 1) * CH, 2 * l + b] = 1.0
    dmask = jnp.asarray(dmask)

    x0 = jnp.tile(params['const'].reshape(CH, 16), (1, B)).astype(jnp.float32)  # (CH, 32)

    w3_l, w1_l = [], []
    modw_l, modb_l, bias_l = [], [], []
    wsq_bd = jnp.zeros((N_LAYERS * CH, N_LAYERS * CH), jnp.float32)
    for l, (name, kind, _li) in enumerate(_LAYERS):
        prm = params[name]
        cout = prm['w'].shape[0]
        modw_l.append(prm['mod_w'] * (1.0 / math.sqrt(D)))                  # (CH, D)
        modb_l.append(prm['mod_b'])                                         # (CH,)
        bias_l.append(jnp.pad(prm['b'], (0, CH - cout)))                    # (CH,)
        if kind == '3x3':
            ws = prm['w'] * (1.0 / math.sqrt(CH * 9))                       # (CH, CH, 3, 3)
            w3_l.append(ws.transpose(0, 2, 3, 1).reshape(CH, 9 * CH))       # tap-major K
            wsq_bd = wsq_bd.at[l * CH:(l + 1) * CH, l * CH:(l + 1) * CH].set(
                jnp.sum(ws * ws, axis=(2, 3)))
        else:
            ws = prm['w'] * (1.0 / math.sqrt(CH))                           # (3, CH, 1, 1)
            w1_l.append(ws.reshape(cout, CH))

    return (
        lat_t,                                               # (D, 72)       f32
        params['map_w'].astype(bf16),                        # (8, D, D)     bf16
        params['map_b'].astype(jnp.float32),                 # (D, 8)        f32
        blend_sel,                                           # (72, 16)      f32
        jnp.concatenate(modw_l, axis=0).astype(bf16),        # (128, D)      bf16
        jnp.concatenate(modb_l).reshape(-1, 1).astype(jnp.float32),  # (128, 1)
        dmask,                                               # (2, 128, 16)  f32
        wsq_bd,                                              # (128, 128)    f32
        jnp.concatenate(bias_l).reshape(-1, 1).astype(jnp.float32),  # (128, 1)
        x0,                                                  # (CH, 32)      f32
        jnp.stack(w3_l).astype(bf16),                        # (5, CH, 9*CH) bf16
        jnp.stack(w1_l).astype(bf16),                        # (3, 3, CH)    bf16
        _upsample_matrix(4, 4),                              # (32, 128)     f32
        _upsample_matrix(8, 8),                              # (128, 512)    f32
        _boundary_and_lane_masks(4, 4),                      # (10, 32)      f32
        _boundary_and_lane_masks(8, 8),                      # (10, 128)     f32
        _boundary_and_lane_masks(16, 16),                    # (10, 512)     f32
    )


def _zero_index_map(ndim):
    def idx(i):
        return (0,) * ndim
    return idx


def style_transfer_forward(params, instyle, exstyle_latent,
                           interp_weights=(0.6,) * 7 + (1.0,) * 11):
    """Mirrors StyleTransfer.forward for a fixed style latent (exstyle_latent)."""
    inputs = _prep_kernel_inputs(params, instyle, exstyle_latent, interp_weights)
    n_pix = B * IMG_RES * IMG_RES
    out = pl.pallas_call(
        _dualstyle_fused_kernel,
        out_shape=jax.ShapeDtypeStruct((3, n_pix), jnp.float32),
        grid=(1,),   # TODO(synk): on v7x, split the lane (per-sample) axis over 2 TCs
        in_specs=[pl.BlockSpec(x.shape, _zero_index_map(x.ndim)) for x in inputs],
        out_specs=pl.BlockSpec((3, n_pix), _zero_index_map(2)),
        compiler_params=pltpu.CompilerParams(
            dimension_semantics=("arbitrary",),
            vmem_limit_bytes=32 * 1024 * 1024),
    )(*inputs)
    # lane-dense (3, B*H*W) kernel output -> NCHW
    return out.reshape(3, B, IMG_RES, IMG_RES).transpose(1, 0, 2, 3)


# ----------------------------- deterministic init -----------------------------
def init_params(key):
    D = STYLE_DIM
    ks = jax.random.split(key, 16)

    def conv_params(k, cout, cin, ksz):
        k1, k2 = jax.random.split(k)
        return {
            'w': jax.random.normal(k1, (cout, cin, ksz, ksz), jnp.float32),
            'mod_w': jax.random.normal(k2, (cin, D), jnp.float32),
            'mod_b': jnp.ones((cin,), jnp.float32),      # EqualLinear bias_init=1
            'b': jnp.zeros((cout,), jnp.float32),
        }

    return {
        # mapping network: stored pre-scaled (randn/lr_mul * lr_mul/sqrt(D))
        'map_w': jax.random.normal(ks[0], (N_MLP, D, D), jnp.float32) / math.sqrt(D),
        'map_b': jnp.zeros((D, N_MLP), jnp.float32),
        'const': jax.random.normal(ks[1], (CH, 4, 4), jnp.float32),
        'conv1': conv_params(ks[2], CH, CH, 3),
        'torgb1': conv_params(ks[3], 3, CH, 1),
        'b8_conv1': conv_params(ks[4], CH, CH, 3),
        'b8_conv2': conv_params(ks[5], CH, CH, 3),
        'b8_torgb': conv_params(ks[6], 3, CH, 1),
        'b16_conv1': conv_params(ks[7], CH, CH, 3),
        'b16_conv2': conv_params(ks[8], CH, CH, 3),
        'b16_torgb': conv_params(ks[9], 3, CH, 1),
    }


# ---------------------------------- main ---------------------------------------
if __name__ == "__main__":
    key = jax.random.PRNGKey(0)
    kp, ki, ke = jax.random.split(key, 3)
    params = init_params(kp)

    # instyle: intrinsic z+ code (1, 18, D); synthetic stand-in for
    # self.exstyles[stylename] (style_id=21) — no .npy / checkpoint loading.
    instyle = jax.random.normal(ki, (1, N_LATENT, STYLE_DIM), jnp.float32)
    exstyle_latent = jax.random.normal(ke, (1, N_LATENT, STYLE_DIM), jnp.float32)

    fwd = jax.jit(functools.partial(style_transfer_forward, params))
    img = fwd(instyle, exstyle_latent)
    jax.block_until_ready(img)

    assert img.shape == (B, 3, IMG_RES, IMG_RES), img.shape
    assert bool(jnp.all(jnp.isfinite(img)))
    assert bool(jnp.all(img <= 1.0)) and bool(jnp.all(img >= -1.0))
    print("KERNEL_OK")
</pallas_src>

<mosaic_0001>
module attributes {stable_mosaic.version = 11 : i64} {
  func.func @_dualstyle_fused_kernel(%arg0: i32, %arg1: memref<64x72xf32, #tpu.memory_space<vmem>>, %arg2: memref<8x64x64xbf16, #tpu.memory_space<vmem>>, %arg3: memref<64x8xf32, #tpu.memory_space<vmem>>, %arg4: memref<72x16xf32, #tpu.memory_space<vmem>>, %arg5: memref<128x64xbf16, #tpu.memory_space<vmem>>, %arg6: memref<128x1xf32, #tpu.memory_space<vmem>>, %arg7: memref<2x128x16xf32, #tpu.memory_space<vmem>>, %arg8: memref<128x128xf32, #tpu.memory_space<vmem>>, %arg9: memref<128x1xf32, #tpu.memory_space<vmem>>, %arg10: memref<16x32xf32, #tpu.memory_space<vmem>>, %arg11: memref<5x16x144xbf16, #tpu.memory_space<vmem>>, %arg12: memref<3x3x16xbf16, #tpu.memory_space<vmem>>, %arg13: memref<32x128xf32, #tpu.memory_space<vmem>>, %arg14: memref<128x512xf32, #tpu.memory_space<vmem>>, %arg15: memref<10x32xf32, #tpu.memory_space<vmem>>, %arg16: memref<10x128xf32, #tpu.memory_space<vmem>>, %arg17: memref<10x512xf32, #tpu.memory_space<vmem>>, %arg18: memref<3x512xf32, #tpu.memory_space<vmem>>) attributes {dimension_semantics = [#tpu.dimension_semantics<arbitrary>], iteration_bounds = array<i64: 1>, scalar_prefetch = 0 : i64, scratch_operands = 0 : i64, tpu.core_type = #tpu.core_type<tc>, window_params = [{pipeline_mode = #tpu.pipeline_mode<synchronous>, transform_indices = @transform_0, window_bounds = array<i64: 64, 72>}, {pipeline_mode = #tpu.pipeline_mode<synchronous>, transform_indices = @transform_1, window_bounds = array<i64: 8, 64, 64>}, {pipeline_mode = #tpu.pipeline_mode<synchronous>, transform_indices = @transform_2, window_bounds = array<i64: 64, 8>}, {pipeline_mode = #tpu.pipeline_mode<synchronous>, transform_indices = @transform_3, window_bounds = array<i64: 72, 16>}, {pipeline_mode = #tpu.pipeline_mode<synchronous>, transform_indices = @transform_4, window_bounds = array<i64: 128, 64>}, {pipeline_mode = #tpu.pipeline_mode<synchronous>, transform_indices = @transform_5, window_bounds = array<i64: 128, 1>}, {pipeline_mode = #tpu.pipeline_mode<synchronous>, transform_indices = @transform_6, window_bounds = array<i64: 2, 128, 16>}, {pipeline_mode = #tpu.pipeline_mode<synchronous>, transform_indices = @transform_7, window_bounds = array<i64: 128, 128>}, {pipeline_mode = #tpu.pipeline_mode<synchronous>, transform_indices = @transform_8, window_bounds = array<i64: 128, 1>}, {pipeline_mode = #tpu.pipeline_mode<synchronous>, transform_indices = @transform_9, window_bounds = array<i64: 16, 32>}, {pipeline_mode = #tpu.pipeline_mode<synchronous>, transform_indices = @transform_10, window_bounds = array<i64: 5, 16, 144>}, {pipeline_mode = #tpu.pipeline_mode<synchronous>, transform_indices = @transform_11, window_bounds = array<i64: 3, 3, 16>}, {pipeline_mode = #tpu.pipeline_mode<synchronous>, transform_indices = @transform_12, window_bounds = array<i64: 32, 128>}, {pipeline_mode = #tpu.pipeline_mode<synchronous>, transform_indices = @transform_13, window_bounds = array<i64: 128, 512>}, {pipeline_mode = #tpu.pipeline_mode<synchronous>, transform_indices = @transform_14, window_bounds = array<i64: 10, 32>}, {pipeline_mode = #tpu.pipeline_mode<synchronous>, transform_indices = @transform_15, window_bounds = array<i64: 10, 128>}, {pipeline_mode = #tpu.pipeline_mode<synchronous>, transform_indices = @transform_16, window_bounds = array<i64: 10, 512>}, {pipeline_mode = #tpu.pipeline_mode<synchronous>, transform_indices = @transform_17, window_bounds = array<i64: 3, 512>}]} {
    %c0 = arith.constant 0 : index
    %c0_0 = arith.constant 0 : index
    %0 = vector.load %arg1[%c0, %c0_0] : memref<64x72xf32, #tpu.memory_space<vmem>>, vector<64x72xf32>
    %1 = arith.mulf %0, %0 : vector<64x72xf32>
    %cst = arith.constant dense<0.000000e+00> : vector<72xf32>
    %2 = vector.multi_reduction <add>, %1, %cst [0] : vector<64x72xf32> to vector<72xf32>
    %3 = vector.shape_cast %2 : vector<72xf32> to vector<1x72xf32>
    %cst_1 = arith.constant 6.400000e+01 : f32
    %4 = vector.broadcast %cst_1 : f32 to vector<1x72xf32>
    %5 = arith.divf %3, %4 : vector<1x72xf32>
    %cst_2 = arith.constant 9.99999993E-9 : f32
    %6 = vector.broadcast %cst_2 : f32 to vector<1x72xf32>
    %7 = arith.addf %5, %6 : vector<1x72xf32>
    %8 = math.rsqrt %7 : vector<1x72xf32>
    %9 = vector.broadcast %8 : vector<1x72xf32> to vector<64x72xf32>
    %10 = arith.mulf %0, %9 : vector<64x72xf32>
    %c0_3 = arith.constant 0 : index
    %c0_4 = arith.constant 0 : index
    %11 = vector.load %arg3[%c0_3, %c0_4] : memref<64x8xf32, #tpu.memory_space<vmem>>, vector<64x8xf32>
    %c0_5 = arith.constant 0 : index
    %c0_6 = arith.constant 0 : index
    %c0_7 = arith.constant 0 : index
    %12 = vector.load %arg2[%c0_5, %c0_6, %c0_7] : memref<8x64x64xbf16, #tpu.memory_space<vmem>>, vector<1x64x64xbf16>
    %13 = vector.shape_cast %12 : vector<1x64x64xbf16> to vector<64x64xbf16>
    %14 = arith.truncf %10 : vector<64x72xf32> to vector<64x72xbf16>
    %cst_8 = arith.constant dense<0.000000e+00> : vector<64x72xf32>
    %15 = tpu.matmul %13, %14, %cst_8 {dimension_numbers = #tpu.dot_dimension_numbers<[1], [0], [0], [1], [0, 0, 1, 1], [], []>} : vector<64x64xbf16>, vector<64x72xbf16>, vector<64x72xf32> -> vector<64x72xf32>
    %16 = vector.extract_strided_slice %11 {offsets = [0, 0], sizes = [64, 1], strides = [1, 1]} : vector<64x8xf32> to vector<64x1xf32>
    %17 = vector.broadcast %16 : vector<64x1xf32> to vector<64x72xf32>
    %18 = arith.addf %15, %17 : vector<64x72xf32>
    %cst_9 = arith.constant 0.000000e+00 : f32
    %19 = vector.broadcast %cst_9 : f32 to vector<64x72xf32>
    %20 = arith.cmpf oge, %18, %19 : vector<64x72xf32>
    %cst_10 = arith.constant 2.000000e-01 : f32
    %21 = vector.broadcast %cst_10 : f32 to vector<64x72xf32>
    %22 = arith.mulf %21, %18 : vector<64x72xf32>
    %23 = arith.select %20, %18, %22 : vector<64x72xi1>, vector<64x72xf32>
    %cst_11 = arith.constant 1.41421354 : f32
    %24 = vector.broadcast %cst_11 : f32 to vector<64x72xf32>
    %25 = arith.mulf %23, %24 : vector<64x72xf32>
    %c1 = arith.constant 1 : index
    %c0_12 = arith.constant 0 : index
    %c0_13 = arith.constant 0 : index
    %26 = vector.load %arg2[%c1, %c0_12, %c0_13] : memref<8x64x64xbf16, #tpu.memory_space<vmem>>, vector<1x64x64xbf16>
    %27 = vector.shape_cast %26 : vector<1x64x64xbf16> to vector<64x64xbf16>
    %28 = arith.truncf %25 : vector<64x72xf32> to vector<64x72xbf16>
    %cst_14 = arith.constant dense<0.000000e+00> : vector<64x72xf32>
    %29 = tpu.matmul %27, %28, %cst_14 {dimension_numbers = #tpu.dot_dimension_numbers<[1], [0], [0], [1], [0, 0, 1, 1], [], []>} : vector<64x64xbf16>, vector<64x72xbf16>, vector<64x72xf32> -> vector<64x72xf32>
    %30 = vector.extract_strided_slice %11 {offsets = [0, 1], sizes = [64, 1], strides = [1, 1]} : vector<64x8xf32> to vector<64x1xf32>
    %31 = vector.broadcast %30 : vector<64x1xf32> to vector<64x72xf32>
    %32 = arith.addf %29, %31 : vector<64x72xf32>
    %cst_15 = arith.constant 0.000000e+00 : f32
    %33 = vector.broadcast %cst_15 : f32 to vector<64x72xf32>
    %34 = arith.cmpf oge, %32, %33 : vector<64x72xf32>
    %cst_16 = arith.constant 2.000000e-01 : f32
    %35 = vector.broadcast %cst_16 : f32 to vector<64x72xf32>
    %36 = arith.mulf %35, %32 : vector<64x72xf32>
    %37 = arith.select %34, %32, %36 : vector<64x72xi1>, vector<64x72xf32>
    %cst_17 = arith.constant 1.41421354 : f32
    %38 = vector.broadcast %cst_17 : f32 to vector<64x72xf32>
    %39 = arith.mulf %37, %38 : vector<64x72xf32>
    %c2 = arith.constant 2 : index
    %c0_18 = arith.constant 0 : index
    %c0_19 = arith.constant 0 : index
    %40 = vector.load %arg2[%c2, %c0_18, %c0_19] : memref<8x64x64xbf16, #tpu.memory_space<vmem>>, vector<1x64x64xbf16>
    %41 = vector.shape_cast %40 : vector<1x64x64xbf16> to vector<64x64xbf16>
    %42 = arith.truncf %39 : vector<64x72xf32> to vector<64x72xbf16>
    %cst_20 = arith.constant dense<0.000000e+00> : vector<64x72xf32>
    %43 = tpu.matmul %41, %42, %cst_20 {dimension_numbers = #tpu.dot_dimension_numbers<[1], [0], [0], [1], [0, 0, 1, 1], [], []>} : vector<64x64xbf16>, vector<64x72xbf16>, vector<64x72xf32> -> vector<64x72xf32>
    %44 = vector.extract_strided_slice %11 {offsets = [0, 2], sizes = [64, 1], strides = [1, 1]} : vector<64x8xf32> to vector<64x1xf32>
    %45 = vector.broadcast %44 : vector<64x1xf32> to vector<64x72xf32>
    %46 = arith.addf %43, %45 : vector<64x72xf32>
    %cst_21 = arith.constant 0.000000e+00 : f32
    %47 = vector.broadcast %cst_21 : f32 to vector<64x72xf32>
    %48 = arith.cmpf oge, %46, %47 : vector<64x72xf32>
    %cst_22 = arith.constant 2.000000e-01 : f32
    %49 = vector.broadcast %cst_22 : f32 to vector<64x72xf32>
    %50 = arith.mulf %49, %46 : vector<64x72xf32>
    %51 = arith.select %48, %46, %50 : vector<64x72xi1>, vector<64x72xf32>
    %cst_23 = arith.constant 1.41421354 : f32
    %52 = vector.broadcast %cst_23 : f32 to vector<64x72xf32>
    %53 = arith.mulf %51, %52 : vector<64x72xf32>
    %c3 = arith.constant 3 : index
    %c0_24 = arith.constant 0 : index
    %c0_25 = arith.constant 0 : index
    %54 = vector.load %arg2[%c3, %c0_24, %c0_25] : memref<8x64x64xbf16, #tpu.memory_space<vmem>>, vector<1x64x64xbf16>
    %55 = vector.shape_cast %54 : vector<1x64x64xbf16> to vector<64x64xbf16>
    %56 = arith.truncf %53 : vector<64x72xf32> to vector<64x72xbf16>
    %cst_26 = arith.constant dense<0.000000e+00> : vector<64x72xf32>
    %57 = tpu.matmul %55, %56, %cst_26 {dimension_numbers = #tpu.dot_dimension_numbers<[1], [0], [0], [1], [0, 0, 1, 1], [], []>} : vector<64x64xbf16>, vector<64x72xbf16>, vector<64x72xf32> -> vector<64x72xf32>
    %58 = vector.extract_strided_slice %11 {offsets = [0, 3], sizes = [64, 1], strides = [1, 1]} : vector<64x8xf32> to vector<64x1xf32>
    %59 = vector.broadcast %58 : vector<64x1xf32> to vector<64x72xf32>
    %60 = arith.addf %57, %59 : vector<64x72xf32>
    %cst_27 = arith.constant 0.000000e+00 : f32
    %61 = vector.broadcast %cst_27 : f32 to vector<64x72xf32>
    %62 = arith.cmpf oge, %60, %61 : vector<64x72xf32>
    %cst_28 = arith.constant 2.000000e-01 : f32
    %63 = vector.broadcast %cst_28 : f32 to vector<64x72xf32>
    %64 = arith.mulf %63, %60 : vector<64x72xf32>
    %65 = arith.select %62, %60, %64 : vector<64x72xi1>, vector<64x72xf32>
    %cst_29 = arith.constant 1.41421354 : f32
    %66 = vector.broadcast %cst_29 : f32 to vector<64x72xf32>
    %67 = arith.mulf %65, %66 : vector<64x72xf32>
    %c4 = arith.constant 4 : index
    %c0_30 = arith.constant 0 : index
    %c0_31 = arith.constant 0 : index
    %68 = vector.load %arg2[%c4, %c0_30, %c0_31] : memref<8x64x64xbf16, #tpu.memory_space<vmem>>, vector<1x64x64xbf16>
    %69 = vector.shape_cast %68 : vector<1x64x64xbf16> to vector<64x64xbf16>
    %70 = arith.truncf %67 : vector<64x72xf32> to vector<64x72xbf16>
    %cst_32 = arith.constant dense<0.000000e+00> : vector<64x72xf32>
    %71 = tpu.matmul %69, %70, %cst_32 {dimension_numbers = #tpu.dot_dimension_numbers<[1], [0], [0], [1], [0, 0, 1, 1], [], []>} : vector<64x64xbf16>, vector<64x72xbf16>, vector<64x72xf32> -> vector<64x72xf32>
    %72 = vector.extract_strided_slice %11 {offsets = [0, 4], sizes = [64, 1], strides = [1, 1]} : vector<64x8xf32> to vector<64x1xf32>
    %73 = vector.broadcast %72 : vector<64x1xf32> to vector<64x72xf32>
    %74 = arith.addf %71, %73 : vector<64x72xf32>
    %cst_33 = arith.constant 0.000000e+00 : f32
    %75 = vector.broadcast %cst_33 : f32 to vector<64x72xf32>
    %76 = arith.cmpf oge, %74, %75 : vector<64x72xf32>
    %cst_34 = arith.constant 2.000000e-01 : f32
    %77 = vector.broadcast %cst_34 : f32 to vector<64x72xf32>
    %78 = arith.mulf %77, %74 : vector<64x72xf32>
    %79 = arith.select %76, %74, %78 : vector<64x72xi1>, vector<64x72xf32>
    %cst_35 = arith.constant 1.41421354 : f32
    %80 = vector.broadcast %cst_35 : f32 to vector<64x72xf32>
    %81 = arith.mulf %79, %80 : vector<64x72xf32>
    %c5 = arith.constant 5 : index
    %c0_36 = arith.constant 0 : index
    %c0_37 = arith.constant 0 : index
    %82 = vector.load %arg2[%c5, %c0_36, %c0_37] : memref<8x64x64xbf16, #tpu.memory_space<vmem>>, vector<1x64x64xbf16>
    %83 = vector.shape_cast %82 : vector<1x64x64xbf16> to vector<64x64xbf16>
    %84 = arith.truncf %81 : vector<64x72xf32> to vector<64x72xbf16>
    %cst_38 = arith.constant dense<0.000000e+00> : vector<64x72xf32>
    %85 = tpu.matmul %83, %84, %cst_38 {dimension_numbers = #tpu.dot_dimension_numbers<[1], [0], [0], [1], [0, 0, 1, 1], [], []>} : vector<64x64xbf16>, vector<64x72xbf16>, vector<64x72xf32> -> vector<64x72xf32>
    %86 = vector.extract_strided_slice %11 {offsets = [0, 5], sizes = [64, 1], strides = [1, 1]} : vector<64x8xf32> to vector<64x1xf32>
    %87 = vector.broadcast %86 : vector<64x1xf32> to vector<64x72xf32>
    %88 = arith.addf %85, %87 : vector<64x72xf32>
    %cst_39 = arith.constant 0.000000e+00 : f32
    %89 = vector.broadcast %cst_39 : f32 to vector<64x72xf32>
    %90 = arith.cmpf oge, %88, %89 : vector<64x72xf32>
    %cst_40 = arith.constant 2.000000e-01 : f32
    %91 = vector.broadcast %cst_40 : f32 to vector<64x72xf32>
    %92 = arith.mulf %91, %88 : vector<64x72xf32>
    %93 = arith.select %90, %88, %92 : vector<64x72xi1>, vector<64x72xf32>
    %cst_41 = arith.constant 1.41421354 : f32
    %94 = vector.broadcast %cst_41 : f32 to vector<64x72xf32>
    %95 = arith.mulf %93, %94 : vector<64x72xf32>
    %c6 = arith.constant 6 : index
    %c0_42 = arith.constant 0 : index
    %c0_43 = arith.constant 0 : index
    %96 = vector.load %arg2[%c6, %c0_42, %c0_43] : memref<8x64x64xbf16, #tpu.memory_space<vmem>>, vector<1x64x64xbf16>
    %97 = vector.shape_cast %96 : vector<1x64x64xbf16> to vector<64x64xbf16>
    %98 = arith.truncf %95 : vector<64x72xf32> to vector<64x72xbf16>
    %cst_44 = arith.constant dense<0.000000e+00> : vector<64x72xf32>
    %99 = tpu.matmul %97, %98, %cst_44 {dimension_numbers = #tpu.dot_dimension_numbers<[1], [0], [0], [1], [0, 0, 1, 1], [], []>} : vector<64x64xbf16>, vector<64x72xbf16>, vector<64x72xf32> -> vector<64x72xf32>
    %100 = vector.extract_strided_slice %11 {offsets = [0, 6], sizes = [64, 1], strides = [1, 1]} : vector<64x8xf32> to vector<64x1xf32>
    %101 = vector.broadcast %100 : vector<64x1xf32> to vector<64x72xf32>
    %102 = arith.addf %99, %101 : vector<64x72xf32>
    %cst_45 = arith.constant 0.000000e+00 : f32
    %103 = vector.broadcast %cst_45 : f32 to vector<64x72xf32>
    %104 = arith.cmpf oge, %102, %103 : vector<64x72xf32>
    %cst_46 = arith.constant 2.000000e-01 : f32
    %105 = vector.broadcast %cst_46 : f32 to vector<64x72xf32>
    %106 = arith.mulf %105, %102 : vector<64x72xf32>
    %107 = arith.select %104, %102, %106 : vector<64x72xi1>, vector<64x72xf32>
    %cst_47 = arith.constant 1.41421354 : f32
    %108 = vector.broadcast %cst_47 : f32 to vector<64x72xf32>
    %109 = arith.mulf %107, %108 : vector<64x72xf32>
    %c7 = arith.constant 7 : index
    %c0_48 = arith.constant 0 : index
    %c0_49 = arith.constant 0 : index
    %110 = vector.load %arg2[%c7, %c0_48, %c0_49] : memref<8x64x64xbf16, #tpu.memory_space<vmem>>, vector<1x64x64xbf16>
    %111 = vector.shape_cast %110 : vector<1x64x64xbf16> to vector<64x64xbf16>
    %112 = arith.truncf %109 : vector<64x72xf32> to vector<64x72xbf16>
    %cst_50 = arith.constant dense<0.000000e+00> : vector<64x72xf32>
    %113 = tpu.matmul %111, %112, %cst_50 {dimension_numbers = #tpu.dot_dimension_numbers<[1], [0], [0], [1], [0, 0, 1, 1], [], []>} : vector<64x64xbf16>, vector<64x72xbf16>, vector<64x72xf32> -> vector<64x72xf32>
    %114 = vector.extract_strided_slice %11 {offsets = [0, 7], sizes = [64, 1], strides = [1, 1]} : vector<64x8xf32> to vector<64x1xf32>
    %115 = vector.broadcast %114 : vector<64x1xf32> to vector<64x72xf32>
    %116 = arith.addf %113, %115 : vector<64x72xf32>
    %cst_51 = arith.constant 0.000000e+00 : f32
    %117 = vector.broadcast %cst_51 : f32 to vector<64x72xf32>
    %118 = arith.cmpf oge, %116, %117 : vector<64x72xf32>
    %cst_52 = arith.constant 2.000000e-01 : f32
    %119 = vector.broadcast %cst_52 : f32 to vector<64x72xf32>
    %120 = arith.mulf %119, %116 : vector<64x72xf32>
    %121 = arith.select %118, %116, %120 : vector<64x72xi1>, vector<64x72xf32>
    %cst_53 = arith.constant 1.41421354 : f32
    %122 = vector.broadcast %cst_53 : f32 to vector<64x72xf32>
    %123 = arith.mulf %121, %122 : vector<64x72xf32>
    %c0_54 = arith.constant 0 : index
    %c0_55 = arith.constant 0 : index
    %124 = vector.load %arg4[%c0_54, %c0_55] : memref<72x16xf32, #tpu.memory_space<vmem>>, vector<72x16xf32>
    %cst_56 = arith.constant dense<0.000000e+00> : vector<64x16xf32>
    %125 = tpu.matmul %123, %124, %cst_56 {dimension_numbers = #tpu.dot_dimension_numbers<[1], [0], [0], [1], [0, 0, 1, 1], [], []>} : vector<64x72xf32>, vector<72x16xf32>, vector<64x16xf32> -> vector<64x16xf32>
    %c0_57 = arith.constant 0 : index
    %c0_58 = arith.constant 0 : index
    %126 = vector.load %arg5[%c0_57, %c0_58] : memref<128x64xbf16, #tpu.memory_space<vmem>>, vector<128x64xbf16>
    %127 = arith.truncf %125 : vector<64x16xf32> to vector<64x16xbf16>
    %cst_59 = arith.constant dense<0.000000e+00> : vector<128x16xf32>
    %128 = tpu.matmul %126, %127, %cst_59 {dimension_numbers = #tpu.dot_dimension_numbers<[1], [0], [0], [1], [0, 0, 1, 1], [], []>} : vector<128x64xbf16>, vector<64x16xbf16>, vector<128x16xf32> -> vector<128x16xf32>
    %c0_60 = arith.constant 0 : index
    %c0_61 = arith.constant 0 : index
    %c0_62 = arith.constant 0 : index
    %129 = vector.load %arg7[%c0_60, %c0_61, %c0_62] : memref<2x128x16xf32, #tpu.memory_space<vmem>>, vector<1x128x16xf32>
    %130 = vector.shape_cast %129 : vector<1x128x16xf32> to vector<128x16xf32>
    %131 = arith.mulf %128, %130 : vector<128x16xf32>
    %cst_63 = arith.constant dense<0.000000e+00> : vector<128xf32>
    %132 = vector.multi_reduction <add>, %131, %cst_63 [1] : vector<128x16xf32> to vector<128xf32>
    %133 = vector.shape_cast %132 : vector<128xf32> to vector<128x1xf32>
    %c1_64 = arith.constant 1 : index
    %c0_65 = arith.constant 0 : index
    %c0_66 = arith.constant 0 : index
    %134 = vector.load %arg7[%c1_64, %c0_65, %c0_66] : memref<2x128x16xf32, #tpu.memory_space<vmem>>, vector<1x128x16xf32>
    %135 = vector.shape_cast %134 : vector<1x128x16xf32> to vector<128x16xf32>
    %136 = arith.mulf %128, %135 : vector<128x16xf32>
    %cst_67 = arith.constant dense<0.000000e+00> : vector<128xf32>
    %137 = vector.multi_reduction <add>, %136, %cst_67 [1] : vector<128x16xf32> to vector<128xf32>
    %138 = vector.shape_cast %137 : vector<128xf32> to vector<128x1xf32>
    %139 = tpu.concatenate %133, %138 in 1 : vector<128x1xf32>, vector<128x1xf32> -> vector<128x2xf32>
    %c0_68 = arith.constant 0 : index
    %c0_69 = arith.constant 0 : index
    %140 = vector.load %arg6[%c0_68, %c0_69] : memref<128x1xf32, #tpu.memory_space<vmem>>, vector<128x1xf32>
    %141 = vector.broadcast %140 : vector<128x1xf32> to vector<128x2xf32>
    %142 = arith.addf %139, %141 : vector<128x2xf32>
    %c0_70 = arith.constant 0 : index
    %c0_71 = arith.constant 0 : index
    %143 = vector.load %arg8[%c0_70, %c0_71] : memref<128x128xf32, #tpu.memory_space<vmem>>, vector<128x128xf32>
    %144 = arith.mulf %142, %142 : vector<128x2xf32>
    %cst_72 = arith.constant dense<0.000000e+00> : vector<128x2xf32>
    %145 = tpu.matmul %143, %144, %cst_72 {dimension_numbers = #tpu.dot_dimension_numbers<[1], [0], [0], [1], [0, 0, 1, 1], [], []>} : vector<128x128xf32>, vector<128x2xf32>, vector<128x2xf32> -> vector<128x2xf32>
    %cst_73 = arith.constant 9.99999993E-9 : f32
    %146 = vector.broadcast %cst_73 : f32 to vector<128x2xf32>
    %147 = arith.addf %145, %146 : vector<128x2xf32>
    %148 = math.rsqrt %147 : vector<128x2xf32>
    %c0_74 = arith.constant 0 : index
    %c0_75 = arith.constant 0 : index
    %149 = vector.load %arg9[%c0_74, %c0_75] : memref<128x1xf32, #tpu.memory_space<vmem>>, vector<128x1xf32>
    %c0_76 = arith.constant 0 : index
    %c0_77 = arith.constant 0 : index
    %150 = vector.load %arg15[%c0_76, %c0_77] : memref<10x32xf32, #tpu.memory_space<vmem>>, vector<10x32xf32>
    %c0_78 = arith.constant 0 : index
    %c0_79 = arith.constant 0 : index
    %151 = vector.load %arg16[%c0_78, %c0_79] : memref<10x128xf32, #tpu.memory_space<vmem>>, vector<10x128xf32>
    %c0_80 = arith.constant 0 : index
    %c0_81 = arith.constant 0 : index
    %152 = vector.load %arg17[%c0_80, %c0_81] : memref<10x512xf32, #tpu.memory_space<vmem>>, vector<10x512xf32>
    %c0_82 = arith.constant 0 : index
    %c0_83 = arith.constant 0 : index
    %153 = vector.load %arg10[%c0_82, %c0_83] : memref<16x32xf32, #tpu.memory_space<vmem>>, vector<16x32xf32>
    %154 = vector.extract_strided_slice %150 {offsets = [9, 0], sizes = [1, 32], strides = [1, 1]} : vector<10x32xf32> to vector<1x32xf32>
    %155 = vector.extract_strided_slice %142 {offsets = [0, 0], sizes = [16, 2], strides = [1, 1]} : vector<128x2xf32> to vector<16x2xf32>
    %156 = vector.extract_strided_slice %155 {offsets = [0, 0], sizes = [16, 1], strides = [1, 1]} : vector<16x2xf32> to vector<16x1xf32>
    %157 = vector.extract_strided_slice %155 {offsets = [0, 1], sizes = [16, 1], strides = [1, 1]} : vector<16x2xf32> to vector<16x1xf32>
    %158 = arith.subf %156, %157 : vector<16x1xf32>
    %159 = vector.broadcast %154 : vector<1x32xf32> to vector<16x32xf32>
    %160 = vector.broadcast %158 : vector<16x1xf32> to vector<16x32xf32>
    %161 = arith.mulf %159, %160 : vector<16x32xf32>
    %162 = vector.broadcast %157 : vector<16x1xf32> to vector<16x32xf32>
    %163 = arith.addf %162, %161 : vector<16x32xf32>
    %164 = arith.mulf %153, %163 : vector<16x32xf32>
    %165 = vector.extract_strided_slice %164 {offsets = [0, 27], sizes = [16, 5], strides = [1, 1]} : vector<16x32xf32> to vector<16x5xf32>
    %166 = vector.extract_strided_slice %164 {offsets = [0, 0], sizes = [16, 27], strides = [1, 1]} : vector<16x32xf32> to vector<16x27xf32>
    %167 = tpu.concatenate %165, %166 in 1 : vector<16x5xf32>, vector<16x27xf32> -> vector<16x32xf32>
    %168 = vector.extract_strided_slice %150 {offsets = [0, 0], sizes = [1, 32], strides = [1, 1]} : vector<10x32xf32> to vector<1x32xf32>
    %169 = vector.broadcast %168 : vector<1x32xf32> to vector<16x32xf32>
    %170 = arith.mulf %167, %169 : vector<16x32xf32>
    %171 = vector.extract_strided_slice %164 {offsets = [0, 28], sizes = [16, 4], strides = [1, 1]} : vector<16x32xf32> to vector<16x4xf32>
    %172 = vector.extract_strided_slice %164 {offsets = [0, 0], sizes = [16, 28], strides = [1, 1]} : vector<16x32xf32> to vector<16x28xf32>
    %173 = tpu.concatenate %171, %172 in 1 : vector<16x4xf32>, vector<16x28xf32> -> vector<16x32xf32>
    %174 = vector.extract_strided_slice %150 {offsets = [1, 0], sizes = [1, 32], strides = [1, 1]} : vector<10x32xf32> to vector<1x32xf32>
    %175 = vector.broadcast %174 : vector<1x32xf32> to vector<16x32xf32>
    %176 = arith.mulf %173, %175 : vector<16x32xf32>
    %177 = vector.extract_strided_slice %164 {offsets = [0, 29], sizes = [16, 3], strides = [1, 1]} : vector<16x32xf32> to vector<16x3xf32>
    %178 = vector.extract_strided_slice %164 {offsets = [0, 0], sizes = [16, 29], strides = [1, 1]} : vector<16x32xf32> to vector<16x29xf32>
    %179 = tpu.concatenate %177, %178 in 1 : vector<16x3xf32>, vector<16x29xf32> -> vector<16x32xf32>
    %180 = vector.extract_strided_slice %150 {offsets = [2, 0], sizes = [1, 32], strides = [1, 1]} : vector<10x32xf32> to vector<1x32xf32>
    %181 = vector.broadcast %180 : vector<1x32xf32> to vector<16x32xf32>
    %182 = arith.mulf %179, %181 : vector<16x32xf32>
    %183 = vector.extract_strided_slice %164 {offsets = [0, 31], sizes = [16, 1], strides = [1, 1]} : vector<16x32xf32> to vector<16x1xf32>
    %184 = vector.extract_strided_slice %164 {offsets = [0, 0], sizes = [16, 31], strides = [1, 1]} : vector<16x32xf32> to vector<16x31xf32>
    %185 = tpu.concatenate %183, %184 in 1 : vector<16x1xf32>, vector<16x31xf32> -> vector<16x32xf32>
    %186 = vector.extract_strided_slice %150 {offsets = [3, 0], sizes = [1, 32], strides = [1, 1]} : vector<10x32xf32> to vector<1x32xf32>
    %187 = vector.broadcast %186 : vector<1x32xf32> to vector<16x32xf32>
    %188 = arith.mulf %185, %187 : vector<16x32xf32>
    %189 = vector.extract_strided_slice %150 {offsets = [4, 0], sizes = [1, 32], strides = [1, 1]} : vector<10x32xf32> to vector<1x32xf32>
    %190 = vector.broadcast %189 : vector<1x32xf32> to vector<16x32xf32>
    %191 = arith.mulf %164, %190 : vector<16x32xf32>
    %192 = vector.extract_strided_slice %164 {offsets = [0, 1], sizes = [16, 31], strides = [1, 1]} : vector<16x32xf32> to vector<16x31xf32>
    %193 = vector.extract_strided_slice %164 {offsets = [0, 0], sizes = [16, 1], strides = [1, 1]} : vector<16x32xf32> to vector<16x1xf32>
    %194 = tpu.concatenate %192, %193 in 1 : vector<16x31xf32>, vector<16x1xf32> -> vector<16x32xf32>
    %195 = vector.extract_strided_slice %150 {offsets = [5, 0], sizes = [1, 32], strides = [1, 1]} : vector<10x32xf32> to vector<1x32xf32>
    %196 = vector.broadcast %195 : vector<1x32xf32> to vector<16x32xf32>
    %197 = arith.mulf %194, %196 : vector<16x32xf32>
    %198 = vector.extract_strided_slice %164 {offsets = [0, 3], sizes = [16, 29], strides = [1, 1]} : vector<16x32xf32> to vector<16x29xf32>
    %199 = vector.extract_strided_slice %164 {offsets = [0, 0], sizes = [16, 3], strides = [1, 1]} : vector<16x32xf32> to vector<16x3xf32>
    %200 = tpu.concatenate %198, %199 in 1 : vector<16x29xf32>, vector<16x3xf32> -> vector<16x32xf32>
    %201 = vector.extract_strided_slice %150 {offsets = [6, 0], sizes = [1, 32], strides = [1, 1]} : vector<10x32xf32> to vector<1x32xf32>
    %202 = vector.broadcast %201 : vector<1x32xf32> to vector<16x32xf32>
    %203 = arith.mulf %200, %202 : vector<16x32xf32>
    %204 = vector.extract_strided_slice %164 {offsets = [0, 4], sizes = [16, 28], strides = [1, 1]} : vector<16x32xf32> to vector<16x28xf32>
    %205 = vector.extract_strided_slice %164 {offsets = [0, 0], sizes = [16, 4], strides = [1, 1]} : vector<16x32xf32> to vector<16x4xf32>
    %206 = tpu.concatenate %204, %205 in 1 : vector<16x28xf32>, vector<16x4xf32> -> vector<16x32xf32>
    %207 = vector.extract_strided_slice %150 {offsets = [7, 0], sizes = [1, 32], strides = [1, 1]} : vector<10x32xf32> to vector<1x32xf32>
    %208 = vector.broadcast %207 : vector<1x32xf32> to vector<16x32xf32>
    %209 = arith.mulf %206, %208 : vector<16x32xf32>
    %210 = vector.extract_strided_slice %164 {offsets = [0, 5], sizes = [16, 27], strides = [1, 1]} : vector<16x32xf32> to vector<16x27xf32>
    %211 = vector.extract_strided_slice %164 {offsets = [0, 0], sizes = [16, 5], strides = [1, 1]} : vector<16x32xf32> to vector<16x5xf32>
    %212 = tpu.concatenate %210, %211 in 1 : vector<16x27xf32>, vector<16x5xf32> -> vector<16x32xf32>
    %213 = vector.extract_strided_slice %150 {offsets = [8, 0], sizes = [1, 32], strides = [1, 1]} : vector<10x32xf32> to vector<1x32xf32>
    %214 = vector.broadcast %213 : vector<1x32xf32> to vector<16x32xf32>
    %215 = arith.mulf %212, %214 : vector<16x32xf32>
    %216 = tpu.concatenate %170, %176, %182, %188, %191, %197, %203, %209, %215 in 0 : vector<16x32xf32>, vector<16x32xf32>, vector<16x32xf32>, vector<16x32xf32>, vector<16x32xf32>, vector<16x32xf32>, vector<16x32xf32>, vector<16x32xf32>, vector<16x32xf32> -> vector<144x32xf32>
    %c0_84 = arith.constant 0 : index
    %c0_85 = arith.constant 0 : index
    %c0_86 = arith.constant 0 : index
    %217 = vector.load %arg11[%c0_84, %c0_85, %c0_86] : memref<5x16x144xbf16, #tpu.memory_space<vmem>>, vector<1x16x144xbf16>
    %218 = vector.shape_cast %217 : vector<1x16x144xbf16> to vector<16x144xbf16>
    %219 = arith.truncf %216 : vector<144x32xf32> to vector<144x32xbf16>
    %cst_87 = arith.constant dense<0.000000e+00> : vector<16x32xf32>
    %220 = tpu.matmul %218, %219, %cst_87 {dimension_numbers = #tpu.dot_dimension_numbers<[1], [0], [0], [1], [0, 0, 1, 1], [], []>} : vector<16x144xbf16>, vector<144x32xbf16>, vector<16x32xf32> -> vector<16x32xf32>
    %221 = vector.extract_strided_slice %148 {offsets = [0, 0], sizes = [16, 2], strides = [1, 1]} : vector<128x2xf32> to vector<16x2xf32>
    %222 = vector.extract_strided_slice %221 {offsets = [0, 0], sizes = [16, 1], strides = [1, 1]} : vector<16x2xf32> to vector<16x1xf32>
    %223 = vector.extract_strided_slice %221 {offsets = [0, 1], sizes = [16, 1], strides = [1, 1]} : vector<16x2xf32> to vector<16x1xf32>
    %224 = arith.subf %222, %223 : vector<16x1xf32>
    %225 = vector.broadcast %154 : vector<1x32xf32> to vector<16x32xf32>
    %226 = vector.broadcast %224 : vector<16x1xf32> to vector<16x32xf32>
    %227 = arith.mulf %225, %226 : vector<16x32xf32>
    %228 = vector.broadcast %223 : vector<16x1xf32> to vector<16x32xf32>
    %229 = arith.addf %228, %227 : vector<16x32xf32>
    %230 = arith.mulf %220, %229 : vector<16x32xf32>
    %231 = vector.extract_strided_slice %149 {offsets = [0, 0], sizes = [16, 1], strides = [1, 1]} : vector<128x1xf32> to vector<16x1xf32>
    %232 = vector.broadcast %231 : vector<16x1xf32> to vector<16x32xf32>
    %233 = arith.addf %230, %232 : vector<16x32xf32>
    %cst_88 = arith.constant 0.000000e+00 : f32
    %234 = vector.broadcast %cst_88 : f32 to vector<16x32xf32>
    %235 = arith.cmpf oge, %233, %234 : vector<16x32xf32>
    %cst_89 = arith.constant 2.000000e-01 : f32
    %236 = vector.broadcast %cst_89 : f32 to vector<16x32xf32>
    %237 = arith.mulf %236, %233 : vector<16x32xf32>
    %238 = arith.select %235, %233, %237 : vector<16x32xi1>, vector<16x32xf32>
    %cst_90 = arith.constant 1.41421354 : f32
    %239 = vector.broadcast %cst_90 : f32 to vector<16x32xf32>
    %240 = arith.mulf %238, %239 : vector<16x32xf32>
    %241 = vector.extract_strided_slice %150 {offsets = [9, 0], sizes = [1, 32], strides = [1, 1]} : vector<10x32xf32> to vector<1x32xf32>
    %242 = vector.extract_strided_slice %142 {offsets = [16, 0], sizes = [16, 2], strides = [1, 1]} : vector<128x2xf32> to vector<16x2xf32>
    %243 = vector.extract_strided_slice %242 {offsets = [0, 0], sizes = [16, 1], strides = [1, 1]} : vector<16x2xf32> to vector<16x1xf32>
    %244 = vector.extract_strided_slice %242 {offsets = [0, 1], sizes = [16, 1], strides = [1, 1]} : vector<16x2xf32> to vector<16x1xf32>
    %245 = arith.subf %243, %244 : vector<16x1xf32>
    %246 = vector.broadcast %241 : vector<1x32xf32> to vector<16x32xf32>
    %247 = vector.broadcast %245 : vector<16x1xf32> to vector<16x32xf32>
    %248 = arith.mulf %246, %247 : vector<16x32xf32>
    %249 = vector.broadcast %244 : vector<16x1xf32> to vector<16x32xf32>
    %250 = arith.addf %249, %248 : vector<16x32xf32>
    %251 = arith.mulf %240, %250 : vector<16x32xf32>
    %c0_91 = arith.constant 0 : index
    %c0_92 = arith.constant 0 : index
    %c0_93 = arith.constant 0 : index
    %252 = vector.load %arg12[%c0_91, %c0_92, %c0_93] : memref<3x3x16xbf16, #tpu.memory_space<vmem>>, vector<1x3x16xbf16>
    %253 = vector.shape_cast %252 : vector<1x3x16xbf16> to vector<3x16xbf16>
    %254 = arith.truncf %251 : vector<16x32xf32> to vector<16x32xbf16>
    %cst_94 = arith.constant dense<0.000000e+00> : vector<3x32xf32>
    %255 = tpu.matmul %253, %254, %cst_94 {dimension_numbers = #tpu.dot_dimension_numbers<[1], [0], [0], [1], [0, 0, 1, 1], [], []>} : vector<3x16xbf16>, vector<16x32xbf16>, vector<3x32xf32> -> vector<3x32xf32>
    %256 = vector.extract_strided_slice %149 {offsets = [16, 0], sizes = [3, 1], strides = [1, 1]} : vector<128x1xf32> to vector<3x1xf32>
    %257 = vector.broadcast %256 : vector<3x1xf32> to vector<3x32xf32>
    %258 = arith.addf %255, %257 : vector<3x32xf32>
    %259 = tpu.concatenate %240, %258 in 0 : vector<16x32xf32>, vector<3x32xf32> -> vector<19x32xf32>
    %c0_95 = arith.constant 0 : index
    %c0_96 = arith.constant 0 : index
    %260 = vector.load %arg13[%c0_95, %c0_96] : memref<32x128xf32, #tpu.memory_space<vmem>>, vector<32x128xf32>
    %cst_97 = arith.constant dense<0.000000e+00> : vector<19x128xf32>
    %261 = tpu.matmul %259, %260, %cst_97 {dimension_numbers = #tpu.dot_dimension_numbers<[1], [0], [0], [1], [0, 0, 1, 1], [], []>} : vector<19x32xf32>, vector<32x128xf32>, vector<19x128xf32> -> vector<19x128xf32>
    %262 = vector.extract_strided_slice %261 {offsets = [0, 0], sizes = [16, 128], strides = [1, 1]} : vector<19x128xf32> to vector<16x128xf32>
    %263 = vector.extract_strided_slice %261 {offsets = [16, 0], sizes = [3, 128], strides = [1, 1]} : vector<19x128xf32> to vector<3x128xf32>
    %264 = vector.extract_strided_slice %151 {offsets = [9, 0], sizes = [1, 128], strides = [1, 1]} : vector<10x128xf32> to vector<1x128xf32>
    %265 = vector.extract_strided_slice %142 {offsets = [32, 0], sizes = [16, 2], strides = [1, 1]} : vector<128x2xf32> to vector<16x2xf32>
    %266 = vector.extract_strided_slice %265 {offsets = [0, 0], sizes = [16, 1], strides = [1, 1]} : vector<16x2xf32> to vector<16x1xf32>
    %267 = vector.extract_strided_slice %265 {offsets = [0, 1], sizes = [16, 1], strides = [1, 1]} : vector<16x2xf32> to vector<16x1xf32>
    %268 = arith.subf %266, %267 : vector<16x1xf32>
    %269 = vector.broadcast %264 : vector<1x128xf32> to vector<16x128xf32>
    %270 = vector.broadcast %268 : vector<16x1xf32> to vector<16x128xf32>
    %271 = arith.mulf %269, %270 : vector<16x128xf32>
    %272 = vector.broadcast %267 : vector<16x1xf32> to vector<16x128xf32>
    %273 = arith.addf %272, %271 : vector<16x128xf32>
    %274 = arith.mulf %262, %273 : vector<16x128xf32>
    %c9_i32 = arith.constant 9 : i32
    %275 = tpu.dynamic_rotate %274 by %c9_i32 dim 1 : vector<16x128xf32>, i32 -> vector<16x128xf32>
    %276 = vector.extract_strided_slice %151 {offsets = [0, 0], sizes = [1, 128], strides = [1, 1]} : vector<10x128xf32> to vector<1x128xf32>
    %277 = vector.broadcast %276 : vector<1x128xf32> to vector<16x128xf32>
    %278 = arith.mulf %275, %277 : vector<16x128xf32>
    %c8_i32 = arith.constant 8 : i32
    %279 = tpu.dynamic_rotate %274 by %c8_i32 dim 1 : vector<16x128xf32>, i32 -> vector<16x128xf32>
    %280 = vector.extract_strided_slice %151 {offsets = [1, 0], sizes = [1, 128], strides = [1, 1]} : vector<10x128xf32> to vector<1x128xf32>
    %281 = vector.broadcast %280 : vector<1x128xf32> to vector<16x128xf32>
    %282 = arith.mulf %279, %281 : vector<16x128xf32>
    %c7_i32 = arith.constant 7 : i32
    %283 = tpu.dynamic_rotate %274 by %c7_i32 dim 1 : vector<16x128xf32>, i32 -> vector<16x128xf32>
    %284 = vector.extract_strided_slice %151 {offsets = [2, 0], sizes = [1, 128], strides = [1, 1]} : vector<10x128xf32> to vector<1x128xf32>
    %285 = vector.broadcast %284 : vector<1x128xf32> to vector<16x128xf32>
    %286 = arith.mulf %283, %285 : vector<16x128xf32>
    %c1_i32 = arith.constant 1 : i32
    %287 = tpu.dynamic_rotate %274 by %c1_i32 dim 1 : vector<16x128xf32>, i32 -> vector<16x128xf32>
    %288 = vector.extract_strided_slice %151 {offsets = [3, 0], sizes = [1, 128], strides = [1, 1]} : vector<10x128xf32> to vector<1x128xf32>
    %289 = vector.broadcast %288 : vector<1x128xf32> to vector<16x128xf32>
    %290 = arith.mulf %287, %289 : vector<16x128xf32>
    %291 = vector.extract_strided_slice %151 {offsets = [4, 0], sizes = [1, 128], strides = [1, 1]} : vector<10x128xf32> to vector<1x128xf32>
    %292 = vector.broadcast %291 : vector<1x128xf32> to vector<16x128xf32>
    %293 = arith.mulf %274, %292 : vector<16x128xf32>
    %c127_i32 = arith.constant 127 : i32
    %294 = tpu.dynamic_rotate %274 by %c127_i32 dim 1 : vector<16x128xf32>, i32 -> vector<16x128xf32>
    %295 = vector.extract_strided_slice %151 {offsets = [5, 0], sizes = [1, 128], strides = [1, 1]} : vector<10x128xf32> to vector<1x128xf32>
    %296 = vector.broadcast %295 : vector<1x128xf32> to vector<16x128xf32>
    %297 = arith.mulf %294, %296 : vector<16x128xf32>
    %c121_i32 = arith.constant 121 : i32
    %298 = tpu.dynamic_rotate %274 by %c121_i32 dim 1 : vector<16x128xf32>, i32 -> vector<16x128xf32>
    %299 = vector.extract_strided_slice %151 {offsets = [6, 0], sizes = [1, 128], strides = [1, 1]} : vector<10x128xf32> to vector<1x128xf32>
    %300 = vector.broadcast %299 : vector<1x128xf32> to vector<16x128xf32>
    %301 = arith.mulf %298, %300 : vector<16x128xf32>
    %c120_i32 = arith.constant 120 : i32
    %302 = tpu.dynamic_rotate %274 by %c120_i32 dim 1 : vector<16x128xf32>, i32 -> vector<16x128xf32>
    %303 = vector.extract_strided_slice %151 {offsets = [7, 0], sizes = [1, 128], strides = [1, 1]} : vector<10x128xf32> to vector<1x128xf32>
    %304 = vector.broadcast %303 : vector<1x128xf32> to vector<16x128xf32>
    %305 = arith.mulf %302, %304 : vector<16x128xf32>
    %c119_i32 = arith.constant 119 : i32
    %306 = tpu.dynamic_rotate %274 by %c119_i32 dim 1 : vector<16x128xf32>, i32 -> vector<16x128xf32>
    %307 = vector.extract_strided_slice %151 {offsets = [8, 0], sizes = [1, 128], strides = [1, 1]} : vector<10x128xf32> to vector<1x128xf32>
    %308 = vector.broadcast %307 : vector<1x128xf32> to vector<16x128xf32>
    %309 = arith.mulf %306, %308 : vector<16x128xf32>
    %310 = tpu.concatenate %278, %282, %286, %290, %293, %297, %301, %305, %309 in 0 : vector<16x128xf32>, vector<16x128xf32>, vector<16x128xf32>, vector<16x128xf32>, vector<16x128xf32>, vector<16x128xf32>, vector<16x128xf32>, vector<16x128xf32>, vector<16x128xf32> -> vector<144x128xf32>
    %c1_98 = arith.constant 1 : index
    %c0_99 = arith.constant 0 : index
    %c0_100 = arith.constant 0 : index
    %311 = vector.load %arg11[%c1_98, %c0_99, %c0_100] : memref<5x16x144xbf16, #tpu.memory_space<vmem>>, vector<1x16x144xbf16>
    %312 = vector.shape_cast %311 : vector<1x16x144xbf16> to vector<16x144xbf16>
    %313 = arith.truncf %310 : vector<144x128xf32> to vector<144x128xbf16>
    %cst_101 = arith.constant dense<0.000000e+00> : vector<16x128xf32>
    %314 = tpu.matmul %312, %313, %cst_101 {dimension_numbers = #tpu.dot_dimension_numbers<[1], [0], [0], [1], [0, 0, 1, 1], [], []>} : vector<16x144xbf16>, vector<144x128xbf16>, vector<16x128xf32> -> vector<16x128xf32>
    %315 = vector.extract_strided_slice %148 {offsets = [32, 0], sizes = [16, 2], strides = [1, 1]} : vector<128x2xf32> to vector<16x2xf32>
    %316 = vector.extract_strided_slice %315 {offsets = [0, 0], sizes = [16, 1], strides = [1, 1]} : vector<16x2xf32> to vector<16x1xf32>
    %317 = vector.extract_strided_slice %315 {offsets = [0, 1], sizes = [16, 1], strides = [1, 1]} : vector<16x2xf32> to vector<16x1xf32>
    %318 = arith.subf %316, %317 : vector<16x1xf32>
    %319 = vector.broadcast %264 : vector<1x128xf32> to vector<16x128xf32>
    %320 = vector.broadcast %318 : vector<16x1xf32> to vector<16x128xf32>
    %321 = arith.mulf %319, %320 : vector<16x128xf32>
    %322 = vector.broadcast %317 : vector<16x1xf32> to vector<16x128xf32>
    %323 = arith.addf %322, %321 : vector<16x128xf32>
    %324 = arith.mulf %314, %323 : vector<16x128xf32>
    %325 = vector.extract_strided_slice %149 {offsets = [32, 0], sizes = [16, 1], strides = [1, 1]} : vector<128x1xf32> to vector<16x1xf32>
    %326 = vector.broadcast %325 : vector<16x1xf32> to vector<16x128xf32>
    %327 = arith.addf %324, %326 : vector<16x128xf32>
    %cst_102 = arith.constant 0.000000e+00 : f32
    %328 = vector.broadcast %cst_102 : f32 to vector<16x128xf32>
    %329 = arith.cmpf oge, %327, %328 : vector<16x128xf32>
    %cst_103 = arith.constant 2.000000e-01 : f32
    %330 = vector.broadcast %cst_103 : f32 to vector<16x128xf32>
    %331 = arith.mulf %330, %327 : vector<16x128xf32>
    %332 = arith.select %329, %327, %331 : vector<16x128xi1>, vector<16x128xf32>
    %cst_104 = arith.constant 1.41421354 : f32
    %333 = vector.broadcast %cst_104 : f32 to vector<16x128xf32>
    %334 = arith.mulf %332, %333 : vector<16x128xf32>
    %335 = vector.extract_strided_slice %151 {offsets = [9, 0], sizes = [1, 128], strides = [1, 1]} : vector<10x128xf32> to vector<1x128xf32>
    %336 = vector.extract_strided_slice %142 {offsets = [48, 0], sizes = [16, 2], strides = [1, 1]} : vector<128x2xf32> to vector<16x2xf32>
    %337 = vector.extract_strided_slice %336 {offsets = [0, 0], sizes = [16, 1], strides = [1, 1]} : vector<16x2xf32> to vector<16x1xf32>
    %338 = vector.extract_strided_slice %336 {offsets = [0, 1], sizes = [16, 1], strides = [1, 1]} : vector<16x2xf32> to vector<16x1xf32>
    %339 = arith.subf %337, %338 : vector<16x1xf32>
    %340 = vector.broadcast %335 : vector<1x128xf32> to vector<16x128xf32>
    %341 = vector.broadcast %339 : vector<16x1xf32> to vector<16x128xf32>
    %342 = arith.mulf %340, %341 : vector<16x128xf32>
    %343 = vector.broadcast %338 : vector<16x1xf32> to vector<16x128xf32>
    %344 = arith.addf %343, %342 : vector<16x128xf32>
    %345 = arith.mulf %334, %344 : vector<16x128xf32>
    %c9_i32_105 = arith.constant 9 : i32
    %346 = tpu.dynamic_rotate %345 by %c9_i32_105 dim 1 : vector<16x128xf32>, i32 -> vector<16x128xf32>
    %347 = vector.extract_strided_slice %151 {offsets = [0, 0], sizes = [1, 128], strides = [1, 1]} : vector<10x128xf32> to vector<1x128xf32>
    %348 = vector.broadcast %347 : vector<1x128xf32> to vector<16x128xf32>
    %349 = arith.mulf %346, %348 : vector<16x128xf32>
    %c8_i32_106 = arith.constant 8 : i32
    %350 = tpu.dynamic_rotate %345 by %c8_i32_106 dim 1 : vector<16x128xf32>, i32 -> vector<16x128xf32>
    %351 = vector.extract_strided_slice %151 {offsets = [1, 0], sizes = [1, 128], strides = [1, 1]} : vector<10x128xf32> to vector<1x128xf32>
    %352 = vector.broadcast %351 : vector<1x128xf32> to vector<16x128xf32>
    %353 = arith.mulf %350, %352 : vector<16x128xf32>
    %c7_i32_107 = arith.constant 7 : i32
    %354 = tpu.dynamic_rotate %345 by %c7_i32_107 dim 1 : vector<16x128xf32>, i32 -> vector<16x128xf32>
    %355 = vector.extract_strided_slice %151 {offsets = [2, 0], sizes = [1, 128], strides = [1, 1]} : vector<10x128xf32> to vector<1x128xf32>
    %356 = vector.broadcast %355 : vector<1x128xf32> to vector<16x128xf32>
    %357 = arith.mulf %354, %356 : vector<16x128xf32>
    %c1_i32_108 = arith.constant 1 : i32
    %358 = tpu.dynamic_rotate %345 by %c1_i32_108 dim 1 : vector<16x128xf32>, i32 -> vector<16x128xf32>
    %359 = vector.extract_strided_slice %151 {offsets = [3, 0], sizes = [1, 128], strides = [1, 1]} : vector<10x128xf32> to vector<1x128xf32>
    %360 = vector.broadcast %359 : vector<1x128xf32> to vector<16x128xf32>
    %361 = arith.mulf %358, %360 : vector<16x128xf32>
    %362 = vector.extract_strided_slice %151 {offsets = [4, 0], sizes = [1, 128], strides = [1, 1]} : vector<10x128xf32> to vector<1x128xf32>
    %363 = vector.broadcast %362 : vector<1x128xf32> to vector<16x128xf32>
    %364 = arith.mulf %345, %363 : vector<16x128xf32>
    %c127_i32_109 = arith.constant 127 : i32
    %365 = tpu.dynamic_rotate %345 by %c127_i32_109 dim 1 : vector<16x128xf32>, i32 -> vector<16x128xf32>
    %366 = vector.extract_strided_slice %151 {offsets = [5, 0], sizes = [1, 128], strides = [1, 1]} : vector<10x128xf32> to vector<1x128xf32>
    %367 = vector.broadcast %366 : vector<1x128xf32> to vector<16x128xf32>
    %368 = arith.mulf %365, %367 : vector<16x128xf32>
    %c121_i32_110 = arith.constant 121 : i32
    %369 = tpu.dynamic_rotate %345 by %c121_i32_110 dim 1 : vector<16x128xf32>, i32 -> vector<16x128xf32>
    %370 = vector.extract_strided_slice %151 {offsets = [6, 0], sizes = [1, 128], strides = [1, 1]} : vector<10x128xf32> to vector<1x128xf32>
    %371 = vector.broadcast %370 : vector<1x128xf32> to vector<16x128xf32>
    %372 = arith.mulf %369, %371 : vector<16x128xf32>
    %c120_i32_111 = arith.constant 120 : i32
    %373 = tpu.dynamic_rotate %345 by %c120_i32_111 dim 1 : vector<16x128xf32>, i32 -> vector<16x128xf32>
    %374 = vector.extract_strided_slice %151 {offsets = [7, 0], sizes = [1, 128], strides = [1, 1]} : vector<10x128xf32> to vector<1x128xf32>
    %375 = vector.broadcast %374 : vector<1x128xf32> to vector<16x128xf32>
    %376 = arith.mulf %373, %375 : vector<16x128xf32>
    %c119_i32_112 = arith.constant 119 : i32
    %377 = tpu.dynamic_rotate %345 by %c119_i32_112 dim 1 : vector<16x128xf32>, i32 -> vector<16x128xf32>
    %378 = vector.extract_strided_slice %151 {offsets = [8, 0], sizes = [1, 128], strides = [1, 1]} : vector<10x128xf32> to vector<1x128xf32>
    %379 = vector.broadcast %378 : vector<1x128xf32> to vector<16x128xf32>
    %380 = arith.mulf %377, %379 : vector<16x128xf32>
    %381 = tpu.concatenate %349, %353, %357, %361, %364, %368, %372, %376, %380 in 0 : vector<16x128xf32>, vector<16x128xf32>, vector<16x128xf32>, vector<16x128xf32>, vector<16x128xf32>, vector<16x128xf32>, vector<16x128xf32>, vector<16x128xf32>, vector<16x128xf32> -> vector<144x128xf32>
    %c2_113 = arith.constant 2 : index
    %c0_114 = arith.constant 0 : index
    %c0_115 = arith.constant 0 : index
    %382 = vector.load %arg11[%c2_113, %c0_114, %c0_115] : memref<5x16x144xbf16, #tpu.memory_space<vmem>>, vector<1x16x144xbf16>
    %383 = vector.shape_cast %382 : vector<1x16x144xbf16> to vector<16x144xbf16>
    %384 = arith.truncf %381 : vector<144x128xf32> to vector<144x128xbf16>
    %cst_116 = arith.constant dense<0.000000e+00> : vector<16x128xf32>
    %385 = tpu.matmul %383, %384, %cst_116 {dimension_numbers = #tpu.dot_dimension_numbers<[1], [0], [0], [1], [0, 0, 1, 1], [], []>} : vector<16x144xbf16>, vector<144x128xbf16>, vector<16x128xf32> -> vector<16x128xf32>
    %386 = vector.extract_strided_slice %148 {offsets = [48, 0], sizes = [16, 2], strides = [1, 1]} : vector<128x2xf32> to vector<16x2xf32>
    %387 = vector.extract_strided_slice %386 {offsets = [0, 0], sizes = [16, 1], strides = [1, 1]} : vector<16x2xf32> to vector<16x1xf32>
    %388 = vector.extract_strided_slice %386 {offsets = [0, 1], sizes = [16, 1], strides = [1, 1]} : vector<16x2xf32> to vector<16x1xf32>
    %389 = arith.subf %387, %388 : vector<16x1xf32>
    %390 = vector.broadcast %335 : vector<1x128xf32> to vector<16x128xf32>
    %391 = vector.broadcast %389 : vector<16x1xf32> to vector<16x128xf32>
    %392 = arith.mulf %390, %391 : vector<16x128xf32>
    %393 = vector.broadcast %388 : vector<16x1xf32> to vector<16x128xf32>
    %394 = arith.addf %393, %392 : vector<16x128xf32>
    %395 = arith.mulf %385, %394 : vector<16x128xf32>
    %396 = vector.extract_strided_slice %149 {offsets = [48, 0], sizes = [16, 1], strides = [1, 1]} : vector<128x1xf32> to vector<16x1xf32>
    %397 = vector.broadcast %396 : vector<16x1xf32> to vector<16x128xf32>
    %398 = arith.addf %395, %397 : vector<16x128xf32>
    %cst_117 = arith.constant 0.000000e+00 : f32
    %399 = vector.broadcast %cst_117 : f32 to vector<16x128xf32>
    %400 = arith.cmpf oge, %398, %399 : vector<16x128xf32>
    %cst_118 = arith.constant 2.000000e-01 : f32
    %401 = vector.broadcast %cst_118 : f32 to vector<16x128xf32>
    %402 = arith.mulf %401, %398 : vector<16x128xf32>
    %403 = arith.select %400, %398, %402 : vector<16x128xi1>, vector<16x128xf32>
    %cst_119 = arith.constant 1.41421354 : f32
    %404 = vector.broadcast %cst_119 : f32 to vector<16x128xf32>
    %405 = arith.mulf %403, %404 : vector<16x128xf32>
    %406 = vector.extract_strided_slice %151 {offsets = [9, 0], sizes = [1, 128], strides = [1, 1]} : vector<10x128xf32> to vector<1x128xf32>
    %407 = vector.extract_strided_slice %142 {offsets = [64, 0], sizes = [16, 2], strides = [1, 1]} : vector<128x2xf32> to vector<16x2xf32>
    %408 = vector.extract_strided_slice %407 {offsets = [0, 0], sizes = [16, 1], strides = [1, 1]} : vector<16x2xf32> to vector<16x1xf32>
    %409 = vector.extract_strided_slice %407 {offsets = [0, 1], sizes = [16, 1], strides = [1, 1]} : vector<16x2xf32> to vector<16x1xf32>
    %410 = arith.subf %408, %409 : vector<16x1xf32>
    %411 = vector.broadcast %406 : vector<1x128xf32> to vector<16x128xf32>
    %412 = vector.broadcast %410 : vector<16x1xf32> to vector<16x128xf32>
    %413 = arith.mulf %411, %412 : vector<16x128xf32>
    %414 = vector.broadcast %409 : vector<16x1xf32> to vector<16x128xf32>
    %415 = arith.addf %414, %413 : vector<16x128xf32>
    %416 = arith.mulf %405, %415 : vector<16x128xf32>
    %c1_120 = arith.constant 1 : index
    %c0_121 = arith.constant 0 : index
    %c0_122 = arith.constant 0 : index
    %417 = vector.load %arg12[%c1_120, %c0_121, %c0_122] : memref<3x3x16xbf16, #tpu.memory_space<vmem>>, vector<1x3x16xbf16>
    %418 = vector.shape_cast %417 : vector<1x3x16xbf16> to vector<3x16xbf16>
    %419 = arith.truncf %416 : vector<16x128xf32> to vector<16x128xbf16>
    %cst_123 = arith.constant dense<0.000000e+00> : vector<3x128xf32>
    %420 = tpu.matmul %418, %419, %cst_123 {dimension_numbers = #tpu.dot_dimension_numbers<[1], [0], [0], [1], [0, 0, 1, 1], [], []>} : vector<3x16xbf16>, vector<16x128xbf16>, vector<3x128xf32> -> vector<3x128xf32>
    %421 = vector.extract_strided_slice %149 {offsets = [64, 0], sizes = [3, 1], strides = [1, 1]} : vector<128x1xf32> to vector<3x1xf32>
    %422 = vector.broadcast %421 : vector<3x1xf32> to vector<3x128xf32>
    %423 = arith.addf %420, %422 : vector<3x128xf32>
    %424 = arith.addf %423, %263 : vector<3x128xf32>
    %425 = tpu.concatenate %405, %424 in 0 : vector<16x128xf32>, vector<3x128xf32> -> vector<19x128xf32>
    %c0_124 = arith.constant 0 : index
    %c0_125 = arith.constant 0 : index
    %426 = vector.load %arg14[%c0_124, %c0_125] : memref<128x512xf32, #tpu.memory_space<vmem>>, vector<128x512xf32>
    %cst_126 = arith.constant dense<0.000000e+00> : vector<19x512xf32>
    %427 = tpu.matmul %425, %426, %cst_126 {dimension_numbers = #tpu.dot_dimension_numbers<[1], [0], [0], [1], [0, 0, 1, 1], [], []>} : vector<19x128xf32>, vector<128x512xf32>, vector<19x512xf32> -> vector<19x512xf32>
    %428 = vector.extract_strided_slice %427 {offsets = [0, 0], sizes = [16, 512], strides = [1, 1]} : vector<19x512xf32> to vector<16x512xf32>
    %429 = vector.extract_strided_slice %427 {offsets = [16, 0], sizes = [3, 512], strides = [1, 1]} : vector<19x512xf32> to vector<3x512xf32>
    %430 = vector.extract_strided_slice %152 {offsets = [9, 0], sizes = [1, 512], strides = [1, 1]} : vector<10x512xf32> to vector<1x512xf32>
    %431 = vector.extract_strided_slice %142 {offsets = [80, 0], sizes = [16, 2], strides = [1, 1]} : vector<128x2xf32> to vector<16x2xf32>
    %432 = vector.extract_strided_slice %431 {offsets = [0, 0], sizes = [16, 1], strides = [1, 1]} : vector<16x2xf32> to vector<16x1xf32>
    %433 = vector.extract_strided_slice %431 {offsets = [0, 1], sizes = [16, 1], strides = [1, 1]} : vector<16x2xf32> to vector<16x1xf32>
    %434 = arith.subf %432, %433 : vector<16x1xf32>
    %435 = vector.broadcast %430 : vector<1x512xf32> to vector<16x512xf32>
    %436 = vector.broadcast %434 : vector<16x1xf32> to vector<16x512xf32>
    %437 = arith.mulf %435, %436 : vector<16x512xf32>
    %438 = vector.broadcast %433 : vector<16x1xf32> to vector<16x512xf32>
    %439 = arith.addf %438, %437 : vector<16x512xf32>
    %440 = arith.mulf %428, %439 : vector<16x512xf32>
    %c17_i32 = arith.constant 17 : i32
    %441 = tpu.dynamic_rotate %440 by %c17_i32 dim 1 : vector<16x512xf32>, i32 -> vector<16x512xf32>
    %442 = vector.extract_strided_slice %152 {offsets = [0, 0], sizes = [1, 512], strides = [1, 1]} : vector<10x512xf32> to vector<1x512xf32>
    %443 = vector.broadcast %442 : vector<1x512xf32> to vector<16x512xf32>
    %444 = arith.mulf %441, %443 : vector<16x512xf32>
    %c16_i32 = arith.constant 16 : i32
    %445 = tpu.dynamic_rotate %440 by %c16_i32 dim 1 : vector<16x512xf32>, i32 -> vector<16x512xf32>
    %446 = vector.extract_strided_slice %152 {offsets = [1, 0], sizes = [1, 512], strides = [1, 1]} : vector<10x512xf32> to vector<1x512xf32>
    %447 = vector.broadcast %446 : vector<1x512xf32> to vector<16x512xf32>
    %448 = arith.mulf %445, %447 : vector<16x512xf32>
    %c15_i32 = arith.constant 15 : i32
    %449 = tpu.dynamic_rotate %440 by %c15_i32 dim 1 : vector<16x512xf32>, i32 -> vector<16x512xf32>
    %450 = vector.extract_strided_slice %152 {offsets = [2, 0], sizes = [1, 512], strides = [1, 1]} : vector<10x512xf32> to vector<1x512xf32>
    %451 = vector.broadcast %450 : vector<1x512xf32> to vector<16x512xf32>
    %452 = arith.mulf %449, %451 : vector<16x512xf32>
    %c1_i32_127 = arith.constant 1 : i32
    %453 = tpu.dynamic_rotate %440 by %c1_i32_127 dim 1 : vector<16x512xf32>, i32 -> vector<16x512xf32>
    %454 = vector.extract_strided_slice %152 {offsets = [3, 0], sizes = [1, 512], strides = [1, 1]} : vector<10x512xf32> to vector<1x512xf32>
    %455 = vector.broadcast %454 : vector<1x512xf32> to vector<16x512xf32>
    %456 = arith.mulf %453, %455 : vector<16x512xf32>
    %457 = vector.extract_strided_slice %152 {offsets = [4, 0], sizes = [1, 512], strides = [1, 1]} : vector<10x512xf32> to vector<1x512xf32>
    %458 = vector.broadcast %457 : vector<1x512xf32> to vector<16x512xf32>
    %459 = arith.mulf %440, %458 : vector<16x512xf32>
    %c511_i32 = arith.constant 511 : i32
    %460 = tpu.dynamic_rotate %440 by %c511_i32 dim 1 : vector<16x512xf32>, i32 -> vector<16x512xf32>
    %461 = vector.extract_strided_slice %152 {offsets = [5, 0], sizes = [1, 512], strides = [1, 1]} : vector<10x512xf32> to vector<1x512xf32>
    %462 = vector.broadcast %461 : vector<1x512xf32> to vector<16x512xf32>
    %463 = arith.mulf %460, %462 : vector<16x512xf32>
    %c497_i32 = arith.constant 497 : i32
    %464 = tpu.dynamic_rotate %440 by %c497_i32 dim 1 : vector<16x512xf32>, i32 -> vector<16x512xf32>
    %465 = vector.extract_strided_slice %152 {offsets = [6, 0], sizes = [1, 512], strides = [1, 1]} : vector<10x512xf32> to vector<1x512xf32>
    %466 = vector.broadcast %465 : vector<1x512xf32> to vector<16x512xf32>
    %467 = arith.mulf %464, %466 : vector<16x512xf32>
    %c496_i32 = arith.constant 496 : i32
    %468 = tpu.dynamic_rotate %440 by %c496_i32 dim 1 : vector<16x512xf32>, i32 -> vector<16x512xf32>
    %469 = vector.extract_strided_slice %152 {offsets = [7, 0], sizes = [1, 512], strides = [1, 1]} : vector<10x512xf32> to vector<1x512xf32>
    %470 = vector.broadcast %469 : vector<1x512xf32> to vector<16x512xf32>
    %471 = arith.mulf %468, %470 : vector<16x512xf32>
    %c495_i32 = arith.constant 495 : i32
    %472 = tpu.dynamic_rotate %440 by %c495_i32 dim 1 : vector<16x512xf32>, i32 -> vector<16x512xf32>
    %473 = vector.extract_strided_slice %152 {offsets = [8, 0], sizes = [1, 512], strides = [1, 1]} : vector<10x512xf32> to vector<1x512xf32>
    %474 = vector.broadcast %473 : vector<1x512xf32> to vector<16x512xf32>
    %475 = arith.mulf %472, %474 : vector<16x512xf32>
    %476 = tpu.concatenate %444, %448, %452, %456, %459, %463, %467, %471, %475 in 0 : vector<16x512xf32>, vector<16x512xf32>, vector<16x512xf32>, vector<16x512xf32>, vector<16x512xf32>, vector<16x512xf32>, vector<16x512xf32>, vector<16x512xf32>, vector<16x512xf32> -> vector<144x512xf32>
    %c3_128 = arith.constant 3 : index
    %c0_129 = arith.constant 0 : index
    %c0_130 = arith.constant 0 : index
    %477 = vector.load %arg11[%c3_128, %c0_129, %c0_130] : memref<5x16x144xbf16, #tpu.memory_space<vmem>>, vector<1x16x144xbf16>
    %478 = vector.shape_cast %477 : vector<1x16x144xbf16> to vector<16x144xbf16>
    %479 = arith.truncf %476 : vector<144x512xf32> to vector<144x512xbf16>
    %cst_131 = arith.constant dense<0.000000e+00> : vector<16x512xf32>
    %480 = tpu.matmul %478, %479, %cst_131 {dimension_numbers = #tpu.dot_dimension_numbers<[1], [0], [0], [1], [0, 0, 1, 1], [], []>} : vector<16x144xbf16>, vector<144x512xbf16>, vector<16x512xf32> -> vector<16x512xf32>
    %481 = vector.extract_strided_slice %148 {offsets = [80, 0], sizes = [16, 2], strides = [1, 1]} : vector<128x2xf32> to vector<16x2xf32>
    %482 = vector.extract_strided_slice %481 {offsets = [0, 0], sizes = [16, 1], strides = [1, 1]} : vector<16x2xf32> to vector<16x1xf32>
    %483 = vector.extract_strided_slice %481 {offsets = [0, 1], sizes = [16, 1], strides = [1, 1]} : vector<16x2xf32> to vector<16x1xf32>
    %484 = arith.subf %482, %483 : vector<16x1xf32>
    %485 = vector.broadcast %430 : vector<1x512xf32> to vector<16x512xf32>
    %486 = vector.broadcast %484 : vector<16x1xf32> to vector<16x512xf32>
    %487 = arith.mulf %485, %486 : vector<16x512xf32>
    %488 = vector.broadcast %483 : vector<16x1xf32> to vector<16x512xf32>
    %489 = arith.addf %488, %487 : vector<16x512xf32>
    %490 = arith.mulf %480, %489 : vector<16x512xf32>
    %491 = vector.extract_strided_slice %149 {offsets = [80, 0], sizes = [16, 1], strides = [1, 1]} : vector<128x1xf32> to vector<16x1xf32>
    %492 = vector.broadcast %491 : vector<16x1xf32> to vector<16x512xf32>
    %493 = arith.addf %490, %492 : vector<16x512xf32>
    %cst_132 = arith.constant 0.000000e+00 : f32
    %494 = vector.broadcast %cst_132 : f32 to vector<16x512xf32>
    %495 = arith.cmpf oge, %493, %494 : vector<16x512xf32>
    %cst_133 = arith.constant 2.000000e-01 : f32
    %496 = vector.broadcast %cst_133 : f32 to vector<16x512xf32>
    %497 = arith.mulf %496, %493 : vector<16x512xf32>
    %498 = arith.select %495, %493, %497 : vector<16x512xi1>, vector<16x512xf32>
    %cst_134 = arith.constant 1.41421354 : f32
    %499 = vector.broadcast %cst_134 : f32 to vector<16x512xf32>
    %500 = arith.mulf %498, %499 : vector<16x512xf32>
    %501 = vector.extract_strided_slice %152 {offsets = [9, 0], sizes = [1, 512], strides = [1, 1]} : vector<10x512xf32> to vector<1x512xf32>
    %502 = vector.extract_strided_slice %142 {offsets = [96, 0], sizes = [16, 2], strides = [1, 1]} : vector<128x2xf32> to vector<16x2xf32>
    %503 = vector.extract_strided_slice %502 {offsets = [0, 0], sizes = [16, 1], strides = [1, 1]} : vector<16x2xf32> to vector<16x1xf32>
    %504 = vector.extract_strided_slice %502 {offsets = [0, 1], sizes = [16, 1], strides = [1, 1]} : vector<16x2xf32> to vector<16x1xf32>
    %505 = arith.subf %503, %504 : vector<16x1xf32>
    %506 = vector.broadcast %501 : vector<1x512xf32> to vector<16x512xf32>
    %507 = vector.broadcast %505 : vector<16x1xf32> to vector<16x512xf32>
    %508 = arith.mulf %506, %507 : vector<16x512xf32>
    %509 = vector.broadcast %504 : vector<16x1xf32> to vector<16x512xf32>
    %510 = arith.addf %509, %508 : vector<16x512xf32>
    %511 = arith.mulf %500, %510 : vector<16x512xf32>
    %c17_i32_135 = arith.constant 17 : i32
    %512 = tpu.dynamic_rotate %511 by %c17_i32_135 dim 1 : vector<16x512xf32>, i32 -> vector<16x512xf32>
    %513 = vector.extract_strided_slice %152 {offsets = [0, 0], sizes = [1, 512], strides = [1, 1]} : vector<10x512xf32> to vector<1x512xf32>
    %514 = vector.broadcast %513 : vector<1x512xf32> to vector<16x512xf32>
    %515 = arith.mulf %512, %514 : vector<16x512xf32>
    %c16_i32_136 = arith.constant 16 : i32
    %516 = tpu.dynamic_rotate %511 by %c16_i32_136 dim 1 : vector<16x512xf32>, i32 -> vector<16x512xf32>
    %517 = vector.extract_strided_slice %152 {offsets = [1, 0], sizes = [1, 512], strides = [1, 1]} : vector<10x512xf32> to vector<1x512xf32>
    %518 = vector.broadcast %517 : vector<1x512xf32> to vector<16x512xf32>
    %519 = arith.mulf %516, %518 : vector<16x512xf32>
    %c15_i32_137 = arith.constant 15 : i32
    %520 = tpu.dynamic_rotate %511 by %c15_i32_137 dim 1 : vector<16x512xf32>, i32 -> vector<16x512xf32>
    %521 = vector.extract_strided_slice %152 {offsets = [2, 0], sizes = [1, 512], strides = [1, 1]} : vector<10x512xf32> to vector<1x512xf32>
    %522 = vector.broadcast %521 : vector<1x512xf32> to vector<16x512xf32>
    %523 = arith.mulf %520, %522 : vector<16x512xf32>
    %c1_i32_138 = arith.constant 1 : i32
    %524 = tpu.dynamic_rotate %511 by %c1_i32_138 dim 1 : vector<16x512xf32>, i32 -> vector<16x512xf32>
    %525 = vector.extract_strided_slice %152 {offsets = [3, 0], sizes = [1, 512], strides = [1, 1]} : vector<10x512xf32> to vector<1x512xf32>
    %526 = vector.broadcast %525 : vector<1x512xf32> to vector<16x512xf32>
    %527 = arith.mulf %524, %526 : vector<16x512xf32>
    %528 = vector.extract_strided_slice %152 {offsets = [4, 0], sizes = [1, 512], strides = [1, 1]} : vector<10x512xf32> to vector<1x512xf32>
    %529 = vector.broadcast %528 : vector<1x512xf32> to vector<16x512xf32>
    %530 = arith.mulf %511, %529 : vector<16x512xf32>
    %c511_i32_139 = arith.constant 511 : i32
    %531 = tpu.dynamic_rotate %511 by %c511_i32_139 dim 1 : vector<16x512xf32>, i32 -> vector<16x512xf32>
    %532 = vector.extract_strided_slice %152 {offsets = [5, 0], sizes = [1, 512], strides = [1, 1]} : vector<10x512xf32> to vector<1x512xf32>
    %533 = vector.broadcast %532 : vector<1x512xf32> to vector<16x512xf32>
    %534 = arith.mulf %531, %533 : vector<16x512xf32>
    %c497_i32_140 = arith.constant 497 : i32
    %535 = tpu.dynamic_rotate %511 by %c497_i32_140 dim 1 : vector<16x512xf32>, i32 -> vector<16x512xf32>
    %536 = vector.extract_strided_slice %152 {offsets = [6, 0], sizes = [1, 512], strides = [1, 1]} : vector<10x512xf32> to vector<1x512xf32>
    %537 = vector.broadcast %536 : vector<1x512xf32> to vector<16x512xf32>
    %538 = arith.mulf %535, %537 : vector<16x512xf32>
    %c496_i32_141 = arith.constant 496 : i32
    %539 = tpu.dynamic_rotate %511 by %c496_i32_141 dim 1 : vector<16x512xf32>, i32 -> vector<16x512xf32>
    %540 = vector.extract_strided_slice %152 {offsets = [7, 0], sizes = [1, 512], strides = [1, 1]} : vector<10x512xf32> to vector<1x512xf32>
    %541 = vector.broadcast %540 : vector<1x512xf32> to vector<16x512xf32>
    %542 = arith.mulf %539, %541 : vector<16x512xf32>
    %c495_i32_142 = arith.constant 495 : i32
    %543 = tpu.dynamic_rotate %511 by %c495_i32_142 dim 1 : vector<16x512xf32>, i32 -> vector<16x512xf32>
    %544 = vector.extract_strided_slice %152 {offsets = [8, 0], sizes = [1, 512], strides = [1, 1]} : vector<10x512xf32> to vector<1x512xf32>
    %545 = vector.broadcast %544 : vector<1x512xf32> to vector<16x512xf32>
    %546 = arith.mulf %543, %545 : vector<16x512xf32>
    %547 = tpu.concatenate %515, %519, %523, %527, %530, %534, %538, %542, %546 in 0 : vector<16x512xf32>, vector<16x512xf32>, vector<16x512xf32>, vector<16x512xf32>, vector<16x512xf32>, vector<16x512xf32>, vector<16x512xf32>, vector<16x512xf32>, vector<16x512xf32> -> vector<144x512xf32>
    %c4_143 = arith.constant 4 : index
    %c0_144 = arith.constant 0 : index
    %c0_145 = arith.constant 0 : index
    %548 = vector.load %arg11[%c4_143, %c0_144, %c0_145] : memref<5x16x144xbf16, #tpu.memory_space<vmem>>, vector<1x16x144xbf16>
    %549 = vector.shape_cast %548 : vector<1x16x144xbf16> to vector<16x144xbf16>
    %550 = arith.truncf %547 : vector<144x512xf32> to vector<144x512xbf16>
    %cst_146 = arith.constant dense<0.000000e+00> : vector<16x512xf32>
    %551 = tpu.matmul %549, %550, %cst_146 {dimension_numbers = #tpu.dot_dimension_numbers<[1], [0], [0], [1], [0, 0, 1, 1], [], []>} : vector<16x144xbf16>, vector<144x512xbf16>, vector<16x512xf32> -> vector<16x512xf32>
    %552 = vector.extract_strided_slice %148 {offsets = [96, 0], sizes = [16, 2], strides = [1, 1]} : vector<128x2xf32> to vector<16x2xf32>
    %553 = vector.extract_strided_slice %552 {offsets = [0, 0], sizes = [16, 1], strides = [1, 1]} : vector<16x2xf32> to vector<16x1xf32>
    %554 = vector.extract_strided_slice %552 {offsets = [0, 1], sizes = [16, 1], strides = [1, 1]} : vector<16x2xf32> to vector<16x1xf32>
    %555 = arith.subf %553, %554 : vector<16x1xf32>
    %556 = vector.broadcast %501 : vector<1x512xf32> to vector<16x512xf32>
    %557 = vector.broadcast %555 : vector<16x1xf32> to vector<16x512xf32>
    %558 = arith.mulf %556, %557 : vector<16x512xf32>
    %559 = vector.broadcast %554 : vector<16x1xf32> to vector<16x512xf32>
    %560 = arith.addf %559, %558 : vector<16x512xf32>
    %561 = arith.mulf %551, %560 : vector<16x512xf32>
    %562 = vector.extract_strided_slice %149 {offsets = [96, 0], sizes = [16, 1], strides = [1, 1]} : vector<128x1xf32> to vector<16x1xf32>
    %563 = vector.broadcast %562 : vector<16x1xf32> to vector<16x512xf32>
    %564 = arith.addf %561, %563 : vector<16x512xf32>
    %cst_147 = arith.constant 0.000000e+00 : f32
    %565 = vector.broadcast %cst_147 : f32 to vector<16x512xf32>
    %566 = arith.cmpf oge, %564, %565 : vector<16x512xf32>
    %cst_148 = arith.constant 2.000000e-01 : f32
    %567 = vector.broadcast %cst_148 : f32 to vector<16x512xf32>
    %568 = arith.mulf %567, %564 : vector<16x512xf32>
    %569 = arith.select %566, %564, %568 : vector<16x512xi1>, vector<16x512xf32>
    %cst_149 = arith.constant 1.41421354 : f32
    %570 = vector.broadcast %cst_149 : f32 to vector<16x512xf32>
    %571 = arith.mulf %569, %570 : vector<16x512xf32>
    %572 = vector.extract_strided_slice %152 {offsets = [9, 0], sizes = [1, 512], strides = [1, 1]} : vector<10x512xf32> to vector<1x512xf32>
    %573 = vector.extract_strided_slice %142 {offsets = [112, 0], sizes = [16, 2], strides = [1, 1]} : vector<128x2xf32> to vector<16x2xf32>
    %574 = vector.extract_strided_slice %573 {offsets = [0, 0], sizes = [16, 1], strides = [1, 1]} : vector<16x2xf32> to vector<16x1xf32>
    %575 = vector.extract_strided_slice %573 {offsets = [0, 1], sizes = [16, 1], strides = [1, 1]} : vector<16x2xf32> to vector<16x1xf32>
    %576 = arith.subf %574, %575 : vector<16x1xf32>
    %577 = vector.broadcast %572 : vector<1x512xf32> to vector<16x512xf32>
    %578 = vector.broadcast %576 : vector<16x1xf32> to vector<16x512xf32>
    %579 = arith.mulf %577, %578 : vector<16x512xf32>
    %580 = vector.broadcast %575 : vector<16x1xf32> to vector<16x512xf32>
    %581 = arith.addf %580, %579 : vector<16x512xf32>
    %582 = arith.mulf %571, %581 : vector<16x512xf32>
    %c2_150 = arith.constant 2 : index
    %c0_151 = arith.constant 0 : index
    %c0_152 = arith.constant 0 : index
    %583 = vector.load %arg12[%c2_150, %c0_151, %c0_152] : memref<3x3x16xbf16, #tpu.memory_space<vmem>>, vector<1x3x16xbf16>
    %584 = vector.shape_cast %583 : vector<1x3x16xbf16> to vector<3x16xbf16>
    %585 = arith.truncf %582 : vector<16x512xf32> to vector<16x512xbf16>
    %cst_153 = arith.constant dense<0.000000e+00> : vector<3x512xf32>
    %586 = tpu.matmul %584, %585, %cst_153 {dimension_numbers = #tpu.dot_dimension_numbers<[1], [0], [0], [1], [0, 0, 1, 1], [], []>} : vector<3x16xbf16>, vector<16x512xbf16>, vector<3x512xf32> -> vector<3x512xf32>
    %587 = vector.extract_strided_slice %149 {offsets = [112, 0], sizes = [3, 1], strides = [1, 1]} : vector<128x1xf32> to vector<3x1xf32>
    %588 = vector.broadcast %587 : vector<3x1xf32> to vector<3x512xf32>
    %589 = arith.addf %586, %588 : vector<3x512xf32>
    %590 = arith.addf %589, %429 : vector<3x512xf32>
    %cst_154 = arith.constant -1.000000e+00 : f32
    %cst_155 = arith.constant 1.000000e+00 : f32
    %591 = vector.broadcast %cst_154 : f32 to vector<3x512xf32>
    %592 = arith.maximumf %591, %590 : vector<3x512xf32>
    %593 = vector.broadcast %cst_155 : f32 to vector<3x512xf32>
    %594 = arith.minimumf %593, %592 : vector<3x512xf32>
    %c0_156 = arith.constant 0 : index
    %c0_157 = arith.constant 0 : index
    %595 = vector.load %arg18[%c0_156, %c0_157] : memref<3x512xf32, #tpu.memory_space<vmem>>, vector<3x512xf32>
    tpu.vector_store %arg18[%c0_156, %c0_157], %594 {strides = array<i32>} : memref<3x512xf32, #tpu.memory_space<vmem>>, vector<3x512xf32>,
    return
  }
  func.func @transform_0(%arg0: i32) -> (i32, i32) {
    %c0_i32 = arith.constant 0 : i32
    %c0_i32_0 = arith.constant 0 : i32
    %c0_i32_1 = arith.constant 0 : i32
    return %c0_i32, %c0_i32_0 : i32, i32
  }
  func.func @transform_1(%arg0: i32) -> (i32, i32, i32) {
    %c0_i32 = arith.constant 0 : i32
    %c0_i32_0 = arith.constant 0 : i32
    %c0_i32_1 = arith.constant 0 : i32
    %c0_i32_2 = arith.constant 0 : i32
    return %c0_i32, %c0_i32_0, %c0_i32_1 : i32, i32, i32
  }
  func.func @transform_2(%arg0: i32) -> (i32, i32) {
    %c0_i32 = arith.constant 0 : i32
    %c0_i32_0 = arith.constant 0 : i32
    %c0_i32_1 = arith.constant 0 : i32
    return %c0_i32, %c0_i32_0 : i32, i32
  }
  func.func @transform_3(%arg0: i32) -> (i32, i32) {
    %c0_i32 = arith.constant 0 : i32
    %c0_i32_0 = arith.constant 0 : i32
    %c0_i32_1 = arith.constant 0 : i32
    return %c0_i32, %c0_i32_0 : i32, i32
  }
  func.func @transform_4(%arg0: i32) -> (i32, i32) {
    %c0_i32 = arith.constant 0 : i32
    %c0_i32_0 = arith.constant 0 : i32
    %c0_i32_1 = arith.constant 0 : i32
    return %c0_i32, %c0_i32_0 : i32, i32
  }
  func.func @transform_5(%arg0: i32) -> (i32, i32) {
    %c0_i32 = arith.constant 0 : i32
    %c0_i32_0 = arith.constant 0 : i32
    %c0_i32_1 = arith.constant 0 : i32
    return %c0_i32, %c0_i32_0 : i32, i32
  }
  func.func @transform_6(%arg0: i32) -> (i32, i32, i32) {
    %c0_i32 = arith.constant 0 : i32
    %c0_i32_0 = arith.constant 0 : i32
    %c0_i32_1 = arith.constant 0 : i32
    %c0_i32_2 = arith.constant 0 : i32
    return %c0_i32, %c0_i32_0, %c0_i32_1 : i32, i32, i32
  }
  func.func @transform_7(%arg0: i32) -> (i32, i32) {
    %c0_i32 = arith.constant 0 : i32
    %c0_i32_0 = arith.constant 0 : i32
    %c0_i32_1 = arith.constant 0 : i32
    return %c0_i32, %c0_i32_0 : i32, i32
  }
  func.func @transform_8(%arg0: i32) -> (i32, i32) {
    %c0_i32 = arith.constant 0 : i32
    %c0_i32_0 = arith.constant 0 : i32
    %c0_i32_1 = arith.constant 0 : i32
    return %c0_i32, %c0_i32_0 : i32, i32
  }
  func.func @transform_9(%arg0: i32) -> (i32, i32) {
    %c0_i32 = arith.constant 0 : i32
    %c0_i32_0 = arith.constant 0 : i32
    %c0_i32_1 = arith.constant 0 : i32
    return %c0_i32, %c0_i32_0 : i32, i32
  }
  func.func @transform_10(%arg0: i32) -> (i32, i32, i32) {
    %c0_i32 = arith.constant 0 : i32
    %c0_i32_0 = arith.constant 0 : i32
    %c0_i32_1 = arith.constant 0 : i32
    %c0_i32_2 = arith.constant 0 : i32
    return %c0_i32, %c0_i32_0, %c0_i32_1 : i32, i32, i32
  }
  func.func @transform_11(%arg0: i32) -> (i32, i32, i32) {
    %c0_i32 = arith.constant 0 : i32
    %c0_i32_0 = arith.constant 0 : i32
    %c0_i32_1 = arith.constant 0 : i32
    %c0_i32_2 = arith.constant 0 : i32
    return %c0_i32, %c0_i32_0, %c0_i32_1 : i32, i32, i32
  }
  func.func @transform_12(%arg0: i32) -> (i32, i32) {
    %c0_i32 = arith.constant 0 : i32
    %c0_i32_0 = arith.constant 0 : i32
    %c0_i32_1 = arith.constant 0 : i32
    return %c0_i32, %c0_i32_0 : i32, i32
  }
  func.func @transform_13(%arg0: i32) -> (i32, i32) {
    %c0_i32 = arith.constant 0 : i32
    %c0_i32_0 = arith.constant 0 : i32
    %c0_i32_1 = arith.constant 0 : i32
    return %c0_i32, %c0_i32_0 : i32, i32
  }
  func.func @transform_14(%arg0: i32) -> (i32, i32) {
    %c0_i32 = arith.constant 0 : i32
    %c0_i32_0 = arith.constant 0 : i32
    %c0_i32_1 = arith.constant 0 : i32
    return %c0_i32, %c0_i32_0 : i32, i32
  }
  func.func @transform_15(%arg0: i32) -> (i32, i32) {
    %c0_i32 = arith.constant 0 : i32
    %c0_i32_0 = arith.constant 0 : i32
    %c0_i32_1 = arith.constant 0 : i32
    return %c0_i32, %c0_i32_0 : i32, i32
  }
  func.func @transform_16(%arg0: i32) -> (i32, i32) {
    %c0_i32 = arith.constant 0 : i32
    %c0_i32_0 = arith.constant 0 : i32
    %c0_i32_1 = arith.constant 0 : i32
    return %c0_i32, %c0_i32_0 : i32, i32
  }
  func.func @transform_17(%arg0: i32) -> (i32, i32) {
    %c0_i32 = arith.constant 0 : i32
    %c0_i32_0 = arith.constant 0 : i32
    %c0_i32_1 = arith.constant 0 : i32
    return %c0_i32, %c0_i32_0 : i32, i32
  }
}

</mosaic_0001>

<bundles_post_ra>
// kernel: tile.23
= control target key start
LH: loop header
LB: loop body
LE: loop exit
PB: predicated region body
PF: predicated region fallthrough
CT: control target
= control target key end

     0   :  { %vm3_vm0 = vcmask 523264   ;;  %s86_s0 = inlined_call_operand.vmem [shape: f32[2,1,1,18,64], index: 0, kind: input, shape index: {}]   ;;  %s87_s1 = inlined_call_operand.vmem [shape: f32[36,64], index: 1, kind: output, shape index: {}]  }
   0x1   :  { %v2_v0 = vld [vmem:[%s86_s0] sm:$0xff]   ;;  %v30_v1 = vld [vmem:[%s86_s0 + $0x8] sm:$0xff]   ;;  %v32_v2 = vld [vmem:[%s86_s0 + $0x10] sm:$0x3]  }
   0x2   :  { %4 = vst.msk [vmem:[%s87_s1] sm:$0xff] %vm3_vm0, %v2_v0   ;;  %31 = vst.msk [vmem:[%s87_s1 + $0x8] sm:$0xff] %vm3_vm0, %v30_v1   ;;  %v34_v3 = vld [vmem:[%s86_s0 + $0x18] sm:$0xff]   ;;  %v36_v4 = vld [vmem:[%s86_s0 + $0x20] sm:$0xff]  }
   0x3   :  { %33 = vst.msk [vmem:[%s87_s1 + $0x10] sm:$0x3] %vm3_vm0, %v32_v2   ;;  %v38_v5 = vld [vmem:[%s86_s0 + $0x28] sm:$0x3]   ;;  %35 = vst.msk [vmem:[%s87_s1 + $0x12] sm:$0xff] %vm3_vm0, %v34_v3  }
   0x4   :  { %37 = vst.msk [vmem:[%s87_s1 + $0x1a] sm:$0xff] %vm3_vm0, %v36_v4   ;;  %39 = vst.msk [vmem:[%s87_s1 + $0x22] sm:$0x3] %vm3_vm0, %v38_v5  }

// kernel: tile.27
= control target key start
LH: loop header
LB: loop body
LE: loop exit
PB: predicated region body
PF: predicated region fallthrough
CT: control target
= control target key end

     0   :  { %vm82_vm0 = vcmask 1047556   ;;  %vm84_vm1 = vcmask 130048   ;;  %vm103_vm2 = vcmask 261248   ;;  %s225_s0 = inlined_call_operand.vmem [shape: f32[16,2,16], index: 0, kind: input, shape index: {}]   ;;  %s226_s1 = inlined_call_operand.vmem [shape: f32[16,32], index: 1, kind: output, shape index: {}]  }
   0x1   :  { %v138_v0 = vld [vmem:[%s225_s0 + $0xe] sm:$0x3]  ;;  %v139_v1 = vld [vmem:[%s225_s0 + $0xc] sm:$0x3]  ;;  %v140_v2 = vld [vmem:[%s225_s0 + $0xa] sm:$0x3] }
   0x2   :  { %48 = vst [vmem:[#allocation0 + $0x38] sm:$0x3] %v138_v0  ;;  %53 = vst [vmem:[#allocation0 + $0x30] sm:$0x3] %v139_v1  ;;  %v141_v3 = vld [vmem:[%s225_s0 + $0x8] sm:$0x3] }
   0x3   :  { %58 = vst [vmem:[#allocation0 + $0x28] sm:$0x3] %v140_v2  ;;  %v142_v4 = vld [vmem:[%s225_s0 + $0x6] sm:$0x3]  ;;  %v143_v5 = vld [vmem:[%s225_s0 + $0x4] sm:$0x3] }
   0x4   :  { %63 = vst [vmem:[#allocation0 + $0x20] sm:$0x3] %v141_v3  ;;  %68 = vst [vmem:[#allocation0 + $0x18] sm:$0x3] %v142_v4  ;;  %v144_v6 = vld [vmem:[%s225_s0 + $0x2] sm:$0x3] }
   0x5   :  { %73 = vst [vmem:[#allocation0 + $0x10] sm:$0x3] %v143_v5  ;;  %v78_v7 = vld [vmem:[%s225_s0] sm:$0x3]  ;;  %77 = vst [vmem:[#allocation0 + $0x8] sm:$0x3] %v144_v6 }
   0x6   :  { %79 = vst [vmem:[#allocation0] sm:$0x3] %v78_v7  ;;  %v130_v8 = vld [vmem:[%s225_s0 + $0x1e] sm:$0x3]  ;;  %v131_v9 = vld [vmem:[%s225_s0 + $0x1c] sm:$0x3] }
   0x7   :  { %v132_v10 = vld [vmem:[%s225_s0 + $0x1a] sm:$0x3]  ;;  %8 = vst [vmem:[#allocation0 + $0x78] sm:$0x3] %v130_v8  ;;  %13 = vst [vmem:[#allocation0 + $0x70] sm:$0x3] %v131_v9 }
   0x8   :  { %18 = vst [vmem:[#allocation0 + $0x68] sm:$0x3] %v132_v10  ;;  %v133_v11 = vld [vmem:[%s225_s0 + $0x18] sm:$0x3]  ;;  %v134_v12 = vld [vmem:[%s225_s0 + $0x16] sm:$0x3] }
   0x9   :  { %v135_v13 = vld [vmem:[%s225_s0 + $0x14] sm:$0x3]  ;;  %23 = vst [vmem:[#allocation0 + $0x60] sm:$0x3] %v133_v11  ;;  %28 = vst [vmem:[#allocation0 + $0x58] sm:$0x3] %v134_v12 }
   0xa   :  { %33 = vst [vmem:[#allocation0 + $0x50] sm:$0x3] %v135_v13  ;;  %v136_v14 = vld [vmem:[%s225_s0 + $0x12] sm:$0x3]  ;;  %v137_v15 = vld [vmem:[%s225_s0 + $0x10] sm:$0x3] }
   0xb   :  { %38 = vst [vmem:[#allocation0 + $0x48] sm:$0x3] %v136_v14  ;;  %43 = vst [vmem:[#allocation0 + $0x40] sm:$0x3] %v137_v15  ;;  %s148_s0 = smov 16  }
   0xc   :  { %v98_v16 = vld [vmem:[#allocation0 + $0x1] ss:$8 sm:$0xf0]   ;;  %v81_v17 = vld [vmem:[#allocation0] ss:$8 sm:$0xf0]  }
   0xd   :  { %v96_v18 = vld [vmem:[#allocation0 + $0x1] ss:$8 sm:$0xf]   ;;  %v80_v19 = vld [vmem:[#allocation0] ss:$8 sm:$0xf]  }
   0xe   :  { %v100_v20 = vsel %vm82_vm0, %v98_v16, %v96_v18  ;;  %v83_v21 = vsel %vm82_vm0, %v81_v17, %v80_v19 }
   0xf   :  { %101 = vrot.lane.b32.xlu0 %v100_v20, %s148_s0  ;;  %85 = vst.msk [vmem:[%s226_s1] sm:$0xff] %vm84_vm1, %v83_v21  }
  0x10   :  { %v108_v22 = vld [vmem:[#allocation0 + $0x41] ss:$8 sm:$0xf0]   ;;  %v89_v23 = vld [vmem:[#allocation0 + $0x40] ss:$8 sm:$0xf0]  }
  0x12   :  { %v106_v24 = vld [vmem:[#allocation0 + $0x41] ss:$8 sm:$0xf]   ;;  %v87_v25 = vld [vmem:[#allocation0 + $0x40] ss:$8 sm:$0xf]  }
  0x13   :  { %v110_v26 = vsel %vm82_vm0, %v108_v22, %v106_v24  ;;  %v91_v27 = vsel %vm82_vm0, %v89_v23, %v87_v25 }
  0x14   :  { %145 = vst.msk [vmem:[%s226_s1 + $0x8] sm:$0xff] %vm84_vm1, %v91_v27   ;;  %111 = vrot.lane.b32.xlu0 %v110_v26, %s148_s0 }
  0x81   :  { %v102_v28 = vpop.permute.xlu0 %101  }
  0x82   :  { %104 = vst.msk [vmem:[%s226_s1] sm:$0xff] %vm103_vm2, %v102_v28  }
  0x86   :  { %v112_v29 = vpop.permute.xlu0 %111  }
  0x87   :  { %146 = vst.msk [vmem:[%s226_s1 + $0x8] sm:$0xff] %vm103_vm2, %v112_v29  }

// kernel: style_transfer_forward.1
= control target key start
LH: loop header
LB: loop body
LE: loop exit
PB: predicated region body
PF: predicated region fallthrough
CT: control target
= control target key end

     0   :  { %s9229_s0 = inlined_call_operand.vmem [shape: f32[64,72], index: 0, kind: input, shape index: {}]   ;;  %s9230_s1 = inlined_call_operand.vmem [shape: bf16[8,64,64], index: 1, kind: input, shape index: {}]   ;;  %s9231_s2 = inlined_call_operand.vmem [shape: f32[64,8], index: 2, kind: input, shape index: {}]   ;;  %s9232_s3 = inlined_call_operand.vmem [shape: f32[72,16], index: 3, kind: input, shape index: {}]   ;;  %s9233_s4 = inlined_call_operand.vmem [shape: bf16[128,64], index: 4, kind: input, shape index: {}]   ;;  %s9234_s5 = inlined_call_operand.vmem [shape: f32[128,1], index: 5, kind: input, shape index: {}]   ;;  %s9235_s6 = inlined_call_operand.vmem [shape: f32[2,128,16], index: 6, kind: input, shape index: {}]   ;;  %s9236_s7 = inlined_call_operand.vmem [shape: f32[128,128], index: 7, kind: input, shape index: {}]   ;;  %s9237_s8 = inlined_call_operand.vmem [shape: f32[128,1], index: 8, kind: input, shape index: {}]   ;;  %s9238_s9 = inlined_call_operand.vmem [shape: f32[16,32], index: 9, kind: input, shape index: {}]   ;;  %s9239_s10 = inlined_call_operand.vmem [shape: bf16[5,16,144], index: 10, kind: input, shape index: {}]   ;;  %s9240_s11 = inlined_call_operand.hbm [shape: bf16[3,3,16], index: 11, kind: input, shape index: {}]   ;;  %s9241_s12 = inlined_call_operand.vmem [shape: f32[32,128], index: 12, kind: input, shape index: {}]   ;;  %s9242_s13 = inlined_call_operand.vmem [shape: f32[128,512], index: 13, kind: input, shape index: {}]   ;;  %s9243_s14 = inlined_call_operand.hbm [shape: f32[10,32], index: 14, kind: input, shape index: {}]   ;;  %s9244_s15 = inlined_call_operand.vmem [shape: f32[10,128], index: 15, kind: input, shape index: {}]   ;;  %s9245_s16 = inlined_call_operand.vmem [shape: f32[10,512], index: 16, kind: input, shape index: {}]   ;;  %s9246_s17 = inlined_call_operand.vmem [shape: f32[3,512], index: 17, kind: output, shape index: {}]  }
   0x1   :  { %9372 = sst [smem:[#allocation65_spill]] %s9229_s0 }
   0x2   :  { %9373 = sst [smem:[#allocation66_spill]] %s9230_s1 }
   0x3   :  { %22 = vsyncpa [#allocation3], 0 }
   0x4   :  { %23 = vsyncpa [#allocation5], 0  ;;  %s6042_s24 = smov [#allocation2]   ;;  %s5994_s28 = scalar_lea.hbm %s9240_s11, 96 }
   0x5   :  { %s51_s25 = sshll.u32 %s6042_s24, 4  ;;  %p5995_p0 = scmp.ne.s32.totalorder %s9240_s11, %s5994_s28  ;;  %s52_s25 = int_to_ptr.vmem [resolvable:$true] %s51_s25 }
   0x6   :  { %p5998_p1 = scmp.lt.u32.totalorder %s5994_s28, %s9240_s11 }
   0x8   :  { %p6000_p2 = pnand %p5998_p1, %p5995_p0 }
   0xa   :  { %6003 = shalt.err (!%p6000_p2)
}
   0xb   :  { %s6004_s19 = scalar_lea.vmem %s52_s25, 96  ;;  %p6009_p4 = scmp.lt.s32.totalorder %s52_s25, %s52_s25 }
   0xc   :  { %p6005_p3 = scmp.ne.s32.totalorder %s52_s25, %s6004_s19  ;;  %p6010_p5 = scmp.lt.s32.totalorder %s6004_s19, %s6004_s19 }
   0xe   :  { %p6011_p6 = por %p6010_p5, %p6009_p4 }
  0x10   :  { %p6012_p7 = pnand %p6011_p6, %p6005_p3 }
  0x12   :  { %6015 = shalt.err (!%p6012_p7)
}
  0x13   :  { %s6043_s1 = smov 32   ;;  %s6044_s20 = smov 2  }
  0x14   :  { %57 = dma.hbm_to_vmem [thread:$0]  %s9240_s11, 96, %s52_s25, [#allocation3], %s6043_s1, %s6043_s1, %s6044_s20  }
  0x15   :  { %s6045_s23 = smov [#allocation4]   ;;  %s6016_s28 = scalar_lea.hbm %s9243_s14, 256 }
  0x16   :  { %s67_s24 = sshll.u32 %s6045_s23, 4  ;;  %p6017_p8 = scmp.ne.s32.totalorder %s9243_s14, %s6016_s28  ;;  %s68_s24 = int_to_ptr.vmem [resolvable:$true] %s67_s24 }
  0x17   :  { %p6020_p9 = scmp.lt.u32.totalorder %s6016_s28, %s9243_s14 }
  0x19   :  { %p6022_p10 = pnand %p6020_p9, %p6017_p8 }
  0x1b   :  { %6025 = shalt.err (!%p6022_p10)
}
  0x1c   :  { %s6026_s19 = scalar_lea.vmem %s68_s24, 256  ;;  %p6031_p12 = scmp.lt.s32.totalorder %s68_s24, %s68_s24 }
  0x1d   :  { %p6027_p11 = scmp.ne.s32.totalorder %s68_s24, %s6026_s19  ;;  %p6032_p13 = scmp.lt.s32.totalorder %s6026_s19, %s6026_s19 }
  0x1f   :  { %p6033_p0 = por %p6032_p13, %p6031_p12 }
  0x21   :  { %p6034_p1 = pnand %p6033_p0, %p6027_p11 }
  0x23   :  { %6037 = shalt.err (!%p6034_p1)
}
  0x24   :  { %s6046_s11 = smov 128   ;;  %s6047_s25 = smov 8  }
  0x25   :  { %73 = dma.hbm_to_vmem [thread:$0]  %s9243_s14, 256, %s68_s24, [#allocation5], %s6046_s11, %s6046_s11, %s6047_s25  }
  0x26   :  { %6038 = dma.done.wait [#allocation3], 96  }
  0x27   :  { %6039 = vsyncadd [#allocation3], 4294967200 }
  0x28   :  { %6040 = dma.done.wait [#allocation5], 256  }
  0x29   :  { %6041 = vsyncadd [#allocation5], 4294967040  ;;  %v9249_v0 = vmov 0   ;;  %s9374_s23 = sld [smem:[#allocation65_spill]]  ;;  %vm101_vm0 = vcmask 588800   ;;  %vm215_vm1 = vcmask 523264  }
  0x2a   :  { %5849 = vset.pattern.permute.xlu0 %v9249_v0  ;;  %5850 = vset.pattern.permute.xlu1 %v9249_v0  ;;  %s9375_s27 = sld [smem:[#allocation66_spill]]  ;;  %v6247_v25 = vld [vmem:[%s9231_s2] sm:$0xff]  ;;  %v6252_v26 = vld [vmem:[%s9231_s2 + $0x10] sm:$0xff]  ;;  %v6262_v31 = vld [vmem:[%s9231_s2 + $0x8] sm:$0xff]  ;;  %s6057_s18 = smov 101  }
  0x2b   :  { %157 = vperm.xlu0 %5849, %v6247_v25   ;;  %167 = vperm.xlu1 %5850, %v6252_v26   ;;  %v6267_v32 = vld [vmem:[%s9231_s2 + $0x18] sm:$0xff]  ;;  %v6272_v34 = vld [vmem:[%s9231_s2 + $0x20] sm:$0xff]  ;;  %v6277_v35 = vld [vmem:[%s9231_s2 + $0x28] sm:$0xff]  ;;  %s6058_s19 = smov 5   ;;  %s6060_s20 = smov 4  }
  0x2c   :  { %v6284_v38 = vld [vmem:[%s9231_s2 + $0x30] sm:$0xff]  ;;  %v6289_v39 = vld [vmem:[%s9231_s2 + $0x38] sm:$0xff]  ;;  %s6061_s21 = smov 99   ;;  %s6063_s22 = smov 97  }
  0x2d   :  { %s6064_s26 = smov 1   ;;  %s6066_s28 = smov 125  }
  0x2e   :  { %s6067_s29 = smov 29   ;;  %s6069_s14 = smov 28  }
  0x2f   :  { %v85_v1 = vld [vmem:[%s9374_s23] sm:$0xff]  ;;  %v86_v2 = vld [vmem:[%s9374_s23 + $0x8] sm:$0xff]  ;;  %v87_v3 = vld [vmem:[%s9374_s23 + $0x10] sm:$0xff]  ;;  %162 = vperm.xlu0 %5849, %v6262_v31   ;;  %172 = vperm.xlu1 %5850, %v6267_v32   ;;  %s6071_s24 = smov 27   ;;  %s6075_s1 = smov 9  }
  0x30   :  { %v88_v4 = vld [vmem:[%s9374_s23 + $0x18] sm:$0xff]  ;;  %v89_v5 = vld [vmem:[%s9374_s23 + $0x20] sm:$0xff]  ;;  %v90_v6 = vld [vmem:[%s9374_s23 + $0x28] sm:$0xff]  ;;  %v93_v7 = vmul.f32 %v85_v1, %v85_v1  ;;  %v94_v8 = vmul.f32 %v86_v2, %v86_v2  ;;  %v95_v9 = vmul.f32 %v87_v3, %v87_v3  ;;  %s6078_s30 = smov 120  }
  0x31   :  { %v6224_v10 = vld [vmem:[%s9374_s23 + $0x30] sm:$0xff]  ;;  %v6229_v11 = vld [vmem:[%s9374_s23 + $0x38] sm:$0xff]  ;;  %v96_v12 = vmul.f32 %v88_v4, %v88_v4  ;;  %v97_v13 = vmul.f32 %v89_v5, %v89_v5  ;;  %v5909_v16 = vld [vmem:[%s9375_s27] sm:$0xff]   ;;  %v98_v19 = vmul.f32 %v90_v6, %v90_v6  ;;  %s6065_s23 = smov 31  }
  0x32   :  { %v102_v14 = vsel %vm101_vm0, %v93_v7, 0.0  ;;  %v103_v15 = vsel %vm101_vm0, %v94_v8, 0.0  ;;  %v105_v18 = vsel %vm101_vm0, %v95_v9, 0.0  ;;  %v99_v20 = vmul.f32 %v6224_v10, %v6224_v10  ;;  %5428 = vmatprep.mubr.msk.bf16.mxu0 %vm215_vm1, %v5909_v16  ;;  %v5910_v62 = vld [vmem:[%s9375_s27 + $0x8] sm:$0xff]   ;;  %v5911_v63 = vld [vmem:[%s9375_s27 + $0x10] sm:$0xff]  }
  0x33   :  { %v104_v17 = vadd.f32 %v103_v15, %v102_v14  ;;  %v100_v21 = vmul.f32 %v6229_v11, %v6229_v11  ;;  %v107_v22 = vsel %vm101_vm0, %v96_v12, 0.0  ;;  %v109_v24 = vsel %vm101_vm0, %v97_v13, 0.0  ;;  %177 = vperm.xlu0 %5849, %v6272_v34   ;;  %182 = vperm.xlu1 %5850, %v6277_v35  }
  0x34   :  { %v111_v28 = vsel %vm101_vm0, %v98_v19, 0.0  ;;  %v113_v29 = vsel %vm101_vm0, %v99_v20, 0.0 }
  0x35   :  { %v106_v23 = vadd.f32 %v105_v18, %v104_v17  ;;  %v115_v30 = vsel %vm101_vm0, %v100_v21, 0.0 }
  0x37   :  { %v108_v27 = vadd.f32 %v107_v22, %v106_v23  ;;  %187 = vperm.xlu0 %5849, %v6284_v38   ;;  %192 = vperm.xlu1 %5850, %v6289_v39  }
  0x39   :  { %v110_v33 = vadd.f32 %v109_v24, %v108_v27 }
  0x3b   :  { %v112_v36 = vadd.f32 %v111_v28, %v110_v33 }
  0x3d   :  { %v114_v37 = vadd.f32 %v113_v29, %v112_v36 }
  0x3f   :  { %v116_v40 = vadd.f32 %v115_v30, %v114_v37 }
  0x41   :  { %v117_v41 = vrot.slane %v116_v40, 4 }
  0x43   :  { %v118_v42 = vadd.f32 %v117_v41, %v116_v40 }
  0x45   :  { %v119_v43 = vrot.slane %v118_v42, 2 }
  0x47   :  { %v120_v44 = vadd.f32 %v119_v43, %v118_v42 }
  0x49   :  { %v121_v45 = vrot.slane %v120_v44, 1 }
  0x4b   :  { %v122_v46 = vadd.f32 %v121_v45, %v120_v44 }
  0x4d   :  { %v124_v47 = vmul.f32 0.015625, %v122_v46 }
  0x4f   :  { %v125_v48 = vadd.f32 1e-08, %v124_v47 }
  0x51   :  { %5964 = vrsqrt.f32 %v125_v48 }
  0x5b   :  { %v5965_v49 = vpop.eup %5964 }
  0x5c   :  { %v127_v50 = vmul.f32 %v5965_v49, %v85_v1  ;;  %v128_v51 = vmul.f32 %v5965_v49, %v86_v2  ;;  %v129_v52 = vmul.f32 %v5965_v49, %v87_v3  ;;  %v130_v53 = vmul.f32 %v5965_v49, %v88_v4  ;;  %v5912_v1 = vld [vmem:[%s9375_s27 + $0x18] sm:$0xff]   ;;  %v5913_v2 = vld [vmem:[%s9375_s27 + $0x20] sm:$0xff]  }
  0x5d   :  { %v131_v56 = vmul.f32 %v5965_v49, %v89_v5  ;;  %v132_v57 = vmul.f32 %v5965_v49, %v90_v6  ;;  %v133_v59 = vmul.f32 %v5965_v49, %v6224_v10  ;;  %v134_v60 = vmul.f32 %v5965_v49, %v6229_v11  ;;  %5444 = vmatprep.mubr.msk.bf16.mxu1 %vm215_vm1, %v5913_v2  ;;  %v5915_v2 = vld [vmem:[%s9375_s27 + $0x30] sm:$0xff]  }
  0x5e   :  { %v151_v54 = vpack.c.bf16 %v128_v51, %v127_v50  ;;  %v152_v55 = vpack.c.bf16 %v130_v53, %v129_v52  ;;  %v9251_v3 = vmov 1  }
  0x5f   :  { %v153_v58 = vpack.c.bf16 %v132_v57, %v131_v56  ;;  %v154_v61 = vpack.c.bf16 %v134_v60, %v133_v59  ;;  %5852 = vset.pattern.permute.xlu1 %v9251_v3  ;;  %5851 = vset.pattern.permute.xlu0 %v9251_v3 }
  0x60   :  { %5420 = vmatprep.subr.bf16.mxu0 %v151_v54  ;;  %343 = vperm.xlu1 %5852, %v6262_v31  }
  0x61   :  { %5421 = vmatpush3.bf16.msra.mxu0 %v151_v54  ;;  %339 = vperm.xlu0 %5851, %v6247_v25  }
  0x62   :  { %5422 = vmatprep.subr.bf16.mxu0 %v152_v55 }
  0x64   :  { %347 = vperm.xlu1 %5852, %v6252_v26  }
  0x65   :  { %5423 = vmatpush3.bf16.msra.mxu0 %v152_v55  ;;  %351 = vperm.xlu0 %5851, %v6267_v32  }
  0x66   :  { %5424 = vmatprep.subr.bf16.mxu0 %v153_v58 }
  0x68   :  { %355 = vperm.xlu1 %5852, %v6272_v34  }
  0x69   :  { %5425 = vmatpush3.bf16.msra.mxu0 %v153_v58  ;;  %359 = vperm.xlu0 %5851, %v6277_v35  }
  0x6a   :  { %5426 = vmatprep.subr.bf16.mxu0 %v154_v61 }
  0x6c   :  { %363 = vperm.xlu1 %5852, %v6284_v38  }
  0x6d   :  { %5427 = vmatpush3.bf16.msra.mxu0 %v154_v61  ;;  %367 = vperm.xlu0 %5851, %v6289_v39  }
  0x70   :  { %5429 = vmatmul.mubr.msk.bf16.vlgmr.msra.gmra.mrb[0].mxu0 %vm215_vm1, %v5910_v62 }
  0x71   :  { %5432 = vmatprep.mubr.msk.bf16.mxu0 %vm215_vm1, %v5911_v63 }
  0x78   :  { %5433 = vmatmul.mubr.msk.bf16.gmra.mrb[4].mxu0 %vm215_vm1, %v5912_v1  ;;  %v5914_v1 = vld [vmem:[%s9375_s27 + $0x28] sm:$0xff]  }
  0xaa   :  { %v158_v4 = vpop.permute.xlu0 %157  ;;  %v168_v5 = vpop.permute.xlu1 %167 }
  0xae   :  { %v163_v6 = vpop.permute.xlu0 %162  ;;  %v173_v7 = vpop.permute.xlu1 %172 }
  0xb2   :  { %v178_v11 = vpop.permute.xlu0 %177  ;;  %v183_v17 = vpop.permute.xlu1 %182 }
  0xb6   :  { %v188_v27 = vpop.permute.xlu0 %187  ;;  %v193_v42 = vpop.permute.xlu1 %192 }
 0x143   :  { %v5430_v8 = vpop.f32.mrb[0].mxu0 }
 0x144   :  { %v271_v9 = vadd.f32 %v5430_v8, %v168_v5  ;;  %v262_v10 = vpop.f32.mrb[1].mxu0  ;;  %v5917_v5 = vld [vmem:[%s9375_s27 + $0x40] sm:$0xff]   ;;  %v340_v8 = vpop.permute.xlu0 %339 }
 0x145   :  { %v263_v12 = vadd.f32 %v262_v10, %v158_v4  ;;  %v5431_v13 = vpop.f32.mrb[2].mxu0  ;;  %v5916_v4 = vld [vmem:[%s9375_s27 + $0x38] sm:$0xff]   ;;  %5460 = vmatprep.mubr.msk.bf16.mxu0 %vm215_vm1, %v5917_v5  ;;  %v5918_v5 = vld [vmem:[%s9375_s27 + $0x48] sm:$0xff]  }
 0x146   :  { %vm295_vm2 = vcmp.ge.f32.partialorder %v271_v9, 0.0  ;;  %v303_v14 = vmul.f32 0.2, %v271_v9  ;;  %v274_v15 = vadd.f32 %v5431_v13, %v173_v7  ;;  %v265_v16 = vpop.f32.mrb[3].mxu0  ;;  %v344_v7 = vpop.permute.xlu1 %343 }
 0x147   :  { %vm293_vm3 = vcmp.ge.f32.partialorder %v263_v12, 0.0  ;;  %v301_v18 = vmul.f32 0.2, %v263_v12  ;;  %v266_v19 = vadd.f32 %v265_v16, %v163_v6  ;;  %v6050_v6 = vmov 2  }
 0x148   :  { %v311_v20 = vsel %vm295_vm2, %v271_v9, %v303_v14  ;;  %vm296_vm4 = vcmp.ge.f32.partialorder %v274_v15, 0.0  ;;  %v304_v21 = vmul.f32 0.2, %v274_v15  ;;  %5853 = vset.pattern.permute.xlu1 %v6050_v6  ;;  %5854 = vset.pattern.permute.xlu0 %v6050_v6  ;;  %v352_v10 = vpop.permute.xlu0 %351  ;;  %v5919_v6 = vld [vmem:[%s9375_s27 + $0x50] sm:$0xff]  }
 0x149   :  { %vm294_vm5 = vcmp.ge.f32.partialorder %v266_v19, 0.0  ;;  %v302_v22 = vmul.f32 0.2, %v266_v19  ;;  %v309_v23 = vsel %vm293_vm3, %v263_v12, %v301_v18  ;;  %v319_v28 = vmul.f32 1.4142135, %v311_v20  ;;  %513 = vperm.xlu1 %5853, %v6247_v25   ;;  %517 = vperm.xlu0 %5854, %v6262_v31  }
 0x14a   :  { %v312_v24 = vsel %vm296_vm4, %v274_v15, %v304_v21  ;;  %v317_v40 = vmul.f32 1.4142135, %v309_v23  ;;  %v348_v9 = vpop.permute.xlu1 %347 }
 0x14b   :  { %v320_v29 = vmul.f32 1.4142135, %v312_v24  ;;  %v5434_v30 = vpop.f32.mrb[4].mxu0  ;;  %v310_v33 = vsel %vm294_vm5, %v266_v19, %v302_v22 }
 0x14c   :  { %v287_v36 = vadd.f32 %v5434_v30, %v188_v27  ;;  %v278_v37 = vpop.f32.mrb[5].mxu0  ;;  %v318_v41 = vmul.f32 1.4142135, %v310_v33  ;;  %v360_v20 = vpop.permute.xlu0 %359 }
 0x14d   :  { %v279_v43 = vadd.f32 %v278_v37, %v178_v11  ;;  %v5435_v44 = vpop.f32.mrb[6].mxu0  ;;  %v335_v45 = vpack.c.bf16 %v320_v29, %v319_v28  ;;  %521 = vperm.xlu1 %5853, %v6252_v26   ;;  %529 = vperm.xlu0 %5854, %v6272_v34  }
 0x14e   :  { %vm299_vm6 = vcmp.ge.f32.partialorder %v287_v36, 0.0  ;;  %v307_v46 = vmul.f32 0.2, %v287_v36  ;;  %v290_v47 = vadd.f32 %v5435_v44, %v193_v42  ;;  %v281_v48 = vpop.f32.mrb[7].mxu0  ;;  %v334_v49 = vpack.c.bf16 %v318_v41, %v317_v40  ;;  %v356_v14 = vpop.permute.xlu1 %355 }
 0x14f   :  { %vm297_vm7 = vcmp.ge.f32.partialorder %v279_v43, 0.0  ;;  %v305_v50 = vmul.f32 0.2, %v279_v43  ;;  %v282_v51 = vadd.f32 %v281_v48, %v183_v17 }
 0x150   :  { %v315_v52 = vsel %vm299_vm6, %v287_v36, %v307_v46  ;;  %vm300_vm8 = vcmp.ge.f32.partialorder %v290_v47, 0.0  ;;  %v308_v53 = vmul.f32 0.2, %v290_v47  ;;  %5436 = vmatprep.subr.bf16.mxu1 %v334_v49 }
 0x151   :  { %v313_v54 = vsel %vm297_vm7, %v279_v43, %v305_v50  ;;  %vm298_vm9 = vcmp.ge.f32.partialorder %v282_v51, 0.0  ;;  %v306_v55 = vmul.f32 0.2, %v282_v51  ;;  %5437 = vmatpush3.bf16.msra.mxu1 %v334_v49  ;;  %v323_v57 = vmul.f32 1.4142135, %v315_v52  ;;  %525 = vperm.xlu1 %5853, %v6267_v32  }
 0x152   :  { %v316_v56 = vsel %vm300_vm8, %v290_v47, %v308_v53  ;;  %5438 = vmatprep.subr.bf16.mxu1 %v335_v45  ;;  %v321_v60 = vmul.f32 1.4142135, %v313_v54  ;;  %537 = vperm.xlu0 %5854, %v6284_v38   ;;  %v364_v36 = vpop.permute.xlu1 %363 }
 0x153   :  { %v324_v58 = vmul.f32 1.4142135, %v316_v56  ;;  %v314_v59 = vsel %vm298_vm9, %v282_v51, %v306_v55 }
 0x154   :  { %v322_v61 = vmul.f32 1.4142135, %v314_v59 }
 0x155   :  { %5439 = vmatpush3.bf16.msra.mxu1 %v335_v45  ;;  %v337_v62 = vpack.c.bf16 %v324_v58, %v323_v57  ;;  %533 = vperm.xlu1 %5853, %v6277_v35   ;;  %v368_v45 = vpop.permute.xlu0 %367 }
 0x156   :  { %v336_v63 = vpack.c.bf16 %v322_v61, %v321_v60 }
 0x158   :  { %5440 = vmatprep.subr.bf16.mxu1 %v336_v63 }
 0x159   :  { %5441 = vmatpush3.bf16.msra.mxu1 %v336_v63  ;;  %541 = vperm.xlu1 %5853, %v6289_v39  }
 0x15a   :  { %5442 = vmatprep.subr.bf16.mxu1 %v337_v62 }
 0x15d   :  { %5443 = vmatpush3.bf16.msra.mxu1 %v337_v62 }
 0x160   :  { %5445 = vmatmul.mubr.msk.bf16.vlgmr.msra.gmra.mrb[0].mxu1 %vm215_vm1, %v5914_v1 }
 0x161   :  { %5448 = vmatprep.mubr.msk.bf16.mxu1 %vm215_vm1, %v5915_v2 }
 0x168   :  { %5449 = vmatmul.mubr.msk.bf16.gmra.mrb[4].mxu1 %vm215_vm1, %v5916_v4 }
 0x233   :  { %v5446_v11 = vpop.f32.mrb[0].mxu1 }
 0x234   :  { %v445_v12 = vadd.f32 %v5446_v11, %v348_v9  ;;  %v436_v13 = vpop.f32.mrb[1].mxu1  ;;  %v6051_v9 = vmov 3  }
 0x235   :  { %v437_v15 = vadd.f32 %v436_v13, %v340_v8  ;;  %v5447_v16 = vpop.f32.mrb[2].mxu1  ;;  %v5921_v8 = vld [vmem:[%s9375_s27 + $0x60] sm:$0xff]   ;;  %5856 = vset.pattern.permute.xlu1 %v6051_v9  ;;  %5855 = vset.pattern.permute.xlu0 %v6051_v9  ;;  %v5923_v9 = vld [vmem:[%s9375_s27 + $0x70] sm:$0xff]  }
 0x236   :  { %vm469_vm10 = vcmp.ge.f32.partialorder %v445_v12, 0.0  ;;  %v477_v17 = vmul.f32 0.2, %v445_v12  ;;  %v448_v18 = vadd.f32 %v5447_v16, %v352_v10  ;;  %v439_v19 = vpop.f32.mrb[3].mxu1  ;;  %5476 = vmatprep.mubr.msk.bf16.mxu1 %vm215_vm1, %v5921_v8  ;;  %691 = vperm.xlu1 %5856, %v6262_v31   ;;  %v514_v10 = vpop.permute.xlu1 %513  ;;  %v5922_v8 = vld [vmem:[%s9375_s27 + $0x68] sm:$0xff]  }
 0x237   :  { %vm467_vm11 = vcmp.ge.f32.partialorder %v437_v15, 0.0  ;;  %v475_v21 = vmul.f32 0.2, %v437_v15  ;;  %v440_v22 = vadd.f32 %v439_v19, %v344_v7  ;;  %v5920_v7 = vld [vmem:[%s9375_s27 + $0x58] sm:$0xff]   ;;  %687 = vperm.xlu0 %5855, %v6247_v25  }
 0x238   :  { %v485_v23 = vsel %vm469_vm10, %v445_v12, %v477_v17  ;;  %vm470_vm12 = vcmp.ge.f32.partialorder %v448_v18, 0.0  ;;  %v478_v24 = vmul.f32 0.2, %v448_v18  ;;  %v518_v12 = vpop.permute.xlu0 %517 }
 0x239   :  { %v483_v27 = vsel %vm467_vm11, %v437_v15, %v475_v21  ;;  %vm468_vm13 = vcmp.ge.f32.partialorder %v440_v22, 0.0  ;;  %v476_v28 = vmul.f32 0.2, %v440_v22  ;;  %v493_v30 = vmul.f32 1.4142135, %v485_v23 }
 0x23a   :  { %v486_v29 = vsel %vm470_vm12, %v448_v18, %v478_v24  ;;  %v491_v41 = vmul.f32 1.4142135, %v483_v27  ;;  %695 = vperm.xlu1 %5856, %v6252_v26   ;;  %v522_v11 = vpop.permute.xlu1 %521 }
 0x23b   :  { %v494_v33 = vmul.f32 1.4142135, %v486_v29  ;;  %v484_v37 = vsel %vm468_vm13, %v440_v22, %v476_v28  ;;  %v5450_v40 = vpop.f32.mrb[4].mxu1  ;;  %699 = vperm.xlu0 %5855, %v6267_v32  }
 0x23c   :  { %v492_v42 = vmul.f32 1.4142135, %v484_v37  ;;  %v461_v43 = vadd.f32 %v5450_v40, %v364_v36  ;;  %v452_v44 = vpop.f32.mrb[5].mxu1  ;;  %v530_v17 = vpop.permute.xlu0 %529 }
 0x23d   :  { %v453_v46 = vadd.f32 %v452_v44, %v356_v14  ;;  %v5451_v47 = vpop.f32.mrb[6].mxu1  ;;  %v509_v48 = vpack.c.bf16 %v494_v33, %v493_v30 }
 0x23e   :  { %vm473_vm14 = vcmp.ge.f32.partialorder %v461_v43, 0.0  ;;  %v481_v49 = vmul.f32 0.2, %v461_v43  ;;  %v464_v50 = vadd.f32 %v5451_v47, %v368_v45  ;;  %v455_v51 = vpop.f32.mrb[7].mxu1  ;;  %v508_v52 = vpack.c.bf16 %v492_v42, %v491_v41  ;;  %703 = vperm.xlu1 %5856, %v6272_v34   ;;  %v526_v13 = vpop.permute.xlu1 %525 }
 0x23f   :  { %vm471_vm15 = vcmp.ge.f32.partialorder %v453_v46, 0.0  ;;  %v479_v53 = vmul.f32 0.2, %v453_v46  ;;  %v456_v54 = vadd.f32 %v455_v51, %v360_v20  ;;  %707 = vperm.xlu0 %5855, %v6277_v35  }
 0x240   :  { %v489_v55 = vsel %vm473_vm14, %v461_v43, %v481_v49  ;;  %vm474_vm2 = vcmp.ge.f32.partialorder %v464_v50, 0.0  ;;  %v482_v56 = vmul.f32 0.2, %v464_v50  ;;  %5452 = vmatprep.subr.bf16.mxu0 %v508_v52  ;;  %v538_v41 = vpop.permute.xlu0 %537 }
 0x241   :  { %v487_v57 = vsel %vm471_vm15, %v453_v46, %v479_v53  ;;  %vm472_vm3 = vcmp.ge.f32.partialorder %v456_v54, 0.0  ;;  %v480_v58 = vmul.f32 0.2, %v456_v54  ;;  %5453 = vmatpush3.bf16.msra.mxu0 %v508_v52  ;;  %v497_v60 = vmul.f32 1.4142135, %v489_v55 }
 0x242   :  { %v490_v59 = vsel %vm474_vm2, %v464_v50, %v482_v56  ;;  %5454 = vmatprep.subr.bf16.mxu0 %v509_v48  ;;  %v495_v63 = vmul.f32 1.4142135, %v487_v57  ;;  %711 = vperm.xlu1 %5856, %v6284_v38   ;;  %v534_v23 = vpop.permute.xlu1 %533 }
 0x243   :  { %v498_v61 = vmul.f32 1.4142135, %v490_v59  ;;  %v488_v62 = vsel %vm472_vm3, %v456_v54, %v480_v58  ;;  %715 = vperm.xlu0 %5855, %v6289_v39  }
 0x244   :  { %v496_v1 = vmul.f32 1.4142135, %v488_v62 }
 0x245   :  { %5455 = vmatpush3.bf16.msra.mxu0 %v509_v48  ;;  %v511_v2 = vpack.c.bf16 %v498_v61, %v497_v60 }
 0x246   :  { %v510_v4 = vpack.c.bf16 %v496_v1, %v495_v63  ;;  %v542_v48 = vpop.permute.xlu1 %541 }
 0x248   :  { %5456 = vmatprep.subr.bf16.mxu0 %v510_v4 }
 0x249   :  { %5457 = vmatpush3.bf16.msra.mxu0 %v510_v4 }
 0x24a   :  { %5458 = vmatprep.subr.bf16.mxu0 %v511_v2 }
 0x24d   :  { %5459 = vmatpush3.bf16.msra.mxu0 %v511_v2 }
 0x250   :  { %5461 = vmatmul.mubr.msk.bf16.vlgmr.msra.gmra.mrb[8].mxu0 %vm215_vm1, %v5918_v5 }
 0x251   :  { %5464 = vmatprep.mubr.msk.bf16.mxu0 %vm215_vm1, %v5919_v6 }
 0x258   :  { %5465 = vmatmul.mubr.msk.bf16.gmra.mrb[12].mxu0 %vm215_vm1, %v5920_v7 }
 0x323   :  { %v5462_v14 = vpop.f32.mrb[8].mxu0 }
 0x324   :  { %v619_v15 = vadd.f32 %v5462_v14, %v522_v11  ;;  %v610_v16 = vpop.f32.mrb[9].mxu0  ;;  %v5925_v11 = vld [vmem:[%s9375_s27 + $0x80] sm:$0xff]   ;;  %v688_v14 = vpop.permute.xlu0 %687 }
 0x325   :  { %v611_v18 = vadd.f32 %v610_v16, %v514_v10  ;;  %v5463_v19 = vpop.f32.mrb[10].mxu0  ;;  %v5924_v10 = vld [vmem:[%s9375_s27 + $0x78] sm:$0xff]   ;;  %5492 = vmatprep.mubr.msk.bf16.mxu0 %vm215_vm1, %v5925_v11  ;;  %v5926_v11 = vld [vmem:[%s9375_s27 + $0x88] sm:$0xff]  }
 0x326   :  { %vm643_vm4 = vcmp.ge.f32.partialorder %v619_v15, 0.0  ;;  %v651_v20 = vmul.f32 0.2, %v619_v15  ;;  %v622_v21 = vadd.f32 %v5463_v19, %v526_v13  ;;  %v613_v22 = vpop.f32.mrb[11].mxu0  ;;  %v692_v13 = vpop.permute.xlu1 %691 }
 0x327   :  { %vm641_vm5 = vcmp.ge.f32.partialorder %v611_v18, 0.0  ;;  %v649_v24 = vmul.f32 0.2, %v611_v18  ;;  %v614_v27 = vadd.f32 %v613_v22, %v518_v12  ;;  %v6052_v12 = vmov 4  }
 0x328   :  { %v659_v28 = vsel %vm643_vm4, %v619_v15, %v651_v20  ;;  %vm644_vm6 = vcmp.ge.f32.partialorder %v622_v21, 0.0  ;;  %v652_v29 = vmul.f32 0.2, %v622_v21  ;;  %5857 = vset.pattern.permute.xlu1 %v6052_v12  ;;  %5858 = vset.pattern.permute.xlu0 %v6052_v12  ;;  %v700_v16 = vpop.permute.xlu0 %699  ;;  %v5927_v12 = vld [vmem:[%s9375_s27 + $0x90] sm:$0xff]  }
 0x329   :  { %v657_v30 = vsel %vm641_vm5, %v611_v18, %v649_v24  ;;  %vm642_vm7 = vcmp.ge.f32.partialorder %v614_v27, 0.0  ;;  %v650_v33 = vmul.f32 0.2, %v614_v27  ;;  %v667_v37 = vmul.f32 1.4142135, %v659_v28  ;;  %861 = vperm.xlu1 %5857, %v6247_v25   ;;  %865 = vperm.xlu0 %5858, %v6262_v31  }
 0x32a   :  { %v660_v36 = vsel %vm644_vm6, %v622_v21, %v652_v29  ;;  %v665_v44 = vmul.f32 1.4142135, %v657_v30  ;;  %v696_v15 = vpop.permute.xlu1 %695 }
 0x32b   :  { %v668_v40 = vmul.f32 1.4142135, %v660_v36  ;;  %v658_v42 = vsel %vm642_vm7, %v614_v27, %v650_v33  ;;  %v5466_v43 = vpop.f32.mrb[12].mxu0 }
 0x32c   :  { %v666_v45 = vmul.f32 1.4142135, %v658_v42  ;;  %v635_v46 = vadd.f32 %v5466_v43, %v538_v41  ;;  %v626_v47 = vpop.f32.mrb[13].mxu0  ;;  %v708_v28 = vpop.permute.xlu0 %707 }
 0x32d   :  { %v627_v49 = vadd.f32 %v626_v47, %v530_v17  ;;  %v5467_v50 = vpop.f32.mrb[14].mxu0  ;;  %v683_v51 = vpack.c.bf16 %v668_v40, %v667_v37  ;;  %869 = vperm.xlu1 %5857, %v6252_v26   ;;  %877 = vperm.xlu0 %5858, %v6272_v34  }
 0x32e   :  { %vm647_vm8 = vcmp.ge.f32.partialorder %v635_v46, 0.0  ;;  %v655_v52 = vmul.f32 0.2, %v635_v46  ;;  %v638_v53 = vadd.f32 %v5467_v50, %v542_v48  ;;  %v629_v54 = vpop.f32.mrb[15].mxu0  ;;  %v682_v55 = vpack.c.bf16 %v666_v45, %v665_v44  ;;  %v704_v20 = vpop.permute.xlu1 %703 }
 0x32f   :  { %vm645_vm9 = vcmp.ge.f32.partialorder %v627_v49, 0.0  ;;  %v653_v56 = vmul.f32 0.2, %v627_v49  ;;  %v630_v57 = vadd.f32 %v629_v54, %v534_v23 }
 0x330   :  { %v663_v58 = vsel %vm647_vm8, %v635_v46, %v655_v52  ;;  %vm648_vm10 = vcmp.ge.f32.partialorder %v638_v53, 0.0  ;;  %v656_v59 = vmul.f32 0.2, %v638_v53  ;;  %5468 = vmatprep.subr.bf16.mxu1 %v682_v55 }
 0x331   :  { %v661_v60 = vsel %vm645_vm9, %v627_v49, %v653_v56  ;;  %vm646_vm11 = vcmp.ge.f32.partialorder %v630_v57, 0.0  ;;  %v654_v61 = vmul.f32 0.2, %v630_v57  ;;  %5469 = vmatpush3.bf16.msra.mxu1 %v682_v55  ;;  %v671_v63 = vmul.f32 1.4142135, %v663_v58  ;;  %873 = vperm.xlu1 %5857, %v6267_v32  }
 0x332   :  { %v664_v62 = vsel %vm648_vm10, %v638_v53, %v656_v59  ;;  %5470 = vmatprep.subr.bf16.mxu1 %v683_v51  ;;  %v669_v4 = vmul.f32 1.4142135, %v661_v60  ;;  %885 = vperm.xlu0 %5858, %v6284_v38   ;;  %v712_v44 = vpop.permute.xlu1 %711 }
 0x333   :  { %v672_v1 = vmul.f32 1.4142135, %v664_v62  ;;  %v662_v2 = vsel %vm646_vm11, %v630_v57, %v654_v61 }
 0x334   :  { %v670_v5 = vmul.f32 1.4142135, %v662_v2 }
 0x335   :  { %5471 = vmatpush3.bf16.msra.mxu1 %v683_v51  ;;  %v685_v6 = vpack.c.bf16 %v672_v1, %v671_v63  ;;  %881 = vperm.xlu1 %5857, %v6277_v35   ;;  %v716_v51 = vpop.permute.xlu0 %715 }
 0x336   :  { %v684_v7 = vpack.c.bf16 %v670_v5, %v669_v4 }
 0x338   :  { %5472 = vmatprep.subr.bf16.mxu1 %v684_v7 }
 0x339   :  { %5473 = vmatpush3.bf16.msra.mxu1 %v684_v7  ;;  %889 = vperm.xlu1 %5857, %v6289_v39  }
 0x33a   :  { %5474 = vmatprep.subr.bf16.mxu1 %v685_v6 }
 0x33d   :  { %5475 = vmatpush3.bf16.msra.mxu1 %v685_v6 }
 0x340   :  { %5477 = vmatmul.mubr.msk.bf16.vlgmr.msra.gmra.mrb[8].mxu1 %vm215_vm1, %v5922_v8 }
 0x341   :  { %5480 = vmatprep.mubr.msk.bf16.mxu1 %vm215_vm1, %v5923_v9 }
 0x348   :  { %5481 = vmatmul.mubr.msk.bf16.gmra.mrb[12].mxu1 %vm215_vm1, %v5924_v10 }
 0x413   :  { %v5478_v17 = vpop.f32.mrb[8].mxu1 }
 0x414   :  { %v793_v18 = vadd.f32 %v5478_v17, %v696_v15  ;;  %v784_v19 = vpop.f32.mrb[9].mxu1  ;;  %v6053_v15 = vmov 5  }
 0x415   :  { %v785_v21 = vadd.f32 %v784_v19, %v688_v14  ;;  %v5479_v22 = vpop.f32.mrb[10].mxu1  ;;  %v5929_v14 = vld [vmem:[%s9375_s27 + $0xa0] sm:$0xff]   ;;  %5860 = vset.pattern.permute.xlu1 %v6053_v15  ;;  %5859 = vset.pattern.permute.xlu0 %v6053_v15  ;;  %v6462_v15 = vld [vmem:[%s9231_s2 + $0x18] sm:$0xff] }
 0x416   :  { %vm817_vm12 = vcmp.ge.f32.partialorder %v793_v18, 0.0  ;;  %v825_v23 = vmul.f32 0.2, %v793_v18  ;;  %v796_v24 = vadd.f32 %v5479_v22, %v700_v16  ;;  %v787_v27 = vpop.f32.mrb[11].mxu1  ;;  %5508 = vmatprep.mubr.msk.bf16.mxu1 %vm215_vm1, %v5929_v14  ;;  %1039 = vperm.xlu1 %5860, %v6262_v31   ;;  %v862_v16 = vpop.permute.xlu1 %861  ;;  %v6456_v14 = vld [vmem:[%s9231_s2 + $0x20] sm:$0xff] }
 0x417   :  { %vm815_vm13 = vcmp.ge.f32.partialorder %v785_v21, 0.0  ;;  %v823_v29 = vmul.f32 0.2, %v785_v21  ;;  %v788_v30 = vadd.f32 %v787_v27, %v692_v13  ;;  %v5928_v13 = vld [vmem:[%s9375_s27 + $0x98] sm:$0xff]   ;;  %1035 = vperm.xlu0 %5859, %v6247_v25  }
 0x418   :  { %v833_v33 = vsel %vm817_vm12, %v793_v18, %v825_v23  ;;  %vm818_vm14 = vcmp.ge.f32.partialorder %v796_v24, 0.0  ;;  %v826_v36 = vmul.f32 0.2, %v796_v24  ;;  %v866_v18 = vpop.permute.xlu0 %865 }
 0x419   :  { %v831_v37 = vsel %vm815_vm13, %v785_v21, %v823_v29  ;;  %vm816_vm15 = vcmp.ge.f32.partialorder %v788_v30, 0.0  ;;  %v824_v40 = vmul.f32 0.2, %v788_v30  ;;  %v841_v42 = vmul.f32 1.4142135, %v833_v33 }
 0x41a   :  { %v834_v41 = vsel %vm818_vm14, %v796_v24, %v826_v36  ;;  %v839_v47 = vmul.f32 1.4142135, %v831_v37  ;;  %1043 = vperm.xlu1 %5860, %v6252_v26   ;;  %v870_v17 = vpop.permute.xlu1 %869 }
 0x41b   :  { %v842_v43 = vmul.f32 1.4142135, %v834_v41  ;;  %v832_v45 = vsel %vm816_vm15, %v788_v30, %v824_v40  ;;  %v5482_v46 = vpop.f32.mrb[12].mxu1  ;;  %1047 = vperm.xlu0 %5859, %v6267_v32  }
 0x41c   :  { %v840_v48 = vmul.f32 1.4142135, %v832_v45  ;;  %v809_v49 = vadd.f32 %v5482_v46, %v712_v44  ;;  %v800_v50 = vpop.f32.mrb[13].mxu1  ;;  %v878_v25 = vpop.permute.xlu0 %877 }
 0x41d   :  { %v801_v52 = vadd.f32 %v800_v50, %v704_v20  ;;  %v5483_v53 = vpop.f32.mrb[14].mxu1  ;;  %v857_v54 = vpack.c.bf16 %v842_v43, %v841_v42 }
 0x41e   :  { %vm821_vm2 = vcmp.ge.f32.partialorder %v809_v49, 0.0  ;;  %v829_v55 = vmul.f32 0.2, %v809_v49  ;;  %v812_v56 = vadd.f32 %v5483_v53, %v716_v51  ;;  %v803_v57 = vpop.f32.mrb[15].mxu1  ;;  %v856_v58 = vpack.c.bf16 %v840_v48, %v839_v47  ;;  %1051 = vperm.xlu1 %5860, %v6272_v34   ;;  %v874_v19 = vpop.permute.xlu1 %873 }
 0x41f   :  { %vm819_vm3 = vcmp.ge.f32.partialorder %v801_v52, 0.0  ;;  %v827_v59 = vmul.f32 0.2, %v801_v52  ;;  %v804_v60 = vadd.f32 %v803_v57, %v708_v28  ;;  %1055 = vperm.xlu0 %5859, %v6277_v35  }
 0x420   :  { %v837_v61 = vsel %vm821_vm2, %v809_v49, %v829_v55  ;;  %vm822_vm4 = vcmp.ge.f32.partialorder %v812_v56, 0.0  ;;  %v830_v62 = vmul.f32 0.2, %v812_v56  ;;  %5484 = vmatprep.subr.bf16.mxu0 %v856_v58  ;;  %v886_v37 = vpop.permute.xlu0 %885 }
 0x421   :  { %v835_v63 = vsel %vm819_vm3, %v801_v52, %v827_v59  ;;  %vm820_vm5 = vcmp.ge.f32.partialorder %v804_v60, 0.0  ;;  %v828_v1 = vmul.f32 0.2, %v804_v60  ;;  %5485 = vmatpush3.bf16.msra.mxu0 %v856_v58  ;;  %v845_v4 = vmul.f32 1.4142135, %v837_v61 }
 0x422   :  { %v838_v2 = vsel %vm822_vm4, %v812_v56, %v830_v62  ;;  %5486 = vmatprep.subr.bf16.mxu0 %v857_v54  ;;  %v843_v7 = vmul.f32 1.4142135, %v835_v63  ;;  %1059 = vperm.xlu1 %5860, %v6284_v38   ;;  %v882_v24 = vpop.permute.xlu1 %881 }
 0x423   :  { %v846_v5 = vmul.f32 1.4142135, %v838_v2  ;;  %v836_v6 = vsel %vm820_vm5, %v804_v60, %v828_v1  ;;  %1063 = vperm.xlu0 %5859, %v6289_v39  }
 0x424   :  { %v844_v8 = vmul.f32 1.4142135, %v836_v6  ;;  %v5930_v6 = vld [vmem:[%s9375_s27 + $0xa8] sm:$0xff]  }
 0x425   :  { %5487 = vmatpush3.bf16.msra.mxu0 %v857_v54  ;;  %v859_v9 = vpack.c.bf16 %v846_v5, %v845_v4 }
 0x426   :  { %v858_v10 = vpack.c.bf16 %v844_v8, %v843_v7  ;;  %v890_v46 = vpop.permute.xlu1 %889  ;;  %v5931_v7 = vld [vmem:[%s9375_s27 + $0xb0] sm:$0xff]   ;;  %v5932_v8 = vld [vmem:[%s9375_s27 + $0xb8] sm:$0xff]  }
 0x428   :  { %5488 = vmatprep.subr.bf16.mxu0 %v858_v10 }
 0x429   :  { %5489 = vmatpush3.bf16.msra.mxu0 %v858_v10  ;;  %v6054_v10 = vmov 6  }
 0x42a   :  { %5490 = vmatprep.subr.bf16.mxu0 %v859_v9  ;;  %5861 = vset.pattern.permute.xlu1 %v6054_v10 }
 0x42b   :  { %5862 = vset.pattern.permute.xlu0 %v6054_v10  ;;  %v5935_v10 = vld [vmem:[%s9375_s27 + $0xd0] sm:$0xff]  }
 0x42d   :  { %5491 = vmatpush3.bf16.msra.mxu0 %v859_v9  ;;  %v5933_v9 = vld [vmem:[%s9375_s27 + $0xc0] sm:$0xff]  }
 0x430   :  { %5493 = vmatmul.mubr.msk.bf16.vlgmr.msra.gmra.mrb[16].mxu0 %vm215_vm1, %v5926_v11  ;;  %v6438_v11 = vld [vmem:[%s9231_s2] sm:$0xff] }
 0x431   :  { %5496 = vmatprep.mubr.msk.bf16.mxu0 %vm215_vm1, %v5927_v12  ;;  %1209 = vperm.xlu1 %5861, %v6438_v11   ;;  %v6444_v12 = vld [vmem:[%s9231_s2 + $0x8] sm:$0xff] }
 0x432   :  { %1213 = vperm.xlu0 %5862, %v6444_v12  }
 0x436   :  { %1225 = vperm.xlu0 %5862, %v6456_v14  }
 0x438   :  { %5497 = vmatmul.mubr.msk.bf16.gmra.mrb[20].mxu0 %vm215_vm1, %v5928_v13  ;;  %v6450_v13 = vld [vmem:[%s9231_s2 + $0x10] sm:$0xff] }
 0x439   :  { %5524 = vmatprep.mubr.msk.bf16.mxu0 %vm215_vm1, %v5933_v9  ;;  %1217 = vperm.xlu1 %5861, %v6450_v13   ;;  %v5934_v9 = vld [vmem:[%s9375_s27 + $0xc8] sm:$0xff]  }
 0x43d   :  { %1221 = vperm.xlu1 %5861, %v6462_v15  }
 0x503   :  { %v5494_v20 = vpop.f32.mrb[16].mxu0 }
 0x504   :  { %v967_v31 = vadd.f32 %v5494_v20, %v870_v17  ;;  %v958_v21 = vpop.f32.mrb[17].mxu0  ;;  %v6474_v17 = vld [vmem:[%s9231_s2 + $0x28] sm:$0xff]  ;;  %v1036_v20 = vpop.permute.xlu0 %1035 }
 0x505   :  { %v959_v22 = vadd.f32 %v958_v21, %v862_v16  ;;  %v5495_v26 = vpop.f32.mrb[18].mxu0  ;;  %v6468_v16 = vld [vmem:[%s9231_s2 + $0x30] sm:$0xff]  ;;  %1229 = vperm.xlu1 %5861, %v6474_v17  }
 0x506   :  { %vm991_vm6 = vcmp.ge.f32.partialorder %v967_v31, 0.0  ;;  %v999_v32 = vmul.f32 0.2, %v967_v31  ;;  %v970_v23 = vadd.f32 %v5495_v26, %v874_v19  ;;  %v961_v34 = vpop.f32.mrb[19].mxu0  ;;  %1233 = vperm.xlu0 %5862, %v6468_v16   ;;  %v1040_v19 = vpop.permute.xlu1 %1039 }
 0x507   :  { %vm989_vm7 = vcmp.ge.f32.partialorder %v959_v22, 0.0  ;;  %v997_v35 = vmul.f32 0.2, %v959_v22  ;;  %v962_v38 = vadd.f32 %v961_v34, %v866_v18  ;;  %v6480_v18 = vld [vmem:[%s9231_s2 + $0x38] sm:$0xff] }
 0x508   :  { %v1007_v27 = vsel %vm991_vm6, %v967_v31, %v999_v32  ;;  %vm992_vm8 = vcmp.ge.f32.partialorder %v970_v23, 0.0  ;;  %v1000_v39 = vmul.f32 0.2, %v970_v23  ;;  %v1048_v21 = vpop.permute.xlu0 %1047 }
 0x509   :  { %v1005_v28 = vsel %vm989_vm7, %v959_v22, %v997_v35  ;;  %vm990_vm9 = vcmp.ge.f32.partialorder %v962_v38, 0.0  ;;  %v998_v29 = vmul.f32 0.2, %v962_v38  ;;  %v1015_v33 = vmul.f32 1.4142135, %v1007_v27  ;;  %1237 = vperm.xlu1 %5861, %v6480_v18  }
 0x50a   :  { %v1008_v30 = vsel %vm992_vm8, %v970_v23, %v1000_v39  ;;  %v1013_v42 = vmul.f32 1.4142135, %v1005_v28  ;;  %v1044_v31 = vpop.permute.xlu1 %1043 }
 0x50b   :  { %v1016_v36 = vmul.f32 1.4142135, %v1008_v30  ;;  %v1006_v40 = vsel %vm990_vm9, %v962_v38, %v998_v29  ;;  %v5498_v41 = vpop.f32.mrb[20].mxu0 }
 0x50c   :  { %v1014_v43 = vmul.f32 1.4142135, %v1006_v40  ;;  %v983_v44 = vadd.f32 %v5498_v41, %v886_v37  ;;  %v974_v45 = vpop.f32.mrb[21].mxu0  ;;  %v1056_v27 = vpop.permute.xlu0 %1055 }
 0x50d   :  { %v975_v47 = vadd.f32 %v974_v45, %v878_v25  ;;  %v5499_v48 = vpop.f32.mrb[22].mxu0  ;;  %v1031_v49 = vpack.c.bf16 %v1016_v36, %v1015_v33 }
 0x50e   :  { %vm995_vm10 = vcmp.ge.f32.partialorder %v983_v44, 0.0  ;;  %v1003_v50 = vmul.f32 0.2, %v983_v44  ;;  %v986_v51 = vadd.f32 %v5499_v48, %v890_v46  ;;  %v977_v52 = vpop.f32.mrb[23].mxu0  ;;  %v1030_v53 = vpack.c.bf16 %v1014_v43, %v1013_v42  ;;  %v1052_v32 = vpop.permute.xlu1 %1051 }
 0x50f   :  { %vm993_vm11 = vcmp.ge.f32.partialorder %v975_v47, 0.0  ;;  %v1001_v54 = vmul.f32 0.2, %v975_v47  ;;  %v978_v55 = vadd.f32 %v977_v52, %v882_v24 }
 0x510   :  { %v1011_v56 = vsel %vm995_vm10, %v983_v44, %v1003_v50  ;;  %vm996_vm12 = vcmp.ge.f32.partialorder %v986_v51, 0.0  ;;  %v1004_v57 = vmul.f32 0.2, %v986_v51  ;;  %5500 = vmatprep.subr.bf16.mxu1 %v1030_v53 }
 0x511   :  { %v1009_v58 = vsel %vm993_vm11, %v975_v47, %v1001_v54  ;;  %vm994_vm13 = vcmp.ge.f32.partialorder %v978_v55, 0.0  ;;  %v1002_v59 = vmul.f32 0.2, %v978_v55  ;;  %5501 = vmatpush3.bf16.msra.mxu1 %v1030_v53  ;;  %v1019_v61 = vmul.f32 1.4142135, %v1011_v56 }
 0x512   :  { %v1012_v60 = vsel %vm996_vm12, %v986_v51, %v1004_v57  ;;  %5502 = vmatprep.subr.bf16.mxu1 %v1031_v49  ;;  %v1017_v1 = vmul.f32 1.4142135, %v1009_v58  ;;  %v1060_v42 = vpop.permute.xlu1 %1059 }
 0x513   :  { %v1020_v62 = vmul.f32 1.4142135, %v1012_v60  ;;  %v1010_v63 = vsel %vm994_vm13, %v978_v55, %v1002_v59 }
 0x514   :  { %v1018_v2 = vmul.f32 1.4142135, %v1010_v63 }
 0x515   :  { %5503 = vmatpush3.bf16.msra.mxu1 %v1031_v49  ;;  %v1033_v4 = vpack.c.bf16 %v1020_v62, %v1019_v61  ;;  %v1064_v49 = vpop.permute.xlu0 %1063 }
 0x516   :  { %v1032_v5 = vpack.c.bf16 %v1018_v2, %v1017_v1 }
 0x518   :  { %5504 = vmatprep.subr.bf16.mxu1 %v1032_v5 }
 0x519   :  { %5505 = vmatpush3.bf16.msra.mxu1 %v1032_v5 }
 0x51a   :  { %5506 = vmatprep.subr.bf16.mxu1 %v1033_v4 }
 0x51d   :  { %5507 = vmatpush3.bf16.msra.mxu1 %v1033_v4 }
 0x520   :  { %5509 = vmatmul.mubr.msk.bf16.vlgmr.msra.gmra.mrb[16].mxu1 %vm215_vm1, %v5930_v6 }
 0x521   :  { %5512 = vmatprep.mubr.msk.bf16.mxu1 %vm215_vm1, %v5931_v7 }
 0x528   :  { %5513 = vmatmul.mubr.msk.bf16.gmra.mrb[20].mxu1 %vm215_vm1, %v5932_v8 }
 0x5f3   :  { %v5510_v25 = vpop.f32.mrb[16].mxu1 }
 0x5f4   :  { %v1141_v22 = vadd.f32 %v5510_v25, %v1044_v31  ;;  %v1132_v26 = vpop.f32.mrb[17].mxu1  ;;  %v6055_v31 = vmov 7   ;;  %v1544_v25 = vld [vmem:[%s9232_s3 + $0x8] sm:$0xff] }
 0x5f5   :  { %v1133_v23 = vadd.f32 %v1132_v26, %v1036_v20  ;;  %v5511_v34 = vpop.f32.mrb[18].mxu1  ;;  %v5937_v20 = vld [vmem:[%s9375_s27 + $0xe0] sm:$0xff]   ;;  %5864 = vset.pattern.permute.xlu1 %v6055_v31  ;;  %5863 = vset.pattern.permute.xlu0 %v6055_v31  ;;  %v1545_v26 = vld [vmem:[%s9232_s3 + $0x10] sm:$0xff] }
 0x5f6   :  { %vm1165_vm14 = vcmp.ge.f32.partialorder %v1141_v22, 0.0  ;;  %v1173_v24 = vmul.f32 0.2, %v1141_v22  ;;  %v1144_v35 = vadd.f32 %v5511_v34, %v1048_v21  ;;  %v1135_v38 = vpop.f32.mrb[19].mxu1  ;;  %5540 = vmatprep.mubr.msk.bf16.mxu1 %vm215_vm1, %v5937_v20  ;;  %v1543_v21 = vld [vmem:[%s9232_s3] sm:$0xff]  ;;  %1387 = vperm.xlu1 %5864, %v6444_v12   ;;  %v5940_v20 = vld [vmem:[%s9375_s27 + $0xf8] sm:$0xff]  }
 0x5f7   :  { %vm1163_vm15 = vcmp.ge.f32.partialorder %v1133_v23, 0.0  ;;  %v1171_v39 = vmul.f32 0.2, %v1133_v23  ;;  %v1136_v28 = vadd.f32 %v1135_v38, %v1040_v19  ;;  %v5936_v19 = vld [vmem:[%s9375_s27 + $0xd8] sm:$0xff]   ;;  %1383 = vperm.xlu0 %5863, %v6438_v11   ;;  %v1210_v11 = vpop.permute.xlu1 %1209  ;;  %v1547_v31 = vld [vmem:[%s9232_s3 + $0x20] sm:$0xff] }
 0x5f8   :  { %v1181_v29 = vsel %vm1165_vm14, %v1141_v22, %v1173_v24  ;;  %vm1166_vm2 = vcmp.ge.f32.partialorder %v1144_v35, 0.0  ;;  %v1174_v30 = vmul.f32 0.2, %v1144_v35  ;;  %v5687_v22 = vpack.c.bf16 %v1544_v25, %v1543_v21  ;;  %v1548_v21 = vld [vmem:[%s9232_s3 + $0x28] sm:$0xff] }
 0x5f9   :  { %v1179_v33 = vsel %vm1163_vm15, %v1133_v23, %v1171_v39  ;;  %vm1164_vm3 = vcmp.ge.f32.partialorder %v1136_v28, 0.0  ;;  %v1172_v36 = vmul.f32 0.2, %v1136_v28  ;;  %v1189_v40 = vmul.f32 1.4142135, %v1181_v29 }
 0x5fa   :  { %v1182_v37 = vsel %vm1166_vm2, %v1144_v35, %v1174_v30  ;;  %v1187_v45 = vmul.f32 1.4142135, %v1179_v33  ;;  %1391 = vperm.xlu1 %5864, %v6450_v13   ;;  %v1214_v13 = vpop.permute.xlu0 %1213  ;;  %v5695_v25 = vpack.c.bf16 %v1548_v21, %v1547_v31 }
 0x5fb   :  { %v1190_v41 = vmul.f32 1.4142135, %v1182_v37  ;;  %v1180_v43 = vsel %vm1164_vm3, %v1136_v28, %v1172_v36  ;;  %v5514_v44 = vpop.f32.mrb[20].mxu1  ;;  %1395 = vperm.xlu0 %5863, %v6462_v15   ;;  %v1218_v12 = vpop.permute.xlu1 %1217 }
 0x5fc   :  { %v1188_v46 = vmul.f32 1.4142135, %v1180_v43  ;;  %v1157_v47 = vadd.f32 %v5514_v44, %v1060_v42  ;;  %v1148_v48 = vpop.f32.mrb[21].mxu1 }
 0x5fd   :  { %v1149_v50 = vadd.f32 %v1148_v48, %v1052_v32  ;;  %v5515_v51 = vpop.f32.mrb[22].mxu1  ;;  %v1205_v52 = vpack.c.bf16 %v1190_v41, %v1189_v40  ;;  %v1546_v32 = vld [vmem:[%s9232_s3 + $0x18] sm:$0xff] }
 0x5fe   :  { %vm1169_vm4 = vcmp.ge.f32.partialorder %v1157_v47, 0.0  ;;  %v1177_v53 = vmul.f32 0.2, %v1157_v47  ;;  %v1160_v54 = vadd.f32 %v5515_v51, %v1064_v49  ;;  %v1151_v55 = vpop.f32.mrb[23].mxu1  ;;  %v1204_v56 = vpack.c.bf16 %v1188_v46, %v1187_v45  ;;  %1399 = vperm.xlu1 %5864, %v6456_v14   ;;  %v1226_v38 = vpop.permute.xlu0 %1225 }
 0x5ff   :  { %vm1167_vm5 = vcmp.ge.f32.partialorder %v1149_v50, 0.0  ;;  %v1175_v57 = vmul.f32 0.2, %v1149_v50  ;;  %v1152_v58 = vadd.f32 %v1151_v55, %v1056_v27  ;;  %v5691_v23 = vpack.c.bf16 %v1546_v32, %v1545_v26  ;;  %1403 = vperm.xlu0 %5863, %v6474_v17   ;;  %v1222_v34 = vpop.permute.xlu1 %1221  ;;  %v1550_v26 = vld [vmem:[%s9232_s3 + $0x38] sm:$0xff] }
 0x600   :  { %v1185_v59 = vsel %vm1169_vm4, %v1157_v47, %v1177_v53  ;;  %vm1170_vm6 = vcmp.ge.f32.partialorder %v1160_v54, 0.0  ;;  %v1178_v60 = vmul.f32 0.2, %v1160_v54  ;;  %5516 = vmatprep.subr.bf16.mxu0 %v1204_v56 }
 0x601   :  { %v1183_v61 = vsel %vm1167_vm5, %v1149_v50, %v1175_v57  ;;  %vm1168_vm7 = vcmp.ge.f32.partialorder %v1152_v58, 0.0  ;;  %v1176_v62 = vmul.f32 0.2, %v1152_v58  ;;  %5517 = vmatpush3.bf16.msra.mxu0 %v1204_v56  ;;  %v1193_v1 = vmul.f32 1.4142135, %v1185_v59 }
 0x602   :  { %v1186_v63 = vsel %vm1170_vm6, %v1160_v54, %v1178_v60  ;;  %5518 = vmatprep.subr.bf16.mxu0 %v1205_v52  ;;  %v1191_v5 = vmul.f32 1.4142135, %v1183_v61  ;;  %1407 = vperm.xlu1 %5864, %v6468_v16   ;;  %v1234_v43 = vpop.permute.xlu0 %1233 }
 0x603   :  { %v1194_v2 = vmul.f32 1.4142135, %v1186_v63  ;;  %v1184_v4 = vsel %vm1168_vm7, %v1152_v58, %v1176_v62  ;;  %1411 = vperm.xlu0 %5863, %v6480_v18   ;;  %v1230_v28 = vpop.permute.xlu1 %1229 }
 0x604   :  { %v1192_v6 = vmul.f32 1.4142135, %v1184_v4 }
 0x605   :  { %5519 = vmatpush3.bf16.msra.mxu0 %v1205_v52  ;;  %v1207_v7 = vpack.c.bf16 %v1194_v2, %v1193_v1 }
 0x606   :  { %v1206_v8 = vpack.c.bf16 %v1192_v6, %v1191_v5  ;;  %5866 = vset.pattern.permute.xlu1 %v9249_v0 }
 0x607   :  { %5865 = vset.pattern.permute.xlu0 %v9249_v0  ;;  %v1238_v50 = vpop.permute.xlu1 %1237 }
 0x608   :  { %5520 = vmatprep.subr.bf16.mxu0 %v1206_v8 }
 0x609   :  { %5521 = vmatpush3.bf16.msra.mxu0 %v1206_v8 }
 0x60a   :  { %5522 = vmatprep.subr.bf16.mxu0 %v1207_v7 }
 0x60d   :  { %5523 = vmatpush3.bf16.msra.mxu0 %v1207_v7 }
 0x60e   :  { %5688 = vmatprep.subr.bf16.mxu0 %v5687_v22 }
 0x610   :  { %5525 = vmatmul.mubr.msk.bf16.vlgmr.msra.gmra.mrb[24].mxu0 %vm215_vm1, %v5934_v9 }
 0x611   :  { %5528 = vmatprep.mubr.msk.bf16.mxu0 %vm215_vm1, %v5935_v10  ;;  %5690 = vmatpush3.bf16.msra.mxu0 %v5687_v22  ;;  %v5938_v10 = vld [vmem:[%s9375_s27 + $0xe8] sm:$0xff]   ;;  %v1549_v22 = vld [vmem:[%s9232_s3 + $0x30] sm:$0xff] }
 0x612   :  { %5692 = vmatprep.subr.bf16.mxu0 %v5691_v23  ;;  %v5699_v32 = vpack.c.bf16 %v1550_v26, %v1549_v22 }
 0x615   :  { %5694 = vmatpush3.bf16.msra.mxu0 %v5691_v23  ;;  %v1551_v23 = vld [vmem:[%s9232_s3 + $0x40] sm:$0xff]  ;;  %s6070_s3 = smov 123  }
 0x616   :  { %5696 = vmatprep.subr.bf16.mxu0 %v5695_v25 }
 0x618   :  { %5529 = vmatmul.mubr.msk.bf16.gmra.mrb[28].mxu0 %vm215_vm1, %v5936_v19  ;;  %v5939_v19 = vld [vmem:[%s9375_s27 + $0xf0] sm:$0xff]   ;;  %s6068_s27 = smov 124  }
 0x619   :  { %5698 = vmatpush3.bf16.msra.mxu0 %v5695_v25 }
 0x61a   :  { %5700 = vmatprep.subr.bf16.mxu0 %v5699_v32 }
 0x61d   :  { %5702 = vmatpush3.bf16.msra.mxu0 %v5699_v32 }
 0x61e   :  { %5564 = vmatprep.subr.mxu0 %v1551_v23 }
 0x621   :  { %5565 = vmatpush3.msra.mxu0 %v1551_v23 }
 0x622   :  { %2597 = vmatprep.subr.bf16.mxu0 %v9249_v0 }
 0x6e3   :  { %v5526_v15 = vpop.f32.mrb[24].mxu0 }
 0x6e4   :  { %v1315_v24 = vadd.f32 %v5526_v15, %v1218_v12  ;;  %v1306_v35 = vpop.f32.mrb[25].mxu0  ;;  %v1384_v12 = vpop.permute.xlu0 %1383 }
 0x6e5   :  { %v1307_v27 = vadd.f32 %v1306_v35, %v1210_v11  ;;  %v5527_v14 = vpop.f32.mrb[26].mxu0  ;;  %v1388_v11 = vpop.permute.xlu1 %1387 }
 0x6e6   :  { %vm1339_vm8 = vcmp.ge.f32.partialorder %v1315_v24, 0.0  ;;  %v1347_v17 = vmul.f32 0.2, %v1315_v24  ;;  %v1318_v39 = vadd.f32 %v5527_v14, %v1222_v34  ;;  %v1309_v16 = vpop.f32.mrb[27].mxu0 }
 0x6e7   :  { %vm1337_vm9 = vcmp.ge.f32.partialorder %v1307_v27, 0.0  ;;  %v1345_v18 = vmul.f32 0.2, %v1307_v27  ;;  %v1310_v29 = vadd.f32 %v1309_v16, %v1214_v13 }
 0x6e8   :  { %v1355_v30 = vsel %vm1339_vm8, %v1315_v24, %v1347_v17  ;;  %vm1340_vm10 = vcmp.ge.f32.partialorder %v1318_v39, 0.0  ;;  %v1348_v33 = vmul.f32 0.2, %v1318_v39  ;;  %v1396_v34 = vpop.permute.xlu0 %1395 }
 0x6e9   :  { %v1353_v36 = vsel %vm1337_vm9, %v1307_v27, %v1345_v18  ;;  %vm1338_vm11 = vcmp.ge.f32.partialorder %v1310_v29, 0.0  ;;  %v1346_v37 = vmul.f32 0.2, %v1310_v29  ;;  %v1363_v41 = vmul.f32 1.4142135, %v1355_v30  ;;  %v1392_v13 = vpop.permute.xlu1 %1391 }
 0x6ea   :  { %v1356_v40 = vsel %vm1340_vm10, %v1318_v39, %v1348_v33  ;;  %v1361_v46 = vmul.f32 1.4142135, %v1353_v36  ;;  %vm2413_vm10 = vcmask 39936  }
 0x6eb   :  { %v1364_v42 = vmul.f32 1.4142135, %v1356_v40  ;;  %v1354_v44 = vsel %vm1338_vm11, %v1310_v29, %v1346_v37  ;;  %v5530_v45 = vpop.f32.mrb[28].mxu0  ;;  %vm2434_vm11 = vcmask 31744  }
 0x6ec   :  { %v1362_v47 = vmul.f32 1.4142135, %v1354_v44  ;;  %v1331_v48 = vadd.f32 %v5530_v45, %v1234_v43  ;;  %v1322_v49 = vpop.f32.mrb[29].mxu0 }
 0x6ed   :  { %v1323_v51 = vadd.f32 %v1322_v49, %v1226_v38  ;;  %v5531_v52 = vpop.f32.mrb[30].mxu0  ;;  %v1379_v53 = vpack.c.bf16 %v1364_v42, %v1363_v41  ;;  %v1400_v38 = vpop.permute.xlu1 %1399 }
 0x6ee   :  { %vm1343_vm12 = vcmp.ge.f32.partialorder %v1331_v48, 0.0  ;;  %v1351_v54 = vmul.f32 0.2, %v1331_v48  ;;  %v1334_v55 = vadd.f32 %v5531_v52, %v1238_v50  ;;  %v1325_v56 = vpop.f32.mrb[31].mxu0  ;;  %v1378_v57 = vpack.c.bf16 %v1362_v47, %v1361_v46 }
 0x6ef   :  { %vm1341_vm13 = vcmp.ge.f32.partialorder %v1323_v51, 0.0  ;;  %v1349_v58 = vmul.f32 0.2, %v1323_v51  ;;  %v1326_v59 = vadd.f32 %v1325_v56, %v1230_v28  ;;  %v1404_v28 = vpop.permute.xlu0 %1403 }
 0x6f0   :  { %v1359_v60 = vsel %vm1343_vm12, %v1331_v48, %v1351_v54  ;;  %vm1344_vm14 = vcmp.ge.f32.partialorder %v1334_v55, 0.0  ;;  %v1352_v61 = vmul.f32 0.2, %v1334_v55  ;;  %5532 = vmatprep.subr.bf16.mxu1 %v1378_v57  ;;  %vm2455_vm12 = vcmask 23552  }
 0x6f1   :  { %v1357_v62 = vsel %vm1341_vm13, %v1323_v51, %v1349_v58  ;;  %vm1342_vm15 = vcmp.ge.f32.partialorder %v1326_v59, 0.0  ;;  %v1350_v63 = vmul.f32 0.2, %v1326_v59  ;;  %5533 = vmatpush3.bf16.msra.mxu1 %v1378_v57  ;;  %v1367_v2 = vmul.f32 1.4142135, %v1359_v60  ;;  %v1408_v41 = vpop.permute.xlu1 %1407 }
 0x6f2   :  { %v1360_v1 = vsel %vm1344_vm14, %v1334_v55, %v1352_v61  ;;  %5534 = vmatprep.subr.bf16.mxu1 %v1379_v53  ;;  %v1365_v6 = vmul.f32 1.4142135, %v1357_v62  ;;  %vm2502_vm13 = vcmask 252928   ;;  %vm2523_vm14 = vcmask 236544  }
 0x6f3   :  { %v1368_v4 = vmul.f32 1.4142135, %v1360_v1  ;;  %v1358_v5 = vsel %vm1342_vm15, %v1326_v59, %v1350_v63  ;;  %v1412_v48 = vpop.permute.xlu0 %1411  ;;  %vm2544_vm15 = vcmask 228352  }
 0x6f4   :  { %v1366_v7 = vmul.f32 1.4142135, %v1358_v5 }
 0x6f5   :  { %5535 = vmatpush3.bf16.msra.mxu1 %v1379_v53  ;;  %v1381_v8 = vpack.c.bf16 %v1368_v4, %v1367_v2 }
 0x6f6   :  { %v1380_v9 = vpack.c.bf16 %v1366_v7, %v1365_v6  ;;  %v5941_v6 = vld [vmem:[%s9233_s4] sm:$0xff]  }
 0x6f7   :  { %v2041_v7 = vld [vmem:[%s9234_s5] sm:$0xff] }
 0x6f8   :  { %5536 = vmatprep.subr.bf16.mxu1 %v1380_v9  ;;  %2059 = vperm.xlu0 %5865, %v2041_v7  }
 0x6f9   :  { %5537 = vmatpush3.bf16.msra.mxu1 %v1380_v9  ;;  %v2043_v9 = vld [vmem:[%s9234_s5 + $0x10] sm:$0xff] }
 0x6fa   :  { %5538 = vmatprep.subr.bf16.mxu1 %v1381_v8 }
 0x6fc   :  { %2069 = vperm.xlu0 %5865, %v2043_v9   ;;  %v1869_v9 = vld [vmem:[%s9235_s6 + $0x38] sm:$0xff] }
 0x6fd   :  { %5539 = vmatpush3.bf16.msra.mxu1 %v1381_v8  ;;  %v2042_v8 = vld [vmem:[%s9234_s5 + $0x8] sm:$0xff] }
 0x6fe   :  { %2064 = vperm.xlu1 %5866, %v2042_v8  }
 0x700   :  { %5541 = vmatmul.mubr.msk.bf16.vlgmr.msra.gmra.mrb[24].mxu1 %vm215_vm1, %v5938_v10  ;;  %v2045_v10 = vld [vmem:[%s9234_s5 + $0x20] sm:$0xff] }
 0x701   :  { %5544 = vmatprep.mubr.msk.bf16.mxu1 %vm215_vm1, %v5939_v19  ;;  %2079 = vperm.xlu0 %5865, %v2045_v10  }
 0x708   :  { %5545 = vmatmul.mubr.msk.bf16.gmra.mrb[28].mxu1 %vm215_vm1, %v5940_v20 }
 0x709   :  { %5586 = vmatprep.mubr.msk.bf16.mxu1 %vm215_vm1, %v5941_v6 }
 0x7d3   :  { %v5542_v15 = vpop.f32.mrb[24].mxu1 }
 0x7d4   :  { %v1489_v24 = vadd.f32 %v5542_v15, %v1392_v13  ;;  %v1480_v35 = vpop.f32.mrb[25].mxu1  ;;  %v5943_v15 = vld [vmem:[%s9233_s4 + $0x10] sm:$0xff]  }
 0x7d5   :  { %v1481_v27 = vadd.f32 %v1480_v35, %v1384_v12  ;;  %v5543_v14 = vpop.f32.mrb[26].mxu1  ;;  %v5945_v35 = vld [vmem:[%s9233_s4 + $0x20] sm:$0xff]  }
 0x7d6   :  { %v1521_v17 = vmul.f32 0.2, %v1489_v24  ;;  %v1492_v39 = vadd.f32 %v5543_v14, %v1396_v34  ;;  %v1483_v16 = vpop.f32.mrb[27].mxu1  ;;  %vm1513_vm2 = vcmp.ge.f32.partialorder %v1489_v24, 0.0  ;;  %v5942_v34 = vld [vmem:[%s9233_s4 + $0x8] sm:$0xff]   ;;  %v5948_v14 = vld [vmem:[%s9233_s4 + $0x38] sm:$0xff]  }
 0x7d7   :  { %vm1511_vm3 = vcmp.ge.f32.partialorder %v1481_v27, 0.0  ;;  %v1519_v18 = vmul.f32 0.2, %v1481_v27  ;;  %v1484_v29 = vadd.f32 %v1483_v16, %v1388_v11 }
 0x7d8   :  { %v1522_v33 = vmul.f32 0.2, %v1492_v39  ;;  %v1529_v37 = vsel %vm1513_vm2, %v1489_v24, %v1521_v17  ;;  %vm1514_vm5 = vcmp.ge.f32.partialorder %v1492_v39, 0.0  ;;  %v5944_v24 = vld [vmem:[%s9233_s4 + $0x18] sm:$0xff]   ;;  %v1864_v17 = vld [vmem:[%s9235_s6 + $0x10] sm:$0xff]  ;;  %vm2565_vm2 = vcmask 220160  }
 0x7d9   :  { %v1527_v30 = vsel %vm1511_vm3, %v1481_v27, %v1519_v18  ;;  %vm1512_vm4 = vcmp.ge.f32.partialorder %v1484_v29, 0.0  ;;  %v1520_v36 = vmul.f32 0.2, %v1484_v29  ;;  %v1537_v47 = vmul.f32 1.4142135, %v1529_v37  ;;  %v5947_v27 = vld [vmem:[%s9233_s4 + $0x30] sm:$0xff]  }
 0x7da   :  { %v1535_v40 = vmul.f32 1.4142135, %v1527_v30  ;;  %v1530_v49 = vsel %vm1514_vm5, %v1492_v39, %v1522_v33  ;;  %v5232_v39 = vld [vmem:[%s9235_s6 + $0x80] sm:$0xff]  ;;  %v1865_v30 = vld [vmem:[%s9235_s6 + $0x18] sm:$0xff]  ;;  %vm6073_vm3 = vmmov 0  }
 0x7db   :  { %v1528_v42 = vsel %vm1512_vm4, %v1484_v29, %v1520_v36  ;;  %v5546_v43 = vpop.f32.mrb[28].mxu1  ;;  %v1538_v57 = vmul.f32 1.4142135, %v1530_v49 }
 0x7dc   :  { %v1536_v44 = vmul.f32 1.4142135, %v1528_v42  ;;  %v1505_v45 = vadd.f32 %v5546_v43, %v1408_v41  ;;  %v1496_v46 = vpop.f32.mrb[29].mxu1  ;;  %5566 = vmatprep.mubr.msk.f32.mxu0 %vm101_vm0, %v1535_v40  ;;  %v1862_v42 = vld [vmem:[%s9235_s6] sm:$0xff] }
 0x7dd   :  { %v1497_v50 = vadd.f32 %v1496_v46, %v1400_v38  ;;  %v5547_v51 = vpop.f32.mrb[30].mxu1  ;;  %v5946_v38 = vld [vmem:[%s9233_s4 + $0x28] sm:$0xff]   ;;  %s6056_s4 = smov 127  }
 0x7de   :  { %v1525_v52 = vmul.f32 0.2, %v1505_v45  ;;  %v1508_v53 = vadd.f32 %v5547_v51, %v1412_v48  ;;  %v1499_v54 = vpop.f32.mrb[31].mxu1  ;;  %5567 = vmatmul.mubr.msk.f32.vlgmr.msra.gmra.mrb[32].mxu0 %vm101_vm0, %v1536_v44  ;;  %vm1517_vm6 = vcmp.ge.f32.partialorder %v1505_v45, 0.0  ;;  %v5235_v48 = vld [vmem:[%s9235_s6 + $0x98] sm:$0xff] }
 0x7df   :  { %vm1515_vm7 = vcmp.ge.f32.partialorder %v1497_v50, 0.0  ;;  %v1523_v55 = vmul.f32 0.2, %v1497_v50  ;;  %v1500_v56 = vadd.f32 %v1499_v54, %v1404_v28  ;;  %5569 = vmatprep.mubr.msk.f32.mxu0 %vm101_vm0, %v1537_v47  ;;  %v5234_v28 = vld [vmem:[%s9235_s6 + $0x90] sm:$0xff] }
 0x7e0   :  { %v1526_v59 = vmul.f32 0.2, %v1508_v53  ;;  %v1533_v61 = vsel %vm1517_vm6, %v1505_v45, %v1525_v52  ;;  %vm1518_vm9 = vcmp.ge.f32.partialorder %v1508_v53, 0.0  ;;  %v1863_v45 = vld [vmem:[%s9235_s6 + $0x8] sm:$0xff]  ;;  %vm2780_vm6 = vcmask 261120  }
 0x7e1   :  { %v1531_v58 = vsel %vm1515_vm7, %v1497_v50, %v1523_v55  ;;  %vm1516_vm8 = vcmp.ge.f32.partialorder %v1500_v56, 0.0  ;;  %v1524_v60 = vmul.f32 0.2, %v1500_v56  ;;  %v1541_v2 = vmul.f32 1.4142135, %v1533_v61 }
 0x7e2   :  { %v1539_v62 = vmul.f32 1.4142135, %v1531_v58  ;;  %5570 = vmatmul.mubr.msk.f32.gmra.mrb[34].mxu0 %vm101_vm0, %v1538_v57  ;;  %v1534_v4 = vsel %vm1518_vm9, %v1508_v53, %v1526_v59  ;;  %v5233_v57 = vld [vmem:[%s9235_s6 + $0x88] sm:$0xff]  ;;  %v1866_v59 = vld [vmem:[%s9235_s6 + $0x20] sm:$0xff] }
 0x7e3   :  { %v1532_v63 = vsel %vm1516_vm8, %v1500_v56, %v1524_v60  ;;  %v1542_v5 = vmul.f32 1.4142135, %v1534_v4 }
 0x7e4   :  { %v1540_v1 = vmul.f32 1.4142135, %v1532_v63  ;;  %5572 = vmatprep.mubr.msk.f32.mxu0 %vm101_vm0, %v1539_v62 }
 0x7e6   :  { %5573 = vmatmul.mubr.msk.f32.gmra.mrb[36].mxu0 %vm101_vm0, %v1540_v1 }
 0x7e7   :  { %5575 = vmatprep.mubr.msk.f32.mxu0 %vm101_vm0, %v1541_v2  ;;  %v5236_v2 = vld [vmem:[%s9235_s6 + $0xa0] sm:$0xff] }
 0x7ea   :  { %5576 = vmatmul.mubr.msk.f32.gmra.mrb[38].mxu0 %vm101_vm0, %v1542_v5  ;;  %vm1894_vm0 = vcmask 130048  }
 0x8b1   :  { %v5568_v19 = vpop.f32.mrb[32].mxu0 }
 0x8b2   :  { %v1642_v20 = vpop.f32.mrb[33].mxu0 }
 0x8b3   :  { %v1697_v31 = vpack.c.bf16 %v5568_v19, %v1642_v20 }
 0x8b5   :  { %v5571_v21 = vpop.f32.mrb[34].mxu0  ;;  %5578 = vmatprep.subr.bf16.mxu1 %v1697_v31 }
 0x8b6   :  { %v1652_v25 = vpop.f32.mrb[35].mxu0  ;;  %5579 = vmatpush3.bf16.msra.mxu1 %v1697_v31 }
 0x8b7   :  { %v1698_v22 = vpack.c.bf16 %v5571_v21, %v1652_v25  ;;  %v5239_v21 = vld [vmem:[%s9235_s6 + $0xb8] sm:$0xff] }
 0x8b9   :  { %v5574_v26 = vpop.f32.mrb[36].mxu0  ;;  %5580 = vmatprep.subr.bf16.mxu1 %v1698_v22 }
 0x8ba   :  { %v1662_v32 = vpop.f32.mrb[37].mxu0  ;;  %5581 = vmatpush3.bf16.msra.mxu1 %v1698_v22 }
 0x8bb   :  { %v1699_v23 = vpack.c.bf16 %v5574_v26, %v1662_v32 }
 0x8bd   :  { %v5577_v11 = vpop.f32.mrb[38].mxu0  ;;  %5582 = vmatprep.subr.bf16.mxu1 %v1699_v23 }
 0x8be   :  { %v1672_v12 = vpop.f32.mrb[39].mxu0  ;;  %5583 = vmatpush3.bf16.msra.mxu1 %v1699_v23  ;;  %v1867_v23 = vld [vmem:[%s9235_s6 + $0x28] sm:$0xff] }
 0x8bf   :  { %v1700_v13 = vpack.c.bf16 %v5577_v11, %v1672_v12  ;;  %v2047_v11 = vld [vmem:[%s9234_s5 + $0x30] sm:$0xff] }
 0x8c1   :  { %5584 = vmatprep.subr.bf16.mxu1 %v1700_v13 }
 0x8c2   :  { %5585 = vmatpush3.bf16.msra.mxu1 %v1700_v13 }
 0x8c5   :  { %5587 = vmatmul.mubr.msk.bf16.vlgmr.msra.gmra.mrb[32].mxu1 %vm215_vm1, %v5942_v34  ;;  %v5237_v34 = vld [vmem:[%s9235_s6 + $0xa8] sm:$0xff] }
 0x8c6   :  { %5590 = vmatprep.mubr.msk.bf16.mxu1 %vm215_vm1, %v5943_v15 }
 0x8cd   :  { %5591 = vmatmul.mubr.msk.bf16.gmra.mrb[36].mxu1 %vm215_vm1, %v5944_v24 }
 0x8ce   :  { %5594 = vmatprep.mubr.msk.bf16.mxu1 %vm215_vm1, %v5945_v35  ;;  %v1872_v35 = vld [vmem:[%s9235_s6 + $0x50] sm:$0xff] }
 0x8d5   :  { %5595 = vmatmul.mubr.msk.bf16.gmra.mrb[40].mxu1 %vm215_vm1, %v5946_v38 }
 0x8d6   :  { %5598 = vmatprep.mubr.msk.bf16.mxu1 %vm215_vm1, %v5947_v27 }
 0x8dd   :  { %5599 = vmatmul.mubr.msk.bf16.gmra.mrb[44].mxu1 %vm215_vm1, %v5948_v14  ;;  %v1870_v14 = vld [vmem:[%s9235_s6 + $0x40] sm:$0xff]  ;;  %vm2024_vm1 = vcmask 7168  }
 0x998   :  { %v5588_v16 = vpop.f32.mrb[32].mxu1 }
 0x999   :  { %v1880_v18 = vmul.f32 %v5588_v16, %v1864_v17  ;;  %v1799_v29 = vpop.f32.mrb[33].mxu1  ;;  %v1962_v37 = vmul.f32 %v5588_v16, %v5234_v28  ;;  %v5243_v16 = vld [vmem:[%s9235_s6 + $0xd8] sm:$0xff] }
 0x99a   :  { %v1960_v33 = vmul.f32 %v5232_v39, %v1799_v29  ;;  %v5589_v36 = vpop.f32.mrb[34].mxu1  ;;  %v1878_v46 = vmul.f32 %v1862_v42, %v1799_v29  ;;  %v5241_v29 = vld [vmem:[%s9235_s6 + $0xc8] sm:$0xff]  ;;  %v1874_v42 = vld [vmem:[%s9235_s6 + $0x60] sm:$0xff] }
 0x99b   :  { %v1802_v40 = vpop.f32.mrb[35].mxu1  ;;  %v1901_v41 = vsel %vm1894_vm0, %v1880_v18, 0.0  ;;  %v1881_v43 = vmul.f32 %v5589_v36, %v1865_v30  ;;  %v1982_v47 = vsel %vm1894_vm0, %v1962_v37, 0.0  ;;  %v1963_v54 = vmul.f32 %v5589_v36, %v5235_v48  ;;  %v1876_v36 = vld [vmem:[%s9235_s6 + $0x70] sm:$0xff] }
 0x99c   :  { %1902 = vadd.xlane.f32.xlu1 %v1901_v41  ;;  %v1976_v44 = vsel %vm1894_vm0, %v1960_v33, 0.0  ;;  %v1879_v49 = vmul.f32 %v1863_v45, %v1802_v40  ;;  %v1895_v55 = vsel %vm1894_vm0, %v1878_v46, 0.0  ;;  %v1961_v60 = vmul.f32 %v5233_v57, %v1802_v40  ;;  %v1868_v37 = vld [vmem:[%s9235_s6 + $0x30] sm:$0xff] }
 0x99d   :  { %1977 = vadd.xlane.f32.xlu0 %v1976_v44  ;;  %v1904_v50 = vsel %vm1894_vm0, %v1881_v43, 0.0  ;;  %v1985_v61 = vsel %vm1894_vm0, %v1963_v54, 0.0  ;;  %v5238_v44 = vld [vmem:[%s9235_s6 + $0xb0] sm:$0xff] }
 0x99e   :  { %v1898_v58 = vsel %vm1894_vm0, %v1879_v49, 0.0  ;;  %v1979_v5 = vsel %vm1894_vm0, %v1961_v60, 0.0 }
 0x9a0   :  { %1983 = vadd.xlane.f32.xlu1 %v1982_v47  ;;  %v6626_v51 = vpop.f32.mrb[36].mxu1  ;;  %v5245_v47 = vld [vmem:[%s9235_s6 + $0xe8] sm:$0xff] }
 0x9a1   :  { %1905 = vadd.xlane.f32.xlu0 %v1904_v50  ;;  %v1815_v52 = vpop.f32.mrb[37].mxu1  ;;  %v1884_v43 = vmul.f32 %v6626_v51, %v1868_v37  ;;  %v1966_v48 = vmul.f32 %v6626_v51, %v5238_v44  ;;  %v5242_v50 = vld [vmem:[%s9235_s6 + $0xd0] sm:$0xff]  ;;  %v5240_v51 = vld [vmem:[%s9235_s6 + $0xc0] sm:$0xff]  ;;  %v2056_v37 = vld [vmem:[%s9234_s5 + $0x78] sm:$0xff] }
 0x9a2   :  { %v5593_v53 = vpop.f32.mrb[38].mxu1  ;;  %v1882_v63 = vmul.f32 %v1866_v59, %v1815_v52  ;;  %v1964_v7 = vmul.f32 %v5236_v2, %v1815_v52  ;;  %v1873_v59 = vld [vmem:[%s9235_s6 + $0x58] sm:$0xff]  ;;  %v5246_v2 = vld [vmem:[%s9235_s6 + $0xf0] sm:$0xff] }
 0x9a3   :  { %v1818_v56 = vpop.f32.mrb[39].mxu1  ;;  %v1885_v20 = vmul.f32 %v5593_v53, %v1869_v9  ;;  %v1967_v26 = vmul.f32 %v5593_v53, %v5239_v21  ;;  %v1913_v49 = vsel %vm1894_vm0, %v1884_v43, 0.0  ;;  %v1994_v54 = vsel %vm1894_vm0, %v1966_v48, 0.0  ;;  %v1877_v9 = vld [vmem:[%s9235_s6 + $0x78] sm:$0xff] }
 0x9a4   :  { %1896 = vadd.xlane.f32.xlu1 %v1895_v55  ;;  %v1907_v8 = vsel %vm1894_vm0, %v1882_v63, 0.0  ;;  %v1988_v19 = vsel %vm1894_vm0, %v1964_v7, 0.0  ;;  %v1883_v13 = vmul.f32 %v1867_v23, %v1818_v56  ;;  %v1965_v15 = vmul.f32 %v5237_v34, %v1818_v56  ;;  %v5244_v7 = vld [vmem:[%s9235_s6 + $0xe0] sm:$0xff] }
 0x9a5   :  { %1899 = vadd.xlane.f32.xlu0 %v1898_v58  ;;  %v1916_v32 = vsel %vm1894_vm0, %v1885_v20, 0.0  ;;  %v1997_v12 = vsel %vm1894_vm0, %v1967_v26, 0.0  ;;  %v1875_v20 = vld [vmem:[%s9235_s6 + $0x68] sm:$0xff] }
 0x9a6   :  { %v1910_v24 = vsel %vm1894_vm0, %v1883_v13, 0.0  ;;  %v1991_v38 = vsel %vm1894_vm0, %v1965_v15, 0.0 }
 0x9a8   :  { %1986 = vadd.xlane.f32.xlu1 %v1985_v61  ;;  %v6637_v62 = vpop.f32.mrb[40].mxu1 }
 0x9a9   :  { %v6639_v1 = vpop.f32.mrb[41].mxu1  ;;  %v1888_v27 = vmul.f32 %v6637_v62, %v1872_v35  ;;  %v1970_v55 = vmul.f32 %v6637_v62, %v5242_v50  ;;  %v1871_v62 = vld [vmem:[%s9235_s6 + $0x48] sm:$0xff] }
 0x9aa   :  { %v6644_v4 = vpop.f32.mrb[42].mxu1  ;;  %v1886_v39 = vmul.f32 %v1870_v14, %v6639_v1  ;;  %v1968_v57 = vmul.f32 %v5240_v51, %v6639_v1  ;;  %v2050_v50 = vld [vmem:[%s9234_s5 + $0x48] sm:$0xff]  ;;  %v2053_v51 = vld [vmem:[%s9234_s5 + $0x60] sm:$0xff] }
 0x9ab   :  { %v6647_v6 = vpop.f32.mrb[43].mxu1  ;;  %v1925_v17 = vsel %vm1894_vm0, %v1888_v27, 0.0  ;;  %v1971_v18 = vmul.f32 %v6644_v4, %v5243_v16  ;;  %v2006_v58 = vsel %vm1894_vm0, %v1970_v55, 0.0  ;;  %v1889_v60 = vmul.f32 %v6644_v4, %v1873_v59 }
 0x9ac   :  { %1980 = vadd.xlane.f32.xlu1 %v1979_v5  ;;  %v1919_v28 = vsel %vm1894_vm0, %v1886_v39, 0.0  ;;  %v1969_v33 = vmul.f32 %v5241_v29, %v6647_v6  ;;  %v2000_v61 = vsel %vm1894_vm0, %v1968_v57, 0.0  ;;  %v1887_v63 = vmul.f32 %v1871_v62, %v6647_v6  ;;  %v2049_v29 = vld [vmem:[%s9234_s5 + $0x40] sm:$0xff] }
 0x9ad   :  { %v2009_v30 = vsel %vm1894_vm0, %v1971_v18, 0.0  ;;  %v1928_v1 = vsel %vm1894_vm0, %v1889_v60, 0.0 }
 0x9ae   :  { %v2003_v40 = vsel %vm1894_vm0, %v1969_v33, 0.0  ;;  %v1922_v4 = vsel %vm1894_vm0, %v1887_v63, 0.0  ;;  %v2051_v33 = vld [vmem:[%s9234_s5 + $0x50] sm:$0xff]  ;;  %v2153_v63 = vld [vmem:[%s9236_s7] sm:$0xff] }
 0x9af   :  { %5634 = vmatprep.mubr.f32.mxu1 %v2153_v63 }
 0x9b0   :  { %1908 = vadd.xlane.f32.xlu1 %v1907_v8  ;;  %v6653_v10 = vpop.f32.mrb[44].mxu1 }
 0x9b1   :  { %v6656_v31 = vpop.f32.mrb[45].mxu1  ;;  %v1892_v41 = vmul.f32 %v6653_v10, %v1876_v36  ;;  %v1974_v5 = vmul.f32 %v6653_v10, %v5246_v2  ;;  %v2054_v36 = vld [vmem:[%s9234_s5 + $0x68] sm:$0xff] }
 0x9b2   :  { %v6661_v25 = vpop.f32.mrb[46].mxu1  ;;  %v1890_v46 = vmul.f32 %v1874_v42, %v6656_v31  ;;  %v1972_v8 = vmul.f32 %v5244_v7, %v6656_v31 }
 0x9b3   :  { %v6663_v22 = vpop.f32.mrb[47].mxu1  ;;  %v1937_v45 = vsel %vm1894_vm0, %v1892_v41, 0.0  ;;  %v2018_v6 = vsel %vm1894_vm0, %v1974_v5, 0.0 }
 0x9b4   :  { %1989 = vadd.xlane.f32.xlu1 %v1988_v19  ;;  %v1931_v52 = vsel %vm1894_vm0, %v1890_v46, 0.0  ;;  %v1973_v53 = vmul.f32 %v5245_v47, %v6663_v22  ;;  %v1893_v19 = vmul.f32 %v6661_v25, %v1877_v9  ;;  %v2012_v10 = vsel %vm1894_vm0, %v1972_v8, 0.0  ;;  %v2046_v47 = vld [vmem:[%s9234_s5 + $0x28] sm:$0xff] }
 0x9b5   :  { %v1891_v21 = vmul.f32 %v1875_v20, %v6663_v22 }
 0x9b6   :  { %v2015_v56 = vsel %vm1894_vm0, %v1973_v53, 0.0  ;;  %v1940_v31 = vsel %vm1894_vm0, %v1893_v19, 0.0 }
 0x9b7   :  { %v1934_v26 = vsel %vm1894_vm0, %v1891_v21, 0.0 }
 0x9b8   :  { %1917 = vadd.xlane.f32.xlu1 %v1916_v32  ;;  %v2060_v32 = vpop.permute.xlu0 %2059 }
 0x9bb   :  { %2089 = vperm.xlu0 %5865, %v2047_v11   ;;  %v2065_v11 = vpop.permute.xlu1 %2064 }
 0x9bc   :  { %1998 = vadd.xlane.f32.xlu1 %v1997_v12  ;;  %v6763_v23 = vpop.permute.xlu0 %2069 }
 0x9c0   :  { %1911 = vadd.xlane.f32.xlu1 %v1910_v24  ;;  %v6765_v12 = vpop.permute.xlu0 %2079 }
 0x9c4   :  { %1992 = vadd.xlane.f32.xlu1 %v1991_v38 }
 0x9c8   :  { %1926 = vadd.xlane.f32.xlu1 %v1925_v17 }
 0x9cc   :  { %1920 = vadd.xlane.f32.xlu1 %v1919_v28 }
 0x9d0   :  { %2010 = vadd.xlane.f32.xlu1 %v2009_v30 }
 0x9d4   :  { %2004 = vadd.xlane.f32.xlu1 %v2003_v40  ;;  %v5247_v40 = vld [vmem:[%s9235_s6 + $0xf8] sm:$0xff]  ;;  %s6059_s6 = smov 100  }
 0x9d5   :  { %v1975_v41 = vmul.f32 %v6661_v25, %v5247_v40  ;;  %v2048_v25 = vld [vmem:[%s9234_s5 + $0x38] sm:$0xff] }
 0x9d7   :  { %v2021_v42 = vsel %vm1894_vm0, %v1975_v41, 0.0 }
 0x9d8   :  { %1938 = vadd.xlane.f32.xlu1 %v1937_v45  ;;  %v2044_v45 = vld [vmem:[%s9234_s5 + $0x18] sm:$0xff] }
 0x9da   :  { %1914 = vadd.xlane.f32.xlu0 %v1913_v49 }
 0x9dc   :  { %1932 = vadd.xlane.f32.xlu1 %v1931_v52 }
 0x9de   :  { %1995 = vadd.xlane.f32.xlu0 %v1994_v54  ;;  %v2052_v54 = vld [vmem:[%s9234_s5 + $0x58] sm:$0xff] }
 0x9e0   :  { %2016 = vadd.xlane.f32.xlu1 %v2015_v56 }
 0x9e2   :  { %2007 = vadd.xlane.f32.xlu0 %v2006_v58  ;;  %v2055_v58 = vld [vmem:[%s9234_s5 + $0x70] sm:$0xff]  ;;  %s6082_s5 = smov 16  }
 0x9e6   :  { %2001 = vadd.xlane.f32.xlu0 %v2000_v61 }
 0x9ea   :  { %1929 = vadd.xlane.f32.xlu0 %v1928_v1 }
 0x9ee   :  { %1923 = vadd.xlane.f32.xlu0 %v1922_v4 }
 0x9f2   :  { %2019 = vadd.xlane.f32.xlu0 %v2018_v6 }
 0x9f6   :  { %2013 = vadd.xlane.f32.xlu0 %v2012_v10 }
 0x9fa   :  { %1941 = vadd.xlane.f32.xlu0 %v1940_v31 }
 0x9fe   :  { %1935 = vadd.xlane.f32.xlu0 %v1934_v26 }
 0xa29   :  { %v6767_v13 = vpop.xlane.xlu1 %1902 }
 0xa2a   :  { %v1978_v34 = vpop.xlane.xlu0 %1977 }
 0xa2d   :  { %v6769_v15 = vpop.xlane.xlu1 %1983 }
 0xa2e   :  { %v6772_v35 = vpop.xlane.xlu0 %1905 }
 0xa31   :  { %v1897_v24 = vpop.xlane.xlu1 %1896 }
 0xa32   :  { %v2025_v22 = vsel %vm2024_vm1, %v1897_v24, %v1978_v34  ;;  %v1900_v14 = vpop.xlane.xlu0 %1899 }
 0xa33   :  { %v6774_v38 = vadd.f32 %v2060_v32, %v2025_v22  ;;  %v2027_v32 = vsel %vm2024_vm1, %v6767_v13, %v6769_v15 }
 0xa34   :  { %v6863_v34 = vadd.f32 %v6763_v23, %v2027_v32 }
 0xa35   :  { %v6776_v27 = vpop.xlane.xlu1 %1986  ;;  %2363 = vrot.lane.b32.xlu1 %v6774_v38, %s6056_s4  ;;  %v2169_v28 = vmul.f32 %v6774_v38, %v6774_v38 }
 0xa36   :  { %v2028_v24 = vsel %vm2024_vm1, %v6772_v35, %v6776_v27 }
 0xa39   :  { %v1981_v17 = vpop.xlane.xlu1 %1980 }
 0xa3a   :  { %v2026_v39 = vsel %vm2024_vm1, %v1900_v14, %v1981_v17  ;;  %v2090_v49 = vpop.permute.xlu0 %2089 }
 0xa3b   :  { %v6781_v16 = vadd.f32 %v2065_v11, %v2026_v39  ;;  %v2171_v39 = vmul.f32 %v6863_v34, %v6863_v34 }
 0xa3d   :  { %2365 = vrot.lane.b32.xlu0 %v6781_v16, %s6056_s4  ;;  %v2170_v18 = vmul.f32 %v6781_v16, %v6781_v16  ;;  %v1909_v43 = vpop.xlane.xlu1 %1908 }
 0xa3f   :  { %v5703_v30 = vpack.c.bf16 %v2170_v18, %v2169_v28 }
 0xa41   :  { %5704 = vmatprep.subr.bf16.mxu1 %v5703_v30  ;;  %2099 = vperm.xlu0 %5865, %v2049_v29   ;;  %v1990_v44 = vpop.xlane.xlu1 %1989 }
 0xa42   :  { %5706 = vmatpush3.bf16.msra.mxu1 %v5703_v30  ;;  %v2029_v22 = vsel %vm2024_vm1, %v1909_v43, %v1990_v44 }
 0xa43   :  { %v6872_v17 = vadd.f32 %v6765_v12, %v2029_v22  ;;  %v6956_v22 = vld [vmem:[#allocation4 + $0x8] sm:$0x3] }
 0xa45   :  { %2109 = vperm.xlu0 %5865, %v2051_v33   ;;  %v6809_v46 = vpop.xlane.xlu1 %1917  ;;  %v2173_v12 = vmul.f32 %v6872_v17, %v6872_v17 }
 0xa49   :  { %2124 = vperm.xlu0 %5865, %v2054_v36   ;;  %v6814_v48 = vpop.xlane.xlu1 %1998 }
 0xa4a   :  { %v2032_v30 = vsel %vm2024_vm1, %v6809_v46, %v6814_v48 }
 0xa4d   :  { %2134 = vperm.xlu0 %5865, %v2056_v37   ;;  %v1912_v52 = vpop.xlane.xlu1 %1911 }
 0xa51   :  { %v1993_v55 = vpop.xlane.xlu1 %1992 }
 0xa52   :  { %v2030_v15 = vsel %vm2024_vm1, %v1912_v52, %v1993_v55 }
 0xa55   :  { %v6828_v57 = vpop.xlane.xlu1 %1926 }
 0xa59   :  { %2022 = vadd.xlane.f32.xlu1 %v2021_v42  ;;  %v1921_v60 = vpop.xlane.xlu1 %1920 }
 0xa5d   :  { %v6835_v62 = vpop.xlane.xlu1 %2010 }
 0xa61   :  { %v2005_v2 = vpop.xlane.xlu1 %2004 }
 0xa65   :  { %v6842_v4 = vpop.xlane.xlu1 %1938 }
 0xa67   :  { %v1915_v53 = vpop.xlane.xlu0 %1914 }
 0xa69   :  { %v6846_v8 = vpop.xlane.xlu1 %1932 }
 0xa6a   :  { %2074 = vperm.xlu1 %5866, %v2044_v45  }
 0xa6b   :  { %v1996_v56 = vpop.xlane.xlu0 %1995 }
 0xa6c   :  { %v2031_v23 = vsel %vm2024_vm1, %v1915_v53, %v1996_v56 }
 0xa6d   :  { %v2017_v9 = vpop.xlane.xlu1 %2016  ;;  %v6882_v18 = vadd.f32 %v2090_v49, %v2031_v23  ;;  %v2359_v23 = vld [vmem:[%s9238_s9] sm:$0xff] }
 0xa6e   :  { %2084 = vperm.xlu1 %5866, %v2046_v47  }
 0xa6f   :  { %v6833_v59 = vpop.xlane.xlu0 %2007  ;;  %v2175_v43 = vmul.f32 %v6882_v18, %v6882_v18 }
 0xa72   :  { %2094 = vperm.xlu1 %5866, %v2048_v25   ;;  %v2035_v25 = vsel %vm2024_vm1, %v6828_v57, %v6833_v59 }
 0xa73   :  { %v2002_v61 = vpop.xlane.xlu0 %2001 }
 0xa74   :  { %v2033_v40 = vsel %vm2024_vm1, %v1921_v60, %v2002_v61 }
 0xa76   :  { %2104 = vperm.xlu1 %5866, %v2050_v50  }
 0xa77   :  { %v6840_v1 = vpop.xlane.xlu0 %1929 }
 0xa78   :  { %v2036_v53 = vsel %vm2024_vm1, %v6840_v1, %v6835_v62 }
 0xa7a   :  { %2114 = vperm.xlu1 %5866, %v2052_v54  }
 0xa7b   :  { %v1924_v5 = vpop.xlane.xlu0 %1923 }
 0xa7c   :  { %v2034_v45 = vsel %vm2024_vm1, %v1924_v5, %v2005_v2 }
 0xa7e   :  { %2119 = vperm.xlu1 %5866, %v2053_v51  }
 0xa7f   :  { %v6844_v7 = vpop.xlane.xlu0 %2019 }
 0xa82   :  { %2129 = vperm.xlu1 %5866, %v2055_v58  }
 0xa83   :  { %v6848_v6 = vpop.xlane.xlu0 %2013 }
 0xa84   :  { %v2037_v61 = vsel %vm2024_vm1, %v6846_v8, %v6848_v6  ;;  %v2039_v8 = vsel %vm2024_vm1, %v6842_v4, %v6844_v7  ;;  %v2154_v4 = vld [vmem:[%s9236_s7 + $0x8] sm:$0xff]  ;;  %v2371_v7 = vlaneseq }
 0xa87   :  { %v6850_v19 = vpop.xlane.xlu0 %1941 }
 0xa8b   :  { %v1936_v21 = vpop.xlane.xlu0 %1935 }
 0xa8c   :  { %v2038_v57 = vsel %vm2024_vm1, %v1936_v21, %v2017_v9 }
 0xaa7   :  { %v2364_v10 = vpop.permute.xlu1 %2363 }
 0xaa8   :  { %v2369_v20 = vsub.f32 %v6774_v38, %v2364_v10 }
 0xaaa   :  { %2377 = vperm.xlu1 %5866, %v2369_v20  }
 0xaae   :  { %5867 = vset.pattern.permute.xlu1 %v9251_v3 }
 0xaaf   :  { %2388 = vperm.xlu1 %5867, %v6774_v38   ;;  %v2366_v31 = vpop.permute.xlu0 %2365 }
 0xab0   :  { %v2370_v26 = vsub.f32 %v6781_v16, %v2366_v31 }
 0xab2   :  { %2382 = vperm.xlu0 %5865, %v2370_v26  }
 0xab3   :  { %5869 = vset.pattern.permute.xlu1 %v9249_v0 }
 0xab6   :  { %5868 = vset.pattern.permute.xlu0 %v9251_v3 }
 0xab7   :  { %2392 = vperm.xlu0 %5868, %v6781_v16  }
 0xac0   :  { %v2100_v16 = vpop.permute.xlu0 %2099 }
 0xac1   :  { %v6894_v42 = vadd.f32 %v2100_v16, %v2033_v40 }
 0xac3   :  { %v2177_v50 = vmul.f32 %v6894_v42, %v6894_v42 }
 0xac4   :  { %v2110_v41 = vpop.permute.xlu0 %2109 }
 0xac5   :  { %v6906_v49 = vadd.f32 %v2110_v41, %v2035_v25 }
 0xac7   :  { %v2179_v59 = vmul.f32 %v6906_v49, %v6906_v49 }
 0xac8   :  { %v2125_v54 = vpop.permute.xlu0 %2124 }
 0xac9   :  { %v6918_v58 = vadd.f32 %v2125_v54, %v2038_v57 }
 0xacb   :  { %9376 = vst [vmem:[#allocation8_spill] sm:$0xff] %v6918_v58  ;;  %v2182_v20 = vmul.f32 %v6918_v58, %v6918_v58 }
 0xacc   :  { %v2135_v5 = vpop.permute.xlu0 %2134 }
 0xae6   :  { %v2023_v11 = vpop.xlane.xlu1 %2022 }
 0xae7   :  { %v2040_v62 = vsel %vm2024_vm1, %v6850_v19, %v2023_v11  ;;  %v6951_v11 = vshrl.u32 %v2371_v7, 7 }
 0xae8   :  { %v6931_v9 = vadd.f32 %v2135_v5, %v2040_v62 }
 0xaea   :  { %v2075_v38 = vpop.permute.xlu1 %2074  ;;  %9378 = vst [vmem:[#allocation10_spill] sm:$0xff] %v6931_v9  ;;  %v2184_v26 = vmul.f32 %v6931_v9, %v6931_v9 }
 0xaeb   :  { %v6869_v14 = vadd.f32 %v2075_v38, %v2028_v24  ;;  %v6954_v24 = vsub.s32 1, %v6951_v11 }
 0xaed   :  { %v2172_v13 = vmul.f32 %v6869_v14, %v6869_v14  ;;  %v6960_v38 = vrot.slane %v6956_v22, %v6954_v24 }
 0xaee   :  { %v2085_v35 = vpop.permute.xlu1 %2084 }
 0xaef   :  { %v6880_v27 = vadd.f32 %v2085_v35, %v2030_v15  ;;  %v5707_v28 = vpack.c.bf16 %v2172_v13, %v2171_v39 }
 0xaf1   :  { %5708 = vmatprep.subr.bf16.mxu1 %v5707_v28  ;;  %v2174_v29 = vmul.f32 %v6880_v27, %v6880_v27 }
 0xaf2   :  { %5710 = vmatpush3.bf16.msra.mxu1 %v5707_v28  ;;  %v2095_v33 = vpop.permute.xlu1 %2094 }
 0xaf3   :  { %v6891_v36 = vadd.f32 %v2095_v33, %v2032_v30  ;;  %v5711_v37 = vpack.c.bf16 %v2174_v29, %v2173_v12  ;;  %v6967_v12 = vsub.s32 4, %v6951_v11  ;;  %v6969_v29 = vld [vmem:[#allocation4] sm:$0xff] }
 0xaf4   :  { %v2360_v33 = vld [vmem:[%s9238_s9 + $0x8] sm:$0xff]  ;;  %s6062_s9 = smov 3  }
 0xaf5   :  { %5712 = vmatprep.subr.bf16.mxu1 %v5711_v37  ;;  %v2176_v44 = vmul.f32 %v6891_v36, %v6891_v36  ;;  %v2487_v41 = vrot.slane %v6969_v29, %v6967_v12 }
 0xaf6   :  { %5714 = vmatpush3.bf16.msra.mxu1 %v5711_v37  ;;  %v2105_v46 = vpop.permute.xlu1 %2104 }
 0xaf7   :  { %v6901_v47 = vadd.f32 %v2105_v46, %v2034_v45  ;;  %v5715_v48 = vpack.c.bf16 %v2176_v44, %v2175_v43 }
 0xaf9   :  { %5716 = vmatprep.subr.bf16.mxu1 %v5715_v48  ;;  %v2178_v52 = vmul.f32 %v6901_v47, %v6901_v47 }
 0xafa   :  { %5718 = vmatpush3.bf16.msra.mxu1 %v5715_v48  ;;  %v2115_v55 = vpop.permute.xlu1 %2114  ;;  %v5951_v48 = vld [vmem:[%s9239_s10 + $0x4] ss:$8 sps:$4 sm:$0xff]  }
 0xafb   :  { %v6915_v51 = vadd.f32 %v2115_v55, %v2036_v53  ;;  %v5719_v56 = vpack.c.bf16 %v2178_v52, %v2177_v50  ;;  %5250 = vmatprep.mubr.msk.bf16.mxu0 %vm1894_vm0, %v5951_v48  ;;  %v6992_v53 = vsub.s32 0, %v6951_v11 }
 0xafd   :  { %5720 = vmatprep.subr.bf16.mxu1 %v5719_v56  ;;  %v2180_v60 = vmul.f32 %v6915_v51, %v6915_v51  ;;  %9380 = vst [vmem:[#allocation12_spill] sm:$0xff] %v6992_v53 }
 0xafe   :  { %v2120_v63 = vpop.permute.xlu1 %2119  ;;  %5722 = vmatpush3.bf16.msra.mxu1 %v5719_v56  ;;  %v2419_v56 = vrot.slane %v6969_v29, %v6992_v53 }
 0xaff   :  { %v6929_v1 = vadd.f32 %v2120_v63, %v2037_v61  ;;  %v5723_v2 = vpack.c.bf16 %v2180_v60, %v2179_v59 }
 0xb01   :  { %9377 = vst [vmem:[#allocation9_spill] sm:$0xff] %v6929_v1  ;;  %5724 = vmatprep.subr.bf16.mxu1 %v5723_v2  ;;  %v2181_v10 = vmul.f32 %v6929_v1, %v6929_v1 }
 0xb02   :  { %v2130_v6 = vpop.permute.xlu1 %2129  ;;  %5726 = vmatpush3.bf16.msra.mxu1 %v5723_v2 }
 0xb03   :  { %v6940_v19 = vadd.f32 %v2130_v6, %v2039_v8  ;;  %v5727_v21 = vpack.c.bf16 %v2182_v20, %v2181_v10  ;;  %v2440_v20 = vrot.slane %v6969_v29, %v6954_v24 }
 0xb05   :  { %9379 = vst [vmem:[#allocation11_spill] sm:$0xff] %v6940_v19  ;;  %5728 = vmatprep.subr.bf16.mxu1 %v5727_v21  ;;  %v2183_v31 = vmul.f32 %v6940_v19, %v6940_v19 }
 0xb06   :  { %5730 = vmatpush3.bf16.msra.mxu1 %v5727_v21 }
 0xb07   :  { %v5731_v32 = vpack.c.bf16 %v2184_v26, %v2183_v31 }
 0xb09   :  { %5732 = vmatprep.subr.bf16.mxu1 %v5731_v32 }
 0xb0a   :  { %5734 = vmatpush3.bf16.msra.mxu1 %v5731_v32  ;;  %v7000_v32 = vsub.s32 2, %v6951_v11 }
 0xb0b   :  { %3018 = vmatprep.subr.bf16.mxu1 %v9249_v0 }
 0xb0d   :  { %5635 = vmatmul.mubr.f32.vlgmr.msra.gmra.mrb[48].mxu1 %v2154_v4 }
 0xb29   :  { %v2378_v39 = vpop.permute.xlu1 %2377 }
 0xb2a   :  { %v2385_v13 = vmul.f32 %v2378_v39, %v6960_v38 }
 0xb2e   :  { %v2389_v15 = vpop.permute.xlu1 %2388 }
 0xb2f   :  { %v2395_v16 = vadd.f32 %v2389_v15, %v2385_v13  ;;  %v2461_v15 = vrot.slane %v6969_v29, %v7000_v32 }
 0xb31   :  { %v2397_v35 = vmul.f32 %v2395_v16, %v2359_v23  ;;  %v2383_v28 = vpop.permute.xlu0 %2382 }
 0xb32   :  { %v2386_v30 = vmul.f32 %v2383_v28, %v6960_v38 }
 0xb33   :  { %2401 = vrot.lane.b32.xlu1 %v2397_v35, %s6057_s18  ;;  %2407 = vrot.lane.b32.xlu0 %v2397_v35, %s6058_s19  ;;  %v6977_v44 = vmul.f32 %v2487_v41, %v2397_v35 }
 0xb36   :  { %v2393_v37 = vpop.permute.xlu0 %2392 }
 0xb37   :  { %v2396_v40 = vadd.f32 %v2393_v37, %v2386_v30  ;;  %2422 = vrot.lane.b32.xlu0 %v2397_v35, %s6059_s6  ;;  %v7006_v37 = vsub.s32 3, %v6951_v11 }
 0xb39   :  { %v2398_v43 = vmul.f32 %v2396_v40, %v2360_v33 }
 0xb3b   :  { %2428 = vrot.lane.b32.xlu0 %v2397_v35, %s6060_s20  ;;  %2403 = vrot.lane.b32.xlu1 %v2398_v43, %s6057_s18  ;;  %v6979_v45 = vmul.f32 %v2487_v41, %v2398_v43 }
 0xb3d   :  { %v2580_v46 = vpack.c.bf16 %v6979_v45, %v6977_v44 }
 0xb3f   :  { %2443 = vrot.lane.b32.xlu0 %v2397_v35, %s6061_s21  ;;  %2409 = vrot.lane.b32.xlu1 %v2398_v43, %s6058_s19 }
 0xb43   :  { %2449 = vrot.lane.b32.xlu0 %v2397_v35, %s6062_s9  ;;  %2424 = vrot.lane.b32.xlu1 %v2398_v43, %s6059_s6  ;;  %s6076_s6 = smov 7  }
 0xb47   :  { %2464 = vrot.lane.b32.xlu0 %v2397_v35, %s6063_s22  ;;  %2430 = vrot.lane.b32.xlu1 %v2398_v43, %s6060_s20 }
 0xb4b   :  { %2470 = vrot.lane.b32.xlu0 %v2397_v35, %s6064_s26  ;;  %2445 = vrot.lane.b32.xlu1 %v2398_v43, %s6061_s21  ;;  %s6079_s21 = smov 119  }
 0xb4f   :  { %2490 = vrot.lane.b32.xlu0 %v2397_v35, %s6056_s4  ;;  %2451 = vrot.lane.b32.xlu1 %v2398_v43, %s6062_s9 }
 0xb53   :  { %2496 = vrot.lane.b32.xlu0 %v2397_v35, %s6065_s23  ;;  %2466 = vrot.lane.b32.xlu1 %v2398_v43, %s6063_s22 }
 0xb57   :  { %2511 = vrot.lane.b32.xlu0 %v2397_v35, %s6066_s28  ;;  %2472 = vrot.lane.b32.xlu1 %v2398_v43, %s6064_s26 }
 0xb5b   :  { %2517 = vrot.lane.b32.xlu0 %v2397_v35, %s6067_s29  ;;  %2492 = vrot.lane.b32.xlu1 %v2398_v43, %s6056_s4 }
 0xb5f   :  { %2532 = vrot.lane.b32.xlu0 %v2397_v35, %s6068_s27  ;;  %2498 = vrot.lane.b32.xlu1 %v2398_v43, %s6065_s23 }
 0xb63   :  { %2538 = vrot.lane.b32.xlu0 %v2397_v35, %s6069_s14  ;;  %2513 = vrot.lane.b32.xlu1 %v2398_v43, %s6066_s28 }
 0xb67   :  { %2553 = vrot.lane.b32.xlu0 %v2397_v35, %s6070_s3  ;;  %2519 = vrot.lane.b32.xlu1 %v2398_v43, %s6067_s29 }
 0xb6b   :  { %2559 = vrot.lane.b32.xlu0 %v2397_v35, %s6071_s24  ;;  %2534 = vrot.lane.b32.xlu1 %v2398_v43, %s6068_s27 }
 0xb6f   :  { %2540 = vrot.lane.b32.xlu1 %v2398_v43, %s6069_s14  ;;  %s6080_s14 = smov 112  }
 0xb73   :  { %2555 = vrot.lane.b32.xlu1 %v2398_v43, %s6070_s3  ;;  %s6077_s3 = smov 121  }
 0xb77   :  { %2561 = vrot.lane.b32.xlu1 %v2398_v43, %s6071_s24  ;;  %s6081_s24 = smov 17  }
 0xba5   :  { %v2408_v25 = vpop.permute.xlu0 %2407  ;;  %v2402_v50 = vpop.permute.xlu1 %2401 }
 0xba6   :  { %v2414_v57 = vsel %vm2413_vm10, %v2402_v50, %v2408_v25  ;;  %v2481_v25 = vrot.slane %v6969_v29, %v7006_v37 }
 0xba7   :  { %v2420_v62 = vmul.f32 %v2419_v56, %v2414_v57  ;;  %v7014_v57 = vsub.s32 5, %v6951_v11 }
 0xba9   :  { %v2423_v52 = vpop.permute.xlu0 %2422 }
 0xbad   :  { %v2404_v54 = vpop.permute.xlu1 %2403  ;;  %v2429_v55 = vpop.permute.xlu0 %2428 }
 0xbae   :  { %v2435_v8 = vsel %vm2434_vm11, %v2423_v52, %v2429_v55 }
 0xbaf   :  { %v2441_v26 = vmul.f32 %v2440_v20, %v2435_v8  ;;  %v7020_v8 = vsub.s32 6, %v6951_v11 }
 0xbb1   :  { %v2410_v59 = vpop.permute.xlu1 %2409  ;;  %v2444_v60 = vpop.permute.xlu0 %2443  ;;  %9381 = vst [vmem:[#allocation13_spill] sm:$0xff] %v7020_v8 }
 0xbb2   :  { %v2415_v61 = vsel %vm2413_vm10, %v2404_v54, %v2410_v59 }
 0xbb3   :  { %v2421_v63 = vmul.f32 %v2419_v56, %v2415_v61 }
 0xbb5   :  { %v2576_v2 = vpack.c.bf16 %v2421_v63, %v2420_v62  ;;  %v2425_v5 = vpop.permute.xlu1 %2424  ;;  %v2450_v10 = vpop.permute.xlu0 %2449  ;;  %v2508_v63 = vrot.slane %v6969_v29, %v7014_v57 }
 0xbb6   :  { %v2456_v16 = vsel %vm2455_vm12, %v2444_v60, %v2450_v10 }
 0xbb7   :  { %2598 = vmatpush1.bf16.msra.mxu0 %v2576_v2  ;;  %v2462_v33 = vmul.f32 %v2461_v15, %v2456_v16 }
 0xbb8   :  { %2599 = vmatprep.subr.bf16.mxu0 %v9249_v0 }
 0xbb9   :  { %v2431_v6 = vpop.permute.xlu1 %2430  ;;  %v2465_v21 = vpop.permute.xlu0 %2464 }
 0xbba   :  { %v2436_v31 = vsel %vm2434_vm11, %v2425_v5, %v2431_v6 }
 0xbbb   :  { %v2442_v4 = vmul.f32 %v2440_v20, %v2436_v31 }
 0xbbd   :  { %v2577_v39 = vpack.c.bf16 %v2442_v4, %v2441_v26  ;;  %v2446_v13 = vpop.permute.xlu1 %2445  ;;  %v2471_v23 = vpop.permute.xlu0 %2470  ;;  %v2529_v4 = vrot.slane %v6969_v29, %v7020_v8 }
 0xbbe   :  { %v2476_v50 = vsel %vm2024_vm1, %v2465_v21, %v2471_v23 }
 0xbbf   :  { %2600 = vmatpush1.bf16.msra.mxu0 %v2577_v39  ;;  %v2482_v56 = vmul.f32 %v2481_v25, %v2476_v50 }
 0xbc0   :  { %2601 = vmatprep.subr.bf16.mxu0 %v9249_v0 }
 0xbc1   :  { %v2452_v35 = vpop.permute.xlu1 %2451  ;;  %v2491_v28 = vpop.permute.xlu0 %2490 }
 0xbc2   :  { %v2457_v30 = vsel %vm2455_vm12, %v2446_v13, %v2452_v35  ;;  %v7030_v35 = vsub.s32 7, %v6951_v11 }
 0xbc3   :  { %v2463_v40 = vmul.f32 %v2461_v15, %v2457_v30 }
 0xbc5   :  { %v2578_v41 = vpack.c.bf16 %v2463_v40, %v2462_v33  ;;  %v2467_v43 = vpop.permute.xlu1 %2466  ;;  %v2497_v48 = vpop.permute.xlu0 %2496 }
 0xbc6   :  { %v2503_v2 = vsel %vm2502_vm13, %v2491_v28, %v2497_v48  ;;  %v2550_v28 = vrot.slane %v6969_v29, %v7030_v35  ;;  %v2571_v29 = vrot.slane %v6956_v22, %v6992_v53  ;;  %v2334_v22 = vld [vmem:[%s9237_s8] sm:$0xff] }
 0xbc7   :  { %2602 = vmatpush1.bf16.msra.mxu0 %v2578_v41  ;;  %v2509_v20 = vmul.f32 %v2508_v63, %v2503_v2 }
 0xbc8   :  { %2603 = vmatprep.subr.bf16.mxu0 %v9249_v0 }
 0xbc9   :  { %v2473_v52 = vpop.permute.xlu1 %2472  ;;  %v2512_v54 = vpop.permute.xlu0 %2511 }
 0xbca   :  { %v2477_v55 = vsel %vm2024_vm1, %v2467_v43, %v2473_v52 }
 0xbcb   :  { %v2483_v59 = vmul.f32 %v2481_v25, %v2477_v55 }
 0xbcd   :  { %v2579_v60 = vpack.c.bf16 %v2483_v59, %v2482_v56  ;;  %v2493_v61 = vpop.permute.xlu1 %2492  ;;  %v2518_v62 = vpop.permute.xlu0 %2517 }
 0xbce   :  { %v2524_v39 = vsel %vm2523_vm14, %v2512_v54, %v2518_v62 }
 0xbcf   :  { %2604 = vmatpush1.bf16.msra.mxu0 %v2579_v60  ;;  %v2530_v16 = vmul.f32 %v2529_v4, %v2524_v39 }
 0xbd0   :  { %2605 = vmatprep.subr.bf16.mxu0 %v9249_v0 }
 0xbd1   :  { %v2499_v5 = vpop.permute.xlu1 %2498  ;;  %v2533_v21 = vpop.permute.xlu0 %2532 }
 0xbd2   :  { %v2504_v10 = vsel %vm2502_vm13, %v2493_v61, %v2499_v5 }
 0xbd3   :  { %v2510_v6 = vmul.f32 %v2508_v63, %v2504_v10  ;;  %2606 = vmatpush1.bf16.msra.mxu0 %v2580_v46 }
 0xbd4   :  { %2607 = vmatprep.subr.bf16.mxu0 %v9249_v0 }
 0xbd5   :  { %v2581_v31 = vpack.c.bf16 %v2510_v6, %v2509_v20  ;;  %v2514_v26 = vpop.permute.xlu1 %2513  ;;  %v2539_v13 = vpop.permute.xlu0 %2538  ;;  %v5949_v20 = vld [vmem:[%s9239_s10] ss:$8 sps:$4 sm:$0xff]  }
 0xbd6   :  { %v2545_v33 = vsel %vm2544_vm15, %v2533_v21, %v2539_v13 }
 0xbd7   :  { %2608 = vmatpush1.bf16.msra.mxu0 %v2581_v31  ;;  %v2551_v11 = vmul.f32 %v2550_v28, %v2545_v33 }
 0xbd8   :  { %2609 = vmatprep.subr.bf16.mxu0 %v9249_v0 }
 0xbd9   :  { %v2520_v23 = vpop.permute.xlu1 %2519  ;;  %v2554_v30 = vpop.permute.xlu0 %2553 }
 0xbda   :  { %v2525_v15 = vsel %vm2523_vm14, %v2514_v26, %v2520_v23 }
 0xbdb   :  { %v2531_v44 = vmul.f32 %v2529_v4, %v2525_v15  ;;  %v2335_v4 = vld [vmem:[%s9237_s8 + $0x8] sm:$0xff] }
 0xbdd   :  { %v2582_v45 = vpack.c.bf16 %v2531_v44, %v2530_v16  ;;  %v2535_v46 = vpop.permute.xlu1 %2534  ;;  %v2560_v54 = vpop.permute.xlu0 %2559  ;;  %v6072_v16 = vmov 0.0   ;;  %v2157_v44 = vld [vmem:[%s9236_s7 + $0x20] sm:$0xff] }
 0xbde   :  { %v2566_v59 = vsel %vm2565_vm2, %v2554_v30, %v2560_v54 }
 0xbdf   :  { %2610 = vmatpush1.bf16.msra.mxu0 %v2582_v45  ;;  %v2572_v62 = vmul.f32 %v2571_v29, %v2566_v59  ;;  %v2158_v45 = vld [vmem:[%s9236_s7 + $0x28] sm:$0xff] }
 0xbe0   :  { %v5636_v40 = vpop.f32.mrb[48].mxu1  ;;  %2611 = vmatprep.subr.bf16.mxu0 %v9249_v0 }
 0xbe1   :  { %v2257_v41 = vadd.f32 1e-08, %v5636_v40  ;;  %v2251_v43 = vpop.f32.mrb[49].mxu1  ;;  %v2541_v48 = vpop.permute.xlu1 %2540 }
 0xbe2   :  { %v2252_v25 = vadd.f32 1e-08, %v2251_v43  ;;  %v2546_v50 = vsel %vm2544_vm15, %v2535_v46, %v2541_v48 }
 0xbe3   :  { %5966 = vrsqrt.f32 %v2257_v41  ;;  %v2552_v52 = vmul.f32 %v2550_v28, %v2546_v50 }
 0xbe4   :  { %5968 = vrsqrt.f32 %v2252_v25 }
 0xbe5   :  { %v2583_v55 = vpack.c.bf16 %v2552_v52, %v2551_v11  ;;  %v2556_v56 = vpop.permute.xlu1 %2555 }
 0xbe7   :  { %2612 = vmatpush1.bf16.msra.mxu0 %v2583_v55 }
 0xbe8   :  { %2613 = vmatprep.subr.bf16.mxu0 %v9249_v0 }
 0xbe9   :  { %v2562_v60 = vpop.permute.xlu1 %2561 }
 0xbea   :  { %v2567_v61 = vsel %vm2565_vm2, %v2556_v56, %v2562_v60 }
 0xbeb   :  { %v2573_v63 = vmul.f32 %v2571_v29, %v2567_v61 }
 0xbed   :  { %v5967_v2 = vpop.eup %5966  ;;  %v2584_v5 = vpack.c.bf16 %v2573_v63, %v2572_v62 }
 0xbee   :  { %v5969_v10 = vpop.eup %5968  ;;  %2642 = vrot.lane.b32.xlu1 %v5967_v2, %s6056_s4 }
 0xbef   :  { %2640 = vrot.lane.b32.xlu0 %v5969_v10, %s6056_s4  ;;  %2614 = vmatpush1.bf16.msra.mxu0 %v2584_v5 }
 0xbf0   :  { %5658 = vmatprep.subr.bf16.mxu0 %v6072_v16 }
 0xbf2   :  { %2696 = vrot.lane.b32.xlu1 %v6869_v14, %s6056_s4  ;;  %2630 = vmatmul.mubr.bf16.vlgmr.msra.gmra.mrb[40].mxu0 %v5949_v20 }
 0xbf3   :  { %2694 = vrot.lane.b32.xlu0 %v6863_v34, %s6056_s4  ;;  %5660 = vmatprep.mubr.msk.bf16.mxu0 %vm6073_vm3, %v6072_v16 }
 0xbf6   :  { %2674 = vperm.xlu1 %5869, %v2334_v22  }
 0xbf7   :  { %2665 = vperm.xlu0 %5868, %v5967_v2  }
 0xbfa   :  { %5870 = vset.pattern.permute.xlu1 %v9251_v3 }
 0xbfb   :  { %2661 = vperm.xlu1 %5870, %v5969_v10   ;;  %5872 = vset.pattern.permute.xlu0 %v9249_v0 }
 0xbff   :  { %5871 = vset.pattern.permute.xlu1 %v9249_v0 }
 0xc60   :  { %v2643_v6 = vpop.permute.xlu1 %2642 }
 0xc61   :  { %v2647_v21 = vsub.f32 %v5967_v2, %v2643_v6  ;;  %v2641_v31 = vpop.permute.xlu0 %2640 }
 0xc62   :  { %v2646_v26 = vsub.f32 %v5969_v10, %v2641_v31 }
 0xc63   :  { %2655 = vperm.xlu1 %5871, %v2647_v21  }
 0xc64   :  { %2650 = vperm.xlu0 %5872, %v2646_v26   ;;  %v2697_v13 = vpop.permute.xlu1 %2696 }
 0xc65   :  { %v2695_v39 = vpop.permute.xlu0 %2694  ;;  %v2701_v15 = vsub.f32 %v6869_v14, %v2697_v13 }
 0xc66   :  { %v2700_v23 = vsub.f32 %v6863_v34, %v2695_v39 }
 0xc67   :  { %2679 = vperm.xlu1 %5871, %v2335_v4  }
 0xc68   :  { %2704 = vperm.xlu0 %5872, %v2700_v23  }
 0xc6b   :  { %2709 = vperm.xlu1 %5871, %v2701_v15  }
 0xc6c   :  { %5874 = vset.pattern.permute.xlu0 %v9251_v3 }
 0xc6d   :  { %2719 = vperm.xlu0 %5874, %v6869_v14   ;;  %v2156_v14 = vld [vmem:[%s9236_s7 + $0x18] sm:$0xff] }
 0xc6f   :  { %5873 = vset.pattern.permute.xlu1 %v9251_v3 }
 0xc70   :  { %2715 = vperm.xlu1 %5873, %v6863_v34   ;;  %v2155_v34 = vld [vmem:[%s9236_s7 + $0x10] sm:$0xff] }
 0xc71   :  { %5875 = vset.pattern.permute.xlu0 %v9249_v0  ;;  %5637 = vmatprep.mubr.f32.mxu1 %v2155_v34 }
 0xc72   :  { %5638 = vmatmul.mubr.f32.gmra.mrb[50].mxu1 %v2156_v14 }
 0xc73   :  { %5640 = vmatprep.mubr.f32.mxu1 %v2157_v44  ;;  %v2776_v44 = vld [vmem:[%s9241_s12] sm:$0xff] }
 0xc74   :  { %2872 = vrot.lane.b32.xlu1 %v6872_v17, %s6056_s4 }
 0xc75   :  { %5876 = vset.pattern.permute.xlu1 %v9249_v0  ;;  %v2675_v40 = vpop.permute.xlu1 %2674 }
 0xc76   :  { %5641 = vmatmul.mubr.f32.gmra.mrb[52].mxu1 %v2158_v45  ;;  %v2666_v43 = vpop.permute.xlu0 %2665  ;;  %v2726_v45 = vld [vmem:[#allocation2] sm:$0x3] }
 0xc78   :  { %2874 = vrot.lane.b32.xlu1 %v6880_v27, %s6056_s4 }
 0xc7a   :  { %v2662_v41 = vpop.permute.xlu1 %2661 }
 0xcc5   :  { %v2631_v46 = vpop.f32.mrb[40].mxu0 }
 0xcc6   :  { %v2633_v28 = vpop.f32.mrb[41].mxu0 }
 0xcc7   :  { %v2634_v30 = vpop.f32.mrb[42].mxu0  ;;  %v6074_v28 = vmov 0.0|0.0  }
 0xcc8   :  { %v2636_v33 = vpop.f32.mrb[43].mxu0 }
 0xce2   :  { %v2656_v48 = vpop.permute.xlu1 %2655 }
 0xce3   :  { %v2659_v25 = vmul.f32 %v2656_v48, %v6960_v38  ;;  %v2651_v50 = vpop.permute.xlu0 %2650 }
 0xce4   :  { %v2658_v11 = vmul.f32 %v2651_v50, %v6960_v38 }
 0xce5   :  { %v2669_v52 = vadd.f32 %v2666_v43, %v2659_v25 }
 0xce6   :  { %v2668_v54 = vadd.f32 %v2662_v41, %v2658_v11  ;;  %v2680_v55 = vpop.permute.xlu1 %2679  ;;  %v2779_v41 = vld [vmem:[%s9241_s12 + $0x18] sm:$0xff] }
 0xce7   :  { %v2671_v56 = vmul.f32 %v2669_v52, %v2634_v30  ;;  %v2705_v29 = vpop.permute.xlu0 %2704 }
 0xce8   :  { %v2670_v59 = vmul.f32 %v2668_v54, %v2631_v46  ;;  %v2712_v22 = vmul.f32 %v2705_v29, %v6960_v38 }
 0xce9   :  { %v2683_v60 = vadd.f32 %v2680_v55, %v2671_v56 }
 0xcea   :  { %v2682_v61 = vadd.f32 %v2675_v40, %v2670_v59  ;;  %v2710_v62 = vpop.permute.xlu1 %2709  ;;  %v2778_v40 = vld [vmem:[%s9241_s12 + $0x10] sm:$0xff] }
 0xceb   :  { %vm2685_vm4 = vcmp.ge.f32.partialorder %v2683_v60, 0.0  ;;  %v2687_v63 = vmul.f32 0.2, %v2683_v60  ;;  %v2713_v2 = vmul.f32 %v2710_v62, %v6960_v38  ;;  %v2777_v38 = vld [vmem:[%s9241_s12 + $0x8] sm:$0xff]  ;;  %v5739_v43 = vpack.c.bf16 %v2779_v41, %v2778_v40  ;;  %v2167_v40 = vld [vmem:[%s9236_s7 + $0x70] sm:$0xff]  ;;  %v2168_v41 = vld [vmem:[%s9236_s7 + $0x78] sm:$0xff] }
 0xcec   :  { %v2720_v5 = vpop.permute.xlu0 %2719  ;;  %vm2684_vm5 = vcmp.ge.f32.partialorder %v2682_v61, 0.0  ;;  %v2686_v10 = vmul.f32 0.2, %v2682_v61  ;;  %v5736_v30 = vpack.c.bf16 %v2777_v38, %v2776_v44  ;;  %v2161_v44 = vld [vmem:[%s9236_s7 + $0x40] sm:$0xff]  ;;  %v2162_v38 = vld [vmem:[%s9236_s7 + $0x48] sm:$0xff] }
 0xced   :  { %v2689_v20 = vsel %vm2685_vm4, %v2683_v60, %v2687_v63  ;;  %v2723_v21 = vadd.f32 %v2720_v5, %v2713_v2 }
 0xcee   :  { %v2691_v6 = vmul.f32 1.4142135, %v2689_v20  ;;  %v2688_v31 = vsel %vm2684_vm5, %v2682_v61, %v2686_v10  ;;  %v7132_v10 = vld [vmem:[%s9244_s15] sm:$0xff] }
 0xcef   :  { %v2716_v26 = vpop.permute.xlu1 %2715  ;;  %v2690_v4 = vmul.f32 1.4142135, %v2688_v31 }
 0xcf0   :  { %v2722_v39 = vadd.f32 %v2716_v26, %v2712_v22  ;;  %v2725_v13 = vmul.f32 %v2723_v21, %v2691_v6  ;;  %v7138_v21 = vrot.slane %v7132_v10, %v6967_v12 }
 0xcf2   :  { %v2724_v23 = vmul.f32 %v2722_v39, %v2690_v4 }
 0xcf3   :  { %v2873_v15 = vpop.permute.xlu1 %2872 }
 0xcf4   :  { %v2727_v34 = vpack.c.bf16 %v2725_v13, %v2724_v23  ;;  %v2878_v14 = vsub.f32 %v6872_v17, %v2873_v15  ;;  %v2159_v15 = vld [vmem:[%s9236_s7 + $0x30] sm:$0xff] }
 0xcf5   :  { %5643 = vmatprep.mubr.f32.mxu1 %v2159_v15 }
 0xcf6   :  { %2886 = vperm.xlu0 %5875, %v2878_v14   ;;  %5659 = vmatpush3.bf16.msra.mxu0 %v2727_v34  ;;  %v2160_v34 = vld [vmem:[%s9236_s7 + $0x38] sm:$0xff] }
 0xcf7   :  { %v2875_v46 = vpop.permute.xlu1 %2874  ;;  %5735 = vmatprep.subr.bf16.mxu0 %v6074_v28  ;;  %5644 = vmatmul.mubr.f32.gmra.mrb[54].mxu1 %v2160_v34 }
 0xcf8   :  { %v2879_v33 = vsub.f32 %v6880_v27, %v2875_v46  ;;  %5646 = vmatprep.mubr.f32.mxu1 %v2161_v44  ;;  %v2164_v46 = vld [vmem:[%s9236_s7 + $0x58] sm:$0xff] }
 0xcf9   :  { %5661 = vmatmul.mubr.msk.bf16.vlgmr.msra.gmra.mrb[44].mxu0 %vm1894_vm0, %v2726_v45  ;;  %v2163_v45 = vld [vmem:[%s9236_s7 + $0x50] sm:$0xff] }
 0xcfa   :  { %2891 = vperm.xlu1 %5876, %v2879_v33   ;;  %5878 = vset.pattern.permute.xlu0 %v9251_v3  ;;  %v2166_v33 = vld [vmem:[%s9236_s7 + $0x68] sm:$0xff] }
 0xcfb   :  { %5737 = vmatpush3.bf16.msra.mxu0 %v5736_v30  ;;  %2901 = vperm.xlu0 %5878, %v6880_v27   ;;  %v2165_v30 = vld [vmem:[%s9236_s7 + $0x60] sm:$0xff] }
 0xcfc   :  { %5738 = vmatprep.subr.bf16.mxu0 %v6074_v28  ;;  %5672 = vmatprep.mubr.msk.f32.mxu0 %vm6073_vm3, %v6072_v16 }
 0xcfd   :  { %5647 = vmatmul.mubr.f32.gmra.mrb[56].mxu1 %v2162_v38 }
 0xcfe   :  { %5877 = vset.pattern.permute.xlu1 %v9251_v3  ;;  %5649 = vmatprep.mubr.f32.mxu1 %v2163_v45 }
 0xcff   :  { %5740 = vmatpush3.bf16.msra.mxu0 %v5739_v43  ;;  %2897 = vperm.xlu1 %5877, %v6872_v17   ;;  %v7119_v17 = vld [vmem:[%s9244_s15 + $0x8] sm:$0x3] }
 0xd00   :  { %3221 = vmatprep.subr.bf16.mxu0 %v9249_v0  ;;  %v7125_v55 = vrot.slane %v7119_v17, %v6954_v24 }
 0xd01   :  { %5650 = vmatmul.mubr.f32.gmra.mrb[58].mxu1 %v2164_v46 }
 0xd02   :  { %5673 = vmatmul.mubr.msk.f32.vlgmr.msra.gmra.mrb[48].mxu0 %vm2780_vm6, %v2690_v4  ;;  %5652 = vmatprep.mubr.f32.mxu1 %v2165_v30 }
 0xd03   :  { %5675 = vmatprep.mubr.msk.f32.mxu0 %vm6073_vm3, %v6072_v16  ;;  %5879 = vset.pattern.permute.xlu1 %v9249_v0 }
 0xd05   :  { %5653 = vmatmul.mubr.f32.gmra.mrb[60].mxu1 %v2166_v33  ;;  %v7239_v33 = vrot.slane %v7132_v10, %v7014_v57 }
 0xd06   :  { %5676 = vmatmul.mubr.msk.f32.gmra.mrb[50].mxu0 %vm2780_vm6, %v2691_v6  ;;  %5655 = vmatprep.mubr.f32.mxu1 %v2167_v40 }
 0xd07   :  { %5678 = vmatprep.mubr.msk.f32.mxu0 %vm6073_vm3, %v6072_v16 }
 0xd09   :  { %5656 = vmatmul.mubr.f32.gmra.mrb[62].mxu1 %v2168_v41 }
 0xd45   :  { %v5639_v27 = vpop.f32.mrb[50].mxu1 }
 0xd46   :  { %v2261_v48 = vpop.f32.mrb[51].mxu1  ;;  %v5954_v27 = vld [vmem:[%s9239_s10 + $0x14] ss:$8 sps:$4 sm:$0xff]  }
 0xd47   :  { %5259 = vmatprep.mubr.msk.bf16.mxu1 %vm1894_vm0, %v5954_v27 }
 0xd49   :  { %v5642_v25 = vpop.f32.mrb[52].mxu1 }
 0xd4a   :  { %v2269_v50 = vpop.f32.mrb[53].mxu1  ;;  %v2275_v28 = vadd.f32 1e-08, %v5642_v25 }
 0xd4b   :  { %v2270_v14 = vadd.f32 1e-08, %v2269_v50 }
 0xd4d   :  { %5970 = vrsqrt.f32 %v2270_v14 }
 0xd4e   :  { %5972 = vrsqrt.f32 %v2275_v28 }
 0xd57   :  { %v7190_v43 = vpop.eup %5970 }
 0xd58   :  { %v7202_v48 = vpop.eup %5972 }
 0xd75   :  { %v2887_v29 = vpop.permute.xlu0 %2886 }
 0xd76   :  { %v2894_v61 = vmul.f32 %v2887_v29, %v7125_v55 }
 0xd79   :  { %v2892_v11 = vpop.permute.xlu1 %2891 }
 0xd7a   :  { %v2895_v62 = vmul.f32 %v2892_v11, %v7125_v55  ;;  %v2902_v2 = vpop.permute.xlu0 %2901  ;;  %v7212_v11 = vrot.slane %v7132_v10, %v6992_v53 }
 0xd7c   :  { %v2905_v6 = vadd.f32 %v2902_v2, %v2895_v62 }
 0xd7e   :  { %v2898_v60 = vpop.permute.xlu1 %2897 }
 0xd7f   :  { %v2904_v63 = vadd.f32 %v2898_v60, %v2894_v61 }
 0xdcc   :  { %v7121_v52 = vpop.f32.mrb[44].mxu0 }
 0xdcd   :  { %v5662_v54 = vpop.f32.mrb[45].mxu0 }
 0xdce   :  { %v2773_v56 = vpop.f32.mrb[46].mxu0 }
 0xdcf   :  { %v5663_v59 = vpop.f32.mrb[47].mxu0 }
 0xdd0   :  { %v7217_v59 = vrot.slane %v7132_v10, %v6954_v24 }
 0xdd5   :  { %v2856_v5 = vpop.f32.mrb[48].mxu0 }
 0xdd6   :  { %v2906_v20 = vmul.f32 %v2904_v63, %v2856_v5  ;;  %v5674_v22 = vpop.f32.mrb[49].mxu0  ;;  %v7223_v5 = vrot.slane %v7132_v10, %v7000_v32 }
 0xdd8   :  { %2918 = vrot.lane.b32.xlu0 %v2906_v20, %s6047_s25  ;;  %2908 = vrot.lane.b32.xlu1 %v2906_v20, %s6075_s1  ;;  %v7143_v39 = vmul.f32 %v7138_v21, %v2906_v20 }
 0xdd9   :  { %v2861_v31 = vpop.f32.mrb[50].mxu0 }
 0xdda   :  { %v2907_v26 = vmul.f32 %v2905_v6, %v2861_v31  ;;  %v5677_v4 = vpop.f32.mrb[51].mxu0 }
 0xddb   :  { %v7230_v4 = vrot.slane %v7132_v10, %v7006_v37 }
 0xddc   :  { %2928 = vrot.lane.b32.xlu0 %v2906_v20, %s6076_s6  ;;  %2910 = vrot.lane.b32.xlu1 %v2907_v26, %s6075_s1  ;;  %v7146_v13 = vmul.f32 %v7138_v21, %v2907_v26 }
 0xdde   :  { %v3001_v23 = vpack.c.bf16 %v7146_v13, %v7143_v39 }
 0xde0   :  { %2938 = vrot.lane.b32.xlu0 %v2906_v20, %s6064_s26  ;;  %2920 = vrot.lane.b32.xlu1 %v2907_v26, %s6047_s25 }
 0xde4   :  { %2954 = vrot.lane.b32.xlu0 %v2906_v20, %s6056_s4  ;;  %2930 = vrot.lane.b32.xlu1 %v2907_v26, %s6076_s6 }
 0xde8   :  { %2964 = vrot.lane.b32.xlu0 %v2906_v20, %s6077_s3  ;;  %2940 = vrot.lane.b32.xlu1 %v2907_v26, %s6064_s26 }
 0xdec   :  { %2974 = vrot.lane.b32.xlu0 %v2906_v20, %s6078_s30  ;;  %2956 = vrot.lane.b32.xlu1 %v2907_v26, %s6056_s4 }
 0xdf0   :  { %2984 = vrot.lane.b32.xlu0 %v2906_v20, %s6079_s21  ;;  %2966 = vrot.lane.b32.xlu1 %v2907_v26, %s6077_s3 }
 0xdf4   :  { %3061 = vrot.lane.b32.xlu0 %v7190_v43, %s6056_s4  ;;  %2976 = vrot.lane.b32.xlu1 %v2907_v26, %s6078_s30 }
 0xdf8   :  { %3115 = vrot.lane.b32.xlu0 %v6882_v18, %s6056_s4  ;;  %2986 = vrot.lane.b32.xlu1 %v2907_v26, %s6079_s21 }
 0xdfc   :  { %3086 = vperm.xlu0 %5878, %v7202_v48   ;;  %3063 = vrot.lane.b32.xlu1 %v7202_v48, %s6056_s4 }
 0xe00   :  { %3117 = vrot.lane.b32.xlu1 %v6891_v36, %s6056_s4  ;;  %5881 = vset.pattern.permute.xlu0 %v9249_v0 }
 0xe4a   :  { %v2909_v25 = vpop.permute.xlu1 %2908  ;;  %v2919_v50 = vpop.permute.xlu0 %2918 }
 0xe4b   :  { %v2916_v29 = vmul.f32 %v7212_v11, %v2909_v25  ;;  %v2926_v2 = vmul.f32 %v7217_v59, %v2919_v50  ;;  %v7246_v50 = vrot.slane %v7132_v10, %v7020_v8 }
 0xe4e   :  { %v2911_v54 = vpop.permute.xlu1 %2910  ;;  %v2929_v56 = vpop.permute.xlu0 %2928 }
 0xe4f   :  { %v2917_v60 = vmul.f32 %v7212_v11, %v2911_v54  ;;  %v2936_v26 = vmul.f32 %v7223_v5, %v2929_v56 }
 0xe51   :  { %v2997_v61 = vpack.c.bf16 %v2917_v60, %v2916_v29 }
 0xe52   :  { %v2921_v62 = vpop.permute.xlu1 %2920  ;;  %v2939_v63 = vpop.permute.xlu0 %2938 }
 0xe53   :  { %v2927_v20 = vmul.f32 %v7217_v59, %v2921_v62  ;;  %3019 = vmatpush1.bf16.msra.mxu1 %v2997_v61  ;;  %v2946_v38 = vmul.f32 %v7230_v4, %v2939_v63  ;;  %v7256_v62 = vrot.slane %v7132_v10, %v7030_v35 }
 0xe54   :  { %3020 = vmatprep.subr.bf16.mxu1 %v9249_v0 }
 0xe55   :  { %v2998_v22 = vpack.c.bf16 %v2927_v20, %v2926_v2 }
 0xe56   :  { %v2931_v6 = vpop.permute.xlu1 %2930  ;;  %v2955_v31 = vpop.permute.xlu0 %2954 }
 0xe57   :  { %v2937_v15 = vmul.f32 %v7223_v5, %v2931_v6  ;;  %3021 = vmatpush1.bf16.msra.mxu1 %v2998_v22  ;;  %v2962_v25 = vmul.f32 %v7239_v33, %v2955_v31  ;;  %v7264_v22 = vrot.slane %v7119_v17, %v6992_v53  ;;  %v5952_v17 = vld [vmem:[%s9239_s10 + $0x10] ss:$8 sps:$4 sm:$0xff]  }
 0xe58   :  { %3022 = vmatprep.subr.bf16.mxu1 %v9249_v0 }
 0xe59   :  { %v2999_v34 = vpack.c.bf16 %v2937_v15, %v2936_v26 }
 0xe5a   :  { %v2941_v14 = vpop.permute.xlu1 %2940  ;;  %v2965_v44 = vpop.permute.xlu0 %2964 }
 0xe5b   :  { %v2947_v45 = vmul.f32 %v7230_v4, %v2941_v14  ;;  %3023 = vmatpush1.bf16.msra.mxu1 %v2999_v34  ;;  %v2972_v61 = vmul.f32 %v7246_v50, %v2965_v44  ;;  %v2338_v44 = vld [vmem:[%s9237_s8 + $0x28] sm:$0xff] }
 0xe5c   :  { %3024 = vmatprep.subr.bf16.mxu1 %v9249_v0 }
 0xe5d   :  { %v3000_v46 = vpack.c.bf16 %v2947_v45, %v2946_v38  ;;  %v7294_v45 = vpop.f32.mrb[54].mxu1 }
 0xe5e   :  { %v2957_v28 = vpop.permute.xlu1 %2956  ;;  %v2975_v30 = vpop.permute.xlu0 %2974 }
 0xe5f   :  { %3025 = vmatpush1.bf16.msra.mxu1 %v3000_v46  ;;  %v2963_v40 = vmul.f32 %v7239_v33, %v2957_v28  ;;  %v2982_v20 = vmul.f32 %v7256_v62, %v2975_v30  ;;  %v2279_v46 = vpop.f32.mrb[55].mxu1 }
 0xe60   :  { %3026 = vmatprep.subr.bf16.mxu1 %v9249_v0  ;;  %v5648_v28 = vpop.f32.mrb[56].mxu1 }
 0xe61   :  { %v3002_v54 = vpack.c.bf16 %v2963_v40, %v2962_v25  ;;  %v2289_v30 = vpop.f32.mrb[57].mxu1 }
 0xe62   :  { %v2967_v41 = vpop.permute.xlu1 %2966  ;;  %v2985_v27 = vpop.permute.xlu0 %2984 }
 0xe63   :  { %3027 = vmatpush1.bf16.msra.mxu1 %v3001_v23  ;;  %v2973_v56 = vmul.f32 %v7246_v50, %v2967_v41  ;;  %v2992_v15 = vmul.f32 %v7264_v22, %v2985_v27  ;;  %v7296_v40 = vpop.f32.mrb[58].mxu1 }
 0xe64   :  { %3028 = vmatprep.subr.bf16.mxu1 %v9249_v0  ;;  %v7298_v41 = vpop.f32.mrb[59].mxu1 }
 0xe65   :  { %v3003_v39 = vpack.c.bf16 %v2973_v56, %v2972_v61  ;;  %v7300_v27 = vpop.f32.mrb[60].mxu1 }
 0xe66   :  { %v2977_v29 = vpop.permute.xlu1 %2976  ;;  %v3062_v60 = vpop.permute.xlu0 %3061  ;;  %9382 = vst [vmem:[#allocation14_spill] sm:$0xff] %v7300_v27 }
 0xe67   :  { %v3067_v63 = vsub.f32 %v7190_v43, %v3062_v60  ;;  %3029 = vmatpush1.bf16.msra.mxu1 %v3002_v54  ;;  %v2983_v13 = vmul.f32 %v7256_v62, %v2977_v29  ;;  %v7302_v25 = vpop.f32.mrb[61].mxu1 }
 0xe68   :  { %3030 = vmatprep.subr.bf16.mxu1 %v9249_v0  ;;  %9383 = vst [vmem:[#allocation15_spill] sm:$0xff] %v7302_v25 }
 0xe69   :  { %3071 = vperm.xlu0 %5881, %v3067_v63   ;;  %v3004_v6 = vpack.c.bf16 %v2983_v13, %v2982_v20 }
 0xe6a   :  { %v2987_v23 = vpop.permute.xlu1 %2986  ;;  %v3116_v2 = vpop.permute.xlu0 %3115 }
 0xe6b   :  { %v3121_v10 = vsub.f32 %v6882_v18, %v3116_v2  ;;  %3031 = vmatpush1.bf16.msra.mxu1 %v3003_v39  ;;  %v2993_v31 = vmul.f32 %v7264_v22, %v2987_v23 }
 0xe6c   :  { %3032 = vmatprep.subr.bf16.mxu1 %v9249_v0 }
 0xe6d   :  { %3125 = vperm.xlu0 %5881, %v3121_v10   ;;  %v3005_v14 = vpack.c.bf16 %v2993_v31, %v2992_v15 }
 0xe6e   :  { %v3064_v26 = vpop.permute.xlu1 %3063 }
 0xe6f   :  { %v3068_v34 = vsub.f32 %v7202_v48, %v3064_v26  ;;  %3033 = vmatpush1.bf16.msra.mxu1 %v3004_v6  ;;  %v2337_v48 = vld [vmem:[%s9237_s8 + $0x20] sm:$0xff] }
 0xe70   :  { %3034 = vmatprep.subr.bf16.mxu1 %v9249_v0 }
 0xe71   :  { %3076 = vperm.xlu1 %5879, %v3068_v34   ;;  %5884 = vset.pattern.permute.xlu0 %v9251_v3 }
 0xe72   :  { %3140 = vperm.xlu0 %5884, %v6891_v36   ;;  %v3118_v38 = vpop.permute.xlu1 %3117 }
 0xe73   :  { %3035 = vmatpush1.bf16.msra.mxu1 %v3005_v14 }
 0xe74   :  { %5681 = vmatprep.subr.bf16.mxu1 %v6072_v16 }
 0xe75   :  { %5880 = vset.pattern.permute.xlu1 %v9251_v3 }
 0xe76   :  { %3082 = vperm.xlu1 %5880, %v7190_v43   ;;  %3051 = vmatmul.mubr.bf16.vlgmr.msra.gmra.mrb[64].mxu1 %v5952_v17  ;;  %v3122_v43 = vsub.f32 %v6891_v36, %v3118_v38  ;;  %v5657_v36 = vpop.f32.mrb[62].mxu1 }
 0xe77   :  { %5885 = vset.pattern.permute.xlu0 %v9249_v0  ;;  %5683 = vmatprep.mubr.msk.bf16.mxu1 %vm6073_vm3, %v6072_v16  ;;  %v2317_v54 = vpop.f32.mrb[63].mxu1 }
 0xe7a   :  { %5882 = vset.pattern.permute.xlu1 %v9249_v0 }
 0xe7b   :  { %3095 = vperm.xlu1 %5882, %v2337_v48   ;;  %v3087_v60 = vpop.permute.xlu0 %3086 }
 0xe7f   :  { %3100 = vperm.xlu1 %5882, %v2338_v44  }
 0xe83   :  { %3130 = vperm.xlu1 %5882, %v3122_v43  }
 0xe87   :  { %5883 = vset.pattern.permute.xlu1 %v9251_v3 }
 0xe88   :  { %3136 = vperm.xlu1 %5883, %v6882_v18  }
 0xe8c   :  { %5886 = vset.pattern.permute.xlu1 %v9249_v0 }
 0xee8   :  { %v3072_v63 = vpop.permute.xlu0 %3071 }
 0xee9   :  { %v3079_v39 = vmul.f32 %v3072_v63, %v7125_v55 }
 0xeec   :  { %v3126_v15 = vpop.permute.xlu0 %3125 }
 0xeed   :  { %v3133_v43 = vmul.f32 %v3126_v15, %v7125_v55 }
 0xef0   :  { %v3077_v56 = vpop.permute.xlu1 %3076 }
 0xef1   :  { %v3080_v13 = vmul.f32 %v3077_v56, %v7125_v55 }
 0xef3   :  { %v3090_v31 = vadd.f32 %v3087_v60, %v3080_v13 }
 0xef5   :  { %v3083_v29 = vpop.permute.xlu1 %3082 }
 0xef6   :  { %v3089_v23 = vadd.f32 %v3083_v29, %v3079_v39  ;;  %v3141_v29 = vpop.permute.xlu0 %3140 }
 0xefa   :  { %v3096_v18 = vpop.permute.xlu1 %3095 }
 0xefe   :  { %v3101_v61 = vpop.permute.xlu1 %3100 }
 0xf02   :  { %v3131_v2 = vpop.permute.xlu1 %3130 }
 0xf03   :  { %v3134_v28 = vmul.f32 %v3131_v2, %v7125_v55 }
 0xf05   :  { %v3144_v63 = vadd.f32 %v3141_v29, %v3134_v28 }
 0xf07   :  { %v3137_v48 = vpop.permute.xlu1 %3136 }
 0xf08   :  { %v3143_v54 = vadd.f32 %v3137_v48, %v3133_v43 }
 0xf49   :  { %v3052_v20 = vpop.f32.mrb[64].mxu1 }
 0xf4a   :  { %v3091_v10 = vmul.f32 %v3089_v23, %v3052_v20  ;;  %v3054_v6 = vpop.f32.mrb[65].mxu1  ;;  %v2280_v20 = vadd.f32 1e-08, %v2279_v46 }
 0xf4b   :  { %v3055_v26 = vpop.f32.mrb[66].mxu1 }
 0xf4c   :  { %v3103_v34 = vadd.f32 %v3096_v18, %v3091_v10  ;;  %v3092_v14 = vmul.f32 %v3090_v31, %v3055_v26  ;;  %v3057_v17 = vpop.f32.mrb[67].mxu1  ;;  %5974 = vrsqrt.f32 %v2280_v20  ;;  %v2285_v10 = vadd.f32 1e-08, %v7294_v45 }
 0xf4e   :  { %vm3105_vm7 = vcmp.ge.f32.partialorder %v3103_v34, 0.0  ;;  %v3107_v44 = vmul.f32 0.2, %v3103_v34  ;;  %v3104_v38 = vadd.f32 %v3101_v61, %v3092_v14  ;;  %5976 = vrsqrt.f32 %v2285_v10 }
 0xf50   :  { %v3109_v30 = vsel %vm3105_vm7, %v3103_v34, %v3107_v44  ;;  %vm3106_vm8 = vcmp.ge.f32.partialorder %v3104_v38, 0.0  ;;  %v3108_v36 = vmul.f32 0.2, %v3104_v38 }
 0xf51   :  { %v3111_v56 = vmul.f32 1.4142135, %v3109_v30 }
 0xf52   :  { %v3110_v60 = vsel %vm3106_vm8, %v3104_v38, %v3108_v36 }
 0xf53   :  { %v3145_v39 = vmul.f32 %v3143_v54, %v3111_v56  ;;  %v3112_v18 = vmul.f32 1.4142135, %v3110_v60 }
 0xf55   :  { %v3146_v13 = vmul.f32 %v3144_v63, %v3112_v18  ;;  %3153 = vrot.lane.b32.xlu0 %v3145_v39, %s6047_s25  ;;  %3147 = vrot.lane.b32.xlu1 %v3145_v39, %s6075_s1  ;;  %v7311_v61 = vmul.f32 %v3145_v39, %v7138_v21 }
 0xf56   :  { %v7334_v46 = vpop.eup %5974 }
 0xf57   :  { %v7314_v23 = vmul.f32 %v3146_v13, %v7138_v21  ;;  %v2336_v21 = vld [vmem:[%s9237_s8 + $0x10] sm:$0xff] }
 0xf58   :  { %v7344_v45 = vpop.eup %5976 }
 0xf59   :  { %3159 = vrot.lane.b32.xlu0 %v3145_v39, %s6076_s6  ;;  %3149 = vrot.lane.b32.xlu1 %v3146_v13, %s6075_s1  ;;  %v3204_v2 = vpack.c.bf16 %v7314_v23, %v7311_v61  ;;  %s6084_s1 = smov 113  }
 0xf5d   :  { %3165 = vrot.lane.b32.xlu0 %v3145_v39, %s6064_s26  ;;  %3155 = vrot.lane.b32.xlu1 %v3146_v13, %s6047_s25  ;;  %s6083_s25 = smov 15  }
 0xf61   :  { %3173 = vrot.lane.b32.xlu0 %v3145_v39, %s6056_s4  ;;  %3161 = vrot.lane.b32.xlu1 %v3146_v13, %s6076_s6 }
 0xf65   :  { %3179 = vrot.lane.b32.xlu0 %v3145_v39, %s6077_s3  ;;  %3167 = vrot.lane.b32.xlu1 %v3146_v13, %s6064_s26 }
 0xf69   :  { %2730 = vperm.xlu0 %5885, %v2336_v21   ;;  %3185 = vrot.lane.b32.xlu1 %v3145_v39, %s6078_s30 }
 0xf6d   :  { %3191 = vrot.lane.b32.xlu0 %v3145_v39, %s6079_s21  ;;  %3175 = vrot.lane.b32.xlu1 %v3146_v13, %s6056_s4 }
 0xf6e   :  { %5887 = vset.pattern.permute.xlu0 %v9251_v3 }
 0xf71   :  { %3264 = vrot.lane.b32.xlu0 %v7334_v46, %s6056_s4  ;;  %3181 = vrot.lane.b32.xlu1 %v3146_v13, %s6077_s3 }
 0xf75   :  { %3318 = vrot.lane.b32.xlu0 %v6894_v42, %s6056_s4  ;;  %3187 = vrot.lane.b32.xlu1 %v3146_v13, %s6078_s30  ;;  %s6085_s30 = smov 111  }
 0xf79   :  { %3285 = vperm.xlu0 %5887, %v7334_v46   ;;  %3193 = vrot.lane.b32.xlu1 %v3146_v13, %s6079_s21 }
 0xf7d   :  { %3266 = vrot.lane.b32.xlu1 %v7344_v45, %s6056_s4  ;;  %5888 = vset.pattern.permute.xlu0 %v9249_v0 }
 0xf81   :  { %3320 = vrot.lane.b32.xlu1 %v6901_v47, %s6056_s4 }
 0xfc7   :  { %v3148_v6 = vpop.permute.xlu1 %3147  ;;  %v3154_v31 = vpop.permute.xlu0 %3153 }
 0xfc8   :  { %v3151_v15 = vmul.f32 %v3148_v6, %v7212_v11  ;;  %v3157_v44 = vmul.f32 %v3154_v31, %v7217_v59 }
 0xfcb   :  { %v3150_v26 = vpop.permute.xlu1 %3149  ;;  %v3160_v17 = vpop.permute.xlu0 %3159 }
 0xfcc   :  { %v3152_v34 = vmul.f32 %v3150_v26, %v7212_v11  ;;  %v3163_v30 = vmul.f32 %v3160_v17, %v7223_v5 }
 0xfce   :  { %v3200_v14 = vpack.c.bf16 %v3152_v34, %v3151_v15 }
 0xfcf   :  { %v3156_v48 = vpop.permute.xlu1 %3155  ;;  %v3166_v54 = vpop.permute.xlu0 %3165 }
 0xfd0   :  { %v3158_v38 = vmul.f32 %v3156_v48, %v7217_v59  ;;  %3222 = vmatpush1.bf16.msra.mxu0 %v3200_v14  ;;  %v3169_v29 = vmul.f32 %v3166_v54, %v7230_v4 }
 0xfd1   :  { %3223 = vmatprep.subr.bf16.mxu0 %v9249_v0 }
 0xfd2   :  { %v3201_v43 = vpack.c.bf16 %v3158_v38, %v3157_v44 }
 0xfd3   :  { %v3162_v28 = vpop.permute.xlu1 %3161  ;;  %v3174_v63 = vpop.permute.xlu0 %3173 }
 0xfd4   :  { %v3164_v36 = vmul.f32 %v3162_v28, %v7223_v5  ;;  %3224 = vmatpush1.bf16.msra.mxu0 %v3201_v43  ;;  %v3177_v18 = vmul.f32 %v3174_v63, %v7239_v33  ;;  %v5955_v43 = vld [vmem:[%s9239_s10 + $0x20] ss:$8 sps:$4 sm:$0xff]  }
 0xfd5   :  { %3225 = vmatprep.subr.bf16.mxu0 %v9249_v0 }
 0xfd6   :  { %v3202_v11 = vpack.c.bf16 %v3164_v36, %v3163_v30  ;;  %v2339_v30 = vld [vmem:[%s9237_s8 + $0x30] sm:$0xff] }
 0xfd7   :  { %v3168_v56 = vpop.permute.xlu1 %3167  ;;  %v3180_v61 = vpop.permute.xlu0 %3179 }
 0xfd8   :  { %v3170_v60 = vmul.f32 %v3168_v56, %v7230_v4  ;;  %3226 = vmatpush1.bf16.msra.mxu0 %v3202_v11  ;;  %v3183_v20 = vmul.f32 %v3180_v61, %v7246_v50  ;;  %v3409_v11 = vld [vmem:[%s9242_s13 + $0x38] sm:$0xff]  ;;  %v3404_v56 = vld [vmem:[%s9242_s13 + $0x10] sm:$0xff] }
 0xfd9   :  { %3227 = vmatprep.subr.bf16.mxu0 %v9249_v0  ;;  %v3425_v61 = vld [vmem:[%s9242_s13 + $0xb8] sm:$0xff] }
 0xfda   :  { %v3203_v59 = vpack.c.bf16 %v3170_v60, %v3169_v29  ;;  %v3413_v60 = vld [vmem:[%s9242_s13 + $0x58] sm:$0xff] }
 0xfdb   :  { %v3186_v39 = vpop.permute.xlu1 %3185 }
 0xfdc   :  { %3228 = vmatpush1.bf16.msra.mxu0 %v3203_v59  ;;  %v3189_v31 = vmul.f32 %v3186_v39, %v7256_v62  ;;  %v3417_v59 = vld [vmem:[%s9242_s13 + $0x78] sm:$0xff] }
 0xfdd   :  { %3229 = vmatprep.subr.bf16.mxu0 %v9249_v0  ;;  %v5777_v39 = vpack.c.bf16 %v3417_v59, %v3413_v60  ;;  %v3464_v60 = vld [vmem:[%s9242_s13 + $0x1f0] sm:$0xff] }
 0xfdf   :  { %v3176_v5 = vpop.permute.xlu1 %3175 }
 0xfe0   :  { %v3178_v13 = vmul.f32 %v3176_v5, %v7239_v33  ;;  %3230 = vmatpush1.bf16.msra.mxu0 %v3204_v2  ;;  %v5957_v2 = vld [vmem:[%s9239_s10 + $0x24] ss:$8 sps:$4 sm:$0xff]   ;;  %v3412_v5 = vld [vmem:[%s9242_s13 + $0x50] sm:$0xff] }
 0xfe1   :  { %3231 = vmatprep.subr.bf16.mxu0 %v9249_v0 }
 0xfe2   :  { %v3205_v23 = vpack.c.bf16 %v3178_v13, %v3177_v18  ;;  %v3416_v18 = vld [vmem:[%s9242_s13 + $0x70] sm:$0xff]  ;;  %v3421_v13 = vld [vmem:[%s9242_s13 + $0x98] sm:$0xff] }
 0xfe3   :  { %v3182_v4 = vpop.permute.xlu1 %3181 }
 0xfe4   :  { %v3184_v21 = vmul.f32 %v3182_v4, %v7246_v50  ;;  %3232 = vmatpush1.bf16.msra.mxu0 %v3205_v23  ;;  %v5779_v23 = vpack.c.bf16 %v3416_v18, %v3412_v5  ;;  %v5781_v4 = vpack.c.bf16 %v3425_v61, %v3421_v13 }
 0xfe5   :  { %3233 = vmatprep.subr.bf16.mxu0 %v9249_v0 }
 0xfe6   :  { %v3206_v10 = vpack.c.bf16 %v3184_v21, %v3183_v20  ;;  %v3420_v20 = vld [vmem:[%s9242_s13 + $0x90] sm:$0xff] }
 0xfe7   :  { %v3188_v6 = vpop.permute.xlu1 %3187  ;;  %v3424_v21 = vld [vmem:[%s9242_s13 + $0xb0] sm:$0xff] }
 0xfe8   :  { %v3190_v26 = vmul.f32 %v3188_v6, %v7256_v62  ;;  %3234 = vmatpush1.bf16.msra.mxu0 %v3206_v10  ;;  %v2731_v33 = vpop.permute.xlu0 %2730  ;;  %v3429_v10 = vld [vmem:[%s9242_s13 + $0xd8] sm:$0xff] }
 0xfe9   :  { %v2771_v15 = vadd.f32 %v7121_v52, %v2731_v33  ;;  %3235 = vmatprep.subr.bf16.mxu0 %v9249_v0  ;;  %v3433_v6 = vld [vmem:[%s9242_s13 + $0xf8] sm:$0xff]  ;;  %v3428_v33 = vld [vmem:[%s9242_s13 + $0xd0] sm:$0xff] }
 0xfea   :  { %v3207_v50 = vpack.c.bf16 %v3190_v26, %v3189_v31  ;;  %v5783_v31 = vpack.c.bf16 %v3424_v21, %v3420_v20  ;;  %v5785_v26 = vpack.c.bf16 %v3433_v6, %v3429_v10 }
 0xfeb   :  { %v3194_v34 = vpop.permute.xlu1 %3193  ;;  %5679 = vmatmul.mubr.msk.f32.gmra.mrb[52].mxu0 %vm2780_vm6, %v2771_v15 }
 0xfec   :  { %v3196_v14 = vmul.f32 %v3194_v34, %v7264_v22  ;;  %3236 = vmatpush1.bf16.msra.mxu0 %v3207_v50  ;;  %v3192_v17 = vpop.permute.xlu0 %3191  ;;  %5264 = vmatprep.mubr.msk.bf16.mxu0 %vm1894_vm0, %v5957_v2  ;;  %v3432_v2 = vld [vmem:[%s9242_s13 + $0xf0] sm:$0xff]  ;;  %v3437_v50 = vld [vmem:[%s9242_s13 + $0x118] sm:$0xff] }
 0xfed   :  { %v3195_v62 = vmul.f32 %v3192_v17, %v7264_v22  ;;  %3237 = vmatprep.subr.bf16.mxu0 %v9249_v0  ;;  %v2340_v22 = vld [vmem:[%s9237_s8 + $0x38] sm:$0xff]  ;;  %v5787_v15 = vpack.c.bf16 %v3432_v2, %v3428_v33  ;;  %v3436_v17 = vld [vmem:[%s9242_s13 + $0x110] sm:$0xff]  ;;  %v2341_v33 = vld [vmem:[%s9237_s8 + $0x40] sm:$0xff] }
 0xfee   :  { %v3441_v34 = vld [vmem:[%s9242_s13 + $0x138] sm:$0xff] }
 0xfef   :  { %v3208_v48 = vpack.c.bf16 %v3196_v14, %v3195_v62  ;;  %v3267_v44 = vpop.permute.xlu1 %3266  ;;  %v5789_v14 = vpack.c.bf16 %v3441_v34, %v3437_v50  ;;  %v3440_v62 = vld [vmem:[%s9242_s13 + $0x130] sm:$0xff] }
 0xff0   :  { %v3271_v52 = vsub.f32 %v7344_v45, %v3267_v44  ;;  %v3265_v38 = vpop.permute.xlu0 %3264  ;;  %v5791_v44 = vpack.c.bf16 %v3440_v62, %v3436_v17 }
 0xff1   :  { %v3270_v28 = vsub.f32 %v7334_v46, %v3265_v38  ;;  %3238 = vmatpush1.bf16.msra.mxu0 %v3208_v48  ;;  %v3445_v48 = vld [vmem:[%s9242_s13 + $0x158] sm:$0xff]  ;;  %v3444_v38 = vld [vmem:[%s9242_s13 + $0x150] sm:$0xff] }
 0xff2   :  { %3279 = vperm.xlu1 %5886, %v3271_v52   ;;  %v3449_v52 = vld [vmem:[%s9242_s13 + $0x178] sm:$0xff] }
 0xff3   :  { %3274 = vperm.xlu0 %5888, %v3270_v28   ;;  %v3321_v54 = vpop.permute.xlu1 %3320  ;;  %v5793_v28 = vpack.c.bf16 %v3449_v52, %v3445_v48 }
 0xff4   :  { %3254 = vmatmul.mubr.bf16.vlgmr.msra.gmra.mrb[56].mxu0 %v5955_v43  ;;  %v3319_v46 = vpop.permute.xlu0 %3318  ;;  %v3448_v43 = vld [vmem:[%s9242_s13 + $0x170] sm:$0xff] }
 0xff5   :  { %3613 = vmatprep.mubr.f32.mxu0 %v6072_v16  ;;  %v3324_v36 = vsub.f32 %v6894_v42, %v3319_v46  ;;  %v3457_v46 = vld [vmem:[%s9242_s13 + $0x1b8] sm:$0xff] }
 0xff6   :  { %5889 = vset.pattern.permute.xlu1 %v9251_v3 }
 0xff7   :  { %3289 = vperm.xlu1 %5889, %v7344_v45   ;;  %3303 = vperm.xlu0 %5888, %v2340_v22   ;;  %v3325_v45 = vsub.f32 %v6901_v47, %v3321_v54  ;;  %v5795_v22 = vpack.c.bf16 %v3448_v43, %v3444_v38  ;;  %v3452_v54 = vld [vmem:[%s9242_s13 + $0x190] sm:$0xff] }
 0xffb   :  { %5890 = vset.pattern.permute.xlu1 %v9249_v0  ;;  %5891 = vset.pattern.permute.xlu0 %v9251_v3 }
 0xffc   :  { %3298 = vperm.xlu1 %5890, %v2339_v30   ;;  %3339 = vperm.xlu0 %5891, %v6894_v42   ;;  %v3405_v42 = vld [vmem:[%s9242_s13 + $0x18] sm:$0xff] }
 0xffd   :  { %v5773_v29 = vpack.c.bf16 %v3409_v11, %v3405_v42  ;;  %v3453_v30 = vld [vmem:[%s9242_s13 + $0x198] sm:$0xff] }
 0xffe   :  { %v3461_v11 = vld [vmem:[%s9242_s13 + $0x1d8] sm:$0xff] }
 0xfff   :  { %5774 = vmatprep.subr.bf16.mxu0 %v5773_v29 }
0x1000   :  { %3636 = vrot.lane.b32.xlu0 %v6915_v51, %s6056_s4  ;;  %3328 = vperm.xlu1 %5890, %v3324_v36   ;;  %v5797_v36 = vpack.c.bf16 %v3457_v46, %v3453_v30 }
0x1001   :  { %5894 = vset.pattern.permute.xlu0 %v9249_v0 }
0x1004   :  { %3333 = vperm.xlu1 %5890, %v3325_v45   ;;  %v3456_v45 = vld [vmem:[%s9242_s13 + $0x1b0] sm:$0xff] }
0x1005   :  { %v5799_v42 = vpack.c.bf16 %v3456_v45, %v3452_v54 }
0x1008   :  { %5892 = vset.pattern.permute.xlu1 %v9251_v3 }
0x1009   :  { %3343 = vperm.xlu1 %5892, %v6901_v47   ;;  %v3408_v47 = vld [vmem:[%s9242_s13 + $0x30] sm:$0xff] }
0x100a   :  { %v5775_v63 = vpack.c.bf16 %v3408_v47, %v3404_v56  ;;  %v3465_v56 = vld [vmem:[%s9242_s13 + $0x1f8] sm:$0xff]  ;;  %v3460_v47 = vld [vmem:[%s9242_s13 + $0x1d0] sm:$0xff] }
0x100b   :  { %v5801_v29 = vpack.c.bf16 %v3465_v56, %v3461_v11  ;;  %v5803_v59 = vpack.c.bf16 %v3464_v60, %v3460_v47  ;;  %v3407_v47 = vld [vmem:[%s9242_s13 + $0x28] sm:$0xff] }
0x100c   :  { %5776 = vmatpush1.bf16.msra.mxu0 %v5775_v63  ;;  %v3286_v63 = vpop.permute.xlu0 %3285 }
0x100d   :  { %3634 = vrot.lane.b32.xlu1 %v6906_v49, %s6056_s4  ;;  %5778 = vmatprep.subr.bf16.mxu0 %v5777_v39 }
0x100e   :  { %5893 = vset.pattern.permute.xlu1 %v9249_v0 }
0x1010   :  { %5780 = vmatpush1.bf16.msra.mxu0 %v5779_v23 }
0x1011   :  { %5782 = vmatprep.subr.bf16.mxu0 %v5781_v4 }
0x1014   :  { %5784 = vmatpush1.bf16.msra.mxu0 %v5783_v31 }
0x1015   :  { %5786 = vmatprep.subr.bf16.mxu0 %v5785_v26 }
0x1018   :  { %5788 = vmatpush1.bf16.msra.mxu0 %v5787_v15 }
0x1019   :  { %5790 = vmatprep.subr.bf16.mxu0 %v5789_v14 }
0x101c   :  { %5792 = vmatpush1.bf16.msra.mxu0 %v5791_v44 }
0x101d   :  { %5794 = vmatprep.subr.bf16.mxu0 %v5793_v28 }
0x1020   :  { %5796 = vmatpush1.bf16.msra.mxu0 %v5795_v22 }
0x1021   :  { %5798 = vmatprep.subr.bf16.mxu0 %v5797_v36 }
0x1024   :  { %5800 = vmatpush1.bf16.msra.mxu0 %v5799_v42 }
0x1025   :  { %5802 = vmatprep.subr.bf16.mxu0 %v5801_v29  ;;  %v3403_v29 = vld [vmem:[%s9242_s13 + $0x8] sm:$0xff] }
0x1028   :  { %5804 = vmatpush1.bf16.msra.mxu0 %v5803_v59  ;;  %v5741_v59 = vpack.c.bf16 %v3407_v47, %v3403_v29 }
0x1071   :  { %v3280_v39 = vpop.permute.xlu1 %3279 }
0x1072   :  { %v3275_v5 = vpop.permute.xlu0 %3274  ;;  %v3283_v34 = vmul.f32 %v3280_v39, %v7125_v55  ;;  %v3406_v39 = vld [vmem:[%s9242_s13 + $0x20] sm:$0xff] }
0x1073   :  { %v3282_v50 = vmul.f32 %v3275_v5, %v7125_v55 }
0x1075   :  { %v3292_v14 = vadd.f32 %v3286_v63, %v3282_v50  ;;  %v3402_v63 = vld [vmem:[%s9242_s13] sm:$0xff]  ;;  %v3427_v50 = vld [vmem:[%s9242_s13 + $0xc8] sm:$0xff] }
0x1076   :  { %v3290_v18 = vpop.permute.xlu1 %3289  ;;  %v3304_v13 = vpop.permute.xlu0 %3303 }
0x1077   :  { %v3293_v62 = vadd.f32 %v3290_v18, %v3283_v34  ;;  %v3411_v18 = vld [vmem:[%s9242_s13 + $0x48] sm:$0xff] }
0x1078   :  { %v3431_v34 = vld [vmem:[%s9242_s13 + $0xe8] sm:$0xff] }
0x107b   :  { %v3299_v61 = vpop.permute.xlu1 %3298  ;;  %v3340_v23 = vpop.permute.xlu0 %3339 }
0x107f   :  { %v3329_v4 = vpop.permute.xlu1 %3328  ;;  %v3637_v20 = vpop.permute.xlu0 %3636 }
0x1080   :  { %v3641_v21 = vsub.f32 %v6915_v51, %v3637_v20  ;;  %v3336_v22 = vmul.f32 %v3329_v4, %v7125_v55  ;;  %v3410_v20 = vld [vmem:[%s9242_s13 + $0x40] sm:$0xff] }
0x1082   :  { %3665 = vperm.xlu0 %5894, %v3641_v21   ;;  %v3346_v42 = vadd.f32 %v3340_v23, %v3336_v22  ;;  %v5743_v23 = vpack.c.bf16 %v3406_v39, %v3402_v63  ;;  %v3414_v21 = vld [vmem:[%s9242_s13 + $0x60] sm:$0xff]  ;;  %v3447_v22 = vld [vmem:[%s9242_s13 + $0x168] sm:$0xff] }
0x1083   :  { %v3334_v10 = vpop.permute.xlu1 %3333  ;;  %v3463_v63 = vld [vmem:[%s9242_s13 + $0x1e8] sm:$0xff] }
0x1084   :  { %v3337_v36 = vmul.f32 %v3334_v10, %v7125_v55  ;;  %v3419_v10 = vld [vmem:[%s9242_s13 + $0x88] sm:$0xff] }
0x1086   :  { %3355 = vperm.xlu0 %5894, %v2341_v33   ;;  %v3418_v33 = vld [vmem:[%s9242_s13 + $0x80] sm:$0xff] }
0x1088   :  { %v3344_v6 = vpop.permute.xlu1 %3343 }
0x1089   :  { %v3347_v11 = vadd.f32 %v3344_v6, %v3337_v36  ;;  %v3423_v6 = vld [vmem:[%s9242_s13 + $0xa8] sm:$0xff]  ;;  %v3442_v36 = vld [vmem:[%s9242_s13 + $0x140] sm:$0xff] }
0x108c   :  { %v3635_v31 = vpop.permute.xlu1 %3634 }
0x108d   :  { %v3640_v26 = vsub.f32 %v6906_v49, %v3635_v31  ;;  %v5747_v31 = vpack.c.bf16 %v3414_v21, %v3410_v20 }
0x108f   :  { %3660 = vperm.xlu1 %5893, %v3640_v26   ;;  %v5749_v26 = vpack.c.bf16 %v3423_v6, %v3419_v10 }
0x1093   :  { %5895 = vset.pattern.permute.xlu1 %v9251_v3 }
0x1094   :  { %3677 = vperm.xlu1 %5895, %v6906_v49  }
0x1098   :  { %3681 = vperm.xlu1 %5895, %v6915_v51  }
0x109c   :  { %5896 = vset.pattern.permute.xlu1 %v9249_v0 }
0x10be   :  { %v7513_v2 = vpop.f32.mrb[52].mxu0 }
0x10bf   :  { %v5680_v15 = vpop.f32.mrb[53].mxu0 }
0x10c0   :  { %v3422_v15 = vld [vmem:[%s9242_s13 + $0xa0] sm:$0xff] }
0x10c7   :  { %v3255_v17 = vpop.f32.mrb[56].mxu0 }
0x10c8   :  { %v3294_v49 = vmul.f32 %v3292_v14, %v3255_v17  ;;  %v3257_v48 = vpop.f32.mrb[57].mxu0  ;;  %v5751_v14 = vpack.c.bf16 %v3422_v15, %v3418_v33  ;;  %v5753_v17 = vpack.c.bf16 %v3431_v34, %v3427_v50 }
0x10c9   :  { %v3258_v44 = vpop.f32.mrb[58].mxu0  ;;  %v3435_v48 = vld [vmem:[%s9242_s13 + $0x108] sm:$0xff] }
0x10ca   :  { %v3306_v52 = vadd.f32 %v3299_v61, %v3294_v49  ;;  %v3295_v38 = vmul.f32 %v3293_v62, %v3258_v44  ;;  %v3260_v43 = vpop.f32.mrb[59].mxu0  ;;  %v3351_v61 = vld [vmem:[#allocation2 + $0x2] sm:$0x3]  ;;  %v3439_v44 = vld [vmem:[%s9242_s13 + $0x128] sm:$0xff] }
0x10cb   :  { %v3426_v62 = vld [vmem:[%s9242_s13 + $0xc0] sm:$0xff] }
0x10cc   :  { %vm3308_vm9 = vcmp.ge.f32.partialorder %v3306_v52, 0.0  ;;  %v3310_v51 = vmul.f32 0.2, %v3306_v52  ;;  %v3307_v28 = vadd.f32 %v3304_v13, %v3295_v38  ;;  %v3415_v13 = vld [vmem:[%s9242_s13 + $0x68] sm:$0xff]  ;;  %v3430_v49 = vld [vmem:[%s9242_s13 + $0xe0] sm:$0xff]  ;;  %v5757_v38 = vpack.c.bf16 %v3439_v44, %v3435_v48 }
0x10cd   :  { %v5745_v4 = vpack.c.bf16 %v3415_v13, %v3411_v18  ;;  %v3434_v43 = vld [vmem:[%s9242_s13 + $0x100] sm:$0xff] }
0x10ce   :  { %v3312_v30 = vsel %vm3308_vm9, %v3306_v52, %v3310_v51  ;;  %v3311_v46 = vmul.f32 0.2, %v3307_v28  ;;  %vm3309_vm1 = vcmp.ge.f32.partialorder %v3307_v28, 0.0  ;;  %v5755_v52 = vpack.c.bf16 %v3430_v49, %v3426_v62  ;;  %v3438_v51 = vld [vmem:[%s9242_s13 + $0x120] sm:$0xff] }
0x10cf   :  { %v7519_v54 = vmul.f32 1.4142135, %v3312_v30  ;;  %v5759_v30 = vpack.c.bf16 %v3438_v51, %v3434_v43  ;;  %v3458_v18 = vld [vmem:[%s9242_s13 + $0x1c0] sm:$0xff] }
0x10d0   :  { %v3313_v45 = vsel %vm3309_vm1, %v3307_v28, %v3311_v46  ;;  %v3443_v28 = vld [vmem:[%s9242_s13 + $0x148] sm:$0xff]  ;;  %v3462_v13 = vld [vmem:[%s9242_s13 + $0x1e0] sm:$0xff] }
0x10d1   :  { %3614 = vmatmul.mubr.f32.vlgmr.msra.gmra.mrb[54].mxu0 %v7519_v54  ;;  %v7522_v56 = vmul.f32 1.4142135, %v3313_v45  ;;  %v3348_v60 = vmul.f32 %v3346_v42, %v7519_v54  ;;  %v5761_v46 = vpack.c.bf16 %v3447_v22, %v3443_v28  ;;  %v3446_v45 = vld [vmem:[%s9242_s13 + $0x160] sm:$0xff]  ;;  %v3451_v42 = vld [vmem:[%s9242_s13 + $0x188] sm:$0xff] }
0x10d2   :  { %3619 = vmatprep.mubr.f32.mxu0 %v6072_v16  ;;  %v5763_v29 = vpack.c.bf16 %v3446_v45, %v3442_v36 }
0x10d3   :  { %v3349_v55 = vmul.f32 %v3347_v11, %v7522_v56  ;;  %v3455_v11 = vld [vmem:[%s9242_s13 + $0x1a8] sm:$0xff] }
0x10d4   :  { %v5765_v47 = vpack.c.bf16 %v3455_v11, %v3451_v42 }
0x10d5   :  { %3620 = vmatmul.mubr.f32.gmra.mrb[60].mxu0 %v7522_v56  ;;  %v3352_v5 = vpack.c.bf16 %v3349_v55, %v3348_v60  ;;  %v3450_v55 = vld [vmem:[%s9242_s13 + $0x180] sm:$0xff] }
0x10d6   :  { %3625 = vmatprep.mubr.f32.mxu0 %v6072_v16  ;;  %v3454_v60 = vld [vmem:[%s9242_s13 + $0x1a0] sm:$0xff] }
0x10d7   :  { %5682 = vmatpush3.bf16.msra.mxu1 %v3352_v5  ;;  %v5767_v39 = vpack.c.bf16 %v3454_v60, %v3450_v55  ;;  %v7742_v60 = vld [vmem:[%s9245_s16 + $0x28] sm:$0x3] }
0x10d8   :  { %5742 = vmatprep.subr.bf16.mxu1 %v5741_v59  ;;  %v3459_v59 = vld [vmem:[%s9242_s13 + $0x1c8] sm:$0xff]  ;;  %9390 = vst [vmem:[#allocation22_spill] sm:$0xff] %v7742_v60 }
0x10d9   :  { %v5769_v5 = vpack.c.bf16 %v3463_v63, %v3459_v59 }
0x10da   :  { %5684 = vmatmul.mubr.msk.bf16.vlgmr.msra.gmra.mrb[68].mxu1 %vm1894_vm0, %v3351_v61  ;;  %v5771_v61 = vpack.c.bf16 %v3462_v13, %v3458_v18 }
0x10db   :  { %5744 = vmatpush1.bf16.msra.mxu1 %v5743_v23  ;;  %3530 = vmatprep.mubr.f32.mxu1 %v6072_v16 }
0x10dc   :  { %5746 = vmatprep.subr.bf16.mxu1 %v5745_v4  ;;  %v7636_v4 = vld [vmem:[%s9245_s16 + $0x30] sm:$0x3] }
0x10dd   :  { %9384 = vst [vmem:[#allocation16_spill] sm:$0xff] %v7636_v4  ;;  %v7640_v20 = vrot.slane %v7636_v4, %v6954_v24 }
0x10df   :  { %5748 = vmatpush1.bf16.msra.mxu1 %v5747_v31  ;;  %9385 = vst [vmem:[#allocation17_spill] sm:$0xff] %v7640_v20 }
0x10e0   :  { %5750 = vmatprep.subr.bf16.mxu1 %v5749_v26 }
0x10e3   :  { %5752 = vmatpush1.bf16.msra.mxu1 %v5751_v14 }
0x10e4   :  { %5754 = vmatprep.subr.bf16.mxu1 %v5753_v17 }
0x10e7   :  { %5756 = vmatpush1.bf16.msra.mxu1 %v5755_v52 }
0x10e8   :  { %5758 = vmatprep.subr.bf16.mxu1 %v5757_v38 }
0x10eb   :  { %5760 = vmatpush1.bf16.msra.mxu1 %v5759_v30 }
0x10ec   :  { %5762 = vmatprep.subr.bf16.mxu1 %v5761_v46 }
0x10ef   :  { %5764 = vmatpush1.bf16.msra.mxu1 %v5763_v29 }
0x10f0   :  { %5766 = vmatprep.subr.bf16.mxu1 %v5765_v47  ;;  %v7729_v47 = vld [vmem:[%s9245_s16 + $0x20] sm:$0x3] }
0x10f1   :  { %9388 = vst [vmem:[#allocation20_spill] sm:$0xff] %v7729_v47  ;;  %v7733_v55 = vrot.slane %v7729_v47, %v6954_v24 }
0x10f3   :  { %5768 = vmatpush1.bf16.msra.mxu1 %v5767_v39  ;;  %9389 = vst [vmem:[#allocation21_spill] sm:$0xff] %v7733_v55  ;;  %v7749_v39 = vrot.slane %v7742_v60, %v6954_v24 }
0x10f4   :  { %5770 = vmatprep.subr.bf16.mxu1 %v5769_v5 }
0x10f5   :  { %9391 = vst [vmem:[#allocation23_spill] sm:$0xff] %v7749_v39 }
0x10f7   :  { %5772 = vmatpush1.bf16.msra.mxu1 %v5771_v61 }
0x10fa   :  { %3531 = vmatmul.mubr.f32.vlgmr.msra.gmra.mrb[72].mxu1 %v7519_v54  ;;  %v7647_v54 = vld [vmem:[%s9245_s16 + $0x38] sm:$0x3] }
0x10fb   :  { %3536 = vmatprep.mubr.f32.mxu1 %v6072_v16  ;;  %9386 = vst [vmem:[#allocation18_spill] sm:$0xff] %v7647_v54  ;;  %v7654_v10 = vrot.slane %v7647_v54, %v6954_v24 }
0x10fd   :  { %9387 = vst [vmem:[#allocation19_spill] sm:$0xff] %v7654_v10 }
0x10fe   :  { %3537 = vmatmul.mubr.f32.gmra.mrb[74].mxu1 %v7522_v56 }
0x10ff   :  { %3542 = vmatprep.mubr.f32.mxu1 %v6072_v16 }
0x1101   :  { %v7660_v15 = vpop.permute.xlu0 %3665 }
0x1102   :  { %v3674_v62 = vmul.f32 %v7660_v15, %v7640_v20 }
0x1105   :  { %v3356_v52 = vpop.permute.xlu0 %3355 }
0x110e   :  { %v7631_v23 = vpop.permute.xlu1 %3660 }
0x110f   :  { %v3670_v16 = vmul.f32 %v7631_v23, %v7640_v20  ;;  %v3671_v33 = vmul.f32 %v7631_v23, %v7654_v10  ;;  %v3668_v59 = vmul.f32 %v7631_v23, %v7733_v55  ;;  %v3669_v18 = vmul.f32 %v7631_v23, %v7749_v39 }
0x1113   :  { %v7642_v21 = vpop.permute.xlu1 %3677 }
0x1114   :  { %v3686_v56 = vadd.f32 %v7642_v21, %v3670_v16  ;;  %v3687_v50 = vadd.f32 %v7642_v21, %v3671_v33  ;;  %v3684_v63 = vadd.f32 %v7642_v21, %v3668_v59  ;;  %v3685_v13 = vadd.f32 %v7642_v21, %v3669_v18 }
0x1115   :  { %v3672_v16 = vmul.f32 %v7660_v15, %v7733_v55  ;;  %v3673_v21 = vmul.f32 %v7660_v15, %v7749_v39  ;;  %v2303_v33 = vadd.f32 1e-08, %v7296_v40 }
0x1117   :  { %v7667_v34 = vpop.permute.xlu1 %3681  ;;  %5978 = vrsqrt.f32 %v2303_v33 }
0x1118   :  { %v3690_v48 = vadd.f32 %v7667_v34, %v3674_v62 }
0x11a4   :  { %v3615_v6 = vpop.f32.mrb[54].mxu0 }
0x11a5   :  { %v7656_v31 = vmul.f32 %v3686_v56, %v3615_v6  ;;  %v3617_v26 = vpop.f32.mrb[55].mxu0  ;;  %v3688_v56 = vadd.f32 %v7667_v34, %v3672_v16  ;;  %v3689_v6 = vadd.f32 %v7667_v34, %v3673_v21 }
0x11a6   :  { %v7669_v17 = vmul.f32 %v3687_v50, %v3617_v26 }
0x11a7   :  { %4028 = vrot.lane.b32.xlu1 %v7656_v31, %s6080_s14  ;;  %3708 = vrot.lane.b32.xlu0 %v7656_v31, %s6081_s24 }
0x11a8   :  { %v3621_v14 = vpop.f32.mrb[60].mxu0 }
0x11a9   :  { %v3623_v49 = vpop.f32.mrb[61].mxu0  ;;  %v7678_v44 = vmul.f32 %v3690_v48, %v3621_v14  ;;  %v5960_v14 = vld [vmem:[%s9239_s10 + $0x34] ss:$8 sps:$4 sm:$0xff]   ;;  %v7863_v48 = vpop.eup %5978 }
0x11aa   :  { %9394 = vst [vmem:[#allocation26_spill] sm:$0xff] %v7863_v48 }
0x11ab   :  { %4032 = vrot.lane.b32.xlu1 %v7669_v17, %s6080_s14  ;;  %3759 = vrot.lane.b32.xlu0 %v7656_v31, %s6082_s5 }
0x11ad   :  { %v3395_v38 = vpop.f32.mrb[68].mxu1 }
0x11ae   :  { %v3396_v43 = vadd.f32 %v3395_v38, %v3356_v52  ;;  %v5685_v51 = vpop.f32.mrb[69].mxu1 }
0x11af   :  { %3808 = vrot.lane.b32.xlu0 %v7656_v31, %s6083_s25  ;;  %3710 = vrot.lane.b32.xlu1 %v7678_v44, %s6081_s24  ;;  %v3398_v28 = vpop.f32.mrb[70].mxu1 }
0x11b0   :  { %v3401_v22 = vadd.f32 %v3396_v43, %v7513_v2  ;;  %v5686_v30 = vpop.f32.mrb[71].mxu1  ;;  %v3675_v2 = vmul.f32 %v7660_v15, %v7654_v10  ;;  %v2298_v15 = vadd.f32 1e-08, %v7298_v41  ;;  %v7957_v10 = vld [vmem:[%s9245_s16 + $0x10] sm:$0xff] }
0x11b2   :  { %3543 = vmatmul.mubr.f32.gmra.mrb[76].mxu1 %v3401_v22  ;;  %3626 = vmatmul.mubr.f32.gmra.mrb[62].mxu0 %v3401_v22  ;;  %v3691_v46 = vadd.f32 %v7667_v34, %v3675_v2  ;;  %5980 = vrsqrt.f32 %v2298_v15 }
0x11b3   :  { %3857 = vrot.lane.b32.xlu0 %v7656_v31, %s6064_s26  ;;  %3761 = vrot.lane.b32.xlu1 %v7678_v44, %s6082_s5 }
0x11b4   :  { %v7708_v36 = vmul.f32 %v3691_v46, %v3623_v49  ;;  %5270 = vmatprep.mubr.msk.bf16.mxu1 %vm1894_vm0, %v5960_v14  ;;  %5271 = vmatprep.mubr.msk.bf16.mxu0 %vm1894_vm0, %v5960_v14 }
0x11b7   :  { %3930 = vrot.lane.b32.xlu0 %v7656_v31, %s6056_s4  ;;  %3810 = vrot.lane.b32.xlu1 %v7678_v44, %s6083_s25 }
0x11bb   :  { %3979 = vrot.lane.b32.xlu0 %v7656_v31, %s6084_s1  ;;  %3859 = vrot.lane.b32.xlu1 %v7678_v44, %s6064_s26 }
0x11bc   :  { %v7869_v43 = vpop.eup %5980 }
0x11bd   :  { %9395 = vst [vmem:[#allocation27_spill] sm:$0xff] %v7869_v43 }
0x11bf   :  { %3712 = vrot.lane.b32.xlu0 %v7669_v17, %s6081_s24  ;;  %3932 = vrot.lane.b32.xlu1 %v7678_v44, %s6056_s4 }
0x11c3   :  { %3763 = vrot.lane.b32.xlu0 %v7669_v17, %s6082_s5  ;;  %3981 = vrot.lane.b32.xlu1 %v7678_v44, %s6084_s1 }
0x11c7   :  { %3812 = vrot.lane.b32.xlu0 %v7669_v17, %s6083_s25  ;;  %3714 = vrot.lane.b32.xlu1 %v7708_v36, %s6081_s24 }
0x11cb   :  { %3861 = vrot.lane.b32.xlu0 %v7669_v17, %s6064_s26  ;;  %3765 = vrot.lane.b32.xlu1 %v7708_v36, %s6082_s5 }
0x11cd   :  { %v3532_v45 = vpop.f32.mrb[72].mxu1 }
0x11ce   :  { %v3534_v42 = vpop.f32.mrb[73].mxu1  ;;  %v7755_v5 = vmul.f32 %v3684_v63, %v3532_v45  ;;  %v7892_v45 = vand.u32 127, %v2371_v7 }
0x11cf   :  { %3934 = vrot.lane.b32.xlu0 %v7669_v17, %s6056_s4  ;;  %3814 = vrot.lane.b32.xlu1 %v7708_v36, %s6083_s25  ;;  %v7764_v61 = vmul.f32 %v3685_v13, %v3534_v42 }
0x11d0   :  { %vm3718_vm10 = vcmp.lt.s32.totalorder %v7892_v45, 17  ;;  %vm3767_vm11 = vcmp.lt.s32.totalorder %v7892_v45, 16  ;;  %vm3816_vm12 = vcmp.lt.s32.totalorder %v7892_v45, 15  ;;  %vm3865_vm13 = vcmp.lt.s32.totalorder %v7892_v45, 1 }
0x11d1   :  { %v3538_v11 = vpop.f32.mrb[74].mxu1  ;;  %vm3938_vm14 = vcmp.lt.s32.totalorder %v7892_v45, 127  ;;  %vm4036_vm15 = vcmp.lt.s32.totalorder %v7892_v45, 112  ;;  %vm3987_vm2 = vcmp.lt.s32.totalorder %v7892_v45, 113  ;;  %vm4085_vm3 = vcmp.lt.s32.totalorder %v7892_v45, 111  ;;  %v9556_v45 = vld [vmem:[#allocation10_spill] sm:$0xff] }
0x11d2   :  { %v3540_v29 = vpop.f32.mrb[75].mxu1  ;;  %v7773_v23 = vmul.f32 %v3688_v56, %v3538_v11 }
0x11d3   :  { %3983 = vrot.lane.b32.xlu0 %v7669_v17, %s6084_s1  ;;  %3863 = vrot.lane.b32.xlu1 %v7708_v36, %s6064_s26  ;;  %v7802_v26 = vmul.f32 %v3689_v6, %v3540_v29  ;;  %v7902_v29 = vld [vmem:[%s9245_s16 + $0x18] sm:$0xff] }
0x11d4   :  { %v7906_v59 = vrot.slane %v7902_v29, %v6992_v53  ;;  %v7965_v39 = vrot.slane %v7902_v29, %v6967_v12 }
0x11d6   :  { %9398 = vst [vmem:[#allocation30_spill] sm:$0xff] %v7906_v59  ;;  %9405 = vst [vmem:[#allocation37_spill] sm:$0xff] %v7965_v39  ;;  %v7995_v60 = vmul.f32 %v7965_v39, %v7669_v17 }
0x11d7   :  { %4030 = vrot.lane.b32.xlu0 %v7678_v44, %s6080_s14  ;;  %3936 = vrot.lane.b32.xlu1 %v7708_v36, %s6056_s4 }
0x11d8   :  { %9410 = vst [vmem:[#allocation42_spill] sm:$0xff] %v7995_v60 }
0x11db   :  { %4034 = vrot.lane.b32.xlu0 %v7708_v36, %s6080_s14  ;;  %3985 = vrot.lane.b32.xlu1 %v7708_v36, %s6084_s1 }
0x11df   :  { %3700 = vrot.lane.b32.xlu0 %v7755_v5, %s6081_s24  ;;  %4020 = vrot.lane.b32.xlu1 %v7755_v5, %s6080_s14 }
0x11e3   :  { %3751 = vrot.lane.b32.xlu0 %v7755_v5, %s6082_s5  ;;  %4024 = vrot.lane.b32.xlu1 %v7764_v61, %s6080_s14 }
0x11e7   :  { %3800 = vrot.lane.b32.xlu0 %v7755_v5, %s6083_s25  ;;  %3702 = vrot.lane.b32.xlu1 %v7773_v23, %s6081_s24 }
0x11eb   :  { %3849 = vrot.lane.b32.xlu0 %v7755_v5, %s6064_s26  ;;  %3753 = vrot.lane.b32.xlu1 %v7773_v23, %s6082_s5 }
0x11ef   :  { %3922 = vrot.lane.b32.xlu0 %v7755_v5, %s6056_s4  ;;  %3802 = vrot.lane.b32.xlu1 %v7773_v23, %s6083_s25 }
0x11f3   :  { %3971 = vrot.lane.b32.xlu0 %v7755_v5, %s6084_s1  ;;  %3851 = vrot.lane.b32.xlu1 %v7773_v23, %s6064_s26 }
0x11f7   :  { %3704 = vrot.lane.b32.xlu0 %v7764_v61, %s6081_s24  ;;  %3924 = vrot.lane.b32.xlu1 %v7773_v23, %s6056_s4 }
0x11fb   :  { %3755 = vrot.lane.b32.xlu0 %v7764_v61, %s6082_s5  ;;  %3973 = vrot.lane.b32.xlu1 %v7773_v23, %s6084_s1 }
0x11ff   :  { %3804 = vrot.lane.b32.xlu0 %v7764_v61, %s6083_s25  ;;  %3706 = vrot.lane.b32.xlu1 %v7802_v26, %s6081_s24 }
0x1203   :  { %3853 = vrot.lane.b32.xlu0 %v7764_v61, %s6064_s26  ;;  %3757 = vrot.lane.b32.xlu1 %v7802_v26, %s6082_s5 }
0x1207   :  { %3926 = vrot.lane.b32.xlu0 %v7764_v61, %s6056_s4  ;;  %3806 = vrot.lane.b32.xlu1 %v7802_v26, %s6083_s25 }
0x120b   :  { %3975 = vrot.lane.b32.xlu0 %v7764_v61, %s6084_s1  ;;  %3855 = vrot.lane.b32.xlu1 %v7802_v26, %s6064_s26 }
0x120f   :  { %4022 = vrot.lane.b32.xlu0 %v7773_v23, %s6080_s14  ;;  %4073 = vrot.lane.b32.xlu1 %v7764_v61, %s6085_s30 }
0x1213   :  { %4079 = vrot.lane.b32.xlu0 %v7678_v44, %s6085_s30  ;;  %3928 = vrot.lane.b32.xlu1 %v7802_v26, %s6056_s4 }
0x1217   :  { %4071 = vrot.lane.b32.xlu0 %v7773_v23, %s6085_s30  ;;  %3977 = vrot.lane.b32.xlu1 %v7802_v26, %s6084_s1 }
0x1219   :  { %v7834_v50 = vpop.permute.xlu1 %4028  ;;  %v7836_v34 = vpop.permute.xlu0 %3708 }
0x121a   :  { %9392 = vst [vmem:[#allocation24_spill] sm:$0xff] %v7834_v50 }
0x121b   :  { %4026 = vrot.lane.b32.xlu0 %v7802_v26, %s6080_s14  ;;  %4077 = vrot.lane.b32.xlu1 %v7656_v31, %s6085_s30 }
0x121d   :  { %v7847_v40 = vpop.permute.xlu1 %4032  ;;  %v7849_v41 = vpop.permute.xlu0 %3759 }
0x121e   :  { %9393 = vst [vmem:[#allocation25_spill] sm:$0xff] %v7847_v40 }
0x121f   :  { %4075 = vrot.lane.b32.xlu0 %v7802_v26, %s6085_s30  ;;  %4069 = vrot.lane.b32.xlu1 %v7755_v5, %s6085_s30 }
0x1221   :  { %v7855_v62 = vpop.permute.xlu1 %3710  ;;  %v7857_v49 = vpop.permute.xlu0 %3808 }
0x1223   :  { %4083 = vrot.lane.b32.xlu0 %v7708_v36, %s6085_s30  ;;  %4081 = vrot.lane.b32.xlu1 %v7669_v17, %s6085_s30  ;;  %v8016_v17 = vrot.slane %v7902_v29, %v6954_v24 }
0x1225   :  { %v7865_v52 = vpop.permute.xlu1 %3761  ;;  %v7867_v38 = vpop.permute.xlu0 %3857 }
0x1227   :  { %4259 = vrot.lane.b32.xlu0 %v7863_v48, %s6056_s4  ;;  %4257 = vrot.lane.b32.xlu1 %v7869_v43, %s6056_s4  ;;  %v7979_v48 = vld [vmem:[%s9245_s16 + $0x8] sm:$0xff]  ;;  %v7983_v43 = vmul.f32 %v7965_v39, %v7708_v36  ;;  %v8003_v36 = vrot.slane %v7957_v10, %v7030_v35  ;;  %v8042_v39 = vrot.slane %v7902_v29, %v7006_v37 }
0x1229   :  { %v7875_v51 = vpop.permute.xlu1 %3810  ;;  %v7877_v28 = vpop.permute.xlu0 %3930  ;;  %9407 = vst [vmem:[#allocation39_spill] sm:$0xff] %v7983_v43  ;;  %9412 = vst [vmem:[#allocation44_spill] sm:$0xff] %v8003_v36 }
0x122a   :  { %9419 = vst [vmem:[#allocation51_spill] sm:$0xff] %v8042_v39 }
0x122b   :  { %4361 = vrot.lane.b32.xlu0 %v6918_v58, %s6056_s4  ;;  %4359 = vrot.lane.b32.xlu1 %v6929_v1, %s6056_s4  ;;  %v7969_v58 = vrot.slane %v7957_v10, %v6967_v12  ;;  %v7974_v1 = vld [vmem:[%s9245_s16] sm:$0xff] }
0x122c   :  { %v8067_v43 = vrot.slane %v7974_v1, %v6992_v53 }
0x122d   :  { %v7883_v22 = vpop.permute.xlu1 %3859  ;;  %v7885_v30 = vpop.permute.xlu0 %3979  ;;  %9406 = vst [vmem:[#allocation38_spill] sm:$0xff] %v7969_v58  ;;  %v7987_v54 = vmul.f32 %v7969_v58, %v7678_v44  ;;  %v8007_v44 = vrot.slane %v7979_v48, %v6967_v12 }
0x122e   :  { %9396 = vst [vmem:[#allocation28_spill] sm:$0xff] %v7885_v30 }
0x122f   :  { %9408 = vst [vmem:[#allocation40_spill] sm:$0xff] %v7987_v54  ;;  %9413 = vst [vmem:[#allocation45_spill] sm:$0xff] %v8007_v44  ;;  %v8059_v54 = vmul.f32 %v8007_v44, %v7764_v61  ;;  %v8079_v61 = vrot.slane %v7974_v1, %v6954_v24 }
0x1231   :  { %v7887_v2 = vpop.permute.xlu1 %3932  ;;  %v7889_v46 = vpop.permute.xlu0 %3712  ;;  %9423 = vst [vmem:[#allocation55_spill] sm:$0xff] %v8059_v54  ;;  %v8125_v54 = vrot.slane %v7957_v10, %v6954_v24 }
0x1232   :  { %v3719_v7 = vsel %vm3718_vm10, %v7836_v34, %v7889_v46 }
0x1233   :  { %v3746_v16 = vmul.f32 %v7906_v59, %v3719_v7 }
0x1235   :  { %v7895_v42 = vpop.permute.xlu1 %3981  ;;  %v7897_v11 = vpop.permute.xlu0 %3763 }
0x1236   :  { %9397 = vst [vmem:[#allocation29_spill] sm:$0xff] %v7895_v42  ;;  %v8105_v42 = vrot.slane %v7902_v29, %v7014_v57 }
0x1238   :  { %9427 = vst [vmem:[#allocation59_spill] sm:$0xff] %v8105_v42 }
0x1239   :  { %v7912_v63 = vpop.permute.xlu1 %3714  ;;  %v7914_v18 = vpop.permute.xlu0 %3812 }
0x123a   :  { %v3720_v13 = vsel %vm3718_vm10, %v7855_v62, %v7912_v63 }
0x123b   :  { %v3750_v56 = vmul.f32 %v7906_v59, %v3720_v13 }
0x123d   :  { %v7922_v21 = vpop.permute.xlu1 %3765  ;;  %v7924_v6 = vpop.permute.xlu0 %3861  ;;  %v4124_v33 = vpack.c.bf16 %v3750_v56, %v3746_v16 }
0x123f   :  { %4212 = vmatprep.subr.bf16.mxu0 %v4124_v33 }
0x1241   :  { %v7926_v15 = vpop.permute.xlu1 %3814  ;;  %v7928_v14 = vpop.permute.xlu0 %3934 }
0x1245   :  { %v7930_v0 = vpop.permute.xlu1 %3863  ;;  %v7932_v3 = vpop.permute.xlu0 %3983 }
0x1246   :  { %9399 = vst [vmem:[#allocation31_spill] sm:$0xff] %v7932_v3  ;;  %v3867_v3 = vsel %vm3865_vm13, %v7883_v22, %v7930_v0 }
0x1249   :  { %v7934_v9 = vpop.permute.xlu1 %3936  ;;  %v7936_v19 = vpop.permute.xlu0 %4030 }
0x124a   :  { %9400 = vst [vmem:[#allocation32_spill] sm:$0xff] %v7936_v19  ;;  %v8033_v19 = vmul.f32 %v8007_v44, %v7802_v26  ;;  %v8051_v26 = vrot.slane %v7957_v10, %v7020_v8  ;;  %v8087_v44 = vrot.slane %v7974_v1, %v7006_v37 }
0x124c   :  { %9417 = vst [vmem:[#allocation49_spill] sm:$0xff] %v8033_v19  ;;  %9421 = vst [vmem:[#allocation53_spill] sm:$0xff] %v8051_v26  ;;  %v8075_v26 = vrot.slane %v7979_v48, %v7030_v35  ;;  %v8141_v19 = vrot.slane %v7957_v10, %v7000_v32 }
0x124d   :  { %v7938_v7 = vpop.permute.xlu1 %3985  ;;  %v7940_v13 = vpop.permute.xlu0 %4034 }
0x124e   :  { %9401 = vst [vmem:[#allocation33_spill] sm:$0xff] %v7938_v7  ;;  %9402 = vst [vmem:[#allocation34_spill] sm:$0xff] %v7940_v13  ;;  %v3818_v13 = vsel %vm3816_vm12, %v7875_v51, %v7926_v15  ;;  %v3866_v7 = vsel %vm3865_vm13, %v7867_v38, %v7924_v6 }
0x124f   :  { %9426 = vst [vmem:[#allocation58_spill] sm:$0xff] %v8075_v26  ;;  %v3769_v26 = vsel %vm3767_vm11, %v7865_v52, %v7922_v21 }
0x1251   :  { %v7942_v59 = vpop.permute.xlu1 %4020  ;;  %v7944_v16 = vpop.permute.xlu0 %3700 }
0x1252   :  { %9403 = vst [vmem:[#allocation35_spill] sm:$0xff] %v7942_v59  ;;  %v8011_v59 = vrot.slane %v7974_v1, %v6967_v12 }
0x1254   :  { %9414 = vst [vmem:[#allocation46_spill] sm:$0xff] %v8011_v59  ;;  %v8063_v60 = vmul.f32 %v8011_v59, %v7755_v5  ;;  %v8083_v5 = vrot.slane %v7974_v1, %v7000_v32 }
0x1255   :  { %v7946_v56 = vpop.permute.xlu1 %4024  ;;  %v7948_v33 = vpop.permute.xlu0 %3751 }
0x1256   :  { %9404 = vst [vmem:[#allocation36_spill] sm:$0xff] %v7946_v56  ;;  %v7999_v56 = vmul.f32 %v7969_v58, %v7656_v31  ;;  %v8025_v58 = vrot.slane %v7902_v29, %v7000_v32  ;;  %v8037_v31 = vmul.f32 %v8011_v59, %v7773_v23  ;;  %v8055_v23 = vrot.slane %v7902_v29, %v7030_v35 }
0x1257   :  { %9424 = vst [vmem:[#allocation56_spill] sm:$0xff] %v8063_v60  ;;  %v8117_v60 = vrot.slane %v7957_v10, %v6992_v53 }
0x1258   :  { %9411 = vst [vmem:[#allocation43_spill] sm:$0xff] %v7999_v56  ;;  %9415 = vst [vmem:[#allocation47_spill] sm:$0xff] %v8025_v58  ;;  %v8047_v56 = vrot.slane %v7957_v10, %v7014_v57  ;;  %v8149_v30 = vmul.f32 %v8025_v58, %v3818_v13  ;;  %v8167_v13 = vrot.slane %v7957_v10, %v7006_v37 }
0x1259   :  { %v7950_v27 = vpop.permute.xlu1 %3702  ;;  %v7952_v25 = vpop.permute.xlu0 %3800  ;;  %9418 = vst [vmem:[#allocation50_spill] sm:$0xff] %v8037_v31  ;;  %9422 = vst [vmem:[#allocation54_spill] sm:$0xff] %v8055_v23  ;;  %v8121_v31 = vrot.slane %v7979_v48, %v6954_v24  ;;  %v3799_v24 = vmul.f32 %v8016_v17, %v3769_v26  ;;  %v8163_v26 = vrot.slane %v7979_v48, %v7006_v37 }
0x125a   :  { %9420 = vst [vmem:[#allocation52_spill] sm:$0xff] %v8047_v56  ;;  %9429 = vst [vmem:[#allocation61_spill] sm:$0xff] %v8117_v60  ;;  %v8186_v37 = vmul.f32 %v8042_v39, %v3866_v7  ;;  %v8189_v10 = vmul.f32 %v8042_v39, %v3867_v3 }
0x125d   :  { %v7959_v20 = vpop.permute.xlu1 %3753  ;;  %v7961_v55 = vpop.permute.xlu0 %3849 }
0x1261   :  { %v7989_v4 = vpop.permute.xlu1 %3802  ;;  %v7991_v47 = vpop.permute.xlu0 %3922 }
0x1262   :  { %9409 = vst [vmem:[#allocation41_spill] sm:$0xff] %v7991_v47  ;;  %v8183_v47 = vrot.slane %v7979_v48, %v7014_v57 }
0x1264   :  { %9432 = vst [vmem:[#allocation64_spill] sm:$0xff] %v8183_v47 }
0x1265   :  { %v8027_v12 = vpop.permute.xlu1 %3851  ;;  %v8029_v36 = vpop.permute.xlu0 %3971 }
0x1266   :  { %9416 = vst [vmem:[#allocation48_spill] sm:$0xff] %v8029_v36  ;;  %v8071_v36 = vrot.slane %v7974_v1, %v7030_v35  ;;  %v8113_v35 = vrot.slane %v7979_v48, %v6992_v53  ;;  %v8137_v53 = vrot.slane %v7979_v48, %v7000_v32  ;;  %v3726_v32 = vsel %vm3718_vm10, %v7912_v63, %v7950_v27 }
0x1267   :  { %v3725_v63 = vsel %vm3718_vm10, %v7889_v46, %v7944_v16  ;;  %v3747_v46 = vmul.f32 %v8067_v43, %v3726_v32 }
0x1268   :  { %9425 = vst [vmem:[#allocation57_spill] sm:$0xff] %v8071_v36  ;;  %v8109_v36 = vrot.slane %v7902_v29, %v7020_v8  ;;  %v3768_v29 = vsel %vm3767_vm11, %v7849_v41, %v7897_v11  ;;  %v8171_v8 = vrot.slane %v7974_v1, %v7014_v57  ;;  %v8201_v57 = vsel %vm3938_vm14, %v7877_v28, %v7928_v14 }
0x1269   :  { %v8089_v59 = vpop.permute.xlu1 %3924  ;;  %v3705_v23 = vpop.permute.xlu0 %3704 }
0x126a   :  { %9428 = vst [vmem:[#allocation60_spill] sm:$0xff] %v8109_v36  ;;  %v3817_v36 = vsel %vm3816_vm12, %v7857_v49, %v7914_v18  ;;  %9431 = vst [vmem:[#allocation63_spill] sm:$0xff] %v8171_v8 }
0x126b   :  { %v8175_v42 = vmul.f32 %v8025_v58, %v3817_v36  ;;  %v3721_v36 = vsel %vm3718_vm10, %v3705_v23, %v7836_v34  ;;  %v3743_v34 = vmul.f32 %v8067_v43, %v3725_v63  ;;  %v4136_v63 = vpack.c.bf16 %v8189_v10, %v8186_v37  ;;  %v9440_v37 = vld [vmem:[#allocation31_spill] sm:$0xff]  ;;  %v9441_v10 = vld [vmem:[#allocation28_spill] sm:$0xff] }
0x126d   :  { %v8155_v50 = vpop.permute.xlu1 %3973  ;;  %v3756_v40 = vpop.permute.xlu0 %3755  ;;  %v4132_v39 = vpack.c.bf16 %v8149_v30, %v8175_v42 }
0x126e   :  { %9430 = vst [vmem:[#allocation62_spill] sm:$0xff] %v8155_v50  ;;  %v3795_v50 = vmul.f32 %v8016_v17, %v3768_v29  ;;  %v3723_v29 = vsel %vm3718_vm10, %v7944_v16, %v3705_v23  ;;  %v3775_v16 = vsel %vm3767_vm11, %v7922_v21, %v7959_v20  ;;  %v3774_v21 = vsel %vm3767_vm11, %v7897_v11, %v7948_v33 }
0x1270   :  { %v4128_v3 = vpack.c.bf16 %v3799_v24, %v3795_v50  ;;  %v3744_v50 = vmul.f32 %v8113_v35, %v3723_v29  ;;  %v3745_v24 = vmul.f32 %v8117_v60, %v3721_v36  ;;  %v4121_v36 = vpack.c.bf16 %v3747_v46, %v3743_v34 }
0x1271   :  { %v3707_v7 = vpop.permute.xlu1 %3706  ;;  %v3805_v58 = vpop.permute.xlu0 %3804  ;;  %v3823_v29 = vsel %vm3816_vm12, %v7914_v18, %v7952_v25 }
0x1272   :  { %v3722_v23 = vsel %vm3718_vm10, %v3707_v7, %v7855_v62  ;;  %v3724_v32 = vsel %vm3718_vm10, %v7950_v27, %v3707_v7  ;;  %v3770_v62 = vsel %vm3767_vm11, %v3756_v40, %v7849_v41  ;;  %v3772_v27 = vsel %vm3767_vm11, %v7948_v33, %v3756_v40 }
0x1273   :  { %v3748_v30 = vmul.f32 %v8113_v35, %v3724_v32  ;;  %v3749_v42 = vmul.f32 %v8117_v60, %v3722_v23  ;;  %v3796_v60 = vmul.f32 %v8079_v61, %v3775_v16  ;;  %v3824_v40 = vsel %vm3816_vm12, %v7926_v15, %v7989_v4 }
0x1274   :  { %v3793_v18 = vmul.f32 %v8121_v31, %v3772_v27  ;;  %v3794_v46 = vmul.f32 %v8125_v54, %v3770_v62  ;;  %v3819_v15 = vsel %vm3816_vm12, %v3805_v58, %v7857_v49  ;;  %v3873_v49 = vsel %vm3865_vm13, %v7930_v0, %v8027_v12 }
0x1275   :  { %v4123_v7 = vpack.c.bf16 %v3749_v42, %v3745_v24  ;;  %v3758_v23 = vpop.permute.xlu1 %3757  ;;  %v3854_v11 = vpop.permute.xlu0 %3853  ;;  %v4122_v32 = vpack.c.bf16 %v3748_v30, %v3744_v50  ;;  %v3792_v50 = vmul.f32 %v8079_v61, %v3774_v21  ;;  %v3845_v24 = vmul.f32 %v8083_v5, %v3824_v40 }
0x1276   :  { %v3771_v41 = vsel %vm3767_vm11, %v3758_v23, %v7865_v52  ;;  %v3773_v33 = vsel %vm3767_vm11, %v7959_v20, %v3758_v23  ;;  %v3821_v52 = vsel %vm3816_vm12, %v7952_v25, %v3805_v58  ;;  %v3841_v20 = vmul.f32 %v8083_v5, %v3823_v29 }
0x1277   :  { %v3797_v34 = vmul.f32 %v8121_v31, %v3773_v33  ;;  %v3798_v16 = vmul.f32 %v8125_v54, %v3771_v41  ;;  %4169 = vmatprep.subr.bf16.mxu1 %v4122_v32  ;;  %4213 = vmatpush1.bf16.msra.mxu0 %v4123_v7  ;;  %v4125_v21 = vpack.c.bf16 %v3796_v60, %v3792_v50  ;;  %v9434_v50 = vld [vmem:[#allocation59_spill] sm:$0xff] }
0x1278   :  { %4170 = vmatpush1.bf16.msra.mxu1 %v4121_v36  ;;  %4214 = vmatprep.subr.bf16.mxu0 %v4128_v3  ;;  %v3842_v36 = vmul.f32 %v8137_v53, %v3821_v52  ;;  %v3843_v3 = vmul.f32 %v8141_v19, %v3819_v15  ;;  %v3940_v0 = vsel %vm3938_vm14, %v7887_v2, %v7934_v9 }
0x1279   :  { %v4127_v30 = vpack.c.bf16 %v3798_v16, %v3794_v46  ;;  %v3807_v42 = vpop.permute.xlu1 %3806  ;;  %v3927_v62 = vpop.permute.xlu0 %3926  ;;  %v4126_v27 = vpack.c.bf16 %v3797_v34, %v3793_v18  ;;  %v3872_v7 = vsel %vm3865_vm13, %v7924_v6, %v7961_v55  ;;  %v4129_v23 = vpack.c.bf16 %v3845_v24, %v3841_v20  ;;  %v9433_v16 = vld [vmem:[#allocation41_spill] sm:$0xff] }
0x127a   :  { %v3820_v58 = vsel %vm3816_vm12, %v3807_v42, %v7875_v51  ;;  %v3822_v25 = vsel %vm3816_vm12, %v7989_v4, %v3807_v42  ;;  %v3868_v4 = vsel %vm3865_vm13, %v3854_v11, %v7867_v38  ;;  %v3870_v51 = vsel %vm3865_vm13, %v7961_v55, %v3854_v11  ;;  %v9435_v20 = vld [vmem:[#allocation13_spill] sm:$0xff] }
0x127b   :  { %v3846_v29 = vmul.f32 %v8137_v53, %v3822_v25  ;;  %v3847_v60 = vmul.f32 %v8141_v19, %v3820_v58  ;;  %4171 = vmatprep.subr.bf16.mxu1 %v4126_v27  ;;  %4215 = vmatpush1.bf16.msra.mxu0 %v4127_v30  ;;  %v3894_v18 = vmul.f32 %v8087_v44, %v3873_v49 }
0x127c   :  { %4172 = vmatpush1.bf16.msra.mxu1 %v4125_v21  ;;  %4216 = vmatprep.subr.bf16.mxu0 %v4132_v39  ;;  %v3946_v38 = vsel %vm3938_vm14, %v7934_v9, %v8089_v59  ;;  %v3891_v39 = vmul.f32 %v8163_v26, %v3870_v51  ;;  %v3892_v6 = vmul.f32 %v8167_v13, %v3868_v4  ;;  %v9437_v21 = vld [vmem:[#allocation25_spill] sm:$0xff] }
0x127d   :  { %v4131_v32 = vpack.c.bf16 %v3847_v60, %v3843_v3  ;;  %v3856_v40 = vpop.permute.xlu1 %3855  ;;  %v3976_v41 = vpop.permute.xlu0 %3975  ;;  %v4130_v33 = vpack.c.bf16 %v3846_v29, %v3842_v36  ;;  %v8307_v9 = vmul.f32 %v8047_v56, %v3940_v0  ;;  %v3970_v15 = vmul.f32 %v9434_v50, %v3946_v38  ;;  %v9442_v3 = vld [vmem:[#allocation62_spill] sm:$0xff]  ;;  %v9443_v29 = vld [vmem:[#allocation33_spill] sm:$0xff] }
0x127e   :  { %v3869_v11 = vsel %vm3865_vm13, %v3856_v40, %v7883_v22  ;;  %v3871_v55 = vsel %vm3865_vm13, %v8027_v12, %v3856_v40  ;;  %v3890_v22 = vmul.f32 %v8087_v44, %v3872_v7  ;;  %v3945_v12 = vsel %vm3938_vm14, %v7928_v14, %v9433_v16  ;;  %v9438_v14 = vld [vmem:[#allocation24_spill] sm:$0xff]  ;;  %v9444_v0 = vld [vmem:[#allocation29_spill] sm:$0xff]  ;;  %v9445_v7 = vld [vmem:[#allocation34_spill] sm:$0xff] }
0x127f   :  { %v3895_v46 = vmul.f32 %v8163_v26, %v3871_v55  ;;  %v3896_v34 = vmul.f32 %v8167_v13, %v3869_v11  ;;  %4173 = vmatprep.subr.bf16.mxu1 %v4130_v33  ;;  %4217 = vmatpush1.bf16.msra.mxu0 %v4131_v32  ;;  %v8317_v24 = vrot.slane %v7974_v1, %v9435_v20  ;;  %v9447_v40 = vld [vmem:[#allocation48_spill] sm:$0xff]  ;;  %v9449_v38 = vld [vmem:[#allocation42_spill] sm:$0xff] }
0x1280   :  { %4174 = vmatpush1.bf16.msra.mxu1 %v4129_v23  ;;  %4218 = vmatprep.subr.bf16.mxu0 %v4136_v63  ;;  %v8330_v49 = vsel %vm4036_vm15, %v9438_v14, %v9437_v21  ;;  %v3965_v58 = vmul.f32 %v8047_v56, %v8201_v57  ;;  %v4133_v1 = vpack.c.bf16 %v3894_v18, %v3890_v22  ;;  %v9446_v23 = vld [vmem:[#allocation32_spill] sm:$0xff]  ;;  %v9448_v18 = vld [vmem:[#allocation39_spill] sm:$0xff] }
0x1281   :  { %v4135_v52 = vpack.c.bf16 %v3896_v34, %v3892_v6  ;;  %9436 = vst [vmem:[#allocation41_spill] sm:$0xff] %v8317_v24  ;;  %v8322_v30 = vpop.permute.xlu1 %4073  ;;  %v8324_v42 = vpop.permute.xlu0 %4022  ;;  %v4134_v27 = vpack.c.bf16 %v3895_v46, %v3891_v39  ;;  %v8336_v25 = vrot.slane %v7979_v48, %v9435_v20  ;;  %v3988_v63 = vsel %vm3987_vm2, %v9441_v10, %v9440_v37  ;;  %v9455_v34 = vld [vmem:[#allocation60_spill] sm:$0xff] }
0x1282   :  { %v3966_v36 = vmul.f32 %v9434_v50, %v3945_v12  ;;  %v3995_v60 = vsel %vm3987_vm2, %v9443_v29, %v9442_v3  ;;  %v3943_v57 = vsel %vm3938_vm14, %v9433_v16, %v3927_v62  ;;  %v4143_v48 = vpack.c.bf16 %v8307_v9, %v3965_v58 }
0x1283   :  { %9439 = vst [vmem:[#allocation59_spill] sm:$0xff] %v8336_v25  ;;  %4175 = vmatprep.subr.bf16.mxu1 %v4134_v27  ;;  %v3989_v4 = vsel %vm3987_vm2, %v9444_v0, %v9443_v29  ;;  %v3941_v51 = vsel %vm3938_vm14, %v3927_v62, %v7877_v28  ;;  %4219 = vmatpush1.bf16.msra.mxu0 %v4135_v52  ;;  %v9452_v28 = vld [vmem:[#allocation49_spill] sm:$0xff]  ;;  %v9453_v62 = vld [vmem:[#allocation55_spill] sm:$0xff] }
0x1284   :  { %4176 = vmatpush1.bf16.msra.mxu1 %v4133_v1  ;;  %v4038_v32 = vsel %vm4036_vm15, %v9446_v23, %v9445_v7  ;;  %v3994_v33 = vsel %vm3987_vm2, %v9440_v37, %v9447_v40  ;;  %v9450_v11 = vpack.c.bf16 %v9448_v18, %v9449_v38  ;;  %v9454_v6 = vpack.c.bf16 %v9452_v28, %v9453_v62  ;;  %v9463_v18 = vld [vmem:[#allocation56_spill] sm:$0xff] }
0x1285   :  { %v3929_v55 = vpop.permute.xlu1 %3928  ;;  %v8369_v39 = vpop.f32.mrb[76].mxu1  ;;  %v4144_v46 = vpack.c.bf16 %v3970_v15, %v3966_v36  ;;  %v4019_v9 = vmul.f32 %v9455_v34, %v3995_v60  ;;  %v3963_v22 = vmul.f32 %v8171_v8, %v3943_v57  ;;  %v3964_v27 = vmul.f32 %v8183_v47, %v3941_v51  ;;  %v9459_v60 = vld [vmem:[#allocation40_spill] sm:$0xff]  ;;  %v9460_v57 = vld [vmem:[#allocation43_spill] sm:$0xff] }
0x1286   :  { %4220 = vmatprep.subr.bf16.mxu0 %v9450_v11  ;;  %9451 = vst [vmem:[#allocation13_spill] sm:$0xff] %v8369_v39  ;;  %4177 = vmatprep.subr.bf16.mxu1 %v9454_v6  ;;  %v3942_v16 = vsel %vm3938_vm14, %v3929_v55, %v7887_v2  ;;  %v3944_v12 = vsel %vm3938_vm14, %v8089_v59, %v3929_v55  ;;  %v8382_v52 = vpop.f32.mrb[62].mxu0  ;;  %v8384_v20 = vpop.permute.xlu0 %4079  ;;  %v9465_v11 = vld [vmem:[#allocation53_spill] sm:$0xff] }
0x1287   :  { %9456 = vst [vmem:[#allocation25_spill] sm:$0xff] %v8382_v52  ;;  %v3992_v15 = vsel %vm3987_vm2, %v9447_v40, %v3976_v41  ;;  %v3967_v58 = vmul.f32 %v8171_v8, %v3944_v12  ;;  %v3968_v1 = vmul.f32 %v8183_v47, %v3942_v16  ;;  %v8392_v37 = vpop.f32.mrb[77].mxu1  ;;  %v8394_v2 = vpop.f32.mrb[63].mxu0  ;;  %v4015_v59 = vmul.f32 %v9455_v34, %v3994_v33  ;;  %v9462_v40 = vld [vmem:[#allocation50_spill] sm:$0xff]  ;;  %v9466_v33 = vld [vmem:[#allocation35_spill] sm:$0xff]  ;;  %v9512_v8 = vld [vmem:[#allocation45_spill] sm:$0xff] }
0x1288   :  { %9457 = vst [vmem:[#allocation24_spill] sm:$0xff] %v8392_v37  ;;  %9458 = vst [vmem:[#allocation31_spill] sm:$0xff] %v8394_v2  ;;  %v3990_v36 = vsel %vm3987_vm2, %v3976_v41, %v9441_v10  ;;  %v4044_v29 = vsel %vm4036_vm15, %v9445_v7, %v8324_v42  ;;  %v9461_v51 = vpack.c.bf16 %v9459_v60, %v9460_v57 }
0x1289   :  { %v9464_v38 = vpack.c.bf16 %v9462_v40, %v9463_v18  ;;  %v4018_v55 = vmul.f32 %v9465_v11, %v3989_v4  ;;  %v4043_v41 = vsel %vm4036_vm15, %v9437_v21, %v9466_v33  ;;  %v4141_v10 = vpack.c.bf16 %v3967_v58, %v3963_v22  ;;  %v3978_v28 = vpop.permute.xlu1 %3977  ;;  %v9467_v21 = vld [vmem:[#allocation54_spill] sm:$0xff]  ;;  %v9468_v58 = vld [vmem:[#allocation36_spill] sm:$0xff] }
0x128a   :  { %4221 = vmatpush1.bf16.msra.mxu0 %v9461_v51  ;;  %v4142_v62 = vpack.c.bf16 %v3968_v1, %v3964_v27  ;;  %v4012_v7 = vmul.f32 %v8317_v24, %v3992_v15  ;;  %v3991_v6 = vsel %vm3987_vm2, %v3978_v28, %v9444_v0  ;;  %v3993_v16 = vsel %vm3987_vm2, %v9442_v3, %v3978_v28  ;;  %v8422_v4 = vpop.permute.xlu0 %4071  ;;  %v9469_v3 = vld [vmem:[#allocation12_spill] sm:$0xff] }
0x128b   :  { %4178 = vmatpush1.bf16.msra.mxu1 %v9464_v38  ;;  %4222 = vmatprep.subr.bf16.mxu0 %v4144_v46  ;;  %v4148_v12 = vpack.c.bf16 %v4019_v9, %v4015_v59  ;;  %v4013_v60 = vmul.f32 %v8336_v25, %v3990_v36  ;;  %v4068_v22 = vmul.f32 %v9467_v21, %v4044_v29  ;;  %v9470_v9 = vld [vmem:[#allocation22_spill] sm:$0xff] }
0x128c   :  { %v4016_v46 = vmul.f32 %v8317_v24, %v3993_v16  ;;  %v4017_v27 = vmul.f32 %v8336_v25, %v3991_v6  ;;  %4179 = vmatprep.subr.bf16.mxu1 %v4142_v62  ;;  %v4014_v15 = vmul.f32 %v9465_v11, %v3988_v63  ;;  %v4041_v0 = vsel %vm4036_vm15, %v9466_v33, %v9468_v58  ;;  %v9473_v33 = vld [vmem:[#allocation20_spill] sm:$0xff] }
0x128d   :  { %v8436_v1 = vrot.slane %v9470_v9, %v9469_v3  ;;  %v4064_v59 = vmul.f32 %v9467_v21, %v4043_v41  ;;  %v4039_v63 = vsel %vm4036_vm15, %v9468_v58, %v9438_v14  ;;  %v4078_v29 = vpop.permute.xlu1 %4077  ;;  %v9475_v41 = vld [vmem:[#allocation57_spill] sm:$0xff] }
0x128e   :  { %4223 = vmatpush1.bf16.msra.mxu0 %v4143_v48  ;;  %v4145_v36 = vpack.c.bf16 %v4016_v46, %v4012_v7  ;;  %v4146_v57 = vpack.c.bf16 %v4017_v27, %v4013_v60  ;;  %v9472_v48 = vld [vmem:[#allocation44_spill] sm:$0xff]  ;;  %v4147_v40 = vpack.c.bf16 %v4018_v55, %v4014_v15  ;;  %v4027_v38 = vpop.permute.xlu0 %4026  ;;  %v4061_v28 = vmul.f32 %v9475_v41, %v4041_v0  ;;  %v9476_v55 = vld [vmem:[#allocation58_spill] sm:$0xff] }
0x128f   :  { %4180 = vmatpush1.bf16.msra.mxu1 %v4141_v10  ;;  %9471 = vst [vmem:[#allocation28_spill] sm:$0xff] %v8436_v1  ;;  %4224 = vmatprep.subr.bf16.mxu0 %v4148_v12  ;;  %v4063_v51 = vmul.f32 %v9472_v48, %v8330_v49  ;;  %v4067_v18 = vmul.f32 %v9472_v48, %v4038_v32  ;;  %v9477_v12 = vld [vmem:[#allocation16_spill] sm:$0xff] }
0x1290   :  { %v8448_v10 = vrot.slane %v9473_v33, %v9469_v3  ;;  %v4040_v14 = vsel %vm4036_vm15, %v4027_v38, %v9446_v23  ;;  %v4042_v62 = vsel %vm4036_vm15, %v8324_v42, %v4027_v38  ;;  %4181 = vmatprep.subr.bf16.mxu1 %v4146_v57  ;;  %v4152_v49 = vpack.c.bf16 %v4068_v22, %v4064_v59  ;;  %v9479_v59 = vld [vmem:[#allocation18_spill] sm:$0xff] }
0x1291   :  { %v4062_v7 = vmul.f32 %v9476_v55, %v4039_v63  ;;  %v4065_v32 = vmul.f32 %v9475_v41, %v4042_v62  ;;  %v4066_v6 = vmul.f32 %v9476_v55, %v4040_v14  ;;  %v4088_v16 = vsel %vm4085_vm3, %v8322_v30, %v4078_v29  ;;  %v4070_v23 = vpop.permute.xlu1 %4069 }
0x1292   :  { %9474 = vst [vmem:[#allocation62_spill] sm:$0xff] %v8448_v10  ;;  %4225 = vmatpush1.bf16.msra.mxu0 %v4147_v40  ;;  %v8465_v60 = vrot.slane %v9477_v12, %v9469_v3  ;;  %v4151_v42 = vpack.c.bf16 %v4067_v18, %v4063_v51  ;;  %v4090_v46 = vsel %vm4085_vm3, %v4070_v23, %v8322_v30  ;;  %v4076_v27 = vpop.permute.xlu0 %4075 }
0x1293   :  { %4182 = vmatpush1.bf16.msra.mxu1 %v4145_v36  ;;  %4226 = vmatprep.subr.bf16.mxu0 %v4152_v49  ;;  %v4149_v22 = vpack.c.bf16 %v4065_v32, %v4061_v28  ;;  %v4150_v15 = vpack.c.bf16 %v4066_v6, %v4062_v7  ;;  %v4110_v58 = vmul.f32 %v8448_v10, %v4090_v46  ;;  %v5958_v32 = vld [vmem:[%s9239_s10 + $0x30] ss:$8 sps:$4 sm:$0xff]  }
0x1294   :  { %9478 = vst [vmem:[#allocation33_spill] sm:$0xff] %v8465_v60  ;;  %v4089_v0 = vsel %vm4085_vm3, %v4076_v27, %v8384_v20  ;;  %v4091_v9 = vsel %vm4085_vm3, %v8422_v4, %v4076_v27  ;;  %v8479_v63 = vrot.slane %v9479_v59, %v9469_v3  ;;  %v4111_v36 = vmul.f32 %v8436_v1, %v4088_v16  ;;  %v9483_v27 = vld [vmem:[#allocation9_spill] sm:$0xff] }
0x1295   :  { %v4114_v30 = vmul.f32 %v8448_v10, %v4091_v9  ;;  %v4115_v57 = vmul.f32 %v8436_v1, %v4089_v0  ;;  %4183 = vmatprep.subr.bf16.mxu1 %v4150_v15  ;;  %v4082_v51 = vpop.permute.xlu1 %4081  ;;  %v2342_v0 = vld [vmem:[%s9237_s8 + $0x50] sm:$0xff]  ;;  %v9485_v9 = vmov 0   ;;  %v2343_v59 = vld [vmem:[%s9237_s8 + $0x58] sm:$0xff] }
0x1296   :  { %9480 = vst [vmem:[#allocation29_spill] sm:$0xff] %v8479_v63  ;;  %4227 = vmatpush1.bf16.msra.mxu0 %v4151_v42  ;;  %v4086_v18 = vsel %vm4085_vm3, %v4078_v29, %v4082_v51  ;;  %v4092_v38 = vsel %vm4085_vm3, %v4082_v51, %v4070_v23  ;;  %v4084_v33 = vpop.permute.xlu0 %4083  ;;  %v9481_v23 = vld [vmem:[#allocation27_spill] sm:$0xff] }
0x1297   :  { %4184 = vmatpush1.bf16.msra.mxu1 %v4149_v22  ;;  %v4153_v40 = vpack.c.bf16 %v4114_v30, %v4110_v58  ;;  %v4154_v3 = vpack.c.bf16 %v4115_v57, %v4111_v36  ;;  %v4112_v28 = vmul.f32 %v8465_v60, %v4086_v18  ;;  %v4113_v14 = vmul.f32 %v8479_v63, %v4092_v38  ;;  %v9482_v22 = vld [vmem:[#allocation26_spill] sm:$0xff]  ;;  %v9486_v30 = vld [vmem:[#allocation8_spill] sm:$0xff] }
0x1298   :  { %v4087_v62 = vsel %vm4085_vm3, %v8384_v20, %v4084_v33  ;;  %v4093_v49 = vsel %vm4085_vm3, %v4084_v33, %v8422_v4  ;;  %v9484_v58 = vmov 1   ;;  %v9487_v33 = vld [vmem:[#allocation23_spill] sm:$0xff] }
0x1299   :  { %v4116_v7 = vmul.f32 %v8465_v60, %v4087_v62  ;;  %v4117_v29 = vmul.f32 %v8479_v63, %v4093_v49  ;;  %4185 = vmatprep.subr.bf16.mxu1 %v4154_v3  ;;  %v4258_v6 = vpop.permute.xlu1 %4257 }
0x129a   :  { %v4263_v12 = vsub.f32 %v9481_v23, %v4258_v6  ;;  %v4260_v42 = vpop.permute.xlu0 %4259 }
0x129b   :  { %4186 = vmatpush1.bf16.msra.mxu1 %v4153_v40  ;;  %v4155_v16 = vpack.c.bf16 %v4116_v7, %v4112_v28  ;;  %v4156_v20 = vpack.c.bf16 %v4117_v29, %v4113_v14  ;;  %v4264_v46 = vsub.f32 %v9482_v22, %v4260_v42 }
0x129c   :  { %4267 = vperm.xlu1 %5896, %v4263_v12  }
0x129d   :  { %4228 = vmatprep.subr.bf16.mxu0 %v4156_v20  ;;  %v4360_v4 = vpop.permute.xlu1 %4359  ;;  %4272 = vperm.xlu0 %5894, %v4264_v46  }
0x129e   :  { %4202 = vmatmul.mubr.bf16.vlgmr.msra.gmra.mrb[80].mxu1 %v5958_v32  ;;  %4229 = vmatpush1.bf16.msra.mxu0 %v4155_v16  ;;  %v4365_v15 = vsub.f32 %v9483_v27, %v4360_v4  ;;  %v4362_v36 = vpop.permute.xlu0 %4361 }
0x129f   :  { %v4366_v57 = vsub.f32 %v9486_v30, %v4362_v36 }
0x12a0   :  { %5897 = vset.pattern.permute.xlu1 %v9484_v58 }
0x12a1   :  { %4245 = vmatmul.mubr.bf16.vlgmr.msra.gmra.mrb[64].mxu0 %v5958_v32  ;;  %4369 = vperm.xlu0 %5894, %v4365_v15   ;;  %v9488_v32 = vld [vmem:[#allocation21_spill] sm:$0xff] }
0x12a2   :  { %4284 = vperm.xlu1 %5897, %v9481_v23  }
0x12a5   :  { %5899 = vset.pattern.permute.xlu0 %v9484_v58 }
0x12a6   :  { %5898 = vset.pattern.permute.xlu1 %v9485_v9  ;;  %4288 = vperm.xlu0 %5899, %v9482_v22   ;;  %v9489_v22 = vld [vmem:[#allocation17_spill] sm:$0xff] }
0x12a7   :  { %4309 = vperm.xlu1 %5898, %v2342_v0  }
0x12aa   :  { %4390 = vperm.xlu0 %5899, %v9486_v30  }
0x12ab   :  { %4314 = vperm.xlu1 %5898, %v2343_v59  }
0x12af   :  { %4374 = vperm.xlu1 %5898, %v4366_v57  }
0x12b3   :  { %5900 = vset.pattern.permute.xlu1 %v9484_v58 }
0x12b4   :  { %4386 = vperm.xlu1 %5900, %v9483_v27  }
0x12b8   :  { %5901 = vset.pattern.permute.xlu1 %v9485_v9 }
0x131b   :  { %v8520_v51 = vpop.permute.xlu1 %4267 }
0x131c   :  { %v8522_v40 = vpop.permute.xlu0 %4272  ;;  %v4276_v3 = vmul.f32 %v8520_v51, %v9487_v33  ;;  %v4275_v6 = vmul.f32 %v8520_v51, %v9488_v32  ;;  %v4277_v46 = vmul.f32 %v8520_v51, %v9489_v22 }
0x131d   :  { %v4280_v14 = vmul.f32 %v8522_v40, %v9487_v33 }
0x1320   :  { %v8524_v18 = vpop.permute.xlu0 %4369 }
0x1321   :  { %v8526_v38 = vpop.permute.xlu1 %4284  ;;  %v4377_v36 = vmul.f32 %v8524_v18, %v9488_v32 }
0x1322   :  { %v4292_v28 = vadd.f32 %v8526_v38, %v4276_v3  ;;  %v4291_v23 = vadd.f32 %v8526_v38, %v4275_v6  ;;  %v4293_v59 = vadd.f32 %v8526_v38, %v4277_v46  ;;  %v4281_v6 = vmul.f32 %v8522_v40, %v9489_v22 }
0x1325   :  { %v8533_v62 = vpop.permute.xlu0 %4288 }
0x1326   :  { %v4296_v49 = vadd.f32 %v8533_v62, %v4280_v14  ;;  %v8536_v7 = vpop.permute.xlu1 %4309  ;;  %v4297_v37 = vadd.f32 %v8533_v62, %v4281_v6 }
0x132a   :  { %v8538_v29 = vpop.permute.xlu1 %4314 }
0x132e   :  { %v8542_v16 = vpop.permute.xlu1 %4374 }
0x1333   :  { %v8553_v30 = vpop.permute.xlu1 %4386 }
0x1371   :  { %v4203_v12 = vpop.f32.mrb[80].mxu1 }
0x1372   :  { %v4299_v42 = vmul.f32 %v4291_v23, %v4203_v12  ;;  %v4205_v20 = vpop.f32.mrb[81].mxu1 }
0x1373   :  { %v4300_v4 = vmul.f32 %v4292_v28, %v4205_v20  ;;  %v8547_v27 = vpop.f32.mrb[82].mxu1  ;;  %v4378_v28 = vmul.f32 %v8524_v18, %v9487_v33  ;;  %v4382_v20 = vmul.f32 %v8542_v16, %v9487_v33 }
0x1374   :  { %v4317_v15 = vadd.f32 %v8536_v7, %v4299_v42  ;;  %v4209_v0 = vpop.f32.mrb[83].mxu1  ;;  %v4246_v14 = vpop.f32.mrb[64].mxu0 }
0x1375   :  { %v4318_v57 = vadd.f32 %v8536_v7, %v4300_v4  ;;  %v4304_v3 = vmul.f32 %v4296_v49, %v4209_v0  ;;  %v4301_v12 = vmul.f32 %v4293_v59, %v4246_v14  ;;  %v4248_v42 = vpop.f32.mrb[65].mxu0  ;;  %v4393_v49 = vadd.f32 %v8553_v30, %v4377_v36  ;;  %v8566_v14 = vpop.permute.xlu0 %4390 }
0x1376   :  { %vm4325_vm4 = vcmp.ge.f32.partialorder %v4317_v15, 0.0  ;;  %v4333_v23 = vmul.f32 0.2, %v4317_v15  ;;  %v4250_v4 = vpop.f32.mrb[66].mxu0  ;;  %v4394_v33 = vadd.f32 %v8553_v30, %v4378_v28  ;;  %v4379_v36 = vmul.f32 %v8524_v18, %v9489_v22 }
0x1377   :  { %vm4326_vm5 = vcmp.ge.f32.partialorder %v4318_v57, 0.0  ;;  %v4334_v46 = vmul.f32 0.2, %v4318_v57  ;;  %v4322_v2 = vadd.f32 %v8538_v29, %v4304_v3  ;;  %v4319_v52 = vadd.f32 %v8536_v7, %v4301_v12  ;;  %v4252_v39 = vpop.f32.mrb[67].mxu0 }
0x1378   :  { %v4341_v0 = vsel %vm4325_vm4, %v4317_v15, %v4333_v23  ;;  %v4398_v15 = vadd.f32 %v8566_v14, %v4382_v20  ;;  %v4395_v21 = vadd.f32 %v8553_v30, %v4379_v36 }
0x1379   :  { %v4349_v58 = vmul.f32 1.4142135, %v4341_v0  ;;  %v4342_v63 = vsel %vm4326_vm5, %v4318_v57, %v4334_v46  ;;  %vm4330_vm6 = vcmp.ge.f32.partialorder %v4322_v2, 0.0  ;;  %v4338_v59 = vmul.f32 0.2, %v4322_v2 }
0x137a   :  { %v4350_v60 = vmul.f32 1.4142135, %v4342_v63  ;;  %vm4327_vm7 = vcmp.ge.f32.partialorder %v4319_v52, 0.0  ;;  %v4335_v3 = vmul.f32 0.2, %v4319_v52  ;;  %v4305_v0 = vmul.f32 %v4297_v37, %v4250_v4  ;;  %v9490_v4 = vld [vmem:[#allocation38_spill] sm:$0xff] }
0x137b   :  { %v8572_v23 = vmul.f32 %v4393_v49, %v4349_v58  ;;  %v4346_v6 = vsel %vm4330_vm6, %v4322_v2, %v4338_v59  ;;  %v4383_v58 = vmul.f32 %v8542_v16, %v9489_v22  ;;  %v9506_v22 = vld [vmem:[#allocation30_spill] sm:$0xff] }
0x137c   :  { %v8574_v12 = vmul.f32 %v4394_v33, %v4350_v60  ;;  %v4354_v57 = vmul.f32 1.4142135, %v4346_v6  ;;  %v4343_v46 = vsel %vm4327_vm7, %v4319_v52, %v4335_v3  ;;  %v4323_v28 = vadd.f32 %v8538_v29, %v4305_v0 }
0x137d   :  { %v4351_v48 = vmul.f32 1.4142135, %v4343_v46  ;;  %4409 = vrot.lane.b32.xlu1 %v8572_v23, %s6081_s24  ;;  %v4399_v37 = vadd.f32 %v8566_v14, %v4383_v58  ;;  %v4279_v6 = vmul.f32 %v8522_v40, %v9488_v32 }
0x137e   :  { %v8579_v63 = vmul.f32 %v4398_v15, %v4354_v57  ;;  %vm4331_vm8 = vcmp.ge.f32.partialorder %v4323_v28, 0.0  ;;  %v4339_v2 = vmul.f32 0.2, %v4323_v28  ;;  %v8857_v56 = vmul.f32 %v8574_v12, %v9512_v8 }
0x137f   :  { %v4403_v20 = vmul.f32 %v4395_v21, %v4351_v48  ;;  %v9493_v21 = vld [vmem:[#allocation19_spill] sm:$0xff]  ;;  %v4295_v57 = vadd.f32 %v8533_v62, %v4279_v6 }
0x1380   :  { %v4347_v52 = vsel %vm4331_vm8, %v4323_v28, %v4339_v2  ;;  %v4278_v48 = vmul.f32 %v8520_v51, %v9493_v21  ;;  %9514 = vst [vmem:[#allocation20_spill] sm:$0xff] %v8857_v56 }
0x1381   :  { %4417 = vrot.lane.b32.xlu0 %v4403_v20, %s6081_s24  ;;  %v4355_v60 = vmul.f32 1.4142135, %v4347_v52  ;;  %v8589_v49 = vmul.f32 %v4403_v20, %v9490_v4  ;;  %v4303_v46 = vmul.f32 %v4295_v57, %v8547_v27 }
0x1382   :  { %v4294_v36 = vadd.f32 %v8526_v38, %v4278_v48  ;;  %v4282_v38 = vmul.f32 %v8522_v40, %v9493_v21  ;;  %v4380_v40 = vmul.f32 %v8524_v18, %v9493_v21 }
0x1383   :  { %v4407_v33 = vmul.f32 %v4399_v37, %v4355_v60  ;;  %9491 = vst [vmem:[#allocation34_spill] sm:$0xff] %v8589_v49  ;;  %v4321_v28 = vadd.f32 %v8538_v29, %v4303_v46  ;;  %v4381_v60 = vmul.f32 %v8542_v16, %v9488_v32  ;;  %v9495_v46 = vld [vmem:[#allocation14_spill] sm:$0xff] }
0x1384   :  { %v4302_v15 = vmul.f32 %v4294_v36, %v4248_v42  ;;  %v4298_v0 = vadd.f32 %v8533_v62, %v4282_v38  ;;  %v4396_v62 = vadd.f32 %v8553_v30, %v4380_v40  ;;  %v4384_v30 = vmul.f32 %v8542_v16, %v9493_v21  ;;  %v9494_v16 = vld [vmem:[#allocation15_spill] sm:$0xff] }
0x1385   :  { %4449 = vrot.lane.b32.xlu0 %v4403_v20, %s6082_s5  ;;  %4419 = vrot.lane.b32.xlu1 %v4407_v33, %s6081_s24  ;;  %v8592_v59 = vmul.f32 %v4407_v33, %v9490_v4  ;;  %v4337_v27 = vmul.f32 0.2, %v4321_v28  ;;  %vm4329_vm1 = vcmp.ge.f32.partialorder %v4321_v28, 0.0  ;;  %v2313_v38 = vadd.f32 1e-08, %v9495_v46  ;;  %v9497_v40 = vld [vmem:[#allocation11_spill] sm:$0xff] }
0x1386   :  { %v4320_v51 = vadd.f32 %v8536_v7, %v4302_v15  ;;  %v4306_v58 = vmul.f32 %v4298_v0, %v4252_v39  ;;  %v4400_v15 = vadd.f32 %v8566_v14, %v4384_v30 }
0x1387   :  { %9492 = vst [vmem:[#allocation32_spill] sm:$0xff] %v8592_v59  ;;  %v4345_v39 = vsel %vm4329_vm1, %v4321_v28, %v4337_v27  ;;  %v9510_v59 = vld [vmem:[#allocation46_spill] sm:$0xff] }
0x1388   :  { %v4336_v42 = vmul.f32 0.2, %v4320_v51  ;;  %vm4328_vm9 = vcmp.ge.f32.partialorder %v4320_v51, 0.0  ;;  %v4324_v2 = vadd.f32 %v8538_v29, %v4306_v58  ;;  %v4353_v29 = vmul.f32 1.4142135, %v4345_v39 }
0x1389   :  { %4481 = vrot.lane.b32.xlu0 %v4403_v20, %s6083_s25  ;;  %4451 = vrot.lane.b32.xlu1 %v4407_v33, %s6082_s5 }
0x138a   :  { %v4344_v7 = vsel %vm4328_vm9, %v4320_v51, %v4336_v42  ;;  %v4340_v37 = vmul.f32 0.2, %v4324_v2  ;;  %vm4332_vm4 = vcmp.ge.f32.partialorder %v4324_v2, 0.0  ;;  %v5961_v51 = vld [vmem:[%s9239_s10 + $0x44] ss:$8 sps:$4 sm:$0xff]  }
0x138b   :  { %v4352_v52 = vmul.f32 1.4142135, %v4344_v7  ;;  %5276 = vmatprep.mubr.msk.bf16.mxu1 %vm1894_vm0, %v5961_v51  ;;  %5277 = vmatprep.mubr.msk.bf16.mxu0 %vm1894_vm0, %v5961_v51 }
0x138c   :  { %v4348_v18 = vsel %vm4332_vm4, %v4324_v2, %v4340_v37 }
0x138d   :  { %4513 = vrot.lane.b32.xlu0 %v4403_v20, %s6064_s26  ;;  %4483 = vrot.lane.b32.xlu1 %v4407_v33, %s6083_s25  ;;  %v8625_v4 = vmul.f32 %v4396_v62, %v4352_v52  ;;  %v4356_v36 = vmul.f32 1.4142135, %v4348_v18 }
0x138f   :  { %v8641_v6 = vmul.f32 %v4400_v15, %v4356_v36 }
0x1391   :  { %4553 = vrot.lane.b32.xlu0 %v4403_v20, %s6056_s4  ;;  %4515 = vrot.lane.b32.xlu1 %v4407_v33, %s6064_s26 }
0x1395   :  { %4585 = vrot.lane.b32.xlu0 %v4403_v20, %s6084_s1  ;;  %4555 = vrot.lane.b32.xlu1 %v4407_v33, %s6056_s4 }
0x1399   :  { %4617 = vrot.lane.b32.xlu0 %v4403_v20, %s6080_s14  ;;  %4587 = vrot.lane.b32.xlu1 %v4407_v33, %s6084_s1 }
0x139d   :  { %4649 = vrot.lane.b32.xlu0 %v4403_v20, %s6085_s30  ;;  %4619 = vrot.lane.b32.xlu1 %v4407_v33, %s6080_s14  ;;  %v4397_v20 = vadd.f32 %v8566_v14, %v4381_v60  ;;  %v2308_v14 = vadd.f32 1e-08, %v9494_v16 }
0x139f   :  { %v8634_v48 = vmul.f32 %v4397_v20, %v4353_v29  ;;  %5982 = vrsqrt.f32 %v2308_v14  ;;  %v9500_v29 = vld [vmem:[#allocation10_spill] sm:$0xff] }
0x13a0   :  { %5984 = vrsqrt.f32 %v2313_v38 }
0x13a1   :  { %4421 = vrot.lane.b32.xlu0 %v8625_v4, %s6081_s24  ;;  %4651 = vrot.lane.b32.xlu1 %v4407_v33, %s6085_s30  ;;  %v8835_v47 = vmul.f32 %v8634_v48, %v9510_v59 }
0x13a3   :  { %9511 = vst [vmem:[#allocation12_spill] sm:$0xff] %v8835_v47 }
0x13a5   :  { %4441 = vrot.lane.b32.xlu0 %v8572_v23, %s6082_s5  ;;  %4411 = vrot.lane.b32.xlu1 %v8634_v48, %s6081_s24 }
0x13a9   :  { %4453 = vrot.lane.b32.xlu0 %v8625_v4, %s6082_s5  ;;  %4423 = vrot.lane.b32.xlu1 %v8641_v6, %s6081_s24  ;;  %v8744_v58 = vpop.eup %5982 }
0x13aa   :  { %9496 = vst [vmem:[#allocation48_spill] sm:$0xff] %v8744_v58  ;;  %v8762_v62 = vpop.eup %5984 }
0x13ab   :  { %9498 = vst [vmem:[#allocation39_spill] sm:$0xff] %v8762_v62 }
0x13ad   :  { %4473 = vrot.lane.b32.xlu0 %v8572_v23, %s6083_s25  ;;  %4443 = vrot.lane.b32.xlu1 %v8634_v48, %s6082_s5 }
0x13b1   :  { %4485 = vrot.lane.b32.xlu0 %v8625_v4, %s6083_s25  ;;  %4455 = vrot.lane.b32.xlu1 %v8641_v6, %s6082_s5 }
0x13b5   :  { %4505 = vrot.lane.b32.xlu0 %v8572_v23, %s6064_s26  ;;  %4475 = vrot.lane.b32.xlu1 %v8634_v48, %s6083_s25 }
0x13b9   :  { %4517 = vrot.lane.b32.xlu0 %v8625_v4, %s6064_s26  ;;  %4487 = vrot.lane.b32.xlu1 %v8641_v6, %s6083_s25 }
0x13bd   :  { %4545 = vrot.lane.b32.xlu0 %v8572_v23, %s6056_s4  ;;  %4507 = vrot.lane.b32.xlu1 %v8634_v48, %s6064_s26 }
0x13c1   :  { %4577 = vrot.lane.b32.xlu0 %v8572_v23, %s6084_s1  ;;  %4519 = vrot.lane.b32.xlu1 %v8641_v6, %s6064_s26 }
0x13c5   :  { %4557 = vrot.lane.b32.xlu0 %v8625_v4, %s6056_s4  ;;  %4547 = vrot.lane.b32.xlu1 %v8634_v48, %s6056_s4 }
0x13c9   :  { %4609 = vrot.lane.b32.xlu0 %v8572_v23, %s6080_s14  ;;  %4579 = vrot.lane.b32.xlu1 %v8634_v48, %s6084_s1 }
0x13cd   :  { %4589 = vrot.lane.b32.xlu0 %v8625_v4, %s6084_s1  ;;  %4559 = vrot.lane.b32.xlu1 %v8641_v6, %s6056_s4 }
0x13d1   :  { %4413 = vrot.lane.b32.xlu0 %v8574_v12, %s6081_s24  ;;  %4611 = vrot.lane.b32.xlu1 %v8634_v48, %s6080_s14 }
0x13d5   :  { %4445 = vrot.lane.b32.xlu0 %v8574_v12, %s6082_s5  ;;  %4591 = vrot.lane.b32.xlu1 %v8641_v6, %s6084_s1 }
0x13d9   :  { %4477 = vrot.lane.b32.xlu0 %v8574_v12, %s6083_s25  ;;  %4415 = vrot.lane.b32.xlu1 %v8579_v63, %s6081_s24 }
0x13dd   :  { %4509 = vrot.lane.b32.xlu0 %v8574_v12, %s6064_s26  ;;  %4447 = vrot.lane.b32.xlu1 %v8579_v63, %s6082_s5 }
0x13e1   :  { %4641 = vrot.lane.b32.xlu0 %v8572_v23, %s6085_s30  ;;  %4479 = vrot.lane.b32.xlu1 %v8579_v63, %s6083_s25 }
0x13e5   :  { %4549 = vrot.lane.b32.xlu0 %v8574_v12, %s6056_s4  ;;  %4511 = vrot.lane.b32.xlu1 %v8579_v63, %s6064_s26 }
0x13e9   :  { %4581 = vrot.lane.b32.xlu0 %v8574_v12, %s6084_s1  ;;  %4643 = vrot.lane.b32.xlu1 %v8634_v48, %s6085_s30 }
0x13ed   :  { %4613 = vrot.lane.b32.xlu0 %v8574_v12, %s6080_s14  ;;  %4551 = vrot.lane.b32.xlu1 %v8579_v63, %s6056_s4 }
0x13ef   :  { %v8722_v57 = vpop.permute.xlu1 %4409 }
0x13f1   :  { %4645 = vrot.lane.b32.xlu0 %v8574_v12, %s6085_s30  ;;  %4583 = vrot.lane.b32.xlu1 %v8579_v63, %s6084_s1 }
0x13f3   :  { %v8720_v33 = vpop.permute.xlu0 %4417 }
0x13f5   :  { %4621 = vrot.lane.b32.xlu0 %v8625_v4, %s6080_s14  ;;  %4615 = vrot.lane.b32.xlu1 %v8579_v63, %s6080_s14 }
0x13f7   :  { %v8732_v42 = vpop.permute.xlu0 %4449  ;;  %v8736_v0 = vpop.permute.xlu1 %4419 }
0x13f9   :  { %4653 = vrot.lane.b32.xlu0 %v8625_v4, %s6085_s30  ;;  %4647 = vrot.lane.b32.xlu1 %v8579_v63, %s6085_s30 }
0x13fb   :  { %v8742_v28 = vpop.permute.xlu0 %4481  ;;  %v8746_v7 = vpop.permute.xlu1 %4451 }
0x13fd   :  { %4812 = vrot.lane.b32.xlu0 %v8744_v58, %s6056_s4  ;;  %4623 = vrot.lane.b32.xlu1 %v8641_v6, %s6080_s14 }
0x13ff   :  { %v8752_v27 = vpop.permute.xlu0 %4513  ;;  %v8754_v2 = vpop.permute.xlu1 %4483 }
0x1401   :  { %4914 = vrot.lane.b32.xlu0 %v9497_v40, %s6056_s4  ;;  %4655 = vrot.lane.b32.xlu1 %v8641_v6, %s6085_s30 }
0x1403   :  { %v8760_v52 = vpop.permute.xlu0 %4553  ;;  %v8764_v39 = vpop.permute.xlu1 %4515 }
0x1405   :  { %4843 = vperm.xlu0 %5899, %v8762_v62   ;;  %4814 = vrot.lane.b32.xlu1 %v8762_v62, %s6056_s4 }
0x1407   :  { %v8769_v37 = vpop.permute.xlu0 %4585  ;;  %v8771_v60 = vpop.permute.xlu1 %4555 }
0x1408   :  { %9499 = vst [vmem:[#allocation42_spill] sm:$0xff] %v8769_v37 }
0x1409   :  { %5903 = vset.pattern.permute.xlu0 %v9485_v9  ;;  %4916 = vrot.lane.b32.xlu1 %v9500_v29, %s6056_s4 }
0x140b   :  { %v8776_v18 = vpop.permute.xlu0 %4617  ;;  %v8778_v30 = vpop.permute.xlu1 %4587 }
0x140c   :  { %9501 = vst [vmem:[#allocation49_spill] sm:$0xff] %v8776_v18  ;;  %9502 = vst [vmem:[#allocation55_spill] sm:$0xff] %v8778_v30  ;;  %v8842_v30 = vmul.f32 %v8579_v63, %v9512_v8 }
0x140f   :  { %v8780_v20 = vpop.permute.xlu0 %4649  ;;  %v8782_v36 = vpop.permute.xlu1 %4619 }
0x1410   :  { %9503 = vst [vmem:[#allocation40_spill] sm:$0xff] %v8780_v20  ;;  %9504 = vst [vmem:[#allocation43_spill] sm:$0xff] %v8782_v36 }
0x1413   :  { %v4422_v15 = vpop.permute.xlu0 %4421  ;;  %v8784_v16 = vpop.permute.xlu1 %4651 }
0x1414   :  { %9505 = vst [vmem:[#allocation50_spill] sm:$0xff] %v8784_v16  ;;  %v4425_v38 = vsel %vm3718_vm10, %v8720_v33, %v4422_v15  ;;  %v4431_v34 = vsel %vm3718_vm10, %v4422_v15, %v8722_v57 }
0x1415   :  { %v4436_v32 = vmul.f32 %v4425_v38, %v9506_v22 }
0x1417   :  { %v8786_v14 = vpop.permute.xlu0 %4441  ;;  %v8788_v51 = vpop.permute.xlu1 %4411 }
0x141b   :  { %v4454_v46 = vpop.permute.xlu0 %4453  ;;  %v4424_v3 = vpop.permute.xlu1 %4423 }
0x141c   :  { %v4426_v21 = vsel %vm3718_vm10, %v8736_v0, %v4424_v3  ;;  %v4432_v11 = vsel %vm3718_vm10, %v4424_v3, %v8788_v51  ;;  %v8849_v3 = vmul.f32 %v8572_v23, %v9510_v59  ;;  %v4457_v63 = vsel %vm3767_vm11, %v8732_v42, %v4454_v46 }
0x141d   :  { %v4440_v29 = vmul.f32 %v4426_v21, %v9506_v22  ;;  %v4437_v48 = vmul.f32 %v4432_v11, %v8067_v43  ;;  %v4468_v47 = vmul.f32 %v4457_v63, %v8016_v17  ;;  %v9517_v63 = vld [vmem:[#allocation61_spill] sm:$0xff] }
0x141e   :  { %9513 = vst [vmem:[#allocation22_spill] sm:$0xff] %v8849_v3 }
0x141f   :  { %v8798_v62 = vpop.permute.xlu0 %4473  ;;  %v8800_v9 = vpop.permute.xlu1 %4443  ;;  %v4679_v40 = vpack.c.bf16 %v4440_v29, %v4436_v32 }
0x1421   :  { %4767 = vmatprep.subr.bf16.mxu0 %v4679_v40 }
0x1423   :  { %v4486_v58 = vpop.permute.xlu0 %4485  ;;  %v4456_v1 = vpop.permute.xlu1 %4455 }
0x1424   :  { %v4458_v15 = vsel %vm3767_vm11, %v8746_v7, %v4456_v1  ;;  %v4489_v8 = vsel %vm3816_vm12, %v8742_v28, %v4486_v58  ;;  %v4495_v12 = vsel %vm3816_vm12, %v4486_v58, %v8798_v62 }
0x1427   :  { %v8802_v16 = vpop.permute.xlu0 %4505  ;;  %v8804_v10 = vpop.permute.xlu1 %4475 }
0x142b   :  { %v8806_v20 = vpop.permute.xlu0 %4517  ;;  %v4488_v36 = vpop.permute.xlu1 %4487 }
0x142f   :  { %v8808_v55 = vpop.permute.xlu0 %4545  ;;  %v8810_v38 = vpop.permute.xlu1 %4507 }
0x1433   :  { %v8812_v22 = vpop.permute.xlu0 %4577  ;;  %v8814_v21 = vpop.permute.xlu1 %4519 }
0x1437   :  { %v8816_v41 = vpop.permute.xlu0 %4557  ;;  %v8818_v32 = vpop.permute.xlu1 %4547 }
0x143b   :  { %v8820_v40 = vpop.permute.xlu0 %4609  ;;  %v8822_v29 = vpop.permute.xlu1 %4579 }
0x143c   :  { %9507 = vst [vmem:[#allocation56_spill] sm:$0xff] %v8820_v40  ;;  %9508 = vst [vmem:[#allocation35_spill] sm:$0xff] %v8822_v29  ;;  %v4464_v40 = vsel %vm3767_vm11, %v4456_v1, %v8800_v9  ;;  %v4433_v29 = vmul.f32 %v4431_v34, %v8067_v43  ;;  %v9515_v43 = vld [vmem:[#allocation37_spill] sm:$0xff]  ;;  %v4472_v1 = vmul.f32 %v4458_v15, %v8016_v17 }
0x143d   :  { %v8866_v23 = vmul.f32 %v4464_v40, %v8079_v61  ;;  %v8889_v34 = vmul.f32 %v8625_v4, %v9515_v43  ;;  %v8893_v3 = vmul.f32 %v8641_v6, %v9515_v43  ;;  %v9516_v4 = vld [vmem:[#allocation47_spill] sm:$0xff]  ;;  %v4490_v6 = vsel %vm3816_vm12, %v8754_v2, %v4488_v36 }
0x143e   :  { %v4676_v58 = vpack.c.bf16 %v4437_v48, %v4433_v29  ;;  %v4500_v56 = vmul.f32 %v4489_v8, %v9516_v4 }
0x143f   :  { %v8824_v18 = vpop.permute.xlu0 %4589  ;;  %v8826_v25 = vpop.permute.xlu1 %4559 }
0x1443   :  { %v4414_v24 = vpop.permute.xlu0 %4413  ;;  %v8831_v49 = vpop.permute.xlu1 %4611 }
0x1444   :  { %9509 = vst [vmem:[#allocation36_spill] sm:$0xff] %v8831_v49  ;;  %v4463_v49 = vsel %vm3767_vm11, %v4454_v46, %v8786_v14  ;;  %v4429_v40 = vsel %vm3718_vm10, %v8722_v57, %v4414_v24  ;;  %v8903_v57 = vmul.f32 %v4495_v12, %v8083_v5 }
0x1445   :  { %v8882_v46 = vmul.f32 %v4463_v49, %v8079_v61  ;;  %v4427_v61 = vsel %vm3718_vm10, %v4414_v24, %v8720_v33  ;;  %v4434_v48 = vmul.f32 %v4429_v40, %v8113_v35  ;;  %v4683_v40 = vpack.c.bf16 %v4472_v1, %v4468_v47 }
0x1446   :  { %v4435_v15 = vmul.f32 %v4427_v61, %v9517_v63 }
0x1447   :  { %v4446_v37 = vpop.permute.xlu0 %4445  ;;  %v8868_v11 = vpop.permute.xlu1 %4591  ;;  %v4680_v49 = vpack.c.bf16 %v8866_v23, %v8882_v46 }
0x1448   :  { %v4461_v17 = vsel %vm3767_vm11, %v8786_v14, %v4446_v37  ;;  %v4459_v23 = vsel %vm3767_vm11, %v4446_v37, %v8732_v42  ;;  %v4496_v14 = vsel %vm3816_vm12, %v4488_v36, %v8804_v10 }
0x1449   :  { %v4466_v42 = vmul.f32 %v4461_v17, %v8121_v31  ;;  %v4467_v36 = vmul.f32 %v4459_v23, %v8125_v54 }
0x144b   :  { %v4478_v59 = vpop.permute.xlu0 %4477  ;;  %v4416_v29 = vpop.permute.xlu1 %4415 }
0x144c   :  { %v4428_v24 = vsel %vm3718_vm10, %v4416_v29, %v8736_v0  ;;  %v4430_v33 = vsel %vm3718_vm10, %v8788_v51, %v4416_v29  ;;  %v4504_v0 = vmul.f32 %v4490_v6, %v9516_v4  ;;  %v4521_v51 = vsel %vm3865_vm13, %v8752_v27, %v8806_v20 }
0x144d   :  { %v4438_v8 = vmul.f32 %v4430_v33, %v8113_v35  ;;  %v4439_v12 = vmul.f32 %v4428_v24, %v9517_v63  ;;  %v4522_v35 = vsel %vm3865_vm13, %v8764_v39, %v8814_v21  ;;  %v4491_v4 = vsel %vm3816_vm12, %v4478_v59, %v8742_v28  ;;  %v9518_v24 = vld [vmem:[#allocation51_spill] sm:$0xff] }
0x144e   :  { %v4493_v6 = vsel %vm3816_vm12, %v8798_v62, %v4478_v59  ;;  %v4501_v28 = vmul.f32 %v4496_v14, %v8083_v5  ;;  %v4687_v33 = vpack.c.bf16 %v4504_v0, %v4500_v56 }
0x144f   :  { %v4510_v46 = vpop.permute.xlu0 %4509  ;;  %v4678_v37 = vpack.c.bf16 %v4439_v12, %v4435_v15  ;;  %v4448_v43 = vpop.permute.xlu1 %4447  ;;  %v4677_v61 = vpack.c.bf16 %v4438_v8, %v4434_v48  ;;  %v4498_v63 = vmul.f32 %v4493_v6, %v8137_v53  ;;  %v4499_v15 = vmul.f32 %v4491_v4, %v8141_v19 }
0x1450   :  { %v4460_v47 = vsel %vm3767_vm11, %v4448_v43, %v8746_v7  ;;  %v4462_v1 = vsel %vm3767_vm11, %v8800_v9, %v4448_v43  ;;  %v4532_v7 = vmul.f32 %v4521_v51, %v9518_v24  ;;  %v4528_v9 = vsel %vm3865_vm13, %v8814_v21, %v8810_v38 }
0x1451   :  { %v4470_v29 = vmul.f32 %v4462_v1, %v8121_v31  ;;  %v4471_v48 = vmul.f32 %v4460_v47, %v8125_v54  ;;  %4724 = vmatprep.subr.bf16.mxu1 %v4677_v61  ;;  %4768 = vmatpush1.bf16.msra.mxu0 %v4678_v37  ;;  %v4536_v31 = vmul.f32 %v4522_v35, %v9518_v24  ;;  %v9520_v47 = vld [vmem:[#allocation52_spill] sm:$0xff]  ;;  %v9521_v24 = vld [vmem:[#allocation42_spill] sm:$0xff] }
0x1452   :  { %4725 = vmatpush1.bf16.msra.mxu1 %v4676_v58  ;;  %4769 = vmatprep.subr.bf16.mxu0 %v4683_v40  ;;  %v4525_v21 = vsel %vm3865_vm13, %v8802_v16, %v4510_v46  ;;  %v4684_v12 = vpack.c.bf16 %v4501_v28, %v8903_v57  ;;  %v4568_v57 = vsel %vm3938_vm14, %v8826_v25, %v8818_v32 }
0x1453   :  { %v8953_v17 = vpop.permute.xlu0 %4641  ;;  %v4682_v62 = vpack.c.bf16 %v4471_v48, %v4467_v36  ;;  %v4480_v54 = vpop.permute.xlu1 %4479  ;;  %v4681_v59 = vpack.c.bf16 %v4470_v29, %v4466_v42  ;;  %v4691_v51 = vpack.c.bf16 %v4536_v31, %v4532_v7  ;;  %v4530_v40 = vmul.f32 %v4525_v21, %v8163_v26 }
0x1454   :  { %v4492_v5 = vsel %vm3816_vm12, %v4480_v54, %v8754_v2  ;;  %v4494_v56 = vsel %vm3816_vm12, %v8804_v10, %v4480_v54  ;;  %v4527_v2 = vsel %vm3865_vm13, %v8806_v20, %v8802_v16  ;;  %v4523_v10 = vsel %vm3865_vm13, %v4510_v46, %v8752_v27 }
0x1455   :  { %v4502_v58 = vmul.f32 %v4494_v56, %v8137_v53  ;;  %v4503_v23 = vmul.f32 %v4492_v5, %v8141_v19  ;;  %4726 = vmatprep.subr.bf16.mxu1 %v4681_v59  ;;  %4770 = vmatpush1.bf16.msra.mxu0 %v4682_v62  ;;  %v4533_v53 = vmul.f32 %v4528_v9, %v8087_v44  ;;  %v9524_v62 = vld [vmem:[#allocation20_spill] sm:$0xff]  ;;  %v9526_v59 = vld [vmem:[#allocation63_spill] sm:$0xff] }
0x1456   :  { %4727 = vmatpush1.bf16.msra.mxu1 %v4680_v49  ;;  %4771 = vmatprep.subr.bf16.mxu0 %v4687_v33  ;;  %v4531_v16 = vmul.f32 %v4523_v10, %v8167_v13  ;;  %v4529_v42 = vmul.f32 %v4527_v2, %v8087_v44  ;;  %v4599_v36 = vsel %vm3987_vm2, %v8824_v18, %v8812_v22  ;;  %v9527_v5 = vld [vmem:[#allocation64_spill] sm:$0xff]  ;;  %v9531_v2 = vld [vmem:[#allocation53_spill] sm:$0xff] }
0x1457   :  { %v4550_v8 = vpop.permute.xlu0 %4549  ;;  %v4686_v14 = vpack.c.bf16 %v4503_v23, %v4499_v15  ;;  %v4512_v19 = vpop.permute.xlu1 %4511  ;;  %v4685_v0 = vpack.c.bf16 %v4502_v58, %v4498_v63  ;;  %v4593_v7 = vsel %vm3987_vm2, %v9521_v24, %v8824_v18  ;;  %v9525_v54 = vpack.c.bf16 %v8842_v30, %v9524_v62  ;;  %v9528_v23 = vld [vmem:[#allocation32_spill] sm:$0xff] }
0x1458   :  { %v4524_v20 = vsel %vm3865_vm13, %v4512_v19, %v8764_v39  ;;  %v4526_v27 = vsel %vm3865_vm13, %v8810_v38, %v4512_v19  ;;  %v4561_v39 = vsel %vm3938_vm14, %v8760_v52, %v8816_v41  ;;  %v4567_v38 = vsel %vm3938_vm14, %v8816_v41, %v8808_v55  ;;  %v9519_v41 = vld [vmem:[#allocation35_spill] sm:$0xff] }
0x1459   :  { %v4534_v49 = vmul.f32 %v4526_v27, %v8163_v26  ;;  %v4535_v46 = vmul.f32 %v4524_v20, %v8167_v13  ;;  %4728 = vmatprep.subr.bf16.mxu1 %v4685_v0  ;;  %4772 = vmatpush1.bf16.msra.mxu0 %v4686_v14  ;;  %v4562_v26 = vsel %vm3938_vm14, %v8771_v60, %v8826_v25  ;;  %v9533_v14 = vld [vmem:[#allocation22_spill] sm:$0xff]  ;;  %v9535_v0 = vld [vmem:[#allocation41_spill] sm:$0xff] }
0x145a   :  { %4729 = vmatpush1.bf16.msra.mxu1 %v4684_v12  ;;  %4773 = vmatprep.subr.bf16.mxu0 %v4691_v51  ;;  %v4576_v13 = vmul.f32 %v4568_v57, %v9434_v50  ;;  %v4688_v61 = vpack.c.bf16 %v4533_v53, %v4529_v42  ;;  %v4600_v4 = vsel %vm3987_vm2, %v8868_v11, %v9519_v41  ;;  %v9532_v53 = vld [vmem:[#allocation12_spill] sm:$0xff] }
0x145b   :  { %v4582_v35 = vpop.permute.xlu0 %4581  ;;  %v4690_v44 = vpack.c.bf16 %v4535_v46, %v4531_v16  ;;  %v9012_v37 = vpop.permute.xlu1 %4643  ;;  %v4689_v43 = vpack.c.bf16 %v4534_v49, %v4530_v40  ;;  %v4695_v25 = vpack.c.bf16 %v8893_v3, %v8889_v34  ;;  %v4571_v1 = vmul.f32 %v4561_v39, %v9520_v47  ;;  %v9536_v16 = vld [vmem:[#allocation59_spill] sm:$0xff]  ;;  %v9537_v46 = vld [vmem:[#allocation49_spill] sm:$0xff] }
0x145c   :  { %v4572_v6 = vmul.f32 %v4567_v38, %v9434_v50  ;;  %v4565_v29 = vsel %vm3938_vm14, %v8808_v55, %v4550_v8  ;;  %v4575_v28 = vmul.f32 %v4562_v26, %v9520_v47  ;;  %v4563_v3 = vsel %vm3938_vm14, %v4550_v8, %v8760_v52  ;;  %v9522_v50 = vld [vmem:[#allocation60_spill] sm:$0xff]  ;;  %v9523_v55 = vld [vmem:[#allocation55_spill] sm:$0xff]  ;;  %v9539_v47 = vld [vmem:[#allocation57_spill] sm:$0xff] }
0x145d   :  { %4730 = vmatprep.subr.bf16.mxu1 %v4689_v43  ;;  %4774 = vmatpush1.bf16.msra.mxu0 %v4690_v44  ;;  %v4604_v34 = vmul.f32 %v4599_v36, %v9522_v50  ;;  %v4594_v33 = vsel %vm3987_vm2, %v9523_v55, %v8868_v11  ;;  %v4608_v9 = vmul.f32 %v4600_v4, %v9522_v50  ;;  %v9538_v38 = vld [vmem:[#allocation56_spill] sm:$0xff] }
0x145e   :  { %4731 = vmatpush1.bf16.msra.mxu1 %v4688_v61  ;;  %4775 = vmatprep.subr.bf16.mxu0 %v4695_v25  ;;  %v4699_v18 = vpack.c.bf16 %v4576_v13, %v4572_v6  ;;  %v4569_v63 = vmul.f32 %v4565_v29, %v9526_v59  ;;  %v4597_v52 = vsel %vm3987_vm2, %v8812_v22, %v4582_v35  ;;  %v9529_v22 = vld [vmem:[#allocation34_spill] sm:$0xff]  ;;  %v9541_v29 = vld [vmem:[#allocation43_spill] sm:$0xff] }
0x145f   :  { %v4614_v48 = vpop.permute.xlu0 %4613  ;;  %v4552_v31 = vpop.permute.xlu1 %4551  ;;  %4732 = vmatprep.subr.bf16.mxu1 %v9525_v54  ;;  %v4570_v56 = vmul.f32 %v4563_v3, %v9527_v5  ;;  %v4595_v30 = vsel %vm3987_vm2, %v4582_v35, %v9521_v24  ;;  %v9530_v8 = vpack.c.bf16 %v9528_v23, %v9529_v22  ;;  %v4603_v10 = vmul.f32 %v4593_v7, %v9531_v2  ;;  %v9544_v54 = vld [vmem:[#allocation62_spill] sm:$0xff]  ;;  %v9547_v23 = vld [vmem:[#allocation48_spill] sm:$0xff] }
0x1460   :  { %v4564_v15 = vsel %vm3938_vm14, %v4552_v31, %v8771_v60  ;;  %v4566_v11 = vsel %vm3938_vm14, %v8818_v32, %v4552_v31  ;;  %v4698_v60 = vpack.c.bf16 %v4575_v28, %v4571_v1  ;;  %v4607_v32 = vmul.f32 %v4594_v33, %v9531_v2  ;;  %v9542_v28 = vld [vmem:[#allocation36_spill] sm:$0xff] }
0x1461   :  { %v4573_v21 = vmul.f32 %v4566_v11, %v9526_v59  ;;  %v4574_v58 = vmul.f32 %v4564_v15, %v9527_v5  ;;  %4776 = vmatpush1.bf16.msra.mxu0 %v9530_v8  ;;  %v9534_v19 = vpack.c.bf16 %v9532_v53, %v9533_v14  ;;  %v4601_v51 = vmul.f32 %v4597_v52, %v9535_v0  ;;  %v9545_v59 = vld [vmem:[#allocation50_spill] sm:$0xff]  ;;  %v9546_v15 = vld [vmem:[#allocation28_spill] sm:$0xff] }
0x1462   :  { %4777 = vmatprep.subr.bf16.mxu0 %v4699_v18  ;;  %v4703_v27 = vpack.c.bf16 %v4608_v9, %v4604_v34  ;;  %v4602_v49 = vmul.f32 %v4595_v30, %v9536_v16  ;;  %v4627_v35 = vsel %vm4036_vm15, %v4614_v48, %v9537_v46  ;;  %v4629_v26 = vsel %vm4036_vm15, %v9538_v38, %v4614_v48  ;;  %v9548_v2 = vld [vmem:[#allocation44_spill] sm:$0xff]  ;;  %v9549_v14 = vld [vmem:[#allocation54_spill] sm:$0xff] }
0x1463   :  { %v4646_v12 = vpop.permute.xlu0 %4645  ;;  %4733 = vmatpush1.bf16.msra.mxu1 %v9534_v19  ;;  %v4696_v57 = vpack.c.bf16 %v4573_v21, %v4569_v63  ;;  %v4584_v40 = vpop.permute.xlu1 %4583  ;;  %v4697_v20 = vpack.c.bf16 %v4574_v58, %v4570_v56  ;;  %v4702_v61 = vpack.c.bf16 %v4607_v32, %v4603_v10  ;;  %v4633_v1 = vmul.f32 %v4629_v26, %v9539_v47 }
0x1464   :  { %v4596_v42 = vsel %vm3987_vm2, %v4584_v40, %v9523_v55  ;;  %v4598_v39 = vsel %vm3987_vm2, %v9519_v41, %v4584_v40  ;;  %v9540_v41 = vld [vmem:[#allocation58_spill] sm:$0xff]  ;;  %v4661_v7 = vsel %vm4085_vm3, %v8953_v17, %v4646_v12  ;;  %v9543_v55 = vld [vmem:[#allocation40_spill] sm:$0xff] }
0x1465   :  { %v4605_v13 = vmul.f32 %v4598_v39, %v9535_v0  ;;  %v4606_v44 = vmul.f32 %v4596_v42, %v9536_v16  ;;  %4734 = vmatprep.subr.bf16.mxu1 %v4697_v20  ;;  %4778 = vmatpush1.bf16.msra.mxu0 %v4698_v60  ;;  %v4634_v6 = vmul.f32 %v4627_v35, %v9540_v41  ;;  %v5963_v40 = vld [vmem:[%s9239_s10 + $0x40] ss:$8 sps:$4 sm:$0xff]   ;;  %v9550_v16 = vld [vmem:[#allocation11_spill] sm:$0xff] }
0x1466   :  { %4779 = vmatprep.subr.bf16.mxu0 %v4703_v27  ;;  %v4659_v33 = vsel %vm4085_vm3, %v4646_v12, %v9543_v55  ;;  %v4665_v18 = vmul.f32 %v4661_v7, %v9544_v54  ;;  %v9551_v39 = vld [vmem:[#allocation33_spill] sm:$0xff] }
0x1467   :  { %v4622_v43 = vpop.permute.xlu0 %4621  ;;  %4735 = vmatpush1.bf16.msra.mxu1 %v4696_v57  ;;  %v4700_v36 = vpack.c.bf16 %v4605_v13, %v4601_v51  ;;  %v4616_v4 = vpop.permute.xlu1 %4615  ;;  %v4701_v25 = vpack.c.bf16 %v4606_v44, %v4602_v49  ;;  %v4666_v11 = vmul.f32 %v4659_v33, %v9546_v15  ;;  %v9552_v44 = vld [vmem:[#allocation29_spill] sm:$0xff] }
0x1468   :  { %v4628_v48 = vsel %vm4036_vm15, %v4616_v4, %v9541_v29  ;;  %v4630_v24 = vsel %vm4036_vm15, %v9542_v28, %v4616_v4  ;;  %v4625_v5 = vsel %vm4036_vm15, %v9537_v46, %v4622_v43  ;;  %v4631_v58 = vsel %vm4036_vm15, %v4622_v43, %v9538_v38 }
0x1469   :  { %v4637_v3 = vmul.f32 %v4630_v24, %v9539_v47  ;;  %v4638_v50 = vmul.f32 %v4628_v48, %v9540_v41  ;;  %4736 = vmatprep.subr.bf16.mxu1 %v4701_v25  ;;  %4780 = vmatpush1.bf16.msra.mxu0 %v4702_v61  ;;  %v4635_v10 = vmul.f32 %v4625_v5, %v9548_v2  ;;  %v2346_v24 = vld [vmem:[%s9237_s8 + $0x70] sm:$0xff] }
0x146a   :  { %v4636_v19 = vmul.f32 %v4631_v58, %v9549_v14 }
0x146b   :  { %v4654_v34 = vpop.permute.xlu0 %4653  ;;  %4737 = vmatpush1.bf16.msra.mxu1 %v4700_v36  ;;  %v4704_v9 = vpack.c.bf16 %v4637_v3, %v4633_v1  ;;  %v4648_v31 = vpop.permute.xlu1 %4647  ;;  %v4705_v62 = vpack.c.bf16 %v4638_v50, %v4634_v6  ;;  %v9553_v36 = vmov 0   ;;  %v9554_v1 = vld [vmem:[#allocation39_spill] sm:$0xff]  ;;  %v9555_v6 = vmov 1  }
0x146c   :  { %v4660_v63 = vsel %vm4085_vm3, %v4648_v31, %v9545_v59  ;;  %v4662_v52 = vsel %vm4085_vm3, %v9012_v37, %v4648_v31  ;;  %v4657_v0 = vsel %vm4085_vm3, %v9543_v55, %v4654_v34  ;;  %v4663_v27 = vsel %vm4085_vm3, %v4654_v34, %v8953_v17  ;;  %v9557_v31 = vld [vmem:[#allocation21_spill] sm:$0xff] }
0x146d   :  { %v4669_v56 = vmul.f32 %v4662_v52, %v9544_v54  ;;  %v4670_v30 = vmul.f32 %v4660_v63, %v9546_v15  ;;  %4738 = vmatprep.subr.bf16.mxu1 %v4705_v62  ;;  %v4667_v38 = vmul.f32 %v4657_v0, %v9551_v39  ;;  %v4668_v43 = vmul.f32 %v4663_v27, %v9552_v44  ;;  %v9559_v52 = vld [vmem:[#allocation17_spill] sm:$0xff] }
0x146f   :  { %v4813_v21 = vpop.permute.xlu0 %4812  ;;  %4739 = vmatpush1.bf16.msra.mxu1 %v4704_v9  ;;  %v4708_v8 = vpack.c.bf16 %v4669_v56, %v4665_v18  ;;  %v4624_v12 = vpop.permute.xlu1 %4623  ;;  %v4709_v60 = vpack.c.bf16 %v4670_v30, %v4666_v11  ;;  %v9558_v18 = vld [vmem:[#allocation23_spill] sm:$0xff] }
0x1470   :  { %v4818_v22 = vsub.f32 %v9547_v23, %v4813_v21  ;;  %v4626_v32 = vsel %vm4036_vm15, %v9541_v29, %v4624_v12  ;;  %v4632_v53 = vsel %vm4036_vm15, %v4624_v12, %v9542_v28  ;;  %v2345_v29 = vld [vmem:[%s9237_s8 + $0x68] sm:$0xff] }
0x1471   :  { %v4639_v51 = vmul.f32 %v4626_v32, %v9548_v2  ;;  %v4640_v57 = vmul.f32 %v4632_v53, %v9549_v14  ;;  %4740 = vmatprep.subr.bf16.mxu1 %v4709_v60  ;;  %v9560_v11 = vld [vmem:[#allocation19_spill] sm:$0xff] }
0x1472   :  { %4822 = vperm.xlu0 %5903, %v4818_v22  }
0x1473   :  { %v4915_v20 = vpop.permute.xlu0 %4914  ;;  %4741 = vmatpush1.bf16.msra.mxu1 %v4708_v8  ;;  %v4706_v46 = vpack.c.bf16 %v4639_v51, %v4635_v10  ;;  %v4656_v35 = vpop.permute.xlu1 %4655  ;;  %v4707_v42 = vpack.c.bf16 %v4640_v57, %v4636_v19 }
0x1474   :  { %v4920_v49 = vsub.f32 %v9550_v16, %v4915_v20  ;;  %v4658_v26 = vsel %vm4085_vm3, %v9545_v59, %v4656_v35  ;;  %v4664_v13 = vsel %vm4085_vm3, %v4656_v35, %v9012_v37  ;;  %v2344_v37 = vld [vmem:[%s9237_s8 + $0x60] sm:$0xff] }
0x1475   :  { %v4671_v17 = vmul.f32 %v4658_v26, %v9551_v39  ;;  %v4672_v61 = vmul.f32 %v4664_v13, %v9552_v44  ;;  %4781 = vmatprep.subr.bf16.mxu0 %v4707_v42 }
0x1476   :  { %4924 = vperm.xlu0 %5903, %v4920_v49   ;;  %4757 = vmatmul.mubr.bf16.vlgmr.msra.gmra.mrb[84].mxu1 %v5963_v40 }
0x1477   :  { %4782 = vmatpush1.bf16.msra.mxu0 %v4706_v46  ;;  %5010 = vmatprep.mubr.bf16.mxu1 %v9553_v36  ;;  %v4710_v4 = vpack.c.bf16 %v4671_v17, %v4667_v38  ;;  %v4815_v25 = vpop.permute.xlu1 %4814  ;;  %v4711_v47 = vpack.c.bf16 %v4672_v61, %v4668_v43 }
0x1478   :  { %v4819_v41 = vsub.f32 %v9554_v1, %v4815_v25 }
0x1479   :  { %4783 = vmatprep.subr.bf16.mxu0 %v4711_v47 }
0x147a   :  { %5906 = vset.pattern.permute.xlu0 %v9555_v6  ;;  %4827 = vperm.xlu1 %5901, %v4819_v41  }
0x147b   :  { %4945 = vperm.xlu0 %5906, %v9556_v45   ;;  %4784 = vmatpush1.bf16.msra.mxu0 %v4710_v4  ;;  %v4917_v48 = vpop.permute.xlu1 %4916 }
0x147c   :  { %v4921_v28 = vsub.f32 %v9556_v45, %v4917_v48 }
0x147e   :  { %4800 = vmatmul.mubr.bf16.vlgmr.msra.gmra.mrb[68].mxu0 %v5963_v40  ;;  %5902 = vset.pattern.permute.xlu1 %v9555_v6 }
0x147f   :  { %5908 = vset.pattern.permute.xlu0 %v9553_v36  ;;  %4839 = vperm.xlu1 %5902, %v9547_v23  }
0x1483   :  { %5904 = vset.pattern.permute.xlu1 %v9553_v36 }
0x1484   :  { %4864 = vperm.xlu1 %5904, %v2344_v37   ;;  %v4844_v50 = vpop.permute.xlu0 %4843 }
0x1488   :  { %4869 = vperm.xlu1 %5904, %v2345_v29  }
0x148c   :  { %4929 = vperm.xlu1 %5904, %v4921_v28  }
0x1490   :  { %5905 = vset.pattern.permute.xlu1 %v9555_v6 }
0x1491   :  { %4941 = vperm.xlu1 %5905, %v9550_v16  }
0x1495   :  { %5907 = vset.pattern.permute.xlu1 %v9553_v36 }
0x1496   :  { %4972 = vperm.xlu1 %5907, %v2346_v24  }
0x14f1   :  { %v4823_v55 = vpop.permute.xlu0 %4822 }
0x14f2   :  { %v4830_v62 = vmul.f32 %v4823_v55, %v9557_v31  ;;  %v4831_v63 = vmul.f32 %v4823_v55, %v9558_v18  ;;  %v4832_v21 = vmul.f32 %v4823_v55, %v9559_v52  ;;  %v4833_v12 = vmul.f32 %v4823_v55, %v9560_v11 }
0x14f5   :  { %v9174_v9 = vpop.permute.xlu0 %4924 }
0x14f6   :  { %v4932_v58 = vmul.f32 %v9174_v9, %v9557_v31  ;;  %v4933_v23 = vmul.f32 %v9174_v9, %v9558_v18  ;;  %v9190_v60 = vmul.f32 %v9174_v9, %v9559_v52 }
0x14f9   :  { %v4828_v7 = vpop.permute.xlu1 %4827 }
0x14fa   :  { %v4834_v54 = vmul.f32 %v4828_v7, %v9557_v31  ;;  %v4835_v59 = vmul.f32 %v4828_v7, %v9558_v18  ;;  %v4836_v15 = vmul.f32 %v4828_v7, %v9559_v52  ;;  %v4837_v5 = vmul.f32 %v4828_v7, %v9560_v11  ;;  %v9197_v38 = vpop.permute.xlu0 %4945 }
0x14fc   :  { %v4850_v32 = vadd.f32 %v4844_v50, %v4834_v54  ;;  %v4851_v53 = vadd.f32 %v4844_v50, %v4835_v59  ;;  %v4852_v51 = vadd.f32 %v4844_v50, %v4836_v15  ;;  %v4853_v57 = vadd.f32 %v4844_v50, %v4837_v5 }
0x14fe   :  { %v4840_v3 = vpop.permute.xlu1 %4839 }
0x14ff   :  { %v4846_v30 = vadd.f32 %v4840_v3, %v4830_v62  ;;  %v4847_v8 = vadd.f32 %v4840_v3, %v4831_v63  ;;  %v4848_v49 = vadd.f32 %v4840_v3, %v4832_v21  ;;  %v4849_v39 = vadd.f32 %v4840_v3, %v4833_v12 }
0x1503   :  { %v9170_v34 = vpop.permute.xlu1 %4864 }
0x1507   :  { %v9172_v33 = vpop.permute.xlu1 %4869 }
0x150b   :  { %v4930_v56 = vpop.permute.xlu1 %4929 }
0x150c   :  { %v4936_v14 = vmul.f32 %v4930_v56, %v9557_v31  ;;  %v4937_v40 = vmul.f32 %v4930_v56, %v9558_v18  ;;  %v4938_v46 = vmul.f32 %v4930_v56, %v9559_v52  ;;  %v9200_v26 = vmul.f32 %v4930_v56, %v9560_v11 }
0x150e   :  { %v4952_v43 = vadd.f32 %v9197_v38, %v4936_v14  ;;  %v4953_v25 = vadd.f32 %v9197_v38, %v4937_v40 }
0x1510   :  { %v4942_v17 = vpop.permute.xlu1 %4941 }
0x1511   :  { %v4948_v29 = vadd.f32 %v4942_v17, %v4932_v58  ;;  %v4949_v3 = vadd.f32 %v4942_v17, %v4933_v23  ;;  %v4950_v40 = vadd.f32 %v4942_v17, %v9190_v60 }
0x1515   :  { %v4973_v60 = vpop.permute.xlu1 %4972 }
0x1549   :  { %v4758_v22 = vpop.f32.mrb[84].mxu1 }
0x154a   :  { %v4854_v2 = vmul.f32 %v4846_v30, %v4758_v22  ;;  %v4760_v10 = vpop.f32.mrb[85].mxu1 }
0x154b   :  { %v4855_v19 = vmul.f32 %v4847_v8, %v4760_v10  ;;  %v4762_v0 = vpop.f32.mrb[86].mxu1 }
0x154c   :  { %v4872_v20 = vadd.f32 %v9170_v34, %v4854_v2  ;;  %v4858_v27 = vmul.f32 %v4850_v32, %v4762_v0  ;;  %v4764_v16 = vpop.f32.mrb[87].mxu1 }
0x154d   :  { %v4873_v35 = vadd.f32 %v9170_v34, %v4855_v19  ;;  %v4859_v42 = vmul.f32 %v4851_v53, %v4764_v16  ;;  %v4935_v19 = vmul.f32 %v9174_v9, %v9560_v11  ;;  %v4955_v16 = vadd.f32 %v9197_v38, %v9200_v26 }
0x154e   :  { %vm4880_vm10 = vcmp.ge.f32.partialorder %v4872_v20, 0.0  ;;  %v4888_v13 = vmul.f32 0.2, %v4872_v20  ;;  %v4876_v44 = vadd.f32 %v9172_v33, %v4858_v27  ;;  %v4965_v27 = vld [vmem:[#allocation2 + $0x4] sm:$0x3] }
0x154f   :  { %vm4881_vm11 = vcmp.ge.f32.partialorder %v4873_v35, 0.0  ;;  %v4889_v61 = vmul.f32 0.2, %v4873_v35  ;;  %v4877_v4 = vadd.f32 %v9172_v33, %v4859_v42 }
0x1550   :  { %v4896_v47 = vsel %vm4880_vm10, %v4872_v20, %v4888_v13  ;;  %vm4884_vm12 = vcmp.ge.f32.partialorder %v4876_v44, 0.0  ;;  %v4892_v1 = vmul.f32 0.2, %v4876_v44 }
0x1551   :  { %v4904_v41 = vmul.f32 1.4142135, %v4896_v47  ;;  %v4897_v6 = vsel %vm4881_vm11, %v4873_v35, %v4889_v61  ;;  %vm4885_vm13 = vcmp.ge.f32.partialorder %v4877_v4, 0.0  ;;  %v4893_v45 = vmul.f32 0.2, %v4877_v4  ;;  %v4801_v37 = vpop.f32.mrb[68].mxu0 }
0x1552   :  { %v4905_v48 = vmul.f32 1.4142135, %v4897_v6  ;;  %v4900_v28 = vsel %vm4884_vm12, %v4876_v44, %v4892_v1  ;;  %v4856_v24 = vmul.f32 %v4848_v49, %v4801_v37  ;;  %v4803_v7 = vpop.f32.mrb[69].mxu0  ;;  %v4951_v49 = vadd.f32 %v4942_v17, %v4935_v19  ;;  %v9561_v61 = vld [vmem:[#allocation13_spill] sm:$0xff]  ;;  %v9562_v47 = vld [vmem:[#allocation24_spill] sm:$0xff] }
0x1553   :  { %v4908_v50 = vmul.f32 1.4142135, %v4900_v28  ;;  %v4901_v55 = vsel %vm4885_vm13, %v4877_v4, %v4893_v45  ;;  %v4857_v31 = vmul.f32 %v4849_v39, %v4803_v7  ;;  %v4805_v62 = vpop.f32.mrb[70].mxu0  ;;  %v4956_v54 = vmul.f32 %v4948_v29, %v4904_v41 }
0x1554   :  { %v4909_v18 = vmul.f32 1.4142135, %v4901_v55  ;;  %v4874_v59 = vadd.f32 %v9170_v34, %v4856_v24  ;;  %v4860_v63 = vmul.f32 %v4852_v51, %v4805_v62  ;;  %v4807_v52 = vpop.f32.mrb[71].mxu0  ;;  %v4957_v30 = vmul.f32 %v4949_v3, %v4905_v48  ;;  %v9563_v24 = vld [vmem:[#allocation25_spill] sm:$0xff] }
0x1555   :  { %v4960_v15 = vmul.f32 %v4952_v43, %v4908_v50  ;;  %v4875_v5 = vadd.f32 %v9170_v34, %v4857_v31  ;;  %v4861_v56 = vmul.f32 %v4853_v57, %v4807_v52  ;;  %v4954_v57 = vadd.f32 %v9197_v38, %v4938_v46  ;;  %v9564_v50 = vld [vmem:[#allocation31_spill] sm:$0xff] }
0x1556   :  { %vm4882_vm14 = vcmp.ge.f32.partialorder %v4874_v59, 0.0  ;;  %v4890_v21 = vmul.f32 0.2, %v4874_v59  ;;  %v4878_v58 = vadd.f32 %v9172_v33, %v4860_v63  ;;  %v4961_v23 = vmul.f32 %v4953_v25, %v4909_v18 }
0x1557   :  { %vm4883_vm15 = vcmp.ge.f32.partialorder %v4875_v5, 0.0  ;;  %v4891_v22 = vmul.f32 0.2, %v4875_v5  ;;  %v4879_v8 = vadd.f32 %v9172_v33, %v4861_v56  ;;  %v4966_v12 = vpack.c.bf16 %v4960_v15, %v4956_v54 }
0x1558   :  { %v4898_v2 = vsel %vm4882_vm14, %v4874_v59, %v4890_v21  ;;  %vm4886_vm2 = vcmp.ge.f32.partialorder %v4878_v58, 0.0  ;;  %v4894_v10 = vmul.f32 0.2, %v4878_v58  ;;  %v4967_v32 = vpack.c.bf16 %v4961_v23, %v4957_v30 }
0x1559   :  { %v4906_v53 = vmul.f32 1.4142135, %v4898_v2  ;;  %v4899_v14 = vsel %vm4883_vm15, %v4875_v5, %v4891_v22  ;;  %vm4887_vm3 = vcmp.ge.f32.partialorder %v4879_v8, 0.0  ;;  %v4895_v34 = vmul.f32 0.2, %v4879_v8 }
0x155a   :  { %v4907_v0 = vmul.f32 1.4142135, %v4899_v14  ;;  %v4902_v51 = vsel %vm4886_vm2, %v4878_v58, %v4894_v10  ;;  %4978 = vmatprep.subr.bf16.mxu1 %v4967_v32 }
0x155b   :  { %v4910_v33 = vmul.f32 1.4142135, %v4902_v51  ;;  %v4903_v20 = vsel %vm4887_vm3, %v4879_v8, %v4895_v34  ;;  %4979 = vmatpush1.bf16.msra.mxu1 %v4966_v12  ;;  %v4958_v42 = vmul.f32 %v4950_v40, %v4906_v53 }
0x155c   :  { %v4911_v35 = vmul.f32 1.4142135, %v4903_v20  ;;  %v4959_v9 = vmul.f32 %v4951_v49, %v4907_v0 }
0x155d   :  { %v4962_v39 = vmul.f32 %v4954_v57, %v4910_v33 }
0x155e   :  { %5278 = vmatmul.mubr.msk.bf16.vlgmr.msra.gmra.mrb[88].mxu1 %vm1894_vm0, %v4965_v27  ;;  %v4963_v11 = vmul.f32 %v4955_v16, %v4911_v35 }
0x155f   :  { %v4968_v13 = vpack.c.bf16 %v4962_v39, %v4958_v42  ;;  %5051 = vmatprep.mubr.bf16.mxu1 %v9553_v36 }
0x1560   :  { %v4969_v46 = vpack.c.bf16 %v4963_v11, %v4959_v9 }
0x1562   :  { %5019 = vmatprep.subr.bf16.mxu1 %v4969_v46 }
0x1563   :  { %5020 = vmatpush1.bf16.msra.mxu1 %v4968_v13 }
0x1566   :  { %5279 = vmatmul.mubr.msk.bf16.vlgmr.msra.gmra.mrb[92].mxu1 %vm1894_vm0, %v4965_v27 }
0x1631   :  { %v5012_v44 = vpop.f32.mrb[88].mxu1 }
0x1632   :  { %v5013_v43 = vadd.f32 %v5012_v44, %v4973_v60  ;;  %v5014_v38 = vpop.f32.mrb[89].mxu1 }
0x1633   :  { %v5015_v26 = vadd.f32 %v5014_v38, %v4973_v60  ;;  %v5016_v17 = vpop.f32.mrb[90].mxu1 }
0x1634   :  { %v5060_v4 = vadd.f32 %v5013_v43, %v9561_v61  ;;  %v5017_v25 = vpop.f32.mrb[91].mxu1 }
0x1635   :  { %v5061_v1 = vadd.f32 %v5015_v26, %v9562_v47 }
0x1636   :  { %v5280_v41 = vclamps-f32 %v5060_v4, 1.0 }
0x1637   :  { %v5281_v6 = vclamps-f32 %v5061_v1, 1.0 }
0x1639   :  { %v5076_v45 = vcombine.low %v5280_v41, %v5281_v6  ;;  %v5053_v36 = vpop.f32.mrb[92].mxu1 }
0x163a   :  { %v5054_v37 = vadd.f32 %v5053_v36, %v4973_v60  ;;  %v5055_v29 = vpop.f32.mrb[93].mxu1 }
0x163b   :  { %5080 = vst [vmem:[%s9246_s17] sm:$0x77] %v5076_v45  ;;  %v5056_v48 = vadd.f32 %v5055_v29, %v4973_v60  ;;  %v5057_v28 = vpop.f32.mrb[94].mxu1 }
0x163c   :  { %v5062_v7 = vadd.f32 %v5054_v37, %v9563_v24  ;;  %v5058_v3 = vpop.f32.mrb[95].mxu1 }
0x163d   :  { %v5063_v55 = vadd.f32 %v5056_v48, %v9564_v50 }
0x163e   :  { %v5282_v31 = vclamps-f32 %v5062_v7, 1.0 }
0x163f   :  { %v5283_v62 = vclamps-f32 %v5063_v55, 1.0 }
0x1641   :  { %v5077_v54 = vcombine.low %v5282_v31, %v5283_v62 }
0x1643   :  { %5081 = vst [vmem:[%s9246_s17 + $0x8] sm:$0x77] %v5077_v54 }
0x1644   :  { %5086 = vsyncpa [#allocation3], 1 }
0x1645   :  { %5087 = vsyncpa [#allocation5], 1 }

</bundles_post_ra>
